<compile_context>
chip_gen: v7x
topology: tpu7x:2x2x1
jax: 0.10.0
libtpu: 0.0.40
codegen_flags: <defaults>
</compile_context>

<pallas_src>
import functools

import numpy as np
import jax
import jax.numpy as jnp
from jax import lax
from jax.experimental import pallas as pl
from jax.experimental.pallas import tpu as pltpu


_NEG_SLOPE = 0.01  # torch.nn.LeakyReLU default


def _leaky_relu(x):
    return jnp.where(x >= 0, x, _NEG_SLOPE * x)


def _backbone_kernel(x_ref, w1_ref, b1_ref, w2_ref, b2_ref, w3_ref, b3_ref,
                     se1_ref, so1_ref, se2_ref, so2_ref,
                     out_ref, h1u_ref, p1u_ref, *,
                     H1_used, W1, H3, W2u, W3, W4, W5, C1, C2, C3,
                     h1u_border, p1u_border):
    f32, bf16 = jnp.float32, jnp.bfloat16

    # Zero ONLY the padding-border rows of the scratch buffers (interiors are
    # fully overwritten every grid step).  No program_id gating (v7x megacore
    # starts core 1 at a nonzero index, so gating would be unsafe).
    zero_h1 = jnp.zeros((4 * C1, W2u), bf16)
    for r in h1u_border:
        h1u_ref[r] = zero_h1
    zero_p1 = jnp.zeros((3 * C2, W4), bf16)
    for r in p1u_border:
        p1u_ref[r] = zero_p1

    # Hoisted weights / biases / pool selectors (loaded once per grid step).
    w1 = w1_ref[...]                          # (8, 6)    f32   [cout, kh*2+kw]
    b1 = b1_ref[...]                          # (8, 1)    f32
    w2 = w2_ref[...]                          # (32, 192) bf16  [cout, kh*32+kw*8+cin]
    b2 = b2_ref[...]                          # (32, 1)   f32
    w3 = w3_ref[...]                          # (64, 288) bf16  [cout, kh*96+kw*32+cin]
    b3 = b3_ref[...]                          # (64, 1)   f32
    se1, so1 = se1_ref[...], so1_ref[...]     # (W2u, W3) bf16 one-hot column pickers
    se2, so2 = se2_ref[...], so2_ref[...]     # (W4,  W5) bf16 one-hot column pickers

    zc1 = jnp.zeros((C1, 1), f32)
    zc2 = jnp.zeros((C2, 1), f32)

    # ---- conv1: 1 -> 8, k=(3,2), stride=(2,1), + LeakyReLU ------------------
    # Cin == 1, so each tap is a VPU broadcast MAC (f32).  Each output row is
    # stored already (kw, cin)-unfolded and W-zero-padded in bf16, so conv2's
    # im2col patch build below is pure sublane stacking.
    for h in range(H1_used):
        acc = jnp.zeros((C1, W1), f32)
        for kh in range(3):
            xrow = x_ref[2 * h + kh:2 * h + kh + 1, :]             # (1, Wp) f32
            for kw in range(2):
                t = 2 * kh + kw
                acc = acc + w1[:, t:t + 1] * xrow[:, kw:kw + W1]   # (8, W1)
        act = _leaky_relu(acc + b1)                                # (8, W1) f32
        padded = jnp.concatenate([zc1, act, zc1], axis=1)          # (8, W1+2)
        unfolded = jnp.concatenate(
            [padded[:, kw:kw + W2u] for kw in range(4)], axis=0)   # (32, W2u)
        h1u_ref[h + 3] = unfolded.astype(bf16)

    # ---- conv2: 8 -> 32, k=(6,4), pad=(3,1), + LeakyReLU + MaxPool(4,2) -----
    # One K=192 MXU matmul per surviving conv row; the H-pool is a running max
    # (conv2 rows are never materialised), the 2-wide W-pool is an exact
    # even/odd one-hot selection matmul.  Only pooled-surviving rows/cols are
    # ever computed.
    for p in range(H3):
        hmax = None
        for rr in range(4):
            r = 4 * p + rr
            patch = jnp.concatenate(
                [h1u_ref[r + kh] for kh in range(6)], axis=0)      # (192, W2u) bf16
            acc = jnp.dot(w2, patch, preferred_element_type=f32)   # (32, W2u)  f32
            row = _leaky_relu(acc + b2)
            hmax = row if hmax is None else jnp.maximum(hmax, row)
        hb = hmax.astype(bf16)
        pooled = jnp.maximum(jnp.dot(hb, se1, preferred_element_type=f32),
                             jnp.dot(hb, so1, preferred_element_type=f32))  # (32, W3)
        ppad = jnp.concatenate([zc2, pooled, zc2], axis=1)          # (32, W3+2)
        p1u = jnp.concatenate(
            [ppad[:, kw:kw + W4] for kw in range(3)], axis=0)       # (96, W4)
        p1u_ref[p + 1] = p1u.astype(bf16)

    # ---- conv3: 32 -> 64, k=(3,3), pad=(1,1), + LeakyReLU + MaxPool(1,2) ----
    outs = []
    for h in range(H3):
        patch = jnp.concatenate(
            [p1u_ref[h + kh] for kh in range(3)], axis=0)           # (288, W4) bf16
        acc = jnp.dot(w3, patch, preferred_element_type=f32)        # (64, W4)  f32
        row = _leaky_relu(acc + b3).astype(bf16)
        outs.append(jnp.maximum(jnp.dot(row, se2, preferred_element_type=f32),
                                jnp.dot(row, so2, preferred_element_type=f32)))
    out_ref[...] = jnp.concatenate(outs, axis=1)                    # (64, H5*W5)


def _pick_matrices(n_in, n_out):
    # One-hot "pick even / pick odd column" matrices: se[2j, j] = 1, so[2j+1, j] = 1.
    se = np.zeros((n_in, n_out), np.float32)
    so = np.zeros((n_in, n_out), np.float32)
    idx = np.arange(n_out)
    se[2 * idx, idx] = 1.0
    so[2 * idx + 1, idx] = 1.0
    return jnp.asarray(se, jnp.bfloat16), jnp.asarray(so, jnp.bfloat16)


@jax.jit
def backbone_forward(x, params):
    """Pallas TPU Backbone.forward.  x: (B, 1, H, W) f32, returns NCHW f32."""
    w1, b1, w2, b2, w3, b3 = params           # HWIO conv weights, (Cout,) biases
    if x.shape[1] != 1:
        raise ValueError("Backbone expects a single input channel")
    B, _, H, W = x.shape

    # F.pad(x, (1, 2, 1, 2)) and drop the channel dim -> (B, Hp, Wp), W in lanes.
    xp = jnp.pad(x.astype(jnp.float32)[:, 0], ((0, 0), (1, 2), (1, 2)))
    Hp, Wp = H + 3, W + 3

    # Layer geometry (mirrors the PyTorch ops).
    C1, C2, C3 = 8, 32, 64
    H1 = (Hp - 3) // 2 + 1
    W1 = Wp - 2 + 1
    H2 = H1 + 2 * 3 - 6 + 1
    W2 = W1 + 2 * 1 - 4 + 1
    H3, W3 = H2 // 4, W2 // 2                 # after MaxPool (4,2)
    W2u = 2 * W3                              # conv2 columns that survive the pool
    H4, W4 = H3, W3                           # conv3 preserves the shape
    H5, W5 = H4, W4 // 2                      # after MaxPool (1,2)
    if H3 < 1 or W5 < 1:
        raise ValueError("input too small for Backbone")

    # Scratch-row bookkeeping: conv2 only reads padded conv1 rows 0 .. 4*H3+4.
    n_h1u = 4 * H3 + 5
    H1_used = min(H1, n_h1u - 3)
    h1u_border = tuple(range(3)) + tuple(range(H1_used + 3, n_h1u))
    n_p1u = H3 + 2
    p1u_border = (0, n_p1u - 1)

    # Kernel-layout weights: Cout in sublanes, flattened (kh, kw, cin) taps in lanes.
    w1k = jnp.transpose(w1.reshape(3 * 2, C1)).astype(jnp.float32)        # (8, 6)
    w2k = jnp.transpose(w2.reshape(6 * 4 * C1, C2)).astype(jnp.bfloat16)  # (32, 192)
    w3k = jnp.transpose(w3.reshape(3 * 3 * C2, C3)).astype(jnp.bfloat16)  # (64, 288)
    b1k = b1.reshape(C1, 1).astype(jnp.float32)
    b2k = b2.reshape(C2, 1).astype(jnp.float32)
    b3k = b3.reshape(C3, 1).astype(jnp.float32)
    se1, so1 = _pick_matrices(W2u, W3)
    se2, so2 = _pick_matrices(W4, W5)

    kernel = functools.partial(
        _backbone_kernel,
        H1_used=H1_used, W1=W1, H3=H3, W2u=W2u, W3=W3, W4=W4, W5=W5,
        C1=C1, C2=C2, C3=C3,
        h1u_border=h1u_border, p1u_border=p1u_border)

    out = pl.pallas_call(
        kernel,
        out_shape=jax.ShapeDtypeStruct((B, C3, H5 * W5), jnp.float32),
        grid=(B,),
        in_specs=[
            pl.BlockSpec((None, Hp, Wp), lambda b: (b, 0, 0)),
            pl.BlockSpec((C1, 6), lambda b: (0, 0)),
            pl.BlockSpec((C1, 1), lambda b: (0, 0)),
            pl.BlockSpec((C2, 6 * 4 * C1), lambda b: (0, 0)),
            pl.BlockSpec((C2, 1), lambda b: (0, 0)),
            pl.BlockSpec((C3, 3 * 3 * C2), lambda b: (0, 0)),
            pl.BlockSpec((C3, 1), lambda b: (0, 0)),
            pl.BlockSpec((W2u, W3), lambda b: (0, 0)),
            pl.BlockSpec((W2u, W3), lambda b: (0, 0)),
            pl.BlockSpec((W4, W5), lambda b: (0, 0)),
            pl.BlockSpec((W4, W5), lambda b: (0, 0)),
        ],
        out_specs=pl.BlockSpec((None, C3, H5 * W5), lambda b: (b, 0, 0)),
        scratch_shapes=[
            pltpu.VMEM((n_h1u, 4 * C1, W2u), jnp.bfloat16),   # unfolded conv1 rows
            pltpu.VMEM((n_p1u, 3 * C2, W4), jnp.bfloat16),    # unfolded pool1 rows
        ],
        compiler_params=pltpu.CompilerParams(
            dimension_semantics=("parallel",)),
    )(xp, w1k, b1k, w2k, b2k, w3k, b3k, se1, so1, se2, so2)

    # (B, C3, H5*W5) -> NCHW, no transpose needed.
    return out.reshape(B, C3, H5, W5)


def backbone_reference(x, params):
    """Pure-XLA reference with the same precision policy as the kernel
    (bf16 MXU operands / activations, f32 accumulation and epilogues)."""
    w1, b1, w2, b2, w3, b3 = params
    f32 = jnp.float32
    rb = lambda a: a.astype(jnp.bfloat16).astype(f32)
    dn = ("NCHW", "HWIO", "NCHW")
    hi = lax.Precision.HIGHEST

    y = jnp.pad(x.astype(f32), ((0, 0), (0, 0), (1, 2), (1, 2)))
    y = lax.conv_general_dilated(y, w1.astype(f32), (2, 1), "VALID",
                                 dimension_numbers=dn, precision=hi)
    y = rb(_leaky_relu(y + b1.reshape(1, -1, 1, 1)))
    y = lax.conv_general_dilated(y, rb(w2), (1, 1), ((3, 3), (1, 1)),
                                 dimension_numbers=dn, precision=hi)
    y = rb(_leaky_relu(y + b2.reshape(1, -1, 1, 1)))
    y = lax.reduce_window(y, -jnp.inf, lax.max, (1, 1, 4, 2), (1, 1, 4, 2), "VALID")
    y = lax.conv_general_dilated(y, rb(w3), (1, 1), ((1, 1), (1, 1)),
                                 dimension_numbers=dn, precision=hi)
    y = rb(_leaky_relu(y + b3.reshape(1, -1, 1, 1)))
    y = lax.reduce_window(y, -jnp.inf, lax.max, (1, 1, 1, 2), (1, 1, 1, 2), "VALID")
    return y


if __name__ == "__main__":
    key = jax.random.PRNGKey(0)
    kx, k1, k2, k3, k4, k5, k6 = jax.random.split(key, 7)

    B, H, W = 2, 32, 32
    x = jax.random.normal(kx, (B, 1, H, W), jnp.float32)

    # Conv weights in HWIO (KH, KW, Cin, Cout), biases (Cout,) - deterministic.
    params = (
        0.30 * jax.random.normal(k1, (3, 2, 1, 8), jnp.float32),
        0.10 * jax.random.normal(k2, (8,), jnp.float32),
        0.15 * jax.random.normal(k3, (6, 4, 8, 32), jnp.float32),
        0.10 * jax.random.normal(k4, (32,), jnp.float32),
        0.10 * jax.random.normal(k5, (3, 3, 32, 64), jnp.float32),
        0.10 * jax.random.normal(k6, (64,), jnp.float32),
    )

    out = jax.block_until_ready(backbone_forward(x, params))
    ref = jax.block_until_ready(jax.jit(backbone_reference)(x, params))

    assert out.shape == ref.shape == (B, 64, 4, 8), (out.shape, ref.shape)
    # Tolerance covers the occasional one-ulp bf16 double-rounding flip between
    # the kernel's and XLA's (differently ordered) f32 accumulations.
    np.testing.assert_allclose(np.asarray(out), np.asarray(ref),
                               atol=2e-2, rtol=2e-2)
    print("KERNEL_OK")
</pallas_src>

<mosaic_0001>
module attributes {stable_mosaic.version = 11 : i64} {
  func.func @_backbone_kernel(%arg0: i32, %arg1: memref<1x35x35xf32, #tpu.memory_space<vmem>>, %arg2: memref<8x6xf32, #tpu.memory_space<vmem>>, %arg3: memref<8x1xf32, #tpu.memory_space<vmem>>, %arg4: memref<32x192xbf16, #tpu.memory_space<vmem>>, %arg5: memref<32x1xf32, #tpu.memory_space<vmem>>, %arg6: memref<64x288xbf16, #tpu.memory_space<vmem>>, %arg7: memref<64x1xf32, #tpu.memory_space<vmem>>, %arg8: memref<32x16xbf16, #tpu.memory_space<vmem>>, %arg9: memref<32x16xbf16, #tpu.memory_space<vmem>>, %arg10: memref<16x8xbf16, #tpu.memory_space<vmem>>, %arg11: memref<16x8xbf16, #tpu.memory_space<vmem>>, %arg12: memref<1x64x32xf32, #tpu.memory_space<vmem>>, %arg13: memref<21x32x32xbf16, #tpu.memory_space<vmem>>, %arg14: memref<6x96x16xbf16, #tpu.memory_space<vmem>>) attributes {dimension_semantics = [#tpu.dimension_semantics<parallel>], iteration_bounds = array<i64: 2>, scalar_prefetch = 0 : i64, scratch_operands = 2 : i64, tpu.core_type = #tpu.core_type<tc>, window_params = [{transform_indices = @transform_0, window_bounds = array<i64: 1, 35, 35>}, {pipeline_mode = #tpu.pipeline_mode<synchronous>, transform_indices = @transform_1, window_bounds = array<i64: 8, 6>}, {pipeline_mode = #tpu.pipeline_mode<synchronous>, transform_indices = @transform_2, window_bounds = array<i64: 8, 1>}, {pipeline_mode = #tpu.pipeline_mode<synchronous>, transform_indices = @transform_3, window_bounds = array<i64: 32, 192>}, {pipeline_mode = #tpu.pipeline_mode<synchronous>, transform_indices = @transform_4, window_bounds = array<i64: 32, 1>}, {pipeline_mode = #tpu.pipeline_mode<synchronous>, transform_indices = @transform_5, window_bounds = array<i64: 64, 288>}, {pipeline_mode = #tpu.pipeline_mode<synchronous>, transform_indices = @transform_6, window_bounds = array<i64: 64, 1>}, {pipeline_mode = #tpu.pipeline_mode<synchronous>, transform_indices = @transform_7, window_bounds = array<i64: 32, 16>}, {pipeline_mode = #tpu.pipeline_mode<synchronous>, transform_indices = @transform_8, window_bounds = array<i64: 32, 16>}, {pipeline_mode = #tpu.pipeline_mode<synchronous>, transform_indices = @transform_9, window_bounds = array<i64: 16, 8>}, {pipeline_mode = #tpu.pipeline_mode<synchronous>, transform_indices = @transform_10, window_bounds = array<i64: 16, 8>}, {transform_indices = @transform_11, window_bounds = array<i64: 1, 64, 32>}]} {
    %cst = arith.constant 0.000000e+00 : bf16
    %0 = vector.broadcast %cst : bf16 to vector<32x32xbf16>
    %c0 = arith.constant 0 : index
    %c0_0 = arith.constant 0 : index
    %c0_1 = arith.constant 0 : index
    %1 = vector.load %arg13[%c0, %c0_0, %c0_1] : memref<21x32x32xbf16, #tpu.memory_space<vmem>>, vector<1x32x32xbf16>
    %2 = vector.shape_cast %1 : vector<1x32x32xbf16> to vector<32x32xbf16>
    %3 = vector.shape_cast %0 : vector<32x32xbf16> to vector<1x32x32xbf16>
    tpu.vector_store %arg13[%c0, %c0_0, %c0_1], %3 {strides = array<i32>} : memref<21x32x32xbf16, #tpu.memory_space<vmem>>, vector<1x32x32xbf16>,
    %c1 = arith.constant 1 : index
    %c0_2 = arith.constant 0 : index
    %c0_3 = arith.constant 0 : index
    %4 = vector.load %arg13[%c1, %c0_2, %c0_3] : memref<21x32x32xbf16, #tpu.memory_space<vmem>>, vector<1x32x32xbf16>
    %5 = vector.shape_cast %4 : vector<1x32x32xbf16> to vector<32x32xbf16>
    %6 = vector.shape_cast %0 : vector<32x32xbf16> to vector<1x32x32xbf16>
    tpu.vector_store %arg13[%c1, %c0_2, %c0_3], %6 {strides = array<i32>} : memref<21x32x32xbf16, #tpu.memory_space<vmem>>, vector<1x32x32xbf16>,
    %c2 = arith.constant 2 : index
    %c0_4 = arith.constant 0 : index
    %c0_5 = arith.constant 0 : index
    %7 = vector.load %arg13[%c2, %c0_4, %c0_5] : memref<21x32x32xbf16, #tpu.memory_space<vmem>>, vector<1x32x32xbf16>
    %8 = vector.shape_cast %7 : vector<1x32x32xbf16> to vector<32x32xbf16>
    %9 = vector.shape_cast %0 : vector<32x32xbf16> to vector<1x32x32xbf16>
    tpu.vector_store %arg13[%c2, %c0_4, %c0_5], %9 {strides = array<i32>} : memref<21x32x32xbf16, #tpu.memory_space<vmem>>, vector<1x32x32xbf16>,
    %c20 = arith.constant 20 : index
    %c0_6 = arith.constant 0 : index
    %c0_7 = arith.constant 0 : index
    %10 = vector.load %arg13[%c20, %c0_6, %c0_7] : memref<21x32x32xbf16, #tpu.memory_space<vmem>>, vector<1x32x32xbf16>
    %11 = vector.shape_cast %10 : vector<1x32x32xbf16> to vector<32x32xbf16>
    %12 = vector.shape_cast %0 : vector<32x32xbf16> to vector<1x32x32xbf16>
    tpu.vector_store %arg13[%c20, %c0_6, %c0_7], %12 {strides = array<i32>} : memref<21x32x32xbf16, #tpu.memory_space<vmem>>, vector<1x32x32xbf16>,
    %cst_8 = arith.constant 0.000000e+00 : bf16
    %13 = vector.broadcast %cst_8 : bf16 to vector<96x16xbf16>
    %c0_9 = arith.constant 0 : index
    %c0_10 = arith.constant 0 : index
    %c0_11 = arith.constant 0 : index
    %14 = vector.load %arg14[%c0_9, %c0_10, %c0_11] : memref<6x96x16xbf16, #tpu.memory_space<vmem>>, vector<1x96x16xbf16>
    %15 = vector.shape_cast %14 : vector<1x96x16xbf16> to vector<96x16xbf16>
    %16 = vector.shape_cast %13 : vector<96x16xbf16> to vector<1x96x16xbf16>
    tpu.vector_store %arg14[%c0_9, %c0_10, %c0_11], %16 {strides = array<i32>} : memref<6x96x16xbf16, #tpu.memory_space<vmem>>, vector<1x96x16xbf16>,
    %c5 = arith.constant 5 : index
    %c0_12 = arith.constant 0 : index
    %c0_13 = arith.constant 0 : index
    %17 = vector.load %arg14[%c5, %c0_12, %c0_13] : memref<6x96x16xbf16, #tpu.memory_space<vmem>>, vector<1x96x16xbf16>
    %18 = vector.shape_cast %17 : vector<1x96x16xbf16> to vector<96x16xbf16>
    %19 = vector.shape_cast %13 : vector<96x16xbf16> to vector<1x96x16xbf16>
    tpu.vector_store %arg14[%c5, %c0_12, %c0_13], %19 {strides = array<i32>} : memref<6x96x16xbf16, #tpu.memory_space<vmem>>, vector<1x96x16xbf16>,
    %c0_14 = arith.constant 0 : index
    %c0_15 = arith.constant 0 : index
    %20 = vector.load %arg2[%c0_14, %c0_15] : memref<8x6xf32, #tpu.memory_space<vmem>>, vector<8x6xf32>
    %c0_16 = arith.constant 0 : index
    %c0_17 = arith.constant 0 : index
    %21 = vector.load %arg3[%c0_16, %c0_17] : memref<8x1xf32, #tpu.memory_space<vmem>>, vector<8x1xf32>
    %c0_18 = arith.constant 0 : index
    %c0_19 = arith.constant 0 : index
    %22 = vector.load %arg4[%c0_18, %c0_19] : memref<32x192xbf16, #tpu.memory_space<vmem>>, vector<32x192xbf16>
    %c0_20 = arith.constant 0 : index
    %c0_21 = arith.constant 0 : index
    %23 = vector.load %arg5[%c0_20, %c0_21] : memref<32x1xf32, #tpu.memory_space<vmem>>, vector<32x1xf32>
    %c0_22 = arith.constant 0 : index
    %c0_23 = arith.constant 0 : index
    %24 = vector.load %arg6[%c0_22, %c0_23] : memref<64x288xbf16, #tpu.memory_space<vmem>>, vector<64x288xbf16>
    %c0_24 = arith.constant 0 : index
    %c0_25 = arith.constant 0 : index
    %25 = vector.load %arg7[%c0_24, %c0_25] : memref<64x1xf32, #tpu.memory_space<vmem>>, vector<64x1xf32>
    %c0_26 = arith.constant 0 : index
    %c0_27 = arith.constant 0 : index
    %26 = vector.load %arg8[%c0_26, %c0_27] : memref<32x16xbf16, #tpu.memory_space<vmem>>, vector<32x16xbf16>
    %c0_28 = arith.constant 0 : index
    %c0_29 = arith.constant 0 : index
    %27 = vector.load %arg9[%c0_28, %c0_29] : memref<32x16xbf16, #tpu.memory_space<vmem>>, vector<32x16xbf16>
    %c0_30 = arith.constant 0 : index
    %c0_31 = arith.constant 0 : index
    %28 = vector.load %arg10[%c0_30, %c0_31] : memref<16x8xbf16, #tpu.memory_space<vmem>>, vector<16x8xbf16>
    %c0_32 = arith.constant 0 : index
    %c0_33 = arith.constant 0 : index
    %29 = vector.load %arg11[%c0_32, %c0_33] : memref<16x8xbf16, #tpu.memory_space<vmem>>, vector<16x8xbf16>
    %cst_34 = arith.constant 0.000000e+00 : f32
    %30 = vector.broadcast %cst_34 : f32 to vector<8x1xf32>
    %cst_35 = arith.constant 0.000000e+00 : f32
    %31 = vector.broadcast %cst_35 : f32 to vector<32x1xf32>
    %cst_36 = arith.constant 0.000000e+00 : f32
    %32 = vector.broadcast %cst_36 : f32 to vector<8x34xf32>
    %c0_37 = arith.constant 0 : index
    %c0_38 = arith.constant 0 : index
    %c0_39 = arith.constant 0 : index
    %33 = vector.load %arg1[%c0_37, %c0_38, %c0_39] : memref<1x35x35xf32, #tpu.memory_space<vmem>>, vector<1x1x35xf32>
    %34 = vector.shape_cast %33 : vector<1x1x35xf32> to vector<1x35xf32>
    %35 = vector.extract_strided_slice %20 {offsets = [0, 0], sizes = [8, 1], strides = [1, 1]} : vector<8x6xf32> to vector<8x1xf32>
    %36 = vector.extract_strided_slice %34 {offsets = [0, 0], sizes = [1, 34], strides = [1, 1]} : vector<1x35xf32> to vector<1x34xf32>
    %37 = vector.broadcast %35 : vector<8x1xf32> to vector<8x34xf32>
    %38 = vector.broadcast %36 : vector<1x34xf32> to vector<8x34xf32>
    %39 = arith.mulf %37, %38 : vector<8x34xf32>
    %40 = arith.addf %32, %39 : vector<8x34xf32>
    %41 = vector.extract_strided_slice %20 {offsets = [0, 1], sizes = [8, 1], strides = [1, 1]} : vector<8x6xf32> to vector<8x1xf32>
    %42 = vector.extract_strided_slice %34 {offsets = [0, 1], sizes = [1, 34], strides = [1, 1]} : vector<1x35xf32> to vector<1x34xf32>
    %43 = vector.broadcast %41 : vector<8x1xf32> to vector<8x34xf32>
    %44 = vector.broadcast %42 : vector<1x34xf32> to vector<8x34xf32>
    %45 = arith.mulf %43, %44 : vector<8x34xf32>
    %46 = arith.addf %40, %45 : vector<8x34xf32>
    %c0_40 = arith.constant 0 : index
    %c1_41 = arith.constant 1 : index
    %c0_42 = arith.constant 0 : index
    %47 = vector.load %arg1[%c0_40, %c1_41, %c0_42] : memref<1x35x35xf32, #tpu.memory_space<vmem>>, vector<1x1x35xf32>
    %48 = vector.shape_cast %47 : vector<1x1x35xf32> to vector<1x35xf32>
    %49 = vector.extract_strided_slice %20 {offsets = [0, 2], sizes = [8, 1], strides = [1, 1]} : vector<8x6xf32> to vector<8x1xf32>
    %50 = vector.extract_strided_slice %48 {offsets = [0, 0], sizes = [1, 34], strides = [1, 1]} : vector<1x35xf32> to vector<1x34xf32>
    %51 = vector.broadcast %49 : vector<8x1xf32> to vector<8x34xf32>
    %52 = vector.broadcast %50 : vector<1x34xf32> to vector<8x34xf32>
    %53 = arith.mulf %51, %52 : vector<8x34xf32>
    %54 = arith.addf %46, %53 : vector<8x34xf32>
    %55 = vector.extract_strided_slice %20 {offsets = [0, 3], sizes = [8, 1], strides = [1, 1]} : vector<8x6xf32> to vector<8x1xf32>
    %56 = vector.extract_strided_slice %48 {offsets = [0, 1], sizes = [1, 34], strides = [1, 1]} : vector<1x35xf32> to vector<1x34xf32>
    %57 = vector.broadcast %55 : vector<8x1xf32> to vector<8x34xf32>
    %58 = vector.broadcast %56 : vector<1x34xf32> to vector<8x34xf32>
    %59 = arith.mulf %57, %58 : vector<8x34xf32>
    %60 = arith.addf %54, %59 : vector<8x34xf32>
    %c0_43 = arith.constant 0 : index
    %c2_44 = arith.constant 2 : index
    %c0_45 = arith.constant 0 : index
    %61 = vector.load %arg1[%c0_43, %c2_44, %c0_45] : memref<1x35x35xf32, #tpu.memory_space<vmem>>, vector<1x1x35xf32>
    %62 = vector.shape_cast %61 : vector<1x1x35xf32> to vector<1x35xf32>
    %63 = vector.extract_strided_slice %20 {offsets = [0, 4], sizes = [8, 1], strides = [1, 1]} : vector<8x6xf32> to vector<8x1xf32>
    %64 = vector.extract_strided_slice %62 {offsets = [0, 0], sizes = [1, 34], strides = [1, 1]} : vector<1x35xf32> to vector<1x34xf32>
    %65 = vector.broadcast %63 : vector<8x1xf32> to vector<8x34xf32>
    %66 = vector.broadcast %64 : vector<1x34xf32> to vector<8x34xf32>
    %67 = arith.mulf %65, %66 : vector<8x34xf32>
    %68 = arith.addf %60, %67 : vector<8x34xf32>
    %69 = vector.extract_strided_slice %20 {offsets = [0, 5], sizes = [8, 1], strides = [1, 1]} : vector<8x6xf32> to vector<8x1xf32>
    %70 = vector.extract_strided_slice %62 {offsets = [0, 1], sizes = [1, 34], strides = [1, 1]} : vector<1x35xf32> to vector<1x34xf32>
    %71 = vector.broadcast %69 : vector<8x1xf32> to vector<8x34xf32>
    %72 = vector.broadcast %70 : vector<1x34xf32> to vector<8x34xf32>
    %73 = arith.mulf %71, %72 : vector<8x34xf32>
    %74 = arith.addf %68, %73 : vector<8x34xf32>
    %75 = vector.broadcast %21 : vector<8x1xf32> to vector<8x34xf32>
    %76 = arith.addf %74, %75 : vector<8x34xf32>
    %cst_46 = arith.constant 0.000000e+00 : f32
    %77 = vector.broadcast %cst_46 : f32 to vector<8x34xf32>
    %78 = arith.cmpf oge, %76, %77 : vector<8x34xf32>
    %cst_47 = arith.constant 0.00999999977 : f32
    %79 = vector.broadcast %cst_47 : f32 to vector<8x34xf32>
    %80 = arith.mulf %79, %76 : vector<8x34xf32>
    %81 = arith.select %78, %76, %80 : vector<8x34xi1>, vector<8x34xf32>
    %82 = tpu.concatenate %30, %81, %30 in 1 : vector<8x1xf32>, vector<8x34xf32>, vector<8x1xf32> -> vector<8x36xf32>
    %83 = vector.extract_strided_slice %82 {offsets = [0, 0], sizes = [8, 32], strides = [1, 1]} : vector<8x36xf32> to vector<8x32xf32>
    %84 = vector.extract_strided_slice %82 {offsets = [0, 1], sizes = [8, 32], strides = [1, 1]} : vector<8x36xf32> to vector<8x32xf32>
    %85 = vector.extract_strided_slice %82 {offsets = [0, 2], sizes = [8, 32], strides = [1, 1]} : vector<8x36xf32> to vector<8x32xf32>
    %86 = vector.extract_strided_slice %82 {offsets = [0, 3], sizes = [8, 32], strides = [1, 1]} : vector<8x36xf32> to vector<8x32xf32>
    %87 = tpu.concatenate %83, %84, %85, %86 in 0 : vector<8x32xf32>, vector<8x32xf32>, vector<8x32xf32>, vector<8x32xf32> -> vector<32x32xf32>
    %88 = arith.truncf %87 : vector<32x32xf32> to vector<32x32xbf16>
    %c3 = arith.constant 3 : index
    %c0_48 = arith.constant 0 : index
    %c0_49 = arith.constant 0 : index
    %89 = vector.load %arg13[%c3, %c0_48, %c0_49] : memref<21x32x32xbf16, #tpu.memory_space<vmem>>, vector<1x32x32xbf16>
    %90 = vector.shape_cast %89 : vector<1x32x32xbf16> to vector<32x32xbf16>
    %91 = vector.shape_cast %88 : vector<32x32xbf16> to vector<1x32x32xbf16>
    tpu.vector_store %arg13[%c3, %c0_48, %c0_49], %91 {strides = array<i32>} : memref<21x32x32xbf16, #tpu.memory_space<vmem>>, vector<1x32x32xbf16>,
    %cst_50 = arith.constant 0.000000e+00 : f32
    %92 = vector.broadcast %cst_50 : f32 to vector<8x34xf32>
    %c0_51 = arith.constant 0 : index
    %c2_52 = arith.constant 2 : index
    %c0_53 = arith.constant 0 : index
    %93 = vector.load %arg1[%c0_51, %c2_52, %c0_53] : memref<1x35x35xf32, #tpu.memory_space<vmem>>, vector<1x1x35xf32>
    %94 = vector.shape_cast %93 : vector<1x1x35xf32> to vector<1x35xf32>
    %95 = vector.extract_strided_slice %20 {offsets = [0, 0], sizes = [8, 1], strides = [1, 1]} : vector<8x6xf32> to vector<8x1xf32>
    %96 = vector.extract_strided_slice %94 {offsets = [0, 0], sizes = [1, 34], strides = [1, 1]} : vector<1x35xf32> to vector<1x34xf32>
    %97 = vector.broadcast %95 : vector<8x1xf32> to vector<8x34xf32>
    %98 = vector.broadcast %96 : vector<1x34xf32> to vector<8x34xf32>
    %99 = arith.mulf %97, %98 : vector<8x34xf32>
    %100 = arith.addf %92, %99 : vector<8x34xf32>
    %101 = vector.extract_strided_slice %20 {offsets = [0, 1], sizes = [8, 1], strides = [1, 1]} : vector<8x6xf32> to vector<8x1xf32>
    %102 = vector.extract_strided_slice %94 {offsets = [0, 1], sizes = [1, 34], strides = [1, 1]} : vector<1x35xf32> to vector<1x34xf32>
    %103 = vector.broadcast %101 : vector<8x1xf32> to vector<8x34xf32>
    %104 = vector.broadcast %102 : vector<1x34xf32> to vector<8x34xf32>
    %105 = arith.mulf %103, %104 : vector<8x34xf32>
    %106 = arith.addf %100, %105 : vector<8x34xf32>
    %c0_54 = arith.constant 0 : index
    %c3_55 = arith.constant 3 : index
    %c0_56 = arith.constant 0 : index
    %107 = vector.load %arg1[%c0_54, %c3_55, %c0_56] : memref<1x35x35xf32, #tpu.memory_space<vmem>>, vector<1x1x35xf32>
    %108 = vector.shape_cast %107 : vector<1x1x35xf32> to vector<1x35xf32>
    %109 = vector.extract_strided_slice %20 {offsets = [0, 2], sizes = [8, 1], strides = [1, 1]} : vector<8x6xf32> to vector<8x1xf32>
    %110 = vector.extract_strided_slice %108 {offsets = [0, 0], sizes = [1, 34], strides = [1, 1]} : vector<1x35xf32> to vector<1x34xf32>
    %111 = vector.broadcast %109 : vector<8x1xf32> to vector<8x34xf32>
    %112 = vector.broadcast %110 : vector<1x34xf32> to vector<8x34xf32>
    %113 = arith.mulf %111, %112 : vector<8x34xf32>
    %114 = arith.addf %106, %113 : vector<8x34xf32>
    %115 = vector.extract_strided_slice %20 {offsets = [0, 3], sizes = [8, 1], strides = [1, 1]} : vector<8x6xf32> to vector<8x1xf32>
    %116 = vector.extract_strided_slice %108 {offsets = [0, 1], sizes = [1, 34], strides = [1, 1]} : vector<1x35xf32> to vector<1x34xf32>
    %117 = vector.broadcast %115 : vector<8x1xf32> to vector<8x34xf32>
    %118 = vector.broadcast %116 : vector<1x34xf32> to vector<8x34xf32>
    %119 = arith.mulf %117, %118 : vector<8x34xf32>
    %120 = arith.addf %114, %119 : vector<8x34xf32>
    %c0_57 = arith.constant 0 : index
    %c4 = arith.constant 4 : index
    %c0_58 = arith.constant 0 : index
    %121 = vector.load %arg1[%c0_57, %c4, %c0_58] : memref<1x35x35xf32, #tpu.memory_space<vmem>>, vector<1x1x35xf32>
    %122 = vector.shape_cast %121 : vector<1x1x35xf32> to vector<1x35xf32>
    %123 = vector.extract_strided_slice %20 {offsets = [0, 4], sizes = [8, 1], strides = [1, 1]} : vector<8x6xf32> to vector<8x1xf32>
    %124 = vector.extract_strided_slice %122 {offsets = [0, 0], sizes = [1, 34], strides = [1, 1]} : vector<1x35xf32> to vector<1x34xf32>
    %125 = vector.broadcast %123 : vector<8x1xf32> to vector<8x34xf32>
    %126 = vector.broadcast %124 : vector<1x34xf32> to vector<8x34xf32>
    %127 = arith.mulf %125, %126 : vector<8x34xf32>
    %128 = arith.addf %120, %127 : vector<8x34xf32>
    %129 = vector.extract_strided_slice %20 {offsets = [0, 5], sizes = [8, 1], strides = [1, 1]} : vector<8x6xf32> to vector<8x1xf32>
    %130 = vector.extract_strided_slice %122 {offsets = [0, 1], sizes = [1, 34], strides = [1, 1]} : vector<1x35xf32> to vector<1x34xf32>
    %131 = vector.broadcast %129 : vector<8x1xf32> to vector<8x34xf32>
    %132 = vector.broadcast %130 : vector<1x34xf32> to vector<8x34xf32>
    %133 = arith.mulf %131, %132 : vector<8x34xf32>
    %134 = arith.addf %128, %133 : vector<8x34xf32>
    %135 = vector.broadcast %21 : vector<8x1xf32> to vector<8x34xf32>
    %136 = arith.addf %134, %135 : vector<8x34xf32>
    %cst_59 = arith.constant 0.000000e+00 : f32
    %137 = vector.broadcast %cst_59 : f32 to vector<8x34xf32>
    %138 = arith.cmpf oge, %136, %137 : vector<8x34xf32>
    %cst_60 = arith.constant 0.00999999977 : f32
    %139 = vector.broadcast %cst_60 : f32 to vector<8x34xf32>
    %140 = arith.mulf %139, %136 : vector<8x34xf32>
    %141 = arith.select %138, %136, %140 : vector<8x34xi1>, vector<8x34xf32>
    %142 = tpu.concatenate %30, %141, %30 in 1 : vector<8x1xf32>, vector<8x34xf32>, vector<8x1xf32> -> vector<8x36xf32>
    %143 = vector.extract_strided_slice %142 {offsets = [0, 0], sizes = [8, 32], strides = [1, 1]} : vector<8x36xf32> to vector<8x32xf32>
    %144 = vector.extract_strided_slice %142 {offsets = [0, 1], sizes = [8, 32], strides = [1, 1]} : vector<8x36xf32> to vector<8x32xf32>
    %145 = vector.extract_strided_slice %142 {offsets = [0, 2], sizes = [8, 32], strides = [1, 1]} : vector<8x36xf32> to vector<8x32xf32>
    %146 = vector.extract_strided_slice %142 {offsets = [0, 3], sizes = [8, 32], strides = [1, 1]} : vector<8x36xf32> to vector<8x32xf32>
    %147 = tpu.concatenate %143, %144, %145, %146 in 0 : vector<8x32xf32>, vector<8x32xf32>, vector<8x32xf32>, vector<8x32xf32> -> vector<32x32xf32>
    %148 = arith.truncf %147 : vector<32x32xf32> to vector<32x32xbf16>
    %c4_61 = arith.constant 4 : index
    %c0_62 = arith.constant 0 : index
    %c0_63 = arith.constant 0 : index
    %149 = vector.load %arg13[%c4_61, %c0_62, %c0_63] : memref<21x32x32xbf16, #tpu.memory_space<vmem>>, vector<1x32x32xbf16>
    %150 = vector.shape_cast %149 : vector<1x32x32xbf16> to vector<32x32xbf16>
    %151 = vector.shape_cast %148 : vector<32x32xbf16> to vector<1x32x32xbf16>
    tpu.vector_store %arg13[%c4_61, %c0_62, %c0_63], %151 {strides = array<i32>} : memref<21x32x32xbf16, #tpu.memory_space<vmem>>, vector<1x32x32xbf16>,
    %cst_64 = arith.constant 0.000000e+00 : f32
    %152 = vector.broadcast %cst_64 : f32 to vector<8x34xf32>
    %c0_65 = arith.constant 0 : index
    %c4_66 = arith.constant 4 : index
    %c0_67 = arith.constant 0 : index
    %153 = vector.load %arg1[%c0_65, %c4_66, %c0_67] : memref<1x35x35xf32, #tpu.memory_space<vmem>>, vector<1x1x35xf32>
    %154 = vector.shape_cast %153 : vector<1x1x35xf32> to vector<1x35xf32>
    %155 = vector.extract_strided_slice %20 {offsets = [0, 0], sizes = [8, 1], strides = [1, 1]} : vector<8x6xf32> to vector<8x1xf32>
    %156 = vector.extract_strided_slice %154 {offsets = [0, 0], sizes = [1, 34], strides = [1, 1]} : vector<1x35xf32> to vector<1x34xf32>
    %157 = vector.broadcast %155 : vector<8x1xf32> to vector<8x34xf32>
    %158 = vector.broadcast %156 : vector<1x34xf32> to vector<8x34xf32>
    %159 = arith.mulf %157, %158 : vector<8x34xf32>
    %160 = arith.addf %152, %159 : vector<8x34xf32>
    %161 = vector.extract_strided_slice %20 {offsets = [0, 1], sizes = [8, 1], strides = [1, 1]} : vector<8x6xf32> to vector<8x1xf32>
    %162 = vector.extract_strided_slice %154 {offsets = [0, 1], sizes = [1, 34], strides = [1, 1]} : vector<1x35xf32> to vector<1x34xf32>
    %163 = vector.broadcast %161 : vector<8x1xf32> to vector<8x34xf32>
    %164 = vector.broadcast %162 : vector<1x34xf32> to vector<8x34xf32>
    %165 = arith.mulf %163, %164 : vector<8x34xf32>
    %166 = arith.addf %160, %165 : vector<8x34xf32>
    %c0_68 = arith.constant 0 : index
    %c5_69 = arith.constant 5 : index
    %c0_70 = arith.constant 0 : index
    %167 = vector.load %arg1[%c0_68, %c5_69, %c0_70] : memref<1x35x35xf32, #tpu.memory_space<vmem>>, vector<1x1x35xf32>
    %168 = vector.shape_cast %167 : vector<1x1x35xf32> to vector<1x35xf32>
    %169 = vector.extract_strided_slice %20 {offsets = [0, 2], sizes = [8, 1], strides = [1, 1]} : vector<8x6xf32> to vector<8x1xf32>
    %170 = vector.extract_strided_slice %168 {offsets = [0, 0], sizes = [1, 34], strides = [1, 1]} : vector<1x35xf32> to vector<1x34xf32>
    %171 = vector.broadcast %169 : vector<8x1xf32> to vector<8x34xf32>
    %172 = vector.broadcast %170 : vector<1x34xf32> to vector<8x34xf32>
    %173 = arith.mulf %171, %172 : vector<8x34xf32>
    %174 = arith.addf %166, %173 : vector<8x34xf32>
    %175 = vector.extract_strided_slice %20 {offsets = [0, 3], sizes = [8, 1], strides = [1, 1]} : vector<8x6xf32> to vector<8x1xf32>
    %176 = vector.extract_strided_slice %168 {offsets = [0, 1], sizes = [1, 34], strides = [1, 1]} : vector<1x35xf32> to vector<1x34xf32>
    %177 = vector.broadcast %175 : vector<8x1xf32> to vector<8x34xf32>
    %178 = vector.broadcast %176 : vector<1x34xf32> to vector<8x34xf32>
    %179 = arith.mulf %177, %178 : vector<8x34xf32>
    %180 = arith.addf %174, %179 : vector<8x34xf32>
    %c0_71 = arith.constant 0 : index
    %c6 = arith.constant 6 : index
    %c0_72 = arith.constant 0 : index
    %181 = vector.load %arg1[%c0_71, %c6, %c0_72] : memref<1x35x35xf32, #tpu.memory_space<vmem>>, vector<1x1x35xf32>
    %182 = vector.shape_cast %181 : vector<1x1x35xf32> to vector<1x35xf32>
    %183 = vector.extract_strided_slice %20 {offsets = [0, 4], sizes = [8, 1], strides = [1, 1]} : vector<8x6xf32> to vector<8x1xf32>
    %184 = vector.extract_strided_slice %182 {offsets = [0, 0], sizes = [1, 34], strides = [1, 1]} : vector<1x35xf32> to vector<1x34xf32>
    %185 = vector.broadcast %183 : vector<8x1xf32> to vector<8x34xf32>
    %186 = vector.broadcast %184 : vector<1x34xf32> to vector<8x34xf32>
    %187 = arith.mulf %185, %186 : vector<8x34xf32>
    %188 = arith.addf %180, %187 : vector<8x34xf32>
    %189 = vector.extract_strided_slice %20 {offsets = [0, 5], sizes = [8, 1], strides = [1, 1]} : vector<8x6xf32> to vector<8x1xf32>
    %190 = vector.extract_strided_slice %182 {offsets = [0, 1], sizes = [1, 34], strides = [1, 1]} : vector<1x35xf32> to vector<1x34xf32>
    %191 = vector.broadcast %189 : vector<8x1xf32> to vector<8x34xf32>
    %192 = vector.broadcast %190 : vector<1x34xf32> to vector<8x34xf32>
    %193 = arith.mulf %191, %192 : vector<8x34xf32>
    %194 = arith.addf %188, %193 : vector<8x34xf32>
    %195 = vector.broadcast %21 : vector<8x1xf32> to vector<8x34xf32>
    %196 = arith.addf %194, %195 : vector<8x34xf32>
    %cst_73 = arith.constant 0.000000e+00 : f32
    %197 = vector.broadcast %cst_73 : f32 to vector<8x34xf32>
    %198 = arith.cmpf oge, %196, %197 : vector<8x34xf32>
    %cst_74 = arith.constant 0.00999999977 : f32
    %199 = vector.broadcast %cst_74 : f32 to vector<8x34xf32>
    %200 = arith.mulf %199, %196 : vector<8x34xf32>
    %201 = arith.select %198, %196, %200 : vector<8x34xi1>, vector<8x34xf32>
    %202 = tpu.concatenate %30, %201, %30 in 1 : vector<8x1xf32>, vector<8x34xf32>, vector<8x1xf32> -> vector<8x36xf32>
    %203 = vector.extract_strided_slice %202 {offsets = [0, 0], sizes = [8, 32], strides = [1, 1]} : vector<8x36xf32> to vector<8x32xf32>
    %204 = vector.extract_strided_slice %202 {offsets = [0, 1], sizes = [8, 32], strides = [1, 1]} : vector<8x36xf32> to vector<8x32xf32>
    %205 = vector.extract_strided_slice %202 {offsets = [0, 2], sizes = [8, 32], strides = [1, 1]} : vector<8x36xf32> to vector<8x32xf32>
    %206 = vector.extract_strided_slice %202 {offsets = [0, 3], sizes = [8, 32], strides = [1, 1]} : vector<8x36xf32> to vector<8x32xf32>
    %207 = tpu.concatenate %203, %204, %205, %206 in 0 : vector<8x32xf32>, vector<8x32xf32>, vector<8x32xf32>, vector<8x32xf32> -> vector<32x32xf32>
    %208 = arith.truncf %207 : vector<32x32xf32> to vector<32x32xbf16>
    %c5_75 = arith.constant 5 : index
    %c0_76 = arith.constant 0 : index
    %c0_77 = arith.constant 0 : index
    %209 = vector.load %arg13[%c5_75, %c0_76, %c0_77] : memref<21x32x32xbf16, #tpu.memory_space<vmem>>, vector<1x32x32xbf16>
    %210 = vector.shape_cast %209 : vector<1x32x32xbf16> to vector<32x32xbf16>
    %211 = vector.shape_cast %208 : vector<32x32xbf16> to vector<1x32x32xbf16>
    tpu.vector_store %arg13[%c5_75, %c0_76, %c0_77], %211 {strides = array<i32>} : memref<21x32x32xbf16, #tpu.memory_space<vmem>>, vector<1x32x32xbf16>,
    %cst_78 = arith.constant 0.000000e+00 : f32
    %212 = vector.broadcast %cst_78 : f32 to vector<8x34xf32>
    %c0_79 = arith.constant 0 : index
    %c6_80 = arith.constant 6 : index
    %c0_81 = arith.constant 0 : index
    %213 = vector.load %arg1[%c0_79, %c6_80, %c0_81] : memref<1x35x35xf32, #tpu.memory_space<vmem>>, vector<1x1x35xf32>
    %214 = vector.shape_cast %213 : vector<1x1x35xf32> to vector<1x35xf32>
    %215 = vector.extract_strided_slice %20 {offsets = [0, 0], sizes = [8, 1], strides = [1, 1]} : vector<8x6xf32> to vector<8x1xf32>
    %216 = vector.extract_strided_slice %214 {offsets = [0, 0], sizes = [1, 34], strides = [1, 1]} : vector<1x35xf32> to vector<1x34xf32>
    %217 = vector.broadcast %215 : vector<8x1xf32> to vector<8x34xf32>
    %218 = vector.broadcast %216 : vector<1x34xf32> to vector<8x34xf32>
    %219 = arith.mulf %217, %218 : vector<8x34xf32>
    %220 = arith.addf %212, %219 : vector<8x34xf32>
    %221 = vector.extract_strided_slice %20 {offsets = [0, 1], sizes = [8, 1], strides = [1, 1]} : vector<8x6xf32> to vector<8x1xf32>
    %222 = vector.extract_strided_slice %214 {offsets = [0, 1], sizes = [1, 34], strides = [1, 1]} : vector<1x35xf32> to vector<1x34xf32>
    %223 = vector.broadcast %221 : vector<8x1xf32> to vector<8x34xf32>
    %224 = vector.broadcast %222 : vector<1x34xf32> to vector<8x34xf32>
    %225 = arith.mulf %223, %224 : vector<8x34xf32>
    %226 = arith.addf %220, %225 : vector<8x34xf32>
    %c0_82 = arith.constant 0 : index
    %c7 = arith.constant 7 : index
    %c0_83 = arith.constant 0 : index
    %227 = vector.load %arg1[%c0_82, %c7, %c0_83] : memref<1x35x35xf32, #tpu.memory_space<vmem>>, vector<1x1x35xf32>
    %228 = vector.shape_cast %227 : vector<1x1x35xf32> to vector<1x35xf32>
    %229 = vector.extract_strided_slice %20 {offsets = [0, 2], sizes = [8, 1], strides = [1, 1]} : vector<8x6xf32> to vector<8x1xf32>
    %230 = vector.extract_strided_slice %228 {offsets = [0, 0], sizes = [1, 34], strides = [1, 1]} : vector<1x35xf32> to vector<1x34xf32>
    %231 = vector.broadcast %229 : vector<8x1xf32> to vector<8x34xf32>
    %232 = vector.broadcast %230 : vector<1x34xf32> to vector<8x34xf32>
    %233 = arith.mulf %231, %232 : vector<8x34xf32>
    %234 = arith.addf %226, %233 : vector<8x34xf32>
    %235 = vector.extract_strided_slice %20 {offsets = [0, 3], sizes = [8, 1], strides = [1, 1]} : vector<8x6xf32> to vector<8x1xf32>
    %236 = vector.extract_strided_slice %228 {offsets = [0, 1], sizes = [1, 34], strides = [1, 1]} : vector<1x35xf32> to vector<1x34xf32>
    %237 = vector.broadcast %235 : vector<8x1xf32> to vector<8x34xf32>
    %238 = vector.broadcast %236 : vector<1x34xf32> to vector<8x34xf32>
    %239 = arith.mulf %237, %238 : vector<8x34xf32>
    %240 = arith.addf %234, %239 : vector<8x34xf32>
    %c0_84 = arith.constant 0 : index
    %c8 = arith.constant 8 : index
    %c0_85 = arith.constant 0 : index
    %241 = vector.load %arg1[%c0_84, %c8, %c0_85] : memref<1x35x35xf32, #tpu.memory_space<vmem>>, vector<1x1x35xf32>
    %242 = vector.shape_cast %241 : vector<1x1x35xf32> to vector<1x35xf32>
    %243 = vector.extract_strided_slice %20 {offsets = [0, 4], sizes = [8, 1], strides = [1, 1]} : vector<8x6xf32> to vector<8x1xf32>
    %244 = vector.extract_strided_slice %242 {offsets = [0, 0], sizes = [1, 34], strides = [1, 1]} : vector<1x35xf32> to vector<1x34xf32>
    %245 = vector.broadcast %243 : vector<8x1xf32> to vector<8x34xf32>
    %246 = vector.broadcast %244 : vector<1x34xf32> to vector<8x34xf32>
    %247 = arith.mulf %245, %246 : vector<8x34xf32>
    %248 = arith.addf %240, %247 : vector<8x34xf32>
    %249 = vector.extract_strided_slice %20 {offsets = [0, 5], sizes = [8, 1], strides = [1, 1]} : vector<8x6xf32> to vector<8x1xf32>
    %250 = vector.extract_strided_slice %242 {offsets = [0, 1], sizes = [1, 34], strides = [1, 1]} : vector<1x35xf32> to vector<1x34xf32>
    %251 = vector.broadcast %249 : vector<8x1xf32> to vector<8x34xf32>
    %252 = vector.broadcast %250 : vector<1x34xf32> to vector<8x34xf32>
    %253 = arith.mulf %251, %252 : vector<8x34xf32>
    %254 = arith.addf %248, %253 : vector<8x34xf32>
    %255 = vector.broadcast %21 : vector<8x1xf32> to vector<8x34xf32>
    %256 = arith.addf %254, %255 : vector<8x34xf32>
    %cst_86 = arith.constant 0.000000e+00 : f32
    %257 = vector.broadcast %cst_86 : f32 to vector<8x34xf32>
    %258 = arith.cmpf oge, %256, %257 : vector<8x34xf32>
    %cst_87 = arith.constant 0.00999999977 : f32
    %259 = vector.broadcast %cst_87 : f32 to vector<8x34xf32>
    %260 = arith.mulf %259, %256 : vector<8x34xf32>
    %261 = arith.select %258, %256, %260 : vector<8x34xi1>, vector<8x34xf32>
    %262 = tpu.concatenate %30, %261, %30 in 1 : vector<8x1xf32>, vector<8x34xf32>, vector<8x1xf32> -> vector<8x36xf32>
    %263 = vector.extract_strided_slice %262 {offsets = [0, 0], sizes = [8, 32], strides = [1, 1]} : vector<8x36xf32> to vector<8x32xf32>
    %264 = vector.extract_strided_slice %262 {offsets = [0, 1], sizes = [8, 32], strides = [1, 1]} : vector<8x36xf32> to vector<8x32xf32>
    %265 = vector.extract_strided_slice %262 {offsets = [0, 2], sizes = [8, 32], strides = [1, 1]} : vector<8x36xf32> to vector<8x32xf32>
    %266 = vector.extract_strided_slice %262 {offsets = [0, 3], sizes = [8, 32], strides = [1, 1]} : vector<8x36xf32> to vector<8x32xf32>
    %267 = tpu.concatenate %263, %264, %265, %266 in 0 : vector<8x32xf32>, vector<8x32xf32>, vector<8x32xf32>, vector<8x32xf32> -> vector<32x32xf32>
    %268 = arith.truncf %267 : vector<32x32xf32> to vector<32x32xbf16>
    %c6_88 = arith.constant 6 : index
    %c0_89 = arith.constant 0 : index
    %c0_90 = arith.constant 0 : index
    %269 = vector.load %arg13[%c6_88, %c0_89, %c0_90] : memref<21x32x32xbf16, #tpu.memory_space<vmem>>, vector<1x32x32xbf16>
    %270 = vector.shape_cast %269 : vector<1x32x32xbf16> to vector<32x32xbf16>
    %271 = vector.shape_cast %268 : vector<32x32xbf16> to vector<1x32x32xbf16>
    tpu.vector_store %arg13[%c6_88, %c0_89, %c0_90], %271 {strides = array<i32>} : memref<21x32x32xbf16, #tpu.memory_space<vmem>>, vector<1x32x32xbf16>,
    %cst_91 = arith.constant 0.000000e+00 : f32
    %272 = vector.broadcast %cst_91 : f32 to vector<8x34xf32>
    %c0_92 = arith.constant 0 : index
    %c8_93 = arith.constant 8 : index
    %c0_94 = arith.constant 0 : index
    %273 = vector.load %arg1[%c0_92, %c8_93, %c0_94] : memref<1x35x35xf32, #tpu.memory_space<vmem>>, vector<1x1x35xf32>
    %274 = vector.shape_cast %273 : vector<1x1x35xf32> to vector<1x35xf32>
    %275 = vector.extract_strided_slice %20 {offsets = [0, 0], sizes = [8, 1], strides = [1, 1]} : vector<8x6xf32> to vector<8x1xf32>
    %276 = vector.extract_strided_slice %274 {offsets = [0, 0], sizes = [1, 34], strides = [1, 1]} : vector<1x35xf32> to vector<1x34xf32>
    %277 = vector.broadcast %275 : vector<8x1xf32> to vector<8x34xf32>
    %278 = vector.broadcast %276 : vector<1x34xf32> to vector<8x34xf32>
    %279 = arith.mulf %277, %278 : vector<8x34xf32>
    %280 = arith.addf %272, %279 : vector<8x34xf32>
    %281 = vector.extract_strided_slice %20 {offsets = [0, 1], sizes = [8, 1], strides = [1, 1]} : vector<8x6xf32> to vector<8x1xf32>
    %282 = vector.extract_strided_slice %274 {offsets = [0, 1], sizes = [1, 34], strides = [1, 1]} : vector<1x35xf32> to vector<1x34xf32>
    %283 = vector.broadcast %281 : vector<8x1xf32> to vector<8x34xf32>
    %284 = vector.broadcast %282 : vector<1x34xf32> to vector<8x34xf32>
    %285 = arith.mulf %283, %284 : vector<8x34xf32>
    %286 = arith.addf %280, %285 : vector<8x34xf32>
    %c0_95 = arith.constant 0 : index
    %c9 = arith.constant 9 : index
    %c0_96 = arith.constant 0 : index
    %287 = vector.load %arg1[%c0_95, %c9, %c0_96] : memref<1x35x35xf32, #tpu.memory_space<vmem>>, vector<1x1x35xf32>
    %288 = vector.shape_cast %287 : vector<1x1x35xf32> to vector<1x35xf32>
    %289 = vector.extract_strided_slice %20 {offsets = [0, 2], sizes = [8, 1], strides = [1, 1]} : vector<8x6xf32> to vector<8x1xf32>
    %290 = vector.extract_strided_slice %288 {offsets = [0, 0], sizes = [1, 34], strides = [1, 1]} : vector<1x35xf32> to vector<1x34xf32>
    %291 = vector.broadcast %289 : vector<8x1xf32> to vector<8x34xf32>
    %292 = vector.broadcast %290 : vector<1x34xf32> to vector<8x34xf32>
    %293 = arith.mulf %291, %292 : vector<8x34xf32>
    %294 = arith.addf %286, %293 : vector<8x34xf32>
    %295 = vector.extract_strided_slice %20 {offsets = [0, 3], sizes = [8, 1], strides = [1, 1]} : vector<8x6xf32> to vector<8x1xf32>
    %296 = vector.extract_strided_slice %288 {offsets = [0, 1], sizes = [1, 34], strides = [1, 1]} : vector<1x35xf32> to vector<1x34xf32>
    %297 = vector.broadcast %295 : vector<8x1xf32> to vector<8x34xf32>
    %298 = vector.broadcast %296 : vector<1x34xf32> to vector<8x34xf32>
    %299 = arith.mulf %297, %298 : vector<8x34xf32>
    %300 = arith.addf %294, %299 : vector<8x34xf32>
    %c0_97 = arith.constant 0 : index
    %c10 = arith.constant 10 : index
    %c0_98 = arith.constant 0 : index
    %301 = vector.load %arg1[%c0_97, %c10, %c0_98] : memref<1x35x35xf32, #tpu.memory_space<vmem>>, vector<1x1x35xf32>
    %302 = vector.shape_cast %301 : vector<1x1x35xf32> to vector<1x35xf32>
    %303 = vector.extract_strided_slice %20 {offsets = [0, 4], sizes = [8, 1], strides = [1, 1]} : vector<8x6xf32> to vector<8x1xf32>
    %304 = vector.extract_strided_slice %302 {offsets = [0, 0], sizes = [1, 34], strides = [1, 1]} : vector<1x35xf32> to vector<1x34xf32>
    %305 = vector.broadcast %303 : vector<8x1xf32> to vector<8x34xf32>
    %306 = vector.broadcast %304 : vector<1x34xf32> to vector<8x34xf32>
    %307 = arith.mulf %305, %306 : vector<8x34xf32>
    %308 = arith.addf %300, %307 : vector<8x34xf32>
    %309 = vector.extract_strided_slice %20 {offsets = [0, 5], sizes = [8, 1], strides = [1, 1]} : vector<8x6xf32> to vector<8x1xf32>
    %310 = vector.extract_strided_slice %302 {offsets = [0, 1], sizes = [1, 34], strides = [1, 1]} : vector<1x35xf32> to vector<1x34xf32>
    %311 = vector.broadcast %309 : vector<8x1xf32> to vector<8x34xf32>
    %312 = vector.broadcast %310 : vector<1x34xf32> to vector<8x34xf32>
    %313 = arith.mulf %311, %312 : vector<8x34xf32>
    %314 = arith.addf %308, %313 : vector<8x34xf32>
    %315 = vector.broadcast %21 : vector<8x1xf32> to vector<8x34xf32>
    %316 = arith.addf %314, %315 : vector<8x34xf32>
    %cst_99 = arith.constant 0.000000e+00 : f32
    %317 = vector.broadcast %cst_99 : f32 to vector<8x34xf32>
    %318 = arith.cmpf oge, %316, %317 : vector<8x34xf32>
    %cst_100 = arith.constant 0.00999999977 : f32
    %319 = vector.broadcast %cst_100 : f32 to vector<8x34xf32>
    %320 = arith.mulf %319, %316 : vector<8x34xf32>
    %321 = arith.select %318, %316, %320 : vector<8x34xi1>, vector<8x34xf32>
    %322 = tpu.concatenate %30, %321, %30 in 1 : vector<8x1xf32>, vector<8x34xf32>, vector<8x1xf32> -> vector<8x36xf32>
    %323 = vector.extract_strided_slice %322 {offsets = [0, 0], sizes = [8, 32], strides = [1, 1]} : vector<8x36xf32> to vector<8x32xf32>
    %324 = vector.extract_strided_slice %322 {offsets = [0, 1], sizes = [8, 32], strides = [1, 1]} : vector<8x36xf32> to vector<8x32xf32>
    %325 = vector.extract_strided_slice %322 {offsets = [0, 2], sizes = [8, 32], strides = [1, 1]} : vector<8x36xf32> to vector<8x32xf32>
    %326 = vector.extract_strided_slice %322 {offsets = [0, 3], sizes = [8, 32], strides = [1, 1]} : vector<8x36xf32> to vector<8x32xf32>
    %327 = tpu.concatenate %323, %324, %325, %326 in 0 : vector<8x32xf32>, vector<8x32xf32>, vector<8x32xf32>, vector<8x32xf32> -> vector<32x32xf32>
    %328 = arith.truncf %327 : vector<32x32xf32> to vector<32x32xbf16>
    %c7_101 = arith.constant 7 : index
    %c0_102 = arith.constant 0 : index
    %c0_103 = arith.constant 0 : index
    %329 = vector.load %arg13[%c7_101, %c0_102, %c0_103] : memref<21x32x32xbf16, #tpu.memory_space<vmem>>, vector<1x32x32xbf16>
    %330 = vector.shape_cast %329 : vector<1x32x32xbf16> to vector<32x32xbf16>
    %331 = vector.shape_cast %328 : vector<32x32xbf16> to vector<1x32x32xbf16>
    tpu.vector_store %arg13[%c7_101, %c0_102, %c0_103], %331 {strides = array<i32>} : memref<21x32x32xbf16, #tpu.memory_space<vmem>>, vector<1x32x32xbf16>,
    %cst_104 = arith.constant 0.000000e+00 : f32
    %332 = vector.broadcast %cst_104 : f32 to vector<8x34xf32>
    %c0_105 = arith.constant 0 : index
    %c10_106 = arith.constant 10 : index
    %c0_107 = arith.constant 0 : index
    %333 = vector.load %arg1[%c0_105, %c10_106, %c0_107] : memref<1x35x35xf32, #tpu.memory_space<vmem>>, vector<1x1x35xf32>
    %334 = vector.shape_cast %333 : vector<1x1x35xf32> to vector<1x35xf32>
    %335 = vector.extract_strided_slice %20 {offsets = [0, 0], sizes = [8, 1], strides = [1, 1]} : vector<8x6xf32> to vector<8x1xf32>
    %336 = vector.extract_strided_slice %334 {offsets = [0, 0], sizes = [1, 34], strides = [1, 1]} : vector<1x35xf32> to vector<1x34xf32>
    %337 = vector.broadcast %335 : vector<8x1xf32> to vector<8x34xf32>
    %338 = vector.broadcast %336 : vector<1x34xf32> to vector<8x34xf32>
    %339 = arith.mulf %337, %338 : vector<8x34xf32>
    %340 = arith.addf %332, %339 : vector<8x34xf32>
    %341 = vector.extract_strided_slice %20 {offsets = [0, 1], sizes = [8, 1], strides = [1, 1]} : vector<8x6xf32> to vector<8x1xf32>
    %342 = vector.extract_strided_slice %334 {offsets = [0, 1], sizes = [1, 34], strides = [1, 1]} : vector<1x35xf32> to vector<1x34xf32>
    %343 = vector.broadcast %341 : vector<8x1xf32> to vector<8x34xf32>
    %344 = vector.broadcast %342 : vector<1x34xf32> to vector<8x34xf32>
    %345 = arith.mulf %343, %344 : vector<8x34xf32>
    %346 = arith.addf %340, %345 : vector<8x34xf32>
    %c0_108 = arith.constant 0 : index
    %c11 = arith.constant 11 : index
    %c0_109 = arith.constant 0 : index
    %347 = vector.load %arg1[%c0_108, %c11, %c0_109] : memref<1x35x35xf32, #tpu.memory_space<vmem>>, vector<1x1x35xf32>
    %348 = vector.shape_cast %347 : vector<1x1x35xf32> to vector<1x35xf32>
    %349 = vector.extract_strided_slice %20 {offsets = [0, 2], sizes = [8, 1], strides = [1, 1]} : vector<8x6xf32> to vector<8x1xf32>
    %350 = vector.extract_strided_slice %348 {offsets = [0, 0], sizes = [1, 34], strides = [1, 1]} : vector<1x35xf32> to vector<1x34xf32>
    %351 = vector.broadcast %349 : vector<8x1xf32> to vector<8x34xf32>
    %352 = vector.broadcast %350 : vector<1x34xf32> to vector<8x34xf32>
    %353 = arith.mulf %351, %352 : vector<8x34xf32>
    %354 = arith.addf %346, %353 : vector<8x34xf32>
    %355 = vector.extract_strided_slice %20 {offsets = [0, 3], sizes = [8, 1], strides = [1, 1]} : vector<8x6xf32> to vector<8x1xf32>
    %356 = vector.extract_strided_slice %348 {offsets = [0, 1], sizes = [1, 34], strides = [1, 1]} : vector<1x35xf32> to vector<1x34xf32>
    %357 = vector.broadcast %355 : vector<8x1xf32> to vector<8x34xf32>
    %358 = vector.broadcast %356 : vector<1x34xf32> to vector<8x34xf32>
    %359 = arith.mulf %357, %358 : vector<8x34xf32>
    %360 = arith.addf %354, %359 : vector<8x34xf32>
    %c0_110 = arith.constant 0 : index
    %c12 = arith.constant 12 : index
    %c0_111 = arith.constant 0 : index
    %361 = vector.load %arg1[%c0_110, %c12, %c0_111] : memref<1x35x35xf32, #tpu.memory_space<vmem>>, vector<1x1x35xf32>
    %362 = vector.shape_cast %361 : vector<1x1x35xf32> to vector<1x35xf32>
    %363 = vector.extract_strided_slice %20 {offsets = [0, 4], sizes = [8, 1], strides = [1, 1]} : vector<8x6xf32> to vector<8x1xf32>
    %364 = vector.extract_strided_slice %362 {offsets = [0, 0], sizes = [1, 34], strides = [1, 1]} : vector<1x35xf32> to vector<1x34xf32>
    %365 = vector.broadcast %363 : vector<8x1xf32> to vector<8x34xf32>
    %366 = vector.broadcast %364 : vector<1x34xf32> to vector<8x34xf32>
    %367 = arith.mulf %365, %366 : vector<8x34xf32>
    %368 = arith.addf %360, %367 : vector<8x34xf32>
    %369 = vector.extract_strided_slice %20 {offsets = [0, 5], sizes = [8, 1], strides = [1, 1]} : vector<8x6xf32> to vector<8x1xf32>
    %370 = vector.extract_strided_slice %362 {offsets = [0, 1], sizes = [1, 34], strides = [1, 1]} : vector<1x35xf32> to vector<1x34xf32>
    %371 = vector.broadcast %369 : vector<8x1xf32> to vector<8x34xf32>
    %372 = vector.broadcast %370 : vector<1x34xf32> to vector<8x34xf32>
    %373 = arith.mulf %371, %372 : vector<8x34xf32>
    %374 = arith.addf %368, %373 : vector<8x34xf32>
    %375 = vector.broadcast %21 : vector<8x1xf32> to vector<8x34xf32>
    %376 = arith.addf %374, %375 : vector<8x34xf32>
    %cst_112 = arith.constant 0.000000e+00 : f32
    %377 = vector.broadcast %cst_112 : f32 to vector<8x34xf32>
    %378 = arith.cmpf oge, %376, %377 : vector<8x34xf32>
    %cst_113 = arith.constant 0.00999999977 : f32
    %379 = vector.broadcast %cst_113 : f32 to vector<8x34xf32>
    %380 = arith.mulf %379, %376 : vector<8x34xf32>
    %381 = arith.select %378, %376, %380 : vector<8x34xi1>, vector<8x34xf32>
    %382 = tpu.concatenate %30, %381, %30 in 1 : vector<8x1xf32>, vector<8x34xf32>, vector<8x1xf32> -> vector<8x36xf32>
    %383 = vector.extract_strided_slice %382 {offsets = [0, 0], sizes = [8, 32], strides = [1, 1]} : vector<8x36xf32> to vector<8x32xf32>
    %384 = vector.extract_strided_slice %382 {offsets = [0, 1], sizes = [8, 32], strides = [1, 1]} : vector<8x36xf32> to vector<8x32xf32>
    %385 = vector.extract_strided_slice %382 {offsets = [0, 2], sizes = [8, 32], strides = [1, 1]} : vector<8x36xf32> to vector<8x32xf32>
    %386 = vector.extract_strided_slice %382 {offsets = [0, 3], sizes = [8, 32], strides = [1, 1]} : vector<8x36xf32> to vector<8x32xf32>
    %387 = tpu.concatenate %383, %384, %385, %386 in 0 : vector<8x32xf32>, vector<8x32xf32>, vector<8x32xf32>, vector<8x32xf32> -> vector<32x32xf32>
    %388 = arith.truncf %387 : vector<32x32xf32> to vector<32x32xbf16>
    %c8_114 = arith.constant 8 : index
    %c0_115 = arith.constant 0 : index
    %c0_116 = arith.constant 0 : index
    %389 = vector.load %arg13[%c8_114, %c0_115, %c0_116] : memref<21x32x32xbf16, #tpu.memory_space<vmem>>, vector<1x32x32xbf16>
    %390 = vector.shape_cast %389 : vector<1x32x32xbf16> to vector<32x32xbf16>
    %391 = vector.shape_cast %388 : vector<32x32xbf16> to vector<1x32x32xbf16>
    tpu.vector_store %arg13[%c8_114, %c0_115, %c0_116], %391 {strides = array<i32>} : memref<21x32x32xbf16, #tpu.memory_space<vmem>>, vector<1x32x32xbf16>,
    %cst_117 = arith.constant 0.000000e+00 : f32
    %392 = vector.broadcast %cst_117 : f32 to vector<8x34xf32>
    %c0_118 = arith.constant 0 : index
    %c12_119 = arith.constant 12 : index
    %c0_120 = arith.constant 0 : index
    %393 = vector.load %arg1[%c0_118, %c12_119, %c0_120] : memref<1x35x35xf32, #tpu.memory_space<vmem>>, vector<1x1x35xf32>
    %394 = vector.shape_cast %393 : vector<1x1x35xf32> to vector<1x35xf32>
    %395 = vector.extract_strided_slice %20 {offsets = [0, 0], sizes = [8, 1], strides = [1, 1]} : vector<8x6xf32> to vector<8x1xf32>
    %396 = vector.extract_strided_slice %394 {offsets = [0, 0], sizes = [1, 34], strides = [1, 1]} : vector<1x35xf32> to vector<1x34xf32>
    %397 = vector.broadcast %395 : vector<8x1xf32> to vector<8x34xf32>
    %398 = vector.broadcast %396 : vector<1x34xf32> to vector<8x34xf32>
    %399 = arith.mulf %397, %398 : vector<8x34xf32>
    %400 = arith.addf %392, %399 : vector<8x34xf32>
    %401 = vector.extract_strided_slice %20 {offsets = [0, 1], sizes = [8, 1], strides = [1, 1]} : vector<8x6xf32> to vector<8x1xf32>
    %402 = vector.extract_strided_slice %394 {offsets = [0, 1], sizes = [1, 34], strides = [1, 1]} : vector<1x35xf32> to vector<1x34xf32>
    %403 = vector.broadcast %401 : vector<8x1xf32> to vector<8x34xf32>
    %404 = vector.broadcast %402 : vector<1x34xf32> to vector<8x34xf32>
    %405 = arith.mulf %403, %404 : vector<8x34xf32>
    %406 = arith.addf %400, %405 : vector<8x34xf32>
    %c0_121 = arith.constant 0 : index
    %c13 = arith.constant 13 : index
    %c0_122 = arith.constant 0 : index
    %407 = vector.load %arg1[%c0_121, %c13, %c0_122] : memref<1x35x35xf32, #tpu.memory_space<vmem>>, vector<1x1x35xf32>
    %408 = vector.shape_cast %407 : vector<1x1x35xf32> to vector<1x35xf32>
    %409 = vector.extract_strided_slice %20 {offsets = [0, 2], sizes = [8, 1], strides = [1, 1]} : vector<8x6xf32> to vector<8x1xf32>
    %410 = vector.extract_strided_slice %408 {offsets = [0, 0], sizes = [1, 34], strides = [1, 1]} : vector<1x35xf32> to vector<1x34xf32>
    %411 = vector.broadcast %409 : vector<8x1xf32> to vector<8x34xf32>
    %412 = vector.broadcast %410 : vector<1x34xf32> to vector<8x34xf32>
    %413 = arith.mulf %411, %412 : vector<8x34xf32>
    %414 = arith.addf %406, %413 : vector<8x34xf32>
    %415 = vector.extract_strided_slice %20 {offsets = [0, 3], sizes = [8, 1], strides = [1, 1]} : vector<8x6xf32> to vector<8x1xf32>
    %416 = vector.extract_strided_slice %408 {offsets = [0, 1], sizes = [1, 34], strides = [1, 1]} : vector<1x35xf32> to vector<1x34xf32>
    %417 = vector.broadcast %415 : vector<8x1xf32> to vector<8x34xf32>
    %418 = vector.broadcast %416 : vector<1x34xf32> to vector<8x34xf32>
    %419 = arith.mulf %417, %418 : vector<8x34xf32>
    %420 = arith.addf %414, %419 : vector<8x34xf32>
    %c0_123 = arith.constant 0 : index
    %c14 = arith.constant 14 : index
    %c0_124 = arith.constant 0 : index
    %421 = vector.load %arg1[%c0_123, %c14, %c0_124] : memref<1x35x35xf32, #tpu.memory_space<vmem>>, vector<1x1x35xf32>
    %422 = vector.shape_cast %421 : vector<1x1x35xf32> to vector<1x35xf32>
    %423 = vector.extract_strided_slice %20 {offsets = [0, 4], sizes = [8, 1], strides = [1, 1]} : vector<8x6xf32> to vector<8x1xf32>
    %424 = vector.extract_strided_slice %422 {offsets = [0, 0], sizes = [1, 34], strides = [1, 1]} : vector<1x35xf32> to vector<1x34xf32>
    %425 = vector.broadcast %423 : vector<8x1xf32> to vector<8x34xf32>
    %426 = vector.broadcast %424 : vector<1x34xf32> to vector<8x34xf32>
    %427 = arith.mulf %425, %426 : vector<8x34xf32>
    %428 = arith.addf %420, %427 : vector<8x34xf32>
    %429 = vector.extract_strided_slice %20 {offsets = [0, 5], sizes = [8, 1], strides = [1, 1]} : vector<8x6xf32> to vector<8x1xf32>
    %430 = vector.extract_strided_slice %422 {offsets = [0, 1], sizes = [1, 34], strides = [1, 1]} : vector<1x35xf32> to vector<1x34xf32>
    %431 = vector.broadcast %429 : vector<8x1xf32> to vector<8x34xf32>
    %432 = vector.broadcast %430 : vector<1x34xf32> to vector<8x34xf32>
    %433 = arith.mulf %431, %432 : vector<8x34xf32>
    %434 = arith.addf %428, %433 : vector<8x34xf32>
    %435 = vector.broadcast %21 : vector<8x1xf32> to vector<8x34xf32>
    %436 = arith.addf %434, %435 : vector<8x34xf32>
    %cst_125 = arith.constant 0.000000e+00 : f32
    %437 = vector.broadcast %cst_125 : f32 to vector<8x34xf32>
    %438 = arith.cmpf oge, %436, %437 : vector<8x34xf32>
    %cst_126 = arith.constant 0.00999999977 : f32
    %439 = vector.broadcast %cst_126 : f32 to vector<8x34xf32>
    %440 = arith.mulf %439, %436 : vector<8x34xf32>
    %441 = arith.select %438, %436, %440 : vector<8x34xi1>, vector<8x34xf32>
    %442 = tpu.concatenate %30, %441, %30 in 1 : vector<8x1xf32>, vector<8x34xf32>, vector<8x1xf32> -> vector<8x36xf32>
    %443 = vector.extract_strided_slice %442 {offsets = [0, 0], sizes = [8, 32], strides = [1, 1]} : vector<8x36xf32> to vector<8x32xf32>
    %444 = vector.extract_strided_slice %442 {offsets = [0, 1], sizes = [8, 32], strides = [1, 1]} : vector<8x36xf32> to vector<8x32xf32>
    %445 = vector.extract_strided_slice %442 {offsets = [0, 2], sizes = [8, 32], strides = [1, 1]} : vector<8x36xf32> to vector<8x32xf32>
    %446 = vector.extract_strided_slice %442 {offsets = [0, 3], sizes = [8, 32], strides = [1, 1]} : vector<8x36xf32> to vector<8x32xf32>
    %447 = tpu.concatenate %443, %444, %445, %446 in 0 : vector<8x32xf32>, vector<8x32xf32>, vector<8x32xf32>, vector<8x32xf32> -> vector<32x32xf32>
    %448 = arith.truncf %447 : vector<32x32xf32> to vector<32x32xbf16>
    %c9_127 = arith.constant 9 : index
    %c0_128 = arith.constant 0 : index
    %c0_129 = arith.constant 0 : index
    %449 = vector.load %arg13[%c9_127, %c0_128, %c0_129] : memref<21x32x32xbf16, #tpu.memory_space<vmem>>, vector<1x32x32xbf16>
    %450 = vector.shape_cast %449 : vector<1x32x32xbf16> to vector<32x32xbf16>
    %451 = vector.shape_cast %448 : vector<32x32xbf16> to vector<1x32x32xbf16>
    tpu.vector_store %arg13[%c9_127, %c0_128, %c0_129], %451 {strides = array<i32>} : memref<21x32x32xbf16, #tpu.memory_space<vmem>>, vector<1x32x32xbf16>,
    %cst_130 = arith.constant 0.000000e+00 : f32
    %452 = vector.broadcast %cst_130 : f32 to vector<8x34xf32>
    %c0_131 = arith.constant 0 : index
    %c14_132 = arith.constant 14 : index
    %c0_133 = arith.constant 0 : index
    %453 = vector.load %arg1[%c0_131, %c14_132, %c0_133] : memref<1x35x35xf32, #tpu.memory_space<vmem>>, vector<1x1x35xf32>
    %454 = vector.shape_cast %453 : vector<1x1x35xf32> to vector<1x35xf32>
    %455 = vector.extract_strided_slice %20 {offsets = [0, 0], sizes = [8, 1], strides = [1, 1]} : vector<8x6xf32> to vector<8x1xf32>
    %456 = vector.extract_strided_slice %454 {offsets = [0, 0], sizes = [1, 34], strides = [1, 1]} : vector<1x35xf32> to vector<1x34xf32>
    %457 = vector.broadcast %455 : vector<8x1xf32> to vector<8x34xf32>
    %458 = vector.broadcast %456 : vector<1x34xf32> to vector<8x34xf32>
    %459 = arith.mulf %457, %458 : vector<8x34xf32>
    %460 = arith.addf %452, %459 : vector<8x34xf32>
    %461 = vector.extract_strided_slice %20 {offsets = [0, 1], sizes = [8, 1], strides = [1, 1]} : vector<8x6xf32> to vector<8x1xf32>
    %462 = vector.extract_strided_slice %454 {offsets = [0, 1], sizes = [1, 34], strides = [1, 1]} : vector<1x35xf32> to vector<1x34xf32>
    %463 = vector.broadcast %461 : vector<8x1xf32> to vector<8x34xf32>
    %464 = vector.broadcast %462 : vector<1x34xf32> to vector<8x34xf32>
    %465 = arith.mulf %463, %464 : vector<8x34xf32>
    %466 = arith.addf %460, %465 : vector<8x34xf32>
    %c0_134 = arith.constant 0 : index
    %c15 = arith.constant 15 : index
    %c0_135 = arith.constant 0 : index
    %467 = vector.load %arg1[%c0_134, %c15, %c0_135] : memref<1x35x35xf32, #tpu.memory_space<vmem>>, vector<1x1x35xf32>
    %468 = vector.shape_cast %467 : vector<1x1x35xf32> to vector<1x35xf32>
    %469 = vector.extract_strided_slice %20 {offsets = [0, 2], sizes = [8, 1], strides = [1, 1]} : vector<8x6xf32> to vector<8x1xf32>
    %470 = vector.extract_strided_slice %468 {offsets = [0, 0], sizes = [1, 34], strides = [1, 1]} : vector<1x35xf32> to vector<1x34xf32>
    %471 = vector.broadcast %469 : vector<8x1xf32> to vector<8x34xf32>
    %472 = vector.broadcast %470 : vector<1x34xf32> to vector<8x34xf32>
    %473 = arith.mulf %471, %472 : vector<8x34xf32>
    %474 = arith.addf %466, %473 : vector<8x34xf32>
    %475 = vector.extract_strided_slice %20 {offsets = [0, 3], sizes = [8, 1], strides = [1, 1]} : vector<8x6xf32> to vector<8x1xf32>
    %476 = vector.extract_strided_slice %468 {offsets = [0, 1], sizes = [1, 34], strides = [1, 1]} : vector<1x35xf32> to vector<1x34xf32>
    %477 = vector.broadcast %475 : vector<8x1xf32> to vector<8x34xf32>
    %478 = vector.broadcast %476 : vector<1x34xf32> to vector<8x34xf32>
    %479 = arith.mulf %477, %478 : vector<8x34xf32>
    %480 = arith.addf %474, %479 : vector<8x34xf32>
    %c0_136 = arith.constant 0 : index
    %c16 = arith.constant 16 : index
    %c0_137 = arith.constant 0 : index
    %481 = vector.load %arg1[%c0_136, %c16, %c0_137] : memref<1x35x35xf32, #tpu.memory_space<vmem>>, vector<1x1x35xf32>
    %482 = vector.shape_cast %481 : vector<1x1x35xf32> to vector<1x35xf32>
    %483 = vector.extract_strided_slice %20 {offsets = [0, 4], sizes = [8, 1], strides = [1, 1]} : vector<8x6xf32> to vector<8x1xf32>
    %484 = vector.extract_strided_slice %482 {offsets = [0, 0], sizes = [1, 34], strides = [1, 1]} : vector<1x35xf32> to vector<1x34xf32>
    %485 = vector.broadcast %483 : vector<8x1xf32> to vector<8x34xf32>
    %486 = vector.broadcast %484 : vector<1x34xf32> to vector<8x34xf32>
    %487 = arith.mulf %485, %486 : vector<8x34xf32>
    %488 = arith.addf %480, %487 : vector<8x34xf32>
    %489 = vector.extract_strided_slice %20 {offsets = [0, 5], sizes = [8, 1], strides = [1, 1]} : vector<8x6xf32> to vector<8x1xf32>
    %490 = vector.extract_strided_slice %482 {offsets = [0, 1], sizes = [1, 34], strides = [1, 1]} : vector<1x35xf32> to vector<1x34xf32>
    %491 = vector.broadcast %489 : vector<8x1xf32> to vector<8x34xf32>
    %492 = vector.broadcast %490 : vector<1x34xf32> to vector<8x34xf32>
    %493 = arith.mulf %491, %492 : vector<8x34xf32>
    %494 = arith.addf %488, %493 : vector<8x34xf32>
    %495 = vector.broadcast %21 : vector<8x1xf32> to vector<8x34xf32>
    %496 = arith.addf %494, %495 : vector<8x34xf32>
    %cst_138 = arith.constant 0.000000e+00 : f32
    %497 = vector.broadcast %cst_138 : f32 to vector<8x34xf32>
    %498 = arith.cmpf oge, %496, %497 : vector<8x34xf32>
    %cst_139 = arith.constant 0.00999999977 : f32
    %499 = vector.broadcast %cst_139 : f32 to vector<8x34xf32>
    %500 = arith.mulf %499, %496 : vector<8x34xf32>
    %501 = arith.select %498, %496, %500 : vector<8x34xi1>, vector<8x34xf32>
    %502 = tpu.concatenate %30, %501, %30 in 1 : vector<8x1xf32>, vector<8x34xf32>, vector<8x1xf32> -> vector<8x36xf32>
    %503 = vector.extract_strided_slice %502 {offsets = [0, 0], sizes = [8, 32], strides = [1, 1]} : vector<8x36xf32> to vector<8x32xf32>
    %504 = vector.extract_strided_slice %502 {offsets = [0, 1], sizes = [8, 32], strides = [1, 1]} : vector<8x36xf32> to vector<8x32xf32>
    %505 = vector.extract_strided_slice %502 {offsets = [0, 2], sizes = [8, 32], strides = [1, 1]} : vector<8x36xf32> to vector<8x32xf32>
    %506 = vector.extract_strided_slice %502 {offsets = [0, 3], sizes = [8, 32], strides = [1, 1]} : vector<8x36xf32> to vector<8x32xf32>
    %507 = tpu.concatenate %503, %504, %505, %506 in 0 : vector<8x32xf32>, vector<8x32xf32>, vector<8x32xf32>, vector<8x32xf32> -> vector<32x32xf32>
    %508 = arith.truncf %507 : vector<32x32xf32> to vector<32x32xbf16>
    %c10_140 = arith.constant 10 : index
    %c0_141 = arith.constant 0 : index
    %c0_142 = arith.constant 0 : index
    %509 = vector.load %arg13[%c10_140, %c0_141, %c0_142] : memref<21x32x32xbf16, #tpu.memory_space<vmem>>, vector<1x32x32xbf16>
    %510 = vector.shape_cast %509 : vector<1x32x32xbf16> to vector<32x32xbf16>
    %511 = vector.shape_cast %508 : vector<32x32xbf16> to vector<1x32x32xbf16>
    tpu.vector_store %arg13[%c10_140, %c0_141, %c0_142], %511 {strides = array<i32>} : memref<21x32x32xbf16, #tpu.memory_space<vmem>>, vector<1x32x32xbf16>,
    %cst_143 = arith.constant 0.000000e+00 : f32
    %512 = vector.broadcast %cst_143 : f32 to vector<8x34xf32>
    %c0_144 = arith.constant 0 : index
    %c16_145 = arith.constant 16 : index
    %c0_146 = arith.constant 0 : index
    %513 = vector.load %arg1[%c0_144, %c16_145, %c0_146] : memref<1x35x35xf32, #tpu.memory_space<vmem>>, vector<1x1x35xf32>
    %514 = vector.shape_cast %513 : vector<1x1x35xf32> to vector<1x35xf32>
    %515 = vector.extract_strided_slice %20 {offsets = [0, 0], sizes = [8, 1], strides = [1, 1]} : vector<8x6xf32> to vector<8x1xf32>
    %516 = vector.extract_strided_slice %514 {offsets = [0, 0], sizes = [1, 34], strides = [1, 1]} : vector<1x35xf32> to vector<1x34xf32>
    %517 = vector.broadcast %515 : vector<8x1xf32> to vector<8x34xf32>
    %518 = vector.broadcast %516 : vector<1x34xf32> to vector<8x34xf32>
    %519 = arith.mulf %517, %518 : vector<8x34xf32>
    %520 = arith.addf %512, %519 : vector<8x34xf32>
    %521 = vector.extract_strided_slice %20 {offsets = [0, 1], sizes = [8, 1], strides = [1, 1]} : vector<8x6xf32> to vector<8x1xf32>
    %522 = vector.extract_strided_slice %514 {offsets = [0, 1], sizes = [1, 34], strides = [1, 1]} : vector<1x35xf32> to vector<1x34xf32>
    %523 = vector.broadcast %521 : vector<8x1xf32> to vector<8x34xf32>
    %524 = vector.broadcast %522 : vector<1x34xf32> to vector<8x34xf32>
    %525 = arith.mulf %523, %524 : vector<8x34xf32>
    %526 = arith.addf %520, %525 : vector<8x34xf32>
    %c0_147 = arith.constant 0 : index
    %c17 = arith.constant 17 : index
    %c0_148 = arith.constant 0 : index
    %527 = vector.load %arg1[%c0_147, %c17, %c0_148] : memref<1x35x35xf32, #tpu.memory_space<vmem>>, vector<1x1x35xf32>
    %528 = vector.shape_cast %527 : vector<1x1x35xf32> to vector<1x35xf32>
    %529 = vector.extract_strided_slice %20 {offsets = [0, 2], sizes = [8, 1], strides = [1, 1]} : vector<8x6xf32> to vector<8x1xf32>
    %530 = vector.extract_strided_slice %528 {offsets = [0, 0], sizes = [1, 34], strides = [1, 1]} : vector<1x35xf32> to vector<1x34xf32>
    %531 = vector.broadcast %529 : vector<8x1xf32> to vector<8x34xf32>
    %532 = vector.broadcast %530 : vector<1x34xf32> to vector<8x34xf32>
    %533 = arith.mulf %531, %532 : vector<8x34xf32>
    %534 = arith.addf %526, %533 : vector<8x34xf32>
    %535 = vector.extract_strided_slice %20 {offsets = [0, 3], sizes = [8, 1], strides = [1, 1]} : vector<8x6xf32> to vector<8x1xf32>
    %536 = vector.extract_strided_slice %528 {offsets = [0, 1], sizes = [1, 34], strides = [1, 1]} : vector<1x35xf32> to vector<1x34xf32>
    %537 = vector.broadcast %535 : vector<8x1xf32> to vector<8x34xf32>
    %538 = vector.broadcast %536 : vector<1x34xf32> to vector<8x34xf32>
    %539 = arith.mulf %537, %538 : vector<8x34xf32>
    %540 = arith.addf %534, %539 : vector<8x34xf32>
    %c0_149 = arith.constant 0 : index
    %c18 = arith.constant 18 : index
    %c0_150 = arith.constant 0 : index
    %541 = vector.load %arg1[%c0_149, %c18, %c0_150] : memref<1x35x35xf32, #tpu.memory_space<vmem>>, vector<1x1x35xf32>
    %542 = vector.shape_cast %541 : vector<1x1x35xf32> to vector<1x35xf32>
    %543 = vector.extract_strided_slice %20 {offsets = [0, 4], sizes = [8, 1], strides = [1, 1]} : vector<8x6xf32> to vector<8x1xf32>
    %544 = vector.extract_strided_slice %542 {offsets = [0, 0], sizes = [1, 34], strides = [1, 1]} : vector<1x35xf32> to vector<1x34xf32>
    %545 = vector.broadcast %543 : vector<8x1xf32> to vector<8x34xf32>
    %546 = vector.broadcast %544 : vector<1x34xf32> to vector<8x34xf32>
    %547 = arith.mulf %545, %546 : vector<8x34xf32>
    %548 = arith.addf %540, %547 : vector<8x34xf32>
    %549 = vector.extract_strided_slice %20 {offsets = [0, 5], sizes = [8, 1], strides = [1, 1]} : vector<8x6xf32> to vector<8x1xf32>
    %550 = vector.extract_strided_slice %542 {offsets = [0, 1], sizes = [1, 34], strides = [1, 1]} : vector<1x35xf32> to vector<1x34xf32>
    %551 = vector.broadcast %549 : vector<8x1xf32> to vector<8x34xf32>
    %552 = vector.broadcast %550 : vector<1x34xf32> to vector<8x34xf32>
    %553 = arith.mulf %551, %552 : vector<8x34xf32>
    %554 = arith.addf %548, %553 : vector<8x34xf32>
    %555 = vector.broadcast %21 : vector<8x1xf32> to vector<8x34xf32>
    %556 = arith.addf %554, %555 : vector<8x34xf32>
    %cst_151 = arith.constant 0.000000e+00 : f32
    %557 = vector.broadcast %cst_151 : f32 to vector<8x34xf32>
    %558 = arith.cmpf oge, %556, %557 : vector<8x34xf32>
    %cst_152 = arith.constant 0.00999999977 : f32
    %559 = vector.broadcast %cst_152 : f32 to vector<8x34xf32>
    %560 = arith.mulf %559, %556 : vector<8x34xf32>
    %561 = arith.select %558, %556, %560 : vector<8x34xi1>, vector<8x34xf32>
    %562 = tpu.concatenate %30, %561, %30 in 1 : vector<8x1xf32>, vector<8x34xf32>, vector<8x1xf32> -> vector<8x36xf32>
    %563 = vector.extract_strided_slice %562 {offsets = [0, 0], sizes = [8, 32], strides = [1, 1]} : vector<8x36xf32> to vector<8x32xf32>
    %564 = vector.extract_strided_slice %562 {offsets = [0, 1], sizes = [8, 32], strides = [1, 1]} : vector<8x36xf32> to vector<8x32xf32>
    %565 = vector.extract_strided_slice %562 {offsets = [0, 2], sizes = [8, 32], strides = [1, 1]} : vector<8x36xf32> to vector<8x32xf32>
    %566 = vector.extract_strided_slice %562 {offsets = [0, 3], sizes = [8, 32], strides = [1, 1]} : vector<8x36xf32> to vector<8x32xf32>
    %567 = tpu.concatenate %563, %564, %565, %566 in 0 : vector<8x32xf32>, vector<8x32xf32>, vector<8x32xf32>, vector<8x32xf32> -> vector<32x32xf32>
    %568 = arith.truncf %567 : vector<32x32xf32> to vector<32x32xbf16>
    %c11_153 = arith.constant 11 : index
    %c0_154 = arith.constant 0 : index
    %c0_155 = arith.constant 0 : index
    %569 = vector.load %arg13[%c11_153, %c0_154, %c0_155] : memref<21x32x32xbf16, #tpu.memory_space<vmem>>, vector<1x32x32xbf16>
    %570 = vector.shape_cast %569 : vector<1x32x32xbf16> to vector<32x32xbf16>
    %571 = vector.shape_cast %568 : vector<32x32xbf16> to vector<1x32x32xbf16>
    tpu.vector_store %arg13[%c11_153, %c0_154, %c0_155], %571 {strides = array<i32>} : memref<21x32x32xbf16, #tpu.memory_space<vmem>>, vector<1x32x32xbf16>,
    %cst_156 = arith.constant 0.000000e+00 : f32
    %572 = vector.broadcast %cst_156 : f32 to vector<8x34xf32>
    %c0_157 = arith.constant 0 : index
    %c18_158 = arith.constant 18 : index
    %c0_159 = arith.constant 0 : index
    %573 = vector.load %arg1[%c0_157, %c18_158, %c0_159] : memref<1x35x35xf32, #tpu.memory_space<vmem>>, vector<1x1x35xf32>
    %574 = vector.shape_cast %573 : vector<1x1x35xf32> to vector<1x35xf32>
    %575 = vector.extract_strided_slice %20 {offsets = [0, 0], sizes = [8, 1], strides = [1, 1]} : vector<8x6xf32> to vector<8x1xf32>
    %576 = vector.extract_strided_slice %574 {offsets = [0, 0], sizes = [1, 34], strides = [1, 1]} : vector<1x35xf32> to vector<1x34xf32>
    %577 = vector.broadcast %575 : vector<8x1xf32> to vector<8x34xf32>
    %578 = vector.broadcast %576 : vector<1x34xf32> to vector<8x34xf32>
    %579 = arith.mulf %577, %578 : vector<8x34xf32>
    %580 = arith.addf %572, %579 : vector<8x34xf32>
    %581 = vector.extract_strided_slice %20 {offsets = [0, 1], sizes = [8, 1], strides = [1, 1]} : vector<8x6xf32> to vector<8x1xf32>
    %582 = vector.extract_strided_slice %574 {offsets = [0, 1], sizes = [1, 34], strides = [1, 1]} : vector<1x35xf32> to vector<1x34xf32>
    %583 = vector.broadcast %581 : vector<8x1xf32> to vector<8x34xf32>
    %584 = vector.broadcast %582 : vector<1x34xf32> to vector<8x34xf32>
    %585 = arith.mulf %583, %584 : vector<8x34xf32>
    %586 = arith.addf %580, %585 : vector<8x34xf32>
    %c0_160 = arith.constant 0 : index
    %c19 = arith.constant 19 : index
    %c0_161 = arith.constant 0 : index
    %587 = vector.load %arg1[%c0_160, %c19, %c0_161] : memref<1x35x35xf32, #tpu.memory_space<vmem>>, vector<1x1x35xf32>
    %588 = vector.shape_cast %587 : vector<1x1x35xf32> to vector<1x35xf32>
    %589 = vector.extract_strided_slice %20 {offsets = [0, 2], sizes = [8, 1], strides = [1, 1]} : vector<8x6xf32> to vector<8x1xf32>
    %590 = vector.extract_strided_slice %588 {offsets = [0, 0], sizes = [1, 34], strides = [1, 1]} : vector<1x35xf32> to vector<1x34xf32>
    %591 = vector.broadcast %589 : vector<8x1xf32> to vector<8x34xf32>
    %592 = vector.broadcast %590 : vector<1x34xf32> to vector<8x34xf32>
    %593 = arith.mulf %591, %592 : vector<8x34xf32>
    %594 = arith.addf %586, %593 : vector<8x34xf32>
    %595 = vector.extract_strided_slice %20 {offsets = [0, 3], sizes = [8, 1], strides = [1, 1]} : vector<8x6xf32> to vector<8x1xf32>
    %596 = vector.extract_strided_slice %588 {offsets = [0, 1], sizes = [1, 34], strides = [1, 1]} : vector<1x35xf32> to vector<1x34xf32>
    %597 = vector.broadcast %595 : vector<8x1xf32> to vector<8x34xf32>
    %598 = vector.broadcast %596 : vector<1x34xf32> to vector<8x34xf32>
    %599 = arith.mulf %597, %598 : vector<8x34xf32>
    %600 = arith.addf %594, %599 : vector<8x34xf32>
    %c0_162 = arith.constant 0 : index
    %c20_163 = arith.constant 20 : index
    %c0_164 = arith.constant 0 : index
    %601 = vector.load %arg1[%c0_162, %c20_163, %c0_164] : memref<1x35x35xf32, #tpu.memory_space<vmem>>, vector<1x1x35xf32>
    %602 = vector.shape_cast %601 : vector<1x1x35xf32> to vector<1x35xf32>
    %603 = vector.extract_strided_slice %20 {offsets = [0, 4], sizes = [8, 1], strides = [1, 1]} : vector<8x6xf32> to vector<8x1xf32>
    %604 = vector.extract_strided_slice %602 {offsets = [0, 0], sizes = [1, 34], strides = [1, 1]} : vector<1x35xf32> to vector<1x34xf32>
    %605 = vector.broadcast %603 : vector<8x1xf32> to vector<8x34xf32>
    %606 = vector.broadcast %604 : vector<1x34xf32> to vector<8x34xf32>
    %607 = arith.mulf %605, %606 : vector<8x34xf32>
    %608 = arith.addf %600, %607 : vector<8x34xf32>
    %609 = vector.extract_strided_slice %20 {offsets = [0, 5], sizes = [8, 1], strides = [1, 1]} : vector<8x6xf32> to vector<8x1xf32>
    %610 = vector.extract_strided_slice %602 {offsets = [0, 1], sizes = [1, 34], strides = [1, 1]} : vector<1x35xf32> to vector<1x34xf32>
    %611 = vector.broadcast %609 : vector<8x1xf32> to vector<8x34xf32>
    %612 = vector.broadcast %610 : vector<1x34xf32> to vector<8x34xf32>
    %613 = arith.mulf %611, %612 : vector<8x34xf32>
    %614 = arith.addf %608, %613 : vector<8x34xf32>
    %615 = vector.broadcast %21 : vector<8x1xf32> to vector<8x34xf32>
    %616 = arith.addf %614, %615 : vector<8x34xf32>
    %cst_165 = arith.constant 0.000000e+00 : f32
    %617 = vector.broadcast %cst_165 : f32 to vector<8x34xf32>
    %618 = arith.cmpf oge, %616, %617 : vector<8x34xf32>
    %cst_166 = arith.constant 0.00999999977 : f32
    %619 = vector.broadcast %cst_166 : f32 to vector<8x34xf32>
    %620 = arith.mulf %619, %616 : vector<8x34xf32>
    %621 = arith.select %618, %616, %620 : vector<8x34xi1>, vector<8x34xf32>
    %622 = tpu.concatenate %30, %621, %30 in 1 : vector<8x1xf32>, vector<8x34xf32>, vector<8x1xf32> -> vector<8x36xf32>
    %623 = vector.extract_strided_slice %622 {offsets = [0, 0], sizes = [8, 32], strides = [1, 1]} : vector<8x36xf32> to vector<8x32xf32>
    %624 = vector.extract_strided_slice %622 {offsets = [0, 1], sizes = [8, 32], strides = [1, 1]} : vector<8x36xf32> to vector<8x32xf32>
    %625 = vector.extract_strided_slice %622 {offsets = [0, 2], sizes = [8, 32], strides = [1, 1]} : vector<8x36xf32> to vector<8x32xf32>
    %626 = vector.extract_strided_slice %622 {offsets = [0, 3], sizes = [8, 32], strides = [1, 1]} : vector<8x36xf32> to vector<8x32xf32>
    %627 = tpu.concatenate %623, %624, %625, %626 in 0 : vector<8x32xf32>, vector<8x32xf32>, vector<8x32xf32>, vector<8x32xf32> -> vector<32x32xf32>
    %628 = arith.truncf %627 : vector<32x32xf32> to vector<32x32xbf16>
    %c12_167 = arith.constant 12 : index
    %c0_168 = arith.constant 0 : index
    %c0_169 = arith.constant 0 : index
    %629 = vector.load %arg13[%c12_167, %c0_168, %c0_169] : memref<21x32x32xbf16, #tpu.memory_space<vmem>>, vector<1x32x32xbf16>
    %630 = vector.shape_cast %629 : vector<1x32x32xbf16> to vector<32x32xbf16>
    %631 = vector.shape_cast %628 : vector<32x32xbf16> to vector<1x32x32xbf16>
    tpu.vector_store %arg13[%c12_167, %c0_168, %c0_169], %631 {strides = array<i32>} : memref<21x32x32xbf16, #tpu.memory_space<vmem>>, vector<1x32x32xbf16>,
    %cst_170 = arith.constant 0.000000e+00 : f32
    %632 = vector.broadcast %cst_170 : f32 to vector<8x34xf32>
    %c0_171 = arith.constant 0 : index
    %c20_172 = arith.constant 20 : index
    %c0_173 = arith.constant 0 : index
    %633 = vector.load %arg1[%c0_171, %c20_172, %c0_173] : memref<1x35x35xf32, #tpu.memory_space<vmem>>, vector<1x1x35xf32>
    %634 = vector.shape_cast %633 : vector<1x1x35xf32> to vector<1x35xf32>
    %635 = vector.extract_strided_slice %20 {offsets = [0, 0], sizes = [8, 1], strides = [1, 1]} : vector<8x6xf32> to vector<8x1xf32>
    %636 = vector.extract_strided_slice %634 {offsets = [0, 0], sizes = [1, 34], strides = [1, 1]} : vector<1x35xf32> to vector<1x34xf32>
    %637 = vector.broadcast %635 : vector<8x1xf32> to vector<8x34xf32>
    %638 = vector.broadcast %636 : vector<1x34xf32> to vector<8x34xf32>
    %639 = arith.mulf %637, %638 : vector<8x34xf32>
    %640 = arith.addf %632, %639 : vector<8x34xf32>
    %641 = vector.extract_strided_slice %20 {offsets = [0, 1], sizes = [8, 1], strides = [1, 1]} : vector<8x6xf32> to vector<8x1xf32>
    %642 = vector.extract_strided_slice %634 {offsets = [0, 1], sizes = [1, 34], strides = [1, 1]} : vector<1x35xf32> to vector<1x34xf32>
    %643 = vector.broadcast %641 : vector<8x1xf32> to vector<8x34xf32>
    %644 = vector.broadcast %642 : vector<1x34xf32> to vector<8x34xf32>
    %645 = arith.mulf %643, %644 : vector<8x34xf32>
    %646 = arith.addf %640, %645 : vector<8x34xf32>
    %c0_174 = arith.constant 0 : index
    %c21 = arith.constant 21 : index
    %c0_175 = arith.constant 0 : index
    %647 = vector.load %arg1[%c0_174, %c21, %c0_175] : memref<1x35x35xf32, #tpu.memory_space<vmem>>, vector<1x1x35xf32>
    %648 = vector.shape_cast %647 : vector<1x1x35xf32> to vector<1x35xf32>
    %649 = vector.extract_strided_slice %20 {offsets = [0, 2], sizes = [8, 1], strides = [1, 1]} : vector<8x6xf32> to vector<8x1xf32>
    %650 = vector.extract_strided_slice %648 {offsets = [0, 0], sizes = [1, 34], strides = [1, 1]} : vector<1x35xf32> to vector<1x34xf32>
    %651 = vector.broadcast %649 : vector<8x1xf32> to vector<8x34xf32>
    %652 = vector.broadcast %650 : vector<1x34xf32> to vector<8x34xf32>
    %653 = arith.mulf %651, %652 : vector<8x34xf32>
    %654 = arith.addf %646, %653 : vector<8x34xf32>
    %655 = vector.extract_strided_slice %20 {offsets = [0, 3], sizes = [8, 1], strides = [1, 1]} : vector<8x6xf32> to vector<8x1xf32>
    %656 = vector.extract_strided_slice %648 {offsets = [0, 1], sizes = [1, 34], strides = [1, 1]} : vector<1x35xf32> to vector<1x34xf32>
    %657 = vector.broadcast %655 : vector<8x1xf32> to vector<8x34xf32>
    %658 = vector.broadcast %656 : vector<1x34xf32> to vector<8x34xf32>
    %659 = arith.mulf %657, %658 : vector<8x34xf32>
    %660 = arith.addf %654, %659 : vector<8x34xf32>
    %c0_176 = arith.constant 0 : index
    %c22 = arith.constant 22 : index
    %c0_177 = arith.constant 0 : index
    %661 = vector.load %arg1[%c0_176, %c22, %c0_177] : memref<1x35x35xf32, #tpu.memory_space<vmem>>, vector<1x1x35xf32>
    %662 = vector.shape_cast %661 : vector<1x1x35xf32> to vector<1x35xf32>
    %663 = vector.extract_strided_slice %20 {offsets = [0, 4], sizes = [8, 1], strides = [1, 1]} : vector<8x6xf32> to vector<8x1xf32>
    %664 = vector.extract_strided_slice %662 {offsets = [0, 0], sizes = [1, 34], strides = [1, 1]} : vector<1x35xf32> to vector<1x34xf32>
    %665 = vector.broadcast %663 : vector<8x1xf32> to vector<8x34xf32>
    %666 = vector.broadcast %664 : vector<1x34xf32> to vector<8x34xf32>
    %667 = arith.mulf %665, %666 : vector<8x34xf32>
    %668 = arith.addf %660, %667 : vector<8x34xf32>
    %669 = vector.extract_strided_slice %20 {offsets = [0, 5], sizes = [8, 1], strides = [1, 1]} : vector<8x6xf32> to vector<8x1xf32>
    %670 = vector.extract_strided_slice %662 {offsets = [0, 1], sizes = [1, 34], strides = [1, 1]} : vector<1x35xf32> to vector<1x34xf32>
    %671 = vector.broadcast %669 : vector<8x1xf32> to vector<8x34xf32>
    %672 = vector.broadcast %670 : vector<1x34xf32> to vector<8x34xf32>
    %673 = arith.mulf %671, %672 : vector<8x34xf32>
    %674 = arith.addf %668, %673 : vector<8x34xf32>
    %675 = vector.broadcast %21 : vector<8x1xf32> to vector<8x34xf32>
    %676 = arith.addf %674, %675 : vector<8x34xf32>
    %cst_178 = arith.constant 0.000000e+00 : f32
    %677 = vector.broadcast %cst_178 : f32 to vector<8x34xf32>
    %678 = arith.cmpf oge, %676, %677 : vector<8x34xf32>
    %cst_179 = arith.constant 0.00999999977 : f32
    %679 = vector.broadcast %cst_179 : f32 to vector<8x34xf32>
    %680 = arith.mulf %679, %676 : vector<8x34xf32>
    %681 = arith.select %678, %676, %680 : vector<8x34xi1>, vector<8x34xf32>
    %682 = tpu.concatenate %30, %681, %30 in 1 : vector<8x1xf32>, vector<8x34xf32>, vector<8x1xf32> -> vector<8x36xf32>
    %683 = vector.extract_strided_slice %682 {offsets = [0, 0], sizes = [8, 32], strides = [1, 1]} : vector<8x36xf32> to vector<8x32xf32>
    %684 = vector.extract_strided_slice %682 {offsets = [0, 1], sizes = [8, 32], strides = [1, 1]} : vector<8x36xf32> to vector<8x32xf32>
    %685 = vector.extract_strided_slice %682 {offsets = [0, 2], sizes = [8, 32], strides = [1, 1]} : vector<8x36xf32> to vector<8x32xf32>
    %686 = vector.extract_strided_slice %682 {offsets = [0, 3], sizes = [8, 32], strides = [1, 1]} : vector<8x36xf32> to vector<8x32xf32>
    %687 = tpu.concatenate %683, %684, %685, %686 in 0 : vector<8x32xf32>, vector<8x32xf32>, vector<8x32xf32>, vector<8x32xf32> -> vector<32x32xf32>
    %688 = arith.truncf %687 : vector<32x32xf32> to vector<32x32xbf16>
    %c13_180 = arith.constant 13 : index
    %c0_181 = arith.constant 0 : index
    %c0_182 = arith.constant 0 : index
    %689 = vector.load %arg13[%c13_180, %c0_181, %c0_182] : memref<21x32x32xbf16, #tpu.memory_space<vmem>>, vector<1x32x32xbf16>
    %690 = vector.shape_cast %689 : vector<1x32x32xbf16> to vector<32x32xbf16>
    %691 = vector.shape_cast %688 : vector<32x32xbf16> to vector<1x32x32xbf16>
    tpu.vector_store %arg13[%c13_180, %c0_181, %c0_182], %691 {strides = array<i32>} : memref<21x32x32xbf16, #tpu.memory_space<vmem>>, vector<1x32x32xbf16>,
    %cst_183 = arith.constant 0.000000e+00 : f32
    %692 = vector.broadcast %cst_183 : f32 to vector<8x34xf32>
    %c0_184 = arith.constant 0 : index
    %c22_185 = arith.constant 22 : index
    %c0_186 = arith.constant 0 : index
    %693 = vector.load %arg1[%c0_184, %c22_185, %c0_186] : memref<1x35x35xf32, #tpu.memory_space<vmem>>, vector<1x1x35xf32>
    %694 = vector.shape_cast %693 : vector<1x1x35xf32> to vector<1x35xf32>
    %695 = vector.extract_strided_slice %20 {offsets = [0, 0], sizes = [8, 1], strides = [1, 1]} : vector<8x6xf32> to vector<8x1xf32>
    %696 = vector.extract_strided_slice %694 {offsets = [0, 0], sizes = [1, 34], strides = [1, 1]} : vector<1x35xf32> to vector<1x34xf32>
    %697 = vector.broadcast %695 : vector<8x1xf32> to vector<8x34xf32>
    %698 = vector.broadcast %696 : vector<1x34xf32> to vector<8x34xf32>
    %699 = arith.mulf %697, %698 : vector<8x34xf32>
    %700 = arith.addf %692, %699 : vector<8x34xf32>
    %701 = vector.extract_strided_slice %20 {offsets = [0, 1], sizes = [8, 1], strides = [1, 1]} : vector<8x6xf32> to vector<8x1xf32>
    %702 = vector.extract_strided_slice %694 {offsets = [0, 1], sizes = [1, 34], strides = [1, 1]} : vector<1x35xf32> to vector<1x34xf32>
    %703 = vector.broadcast %701 : vector<8x1xf32> to vector<8x34xf32>
    %704 = vector.broadcast %702 : vector<1x34xf32> to vector<8x34xf32>
    %705 = arith.mulf %703, %704 : vector<8x34xf32>
    %706 = arith.addf %700, %705 : vector<8x34xf32>
    %c0_187 = arith.constant 0 : index
    %c23 = arith.constant 23 : index
    %c0_188 = arith.constant 0 : index
    %707 = vector.load %arg1[%c0_187, %c23, %c0_188] : memref<1x35x35xf32, #tpu.memory_space<vmem>>, vector<1x1x35xf32>
    %708 = vector.shape_cast %707 : vector<1x1x35xf32> to vector<1x35xf32>
    %709 = vector.extract_strided_slice %20 {offsets = [0, 2], sizes = [8, 1], strides = [1, 1]} : vector<8x6xf32> to vector<8x1xf32>
    %710 = vector.extract_strided_slice %708 {offsets = [0, 0], sizes = [1, 34], strides = [1, 1]} : vector<1x35xf32> to vector<1x34xf32>
    %711 = vector.broadcast %709 : vector<8x1xf32> to vector<8x34xf32>
    %712 = vector.broadcast %710 : vector<1x34xf32> to vector<8x34xf32>
    %713 = arith.mulf %711, %712 : vector<8x34xf32>
    %714 = arith.addf %706, %713 : vector<8x34xf32>
    %715 = vector.extract_strided_slice %20 {offsets = [0, 3], sizes = [8, 1], strides = [1, 1]} : vector<8x6xf32> to vector<8x1xf32>
    %716 = vector.extract_strided_slice %708 {offsets = [0, 1], sizes = [1, 34], strides = [1, 1]} : vector<1x35xf32> to vector<1x34xf32>
    %717 = vector.broadcast %715 : vector<8x1xf32> to vector<8x34xf32>
    %718 = vector.broadcast %716 : vector<1x34xf32> to vector<8x34xf32>
    %719 = arith.mulf %717, %718 : vector<8x34xf32>
    %720 = arith.addf %714, %719 : vector<8x34xf32>
    %c0_189 = arith.constant 0 : index
    %c24 = arith.constant 24 : index
    %c0_190 = arith.constant 0 : index
    %721 = vector.load %arg1[%c0_189, %c24, %c0_190] : memref<1x35x35xf32, #tpu.memory_space<vmem>>, vector<1x1x35xf32>
    %722 = vector.shape_cast %721 : vector<1x1x35xf32> to vector<1x35xf32>
    %723 = vector.extract_strided_slice %20 {offsets = [0, 4], sizes = [8, 1], strides = [1, 1]} : vector<8x6xf32> to vector<8x1xf32>
    %724 = vector.extract_strided_slice %722 {offsets = [0, 0], sizes = [1, 34], strides = [1, 1]} : vector<1x35xf32> to vector<1x34xf32>
    %725 = vector.broadcast %723 : vector<8x1xf32> to vector<8x34xf32>
    %726 = vector.broadcast %724 : vector<1x34xf32> to vector<8x34xf32>
    %727 = arith.mulf %725, %726 : vector<8x34xf32>
    %728 = arith.addf %720, %727 : vector<8x34xf32>
    %729 = vector.extract_strided_slice %20 {offsets = [0, 5], sizes = [8, 1], strides = [1, 1]} : vector<8x6xf32> to vector<8x1xf32>
    %730 = vector.extract_strided_slice %722 {offsets = [0, 1], sizes = [1, 34], strides = [1, 1]} : vector<1x35xf32> to vector<1x34xf32>
    %731 = vector.broadcast %729 : vector<8x1xf32> to vector<8x34xf32>
    %732 = vector.broadcast %730 : vector<1x34xf32> to vector<8x34xf32>
    %733 = arith.mulf %731, %732 : vector<8x34xf32>
    %734 = arith.addf %728, %733 : vector<8x34xf32>
    %735 = vector.broadcast %21 : vector<8x1xf32> to vector<8x34xf32>
    %736 = arith.addf %734, %735 : vector<8x34xf32>
    %cst_191 = arith.constant 0.000000e+00 : f32
    %737 = vector.broadcast %cst_191 : f32 to vector<8x34xf32>
    %738 = arith.cmpf oge, %736, %737 : vector<8x34xf32>
    %cst_192 = arith.constant 0.00999999977 : f32
    %739 = vector.broadcast %cst_192 : f32 to vector<8x34xf32>
    %740 = arith.mulf %739, %736 : vector<8x34xf32>
    %741 = arith.select %738, %736, %740 : vector<8x34xi1>, vector<8x34xf32>
    %742 = tpu.concatenate %30, %741, %30 in 1 : vector<8x1xf32>, vector<8x34xf32>, vector<8x1xf32> -> vector<8x36xf32>
    %743 = vector.extract_strided_slice %742 {offsets = [0, 0], sizes = [8, 32], strides = [1, 1]} : vector<8x36xf32> to vector<8x32xf32>
    %744 = vector.extract_strided_slice %742 {offsets = [0, 1], sizes = [8, 32], strides = [1, 1]} : vector<8x36xf32> to vector<8x32xf32>
    %745 = vector.extract_strided_slice %742 {offsets = [0, 2], sizes = [8, 32], strides = [1, 1]} : vector<8x36xf32> to vector<8x32xf32>
    %746 = vector.extract_strided_slice %742 {offsets = [0, 3], sizes = [8, 32], strides = [1, 1]} : vector<8x36xf32> to vector<8x32xf32>
    %747 = tpu.concatenate %743, %744, %745, %746 in 0 : vector<8x32xf32>, vector<8x32xf32>, vector<8x32xf32>, vector<8x32xf32> -> vector<32x32xf32>
    %748 = arith.truncf %747 : vector<32x32xf32> to vector<32x32xbf16>
    %c14_193 = arith.constant 14 : index
    %c0_194 = arith.constant 0 : index
    %c0_195 = arith.constant 0 : index
    %749 = vector.load %arg13[%c14_193, %c0_194, %c0_195] : memref<21x32x32xbf16, #tpu.memory_space<vmem>>, vector<1x32x32xbf16>
    %750 = vector.shape_cast %749 : vector<1x32x32xbf16> to vector<32x32xbf16>
    %751 = vector.shape_cast %748 : vector<32x32xbf16> to vector<1x32x32xbf16>
    tpu.vector_store %arg13[%c14_193, %c0_194, %c0_195], %751 {strides = array<i32>} : memref<21x32x32xbf16, #tpu.memory_space<vmem>>, vector<1x32x32xbf16>,
    %cst_196 = arith.constant 0.000000e+00 : f32
    %752 = vector.broadcast %cst_196 : f32 to vector<8x34xf32>
    %c0_197 = arith.constant 0 : index
    %c24_198 = arith.constant 24 : index
    %c0_199 = arith.constant 0 : index
    %753 = vector.load %arg1[%c0_197, %c24_198, %c0_199] : memref<1x35x35xf32, #tpu.memory_space<vmem>>, vector<1x1x35xf32>
    %754 = vector.shape_cast %753 : vector<1x1x35xf32> to vector<1x35xf32>
    %755 = vector.extract_strided_slice %20 {offsets = [0, 0], sizes = [8, 1], strides = [1, 1]} : vector<8x6xf32> to vector<8x1xf32>
    %756 = vector.extract_strided_slice %754 {offsets = [0, 0], sizes = [1, 34], strides = [1, 1]} : vector<1x35xf32> to vector<1x34xf32>
    %757 = vector.broadcast %755 : vector<8x1xf32> to vector<8x34xf32>
    %758 = vector.broadcast %756 : vector<1x34xf32> to vector<8x34xf32>
    %759 = arith.mulf %757, %758 : vector<8x34xf32>
    %760 = arith.addf %752, %759 : vector<8x34xf32>
    %761 = vector.extract_strided_slice %20 {offsets = [0, 1], sizes = [8, 1], strides = [1, 1]} : vector<8x6xf32> to vector<8x1xf32>
    %762 = vector.extract_strided_slice %754 {offsets = [0, 1], sizes = [1, 34], strides = [1, 1]} : vector<1x35xf32> to vector<1x34xf32>
    %763 = vector.broadcast %761 : vector<8x1xf32> to vector<8x34xf32>
    %764 = vector.broadcast %762 : vector<1x34xf32> to vector<8x34xf32>
    %765 = arith.mulf %763, %764 : vector<8x34xf32>
    %766 = arith.addf %760, %765 : vector<8x34xf32>
    %c0_200 = arith.constant 0 : index
    %c25 = arith.constant 25 : index
    %c0_201 = arith.constant 0 : index
    %767 = vector.load %arg1[%c0_200, %c25, %c0_201] : memref<1x35x35xf32, #tpu.memory_space<vmem>>, vector<1x1x35xf32>
    %768 = vector.shape_cast %767 : vector<1x1x35xf32> to vector<1x35xf32>
    %769 = vector.extract_strided_slice %20 {offsets = [0, 2], sizes = [8, 1], strides = [1, 1]} : vector<8x6xf32> to vector<8x1xf32>
    %770 = vector.extract_strided_slice %768 {offsets = [0, 0], sizes = [1, 34], strides = [1, 1]} : vector<1x35xf32> to vector<1x34xf32>
    %771 = vector.broadcast %769 : vector<8x1xf32> to vector<8x34xf32>
    %772 = vector.broadcast %770 : vector<1x34xf32> to vector<8x34xf32>
    %773 = arith.mulf %771, %772 : vector<8x34xf32>
    %774 = arith.addf %766, %773 : vector<8x34xf32>
    %775 = vector.extract_strided_slice %20 {offsets = [0, 3], sizes = [8, 1], strides = [1, 1]} : vector<8x6xf32> to vector<8x1xf32>
    %776 = vector.extract_strided_slice %768 {offsets = [0, 1], sizes = [1, 34], strides = [1, 1]} : vector<1x35xf32> to vector<1x34xf32>
    %777 = vector.broadcast %775 : vector<8x1xf32> to vector<8x34xf32>
    %778 = vector.broadcast %776 : vector<1x34xf32> to vector<8x34xf32>
    %779 = arith.mulf %777, %778 : vector<8x34xf32>
    %780 = arith.addf %774, %779 : vector<8x34xf32>
    %c0_202 = arith.constant 0 : index
    %c26 = arith.constant 26 : index
    %c0_203 = arith.constant 0 : index
    %781 = vector.load %arg1[%c0_202, %c26, %c0_203] : memref<1x35x35xf32, #tpu.memory_space<vmem>>, vector<1x1x35xf32>
    %782 = vector.shape_cast %781 : vector<1x1x35xf32> to vector<1x35xf32>
    %783 = vector.extract_strided_slice %20 {offsets = [0, 4], sizes = [8, 1], strides = [1, 1]} : vector<8x6xf32> to vector<8x1xf32>
    %784 = vector.extract_strided_slice %782 {offsets = [0, 0], sizes = [1, 34], strides = [1, 1]} : vector<1x35xf32> to vector<1x34xf32>
    %785 = vector.broadcast %783 : vector<8x1xf32> to vector<8x34xf32>
    %786 = vector.broadcast %784 : vector<1x34xf32> to vector<8x34xf32>
    %787 = arith.mulf %785, %786 : vector<8x34xf32>
    %788 = arith.addf %780, %787 : vector<8x34xf32>
    %789 = vector.extract_strided_slice %20 {offsets = [0, 5], sizes = [8, 1], strides = [1, 1]} : vector<8x6xf32> to vector<8x1xf32>
    %790 = vector.extract_strided_slice %782 {offsets = [0, 1], sizes = [1, 34], strides = [1, 1]} : vector<1x35xf32> to vector<1x34xf32>
    %791 = vector.broadcast %789 : vector<8x1xf32> to vector<8x34xf32>
    %792 = vector.broadcast %790 : vector<1x34xf32> to vector<8x34xf32>
    %793 = arith.mulf %791, %792 : vector<8x34xf32>
    %794 = arith.addf %788, %793 : vector<8x34xf32>
    %795 = vector.broadcast %21 : vector<8x1xf32> to vector<8x34xf32>
    %796 = arith.addf %794, %795 : vector<8x34xf32>
    %cst_204 = arith.constant 0.000000e+00 : f32
    %797 = vector.broadcast %cst_204 : f32 to vector<8x34xf32>
    %798 = arith.cmpf oge, %796, %797 : vector<8x34xf32>
    %cst_205 = arith.constant 0.00999999977 : f32
    %799 = vector.broadcast %cst_205 : f32 to vector<8x34xf32>
    %800 = arith.mulf %799, %796 : vector<8x34xf32>
    %801 = arith.select %798, %796, %800 : vector<8x34xi1>, vector<8x34xf32>
    %802 = tpu.concatenate %30, %801, %30 in 1 : vector<8x1xf32>, vector<8x34xf32>, vector<8x1xf32> -> vector<8x36xf32>
    %803 = vector.extract_strided_slice %802 {offsets = [0, 0], sizes = [8, 32], strides = [1, 1]} : vector<8x36xf32> to vector<8x32xf32>
    %804 = vector.extract_strided_slice %802 {offsets = [0, 1], sizes = [8, 32], strides = [1, 1]} : vector<8x36xf32> to vector<8x32xf32>
    %805 = vector.extract_strided_slice %802 {offsets = [0, 2], sizes = [8, 32], strides = [1, 1]} : vector<8x36xf32> to vector<8x32xf32>
    %806 = vector.extract_strided_slice %802 {offsets = [0, 3], sizes = [8, 32], strides = [1, 1]} : vector<8x36xf32> to vector<8x32xf32>
    %807 = tpu.concatenate %803, %804, %805, %806 in 0 : vector<8x32xf32>, vector<8x32xf32>, vector<8x32xf32>, vector<8x32xf32> -> vector<32x32xf32>
    %808 = arith.truncf %807 : vector<32x32xf32> to vector<32x32xbf16>
    %c15_206 = arith.constant 15 : index
    %c0_207 = arith.constant 0 : index
    %c0_208 = arith.constant 0 : index
    %809 = vector.load %arg13[%c15_206, %c0_207, %c0_208] : memref<21x32x32xbf16, #tpu.memory_space<vmem>>, vector<1x32x32xbf16>
    %810 = vector.shape_cast %809 : vector<1x32x32xbf16> to vector<32x32xbf16>
    %811 = vector.shape_cast %808 : vector<32x32xbf16> to vector<1x32x32xbf16>
    tpu.vector_store %arg13[%c15_206, %c0_207, %c0_208], %811 {strides = array<i32>} : memref<21x32x32xbf16, #tpu.memory_space<vmem>>, vector<1x32x32xbf16>,
    %cst_209 = arith.constant 0.000000e+00 : f32
    %812 = vector.broadcast %cst_209 : f32 to vector<8x34xf32>
    %c0_210 = arith.constant 0 : index
    %c26_211 = arith.constant 26 : index
    %c0_212 = arith.constant 0 : index
    %813 = vector.load %arg1[%c0_210, %c26_211, %c0_212] : memref<1x35x35xf32, #tpu.memory_space<vmem>>, vector<1x1x35xf32>
    %814 = vector.shape_cast %813 : vector<1x1x35xf32> to vector<1x35xf32>
    %815 = vector.extract_strided_slice %20 {offsets = [0, 0], sizes = [8, 1], strides = [1, 1]} : vector<8x6xf32> to vector<8x1xf32>
    %816 = vector.extract_strided_slice %814 {offsets = [0, 0], sizes = [1, 34], strides = [1, 1]} : vector<1x35xf32> to vector<1x34xf32>
    %817 = vector.broadcast %815 : vector<8x1xf32> to vector<8x34xf32>
    %818 = vector.broadcast %816 : vector<1x34xf32> to vector<8x34xf32>
    %819 = arith.mulf %817, %818 : vector<8x34xf32>
    %820 = arith.addf %812, %819 : vector<8x34xf32>
    %821 = vector.extract_strided_slice %20 {offsets = [0, 1], sizes = [8, 1], strides = [1, 1]} : vector<8x6xf32> to vector<8x1xf32>
    %822 = vector.extract_strided_slice %814 {offsets = [0, 1], sizes = [1, 34], strides = [1, 1]} : vector<1x35xf32> to vector<1x34xf32>
    %823 = vector.broadcast %821 : vector<8x1xf32> to vector<8x34xf32>
    %824 = vector.broadcast %822 : vector<1x34xf32> to vector<8x34xf32>
    %825 = arith.mulf %823, %824 : vector<8x34xf32>
    %826 = arith.addf %820, %825 : vector<8x34xf32>
    %c0_213 = arith.constant 0 : index
    %c27 = arith.constant 27 : index
    %c0_214 = arith.constant 0 : index
    %827 = vector.load %arg1[%c0_213, %c27, %c0_214] : memref<1x35x35xf32, #tpu.memory_space<vmem>>, vector<1x1x35xf32>
    %828 = vector.shape_cast %827 : vector<1x1x35xf32> to vector<1x35xf32>
    %829 = vector.extract_strided_slice %20 {offsets = [0, 2], sizes = [8, 1], strides = [1, 1]} : vector<8x6xf32> to vector<8x1xf32>
    %830 = vector.extract_strided_slice %828 {offsets = [0, 0], sizes = [1, 34], strides = [1, 1]} : vector<1x35xf32> to vector<1x34xf32>
    %831 = vector.broadcast %829 : vector<8x1xf32> to vector<8x34xf32>
    %832 = vector.broadcast %830 : vector<1x34xf32> to vector<8x34xf32>
    %833 = arith.mulf %831, %832 : vector<8x34xf32>
    %834 = arith.addf %826, %833 : vector<8x34xf32>
    %835 = vector.extract_strided_slice %20 {offsets = [0, 3], sizes = [8, 1], strides = [1, 1]} : vector<8x6xf32> to vector<8x1xf32>
    %836 = vector.extract_strided_slice %828 {offsets = [0, 1], sizes = [1, 34], strides = [1, 1]} : vector<1x35xf32> to vector<1x34xf32>
    %837 = vector.broadcast %835 : vector<8x1xf32> to vector<8x34xf32>
    %838 = vector.broadcast %836 : vector<1x34xf32> to vector<8x34xf32>
    %839 = arith.mulf %837, %838 : vector<8x34xf32>
    %840 = arith.addf %834, %839 : vector<8x34xf32>
    %c0_215 = arith.constant 0 : index
    %c28 = arith.constant 28 : index
    %c0_216 = arith.constant 0 : index
    %841 = vector.load %arg1[%c0_215, %c28, %c0_216] : memref<1x35x35xf32, #tpu.memory_space<vmem>>, vector<1x1x35xf32>
    %842 = vector.shape_cast %841 : vector<1x1x35xf32> to vector<1x35xf32>
    %843 = vector.extract_strided_slice %20 {offsets = [0, 4], sizes = [8, 1], strides = [1, 1]} : vector<8x6xf32> to vector<8x1xf32>
    %844 = vector.extract_strided_slice %842 {offsets = [0, 0], sizes = [1, 34], strides = [1, 1]} : vector<1x35xf32> to vector<1x34xf32>
    %845 = vector.broadcast %843 : vector<8x1xf32> to vector<8x34xf32>
    %846 = vector.broadcast %844 : vector<1x34xf32> to vector<8x34xf32>
    %847 = arith.mulf %845, %846 : vector<8x34xf32>
    %848 = arith.addf %840, %847 : vector<8x34xf32>
    %849 = vector.extract_strided_slice %20 {offsets = [0, 5], sizes = [8, 1], strides = [1, 1]} : vector<8x6xf32> to vector<8x1xf32>
    %850 = vector.extract_strided_slice %842 {offsets = [0, 1], sizes = [1, 34], strides = [1, 1]} : vector<1x35xf32> to vector<1x34xf32>
    %851 = vector.broadcast %849 : vector<8x1xf32> to vector<8x34xf32>
    %852 = vector.broadcast %850 : vector<1x34xf32> to vector<8x34xf32>
    %853 = arith.mulf %851, %852 : vector<8x34xf32>
    %854 = arith.addf %848, %853 : vector<8x34xf32>
    %855 = vector.broadcast %21 : vector<8x1xf32> to vector<8x34xf32>
    %856 = arith.addf %854, %855 : vector<8x34xf32>
    %cst_217 = arith.constant 0.000000e+00 : f32
    %857 = vector.broadcast %cst_217 : f32 to vector<8x34xf32>
    %858 = arith.cmpf oge, %856, %857 : vector<8x34xf32>
    %cst_218 = arith.constant 0.00999999977 : f32
    %859 = vector.broadcast %cst_218 : f32 to vector<8x34xf32>
    %860 = arith.mulf %859, %856 : vector<8x34xf32>
    %861 = arith.select %858, %856, %860 : vector<8x34xi1>, vector<8x34xf32>
    %862 = tpu.concatenate %30, %861, %30 in 1 : vector<8x1xf32>, vector<8x34xf32>, vector<8x1xf32> -> vector<8x36xf32>
    %863 = vector.extract_strided_slice %862 {offsets = [0, 0], sizes = [8, 32], strides = [1, 1]} : vector<8x36xf32> to vector<8x32xf32>
    %864 = vector.extract_strided_slice %862 {offsets = [0, 1], sizes = [8, 32], strides = [1, 1]} : vector<8x36xf32> to vector<8x32xf32>
    %865 = vector.extract_strided_slice %862 {offsets = [0, 2], sizes = [8, 32], strides = [1, 1]} : vector<8x36xf32> to vector<8x32xf32>
    %866 = vector.extract_strided_slice %862 {offsets = [0, 3], sizes = [8, 32], strides = [1, 1]} : vector<8x36xf32> to vector<8x32xf32>
    %867 = tpu.concatenate %863, %864, %865, %866 in 0 : vector<8x32xf32>, vector<8x32xf32>, vector<8x32xf32>, vector<8x32xf32> -> vector<32x32xf32>
    %868 = arith.truncf %867 : vector<32x32xf32> to vector<32x32xbf16>
    %c16_219 = arith.constant 16 : index
    %c0_220 = arith.constant 0 : index
    %c0_221 = arith.constant 0 : index
    %869 = vector.load %arg13[%c16_219, %c0_220, %c0_221] : memref<21x32x32xbf16, #tpu.memory_space<vmem>>, vector<1x32x32xbf16>
    %870 = vector.shape_cast %869 : vector<1x32x32xbf16> to vector<32x32xbf16>
    %871 = vector.shape_cast %868 : vector<32x32xbf16> to vector<1x32x32xbf16>
    tpu.vector_store %arg13[%c16_219, %c0_220, %c0_221], %871 {strides = array<i32>} : memref<21x32x32xbf16, #tpu.memory_space<vmem>>, vector<1x32x32xbf16>,
    %cst_222 = arith.constant 0.000000e+00 : f32
    %872 = vector.broadcast %cst_222 : f32 to vector<8x34xf32>
    %c0_223 = arith.constant 0 : index
    %c28_224 = arith.constant 28 : index
    %c0_225 = arith.constant 0 : index
    %873 = vector.load %arg1[%c0_223, %c28_224, %c0_225] : memref<1x35x35xf32, #tpu.memory_space<vmem>>, vector<1x1x35xf32>
    %874 = vector.shape_cast %873 : vector<1x1x35xf32> to vector<1x35xf32>
    %875 = vector.extract_strided_slice %20 {offsets = [0, 0], sizes = [8, 1], strides = [1, 1]} : vector<8x6xf32> to vector<8x1xf32>
    %876 = vector.extract_strided_slice %874 {offsets = [0, 0], sizes = [1, 34], strides = [1, 1]} : vector<1x35xf32> to vector<1x34xf32>
    %877 = vector.broadcast %875 : vector<8x1xf32> to vector<8x34xf32>
    %878 = vector.broadcast %876 : vector<1x34xf32> to vector<8x34xf32>
    %879 = arith.mulf %877, %878 : vector<8x34xf32>
    %880 = arith.addf %872, %879 : vector<8x34xf32>
    %881 = vector.extract_strided_slice %20 {offsets = [0, 1], sizes = [8, 1], strides = [1, 1]} : vector<8x6xf32> to vector<8x1xf32>
    %882 = vector.extract_strided_slice %874 {offsets = [0, 1], sizes = [1, 34], strides = [1, 1]} : vector<1x35xf32> to vector<1x34xf32>
    %883 = vector.broadcast %881 : vector<8x1xf32> to vector<8x34xf32>
    %884 = vector.broadcast %882 : vector<1x34xf32> to vector<8x34xf32>
    %885 = arith.mulf %883, %884 : vector<8x34xf32>
    %886 = arith.addf %880, %885 : vector<8x34xf32>
    %c0_226 = arith.constant 0 : index
    %c29 = arith.constant 29 : index
    %c0_227 = arith.constant 0 : index
    %887 = vector.load %arg1[%c0_226, %c29, %c0_227] : memref<1x35x35xf32, #tpu.memory_space<vmem>>, vector<1x1x35xf32>
    %888 = vector.shape_cast %887 : vector<1x1x35xf32> to vector<1x35xf32>
    %889 = vector.extract_strided_slice %20 {offsets = [0, 2], sizes = [8, 1], strides = [1, 1]} : vector<8x6xf32> to vector<8x1xf32>
    %890 = vector.extract_strided_slice %888 {offsets = [0, 0], sizes = [1, 34], strides = [1, 1]} : vector<1x35xf32> to vector<1x34xf32>
    %891 = vector.broadcast %889 : vector<8x1xf32> to vector<8x34xf32>
    %892 = vector.broadcast %890 : vector<1x34xf32> to vector<8x34xf32>
    %893 = arith.mulf %891, %892 : vector<8x34xf32>
    %894 = arith.addf %886, %893 : vector<8x34xf32>
    %895 = vector.extract_strided_slice %20 {offsets = [0, 3], sizes = [8, 1], strides = [1, 1]} : vector<8x6xf32> to vector<8x1xf32>
    %896 = vector.extract_strided_slice %888 {offsets = [0, 1], sizes = [1, 34], strides = [1, 1]} : vector<1x35xf32> to vector<1x34xf32>
    %897 = vector.broadcast %895 : vector<8x1xf32> to vector<8x34xf32>
    %898 = vector.broadcast %896 : vector<1x34xf32> to vector<8x34xf32>
    %899 = arith.mulf %897, %898 : vector<8x34xf32>
    %900 = arith.addf %894, %899 : vector<8x34xf32>
    %c0_228 = arith.constant 0 : index
    %c30 = arith.constant 30 : index
    %c0_229 = arith.constant 0 : index
    %901 = vector.load %arg1[%c0_228, %c30, %c0_229] : memref<1x35x35xf32, #tpu.memory_space<vmem>>, vector<1x1x35xf32>
    %902 = vector.shape_cast %901 : vector<1x1x35xf32> to vector<1x35xf32>
    %903 = vector.extract_strided_slice %20 {offsets = [0, 4], sizes = [8, 1], strides = [1, 1]} : vector<8x6xf32> to vector<8x1xf32>
    %904 = vector.extract_strided_slice %902 {offsets = [0, 0], sizes = [1, 34], strides = [1, 1]} : vector<1x35xf32> to vector<1x34xf32>
    %905 = vector.broadcast %903 : vector<8x1xf32> to vector<8x34xf32>
    %906 = vector.broadcast %904 : vector<1x34xf32> to vector<8x34xf32>
    %907 = arith.mulf %905, %906 : vector<8x34xf32>
    %908 = arith.addf %900, %907 : vector<8x34xf32>
    %909 = vector.extract_strided_slice %20 {offsets = [0, 5], sizes = [8, 1], strides = [1, 1]} : vector<8x6xf32> to vector<8x1xf32>
    %910 = vector.extract_strided_slice %902 {offsets = [0, 1], sizes = [1, 34], strides = [1, 1]} : vector<1x35xf32> to vector<1x34xf32>
    %911 = vector.broadcast %909 : vector<8x1xf32> to vector<8x34xf32>
    %912 = vector.broadcast %910 : vector<1x34xf32> to vector<8x34xf32>
    %913 = arith.mulf %911, %912 : vector<8x34xf32>
    %914 = arith.addf %908, %913 : vector<8x34xf32>
    %915 = vector.broadcast %21 : vector<8x1xf32> to vector<8x34xf32>
    %916 = arith.addf %914, %915 : vector<8x34xf32>
    %cst_230 = arith.constant 0.000000e+00 : f32
    %917 = vector.broadcast %cst_230 : f32 to vector<8x34xf32>
    %918 = arith.cmpf oge, %916, %917 : vector<8x34xf32>
    %cst_231 = arith.constant 0.00999999977 : f32
    %919 = vector.broadcast %cst_231 : f32 to vector<8x34xf32>
    %920 = arith.mulf %919, %916 : vector<8x34xf32>
    %921 = arith.select %918, %916, %920 : vector<8x34xi1>, vector<8x34xf32>
    %922 = tpu.concatenate %30, %921, %30 in 1 : vector<8x1xf32>, vector<8x34xf32>, vector<8x1xf32> -> vector<8x36xf32>
    %923 = vector.extract_strided_slice %922 {offsets = [0, 0], sizes = [8, 32], strides = [1, 1]} : vector<8x36xf32> to vector<8x32xf32>
    %924 = vector.extract_strided_slice %922 {offsets = [0, 1], sizes = [8, 32], strides = [1, 1]} : vector<8x36xf32> to vector<8x32xf32>
    %925 = vector.extract_strided_slice %922 {offsets = [0, 2], sizes = [8, 32], strides = [1, 1]} : vector<8x36xf32> to vector<8x32xf32>
    %926 = vector.extract_strided_slice %922 {offsets = [0, 3], sizes = [8, 32], strides = [1, 1]} : vector<8x36xf32> to vector<8x32xf32>
    %927 = tpu.concatenate %923, %924, %925, %926 in 0 : vector<8x32xf32>, vector<8x32xf32>, vector<8x32xf32>, vector<8x32xf32> -> vector<32x32xf32>
    %928 = arith.truncf %927 : vector<32x32xf32> to vector<32x32xbf16>
    %c17_232 = arith.constant 17 : index
    %c0_233 = arith.constant 0 : index
    %c0_234 = arith.constant 0 : index
    %929 = vector.load %arg13[%c17_232, %c0_233, %c0_234] : memref<21x32x32xbf16, #tpu.memory_space<vmem>>, vector<1x32x32xbf16>
    %930 = vector.shape_cast %929 : vector<1x32x32xbf16> to vector<32x32xbf16>
    %931 = vector.shape_cast %928 : vector<32x32xbf16> to vector<1x32x32xbf16>
    tpu.vector_store %arg13[%c17_232, %c0_233, %c0_234], %931 {strides = array<i32>} : memref<21x32x32xbf16, #tpu.memory_space<vmem>>, vector<1x32x32xbf16>,
    %cst_235 = arith.constant 0.000000e+00 : f32
    %932 = vector.broadcast %cst_235 : f32 to vector<8x34xf32>
    %c0_236 = arith.constant 0 : index
    %c30_237 = arith.constant 30 : index
    %c0_238 = arith.constant 0 : index
    %933 = vector.load %arg1[%c0_236, %c30_237, %c0_238] : memref<1x35x35xf32, #tpu.memory_space<vmem>>, vector<1x1x35xf32>
    %934 = vector.shape_cast %933 : vector<1x1x35xf32> to vector<1x35xf32>
    %935 = vector.extract_strided_slice %20 {offsets = [0, 0], sizes = [8, 1], strides = [1, 1]} : vector<8x6xf32> to vector<8x1xf32>
    %936 = vector.extract_strided_slice %934 {offsets = [0, 0], sizes = [1, 34], strides = [1, 1]} : vector<1x35xf32> to vector<1x34xf32>
    %937 = vector.broadcast %935 : vector<8x1xf32> to vector<8x34xf32>
    %938 = vector.broadcast %936 : vector<1x34xf32> to vector<8x34xf32>
    %939 = arith.mulf %937, %938 : vector<8x34xf32>
    %940 = arith.addf %932, %939 : vector<8x34xf32>
    %941 = vector.extract_strided_slice %20 {offsets = [0, 1], sizes = [8, 1], strides = [1, 1]} : vector<8x6xf32> to vector<8x1xf32>
    %942 = vector.extract_strided_slice %934 {offsets = [0, 1], sizes = [1, 34], strides = [1, 1]} : vector<1x35xf32> to vector<1x34xf32>
    %943 = vector.broadcast %941 : vector<8x1xf32> to vector<8x34xf32>
    %944 = vector.broadcast %942 : vector<1x34xf32> to vector<8x34xf32>
    %945 = arith.mulf %943, %944 : vector<8x34xf32>
    %946 = arith.addf %940, %945 : vector<8x34xf32>
    %c0_239 = arith.constant 0 : index
    %c31 = arith.constant 31 : index
    %c0_240 = arith.constant 0 : index
    %947 = vector.load %arg1[%c0_239, %c31, %c0_240] : memref<1x35x35xf32, #tpu.memory_space<vmem>>, vector<1x1x35xf32>
    %948 = vector.shape_cast %947 : vector<1x1x35xf32> to vector<1x35xf32>
    %949 = vector.extract_strided_slice %20 {offsets = [0, 2], sizes = [8, 1], strides = [1, 1]} : vector<8x6xf32> to vector<8x1xf32>
    %950 = vector.extract_strided_slice %948 {offsets = [0, 0], sizes = [1, 34], strides = [1, 1]} : vector<1x35xf32> to vector<1x34xf32>
    %951 = vector.broadcast %949 : vector<8x1xf32> to vector<8x34xf32>
    %952 = vector.broadcast %950 : vector<1x34xf32> to vector<8x34xf32>
    %953 = arith.mulf %951, %952 : vector<8x34xf32>
    %954 = arith.addf %946, %953 : vector<8x34xf32>
    %955 = vector.extract_strided_slice %20 {offsets = [0, 3], sizes = [8, 1], strides = [1, 1]} : vector<8x6xf32> to vector<8x1xf32>
    %956 = vector.extract_strided_slice %948 {offsets = [0, 1], sizes = [1, 34], strides = [1, 1]} : vector<1x35xf32> to vector<1x34xf32>
    %957 = vector.broadcast %955 : vector<8x1xf32> to vector<8x34xf32>
    %958 = vector.broadcast %956 : vector<1x34xf32> to vector<8x34xf32>
    %959 = arith.mulf %957, %958 : vector<8x34xf32>
    %960 = arith.addf %954, %959 : vector<8x34xf32>
    %c0_241 = arith.constant 0 : index
    %c32 = arith.constant 32 : index
    %c0_242 = arith.constant 0 : index
    %961 = vector.load %arg1[%c0_241, %c32, %c0_242] : memref<1x35x35xf32, #tpu.memory_space<vmem>>, vector<1x1x35xf32>
    %962 = vector.shape_cast %961 : vector<1x1x35xf32> to vector<1x35xf32>
    %963 = vector.extract_strided_slice %20 {offsets = [0, 4], sizes = [8, 1], strides = [1, 1]} : vector<8x6xf32> to vector<8x1xf32>
    %964 = vector.extract_strided_slice %962 {offsets = [0, 0], sizes = [1, 34], strides = [1, 1]} : vector<1x35xf32> to vector<1x34xf32>
    %965 = vector.broadcast %963 : vector<8x1xf32> to vector<8x34xf32>
    %966 = vector.broadcast %964 : vector<1x34xf32> to vector<8x34xf32>
    %967 = arith.mulf %965, %966 : vector<8x34xf32>
    %968 = arith.addf %960, %967 : vector<8x34xf32>
    %969 = vector.extract_strided_slice %20 {offsets = [0, 5], sizes = [8, 1], strides = [1, 1]} : vector<8x6xf32> to vector<8x1xf32>
    %970 = vector.extract_strided_slice %962 {offsets = [0, 1], sizes = [1, 34], strides = [1, 1]} : vector<1x35xf32> to vector<1x34xf32>
    %971 = vector.broadcast %969 : vector<8x1xf32> to vector<8x34xf32>
    %972 = vector.broadcast %970 : vector<1x34xf32> to vector<8x34xf32>
    %973 = arith.mulf %971, %972 : vector<8x34xf32>
    %974 = arith.addf %968, %973 : vector<8x34xf32>
    %975 = vector.broadcast %21 : vector<8x1xf32> to vector<8x34xf32>
    %976 = arith.addf %974, %975 : vector<8x34xf32>
    %cst_243 = arith.constant 0.000000e+00 : f32
    %977 = vector.broadcast %cst_243 : f32 to vector<8x34xf32>
    %978 = arith.cmpf oge, %976, %977 : vector<8x34xf32>
    %cst_244 = arith.constant 0.00999999977 : f32
    %979 = vector.broadcast %cst_244 : f32 to vector<8x34xf32>
    %980 = arith.mulf %979, %976 : vector<8x34xf32>
    %981 = arith.select %978, %976, %980 : vector<8x34xi1>, vector<8x34xf32>
    %982 = tpu.concatenate %30, %981, %30 in 1 : vector<8x1xf32>, vector<8x34xf32>, vector<8x1xf32> -> vector<8x36xf32>
    %983 = vector.extract_strided_slice %982 {offsets = [0, 0], sizes = [8, 32], strides = [1, 1]} : vector<8x36xf32> to vector<8x32xf32>
    %984 = vector.extract_strided_slice %982 {offsets = [0, 1], sizes = [8, 32], strides = [1, 1]} : vector<8x36xf32> to vector<8x32xf32>
    %985 = vector.extract_strided_slice %982 {offsets = [0, 2], sizes = [8, 32], strides = [1, 1]} : vector<8x36xf32> to vector<8x32xf32>
    %986 = vector.extract_strided_slice %982 {offsets = [0, 3], sizes = [8, 32], strides = [1, 1]} : vector<8x36xf32> to vector<8x32xf32>
    %987 = tpu.concatenate %983, %984, %985, %986 in 0 : vector<8x32xf32>, vector<8x32xf32>, vector<8x32xf32>, vector<8x32xf32> -> vector<32x32xf32>
    %988 = arith.truncf %987 : vector<32x32xf32> to vector<32x32xbf16>
    %c18_245 = arith.constant 18 : index
    %c0_246 = arith.constant 0 : index
    %c0_247 = arith.constant 0 : index
    %989 = vector.load %arg13[%c18_245, %c0_246, %c0_247] : memref<21x32x32xbf16, #tpu.memory_space<vmem>>, vector<1x32x32xbf16>
    %990 = vector.shape_cast %989 : vector<1x32x32xbf16> to vector<32x32xbf16>
    %991 = vector.shape_cast %988 : vector<32x32xbf16> to vector<1x32x32xbf16>
    tpu.vector_store %arg13[%c18_245, %c0_246, %c0_247], %991 {strides = array<i32>} : memref<21x32x32xbf16, #tpu.memory_space<vmem>>, vector<1x32x32xbf16>,
    %cst_248 = arith.constant 0.000000e+00 : f32
    %992 = vector.broadcast %cst_248 : f32 to vector<8x34xf32>
    %c0_249 = arith.constant 0 : index
    %c32_250 = arith.constant 32 : index
    %c0_251 = arith.constant 0 : index
    %993 = vector.load %arg1[%c0_249, %c32_250, %c0_251] : memref<1x35x35xf32, #tpu.memory_space<vmem>>, vector<1x1x35xf32>
    %994 = vector.shape_cast %993 : vector<1x1x35xf32> to vector<1x35xf32>
    %995 = vector.extract_strided_slice %20 {offsets = [0, 0], sizes = [8, 1], strides = [1, 1]} : vector<8x6xf32> to vector<8x1xf32>
    %996 = vector.extract_strided_slice %994 {offsets = [0, 0], sizes = [1, 34], strides = [1, 1]} : vector<1x35xf32> to vector<1x34xf32>
    %997 = vector.broadcast %995 : vector<8x1xf32> to vector<8x34xf32>
    %998 = vector.broadcast %996 : vector<1x34xf32> to vector<8x34xf32>
    %999 = arith.mulf %997, %998 : vector<8x34xf32>
    %1000 = arith.addf %992, %999 : vector<8x34xf32>
    %1001 = vector.extract_strided_slice %20 {offsets = [0, 1], sizes = [8, 1], strides = [1, 1]} : vector<8x6xf32> to vector<8x1xf32>
    %1002 = vector.extract_strided_slice %994 {offsets = [0, 1], sizes = [1, 34], strides = [1, 1]} : vector<1x35xf32> to vector<1x34xf32>
    %1003 = vector.broadcast %1001 : vector<8x1xf32> to vector<8x34xf32>
    %1004 = vector.broadcast %1002 : vector<1x34xf32> to vector<8x34xf32>
    %1005 = arith.mulf %1003, %1004 : vector<8x34xf32>
    %1006 = arith.addf %1000, %1005 : vector<8x34xf32>
    %c0_252 = arith.constant 0 : index
    %c33 = arith.constant 33 : index
    %c0_253 = arith.constant 0 : index
    %1007 = vector.load %arg1[%c0_252, %c33, %c0_253] : memref<1x35x35xf32, #tpu.memory_space<vmem>>, vector<1x1x35xf32>
    %1008 = vector.shape_cast %1007 : vector<1x1x35xf32> to vector<1x35xf32>
    %1009 = vector.extract_strided_slice %20 {offsets = [0, 2], sizes = [8, 1], strides = [1, 1]} : vector<8x6xf32> to vector<8x1xf32>
    %1010 = vector.extract_strided_slice %1008 {offsets = [0, 0], sizes = [1, 34], strides = [1, 1]} : vector<1x35xf32> to vector<1x34xf32>
    %1011 = vector.broadcast %1009 : vector<8x1xf32> to vector<8x34xf32>
    %1012 = vector.broadcast %1010 : vector<1x34xf32> to vector<8x34xf32>
    %1013 = arith.mulf %1011, %1012 : vector<8x34xf32>
    %1014 = arith.addf %1006, %1013 : vector<8x34xf32>
    %1015 = vector.extract_strided_slice %20 {offsets = [0, 3], sizes = [8, 1], strides = [1, 1]} : vector<8x6xf32> to vector<8x1xf32>
    %1016 = vector.extract_strided_slice %1008 {offsets = [0, 1], sizes = [1, 34], strides = [1, 1]} : vector<1x35xf32> to vector<1x34xf32>
    %1017 = vector.broadcast %1015 : vector<8x1xf32> to vector<8x34xf32>
    %1018 = vector.broadcast %1016 : vector<1x34xf32> to vector<8x34xf32>
    %1019 = arith.mulf %1017, %1018 : vector<8x34xf32>
    %1020 = arith.addf %1014, %1019 : vector<8x34xf32>
    %c0_254 = arith.constant 0 : index
    %c34 = arith.constant 34 : index
    %c0_255 = arith.constant 0 : index
    %1021 = vector.load %arg1[%c0_254, %c34, %c0_255] : memref<1x35x35xf32, #tpu.memory_space<vmem>>, vector<1x1x35xf32>
    %1022 = vector.shape_cast %1021 : vector<1x1x35xf32> to vector<1x35xf32>
    %1023 = vector.extract_strided_slice %20 {offsets = [0, 4], sizes = [8, 1], strides = [1, 1]} : vector<8x6xf32> to vector<8x1xf32>
    %1024 = vector.extract_strided_slice %1022 {offsets = [0, 0], sizes = [1, 34], strides = [1, 1]} : vector<1x35xf32> to vector<1x34xf32>
    %1025 = vector.broadcast %1023 : vector<8x1xf32> to vector<8x34xf32>
    %1026 = vector.broadcast %1024 : vector<1x34xf32> to vector<8x34xf32>
    %1027 = arith.mulf %1025, %1026 : vector<8x34xf32>
    %1028 = arith.addf %1020, %1027 : vector<8x34xf32>
    %1029 = vector.extract_strided_slice %20 {offsets = [0, 5], sizes = [8, 1], strides = [1, 1]} : vector<8x6xf32> to vector<8x1xf32>
    %1030 = vector.extract_strided_slice %1022 {offsets = [0, 1], sizes = [1, 34], strides = [1, 1]} : vector<1x35xf32> to vector<1x34xf32>
    %1031 = vector.broadcast %1029 : vector<8x1xf32> to vector<8x34xf32>
    %1032 = vector.broadcast %1030 : vector<1x34xf32> to vector<8x34xf32>
    %1033 = arith.mulf %1031, %1032 : vector<8x34xf32>
    %1034 = arith.addf %1028, %1033 : vector<8x34xf32>
    %1035 = vector.broadcast %21 : vector<8x1xf32> to vector<8x34xf32>
    %1036 = arith.addf %1034, %1035 : vector<8x34xf32>
    %cst_256 = arith.constant 0.000000e+00 : f32
    %1037 = vector.broadcast %cst_256 : f32 to vector<8x34xf32>
    %1038 = arith.cmpf oge, %1036, %1037 : vector<8x34xf32>
    %cst_257 = arith.constant 0.00999999977 : f32
    %1039 = vector.broadcast %cst_257 : f32 to vector<8x34xf32>
    %1040 = arith.mulf %1039, %1036 : vector<8x34xf32>
    %1041 = arith.select %1038, %1036, %1040 : vector<8x34xi1>, vector<8x34xf32>
    %1042 = tpu.concatenate %30, %1041, %30 in 1 : vector<8x1xf32>, vector<8x34xf32>, vector<8x1xf32> -> vector<8x36xf32>
    %1043 = vector.extract_strided_slice %1042 {offsets = [0, 0], sizes = [8, 32], strides = [1, 1]} : vector<8x36xf32> to vector<8x32xf32>
    %1044 = vector.extract_strided_slice %1042 {offsets = [0, 1], sizes = [8, 32], strides = [1, 1]} : vector<8x36xf32> to vector<8x32xf32>
    %1045 = vector.extract_strided_slice %1042 {offsets = [0, 2], sizes = [8, 32], strides = [1, 1]} : vector<8x36xf32> to vector<8x32xf32>
    %1046 = vector.extract_strided_slice %1042 {offsets = [0, 3], sizes = [8, 32], strides = [1, 1]} : vector<8x36xf32> to vector<8x32xf32>
    %1047 = tpu.concatenate %1043, %1044, %1045, %1046 in 0 : vector<8x32xf32>, vector<8x32xf32>, vector<8x32xf32>, vector<8x32xf32> -> vector<32x32xf32>
    %1048 = arith.truncf %1047 : vector<32x32xf32> to vector<32x32xbf16>
    %c19_258 = arith.constant 19 : index
    %c0_259 = arith.constant 0 : index
    %c0_260 = arith.constant 0 : index
    %1049 = vector.load %arg13[%c19_258, %c0_259, %c0_260] : memref<21x32x32xbf16, #tpu.memory_space<vmem>>, vector<1x32x32xbf16>
    %1050 = vector.shape_cast %1049 : vector<1x32x32xbf16> to vector<32x32xbf16>
    %1051 = vector.shape_cast %1048 : vector<32x32xbf16> to vector<1x32x32xbf16>
    tpu.vector_store %arg13[%c19_258, %c0_259, %c0_260], %1051 {strides = array<i32>} : memref<21x32x32xbf16, #tpu.memory_space<vmem>>, vector<1x32x32xbf16>,
    %c0_261 = arith.constant 0 : index
    %c0_262 = arith.constant 0 : index
    %c0_263 = arith.constant 0 : index
    %1052 = vector.load %arg13[%c0_261, %c0_262, %c0_263] : memref<21x32x32xbf16, #tpu.memory_space<vmem>>, vector<1x32x32xbf16>
    %1053 = vector.shape_cast %1052 : vector<1x32x32xbf16> to vector<32x32xbf16>
    %c1_264 = arith.constant 1 : index
    %c0_265 = arith.constant 0 : index
    %c0_266 = arith.constant 0 : index
    %1054 = vector.load %arg13[%c1_264, %c0_265, %c0_266] : memref<21x32x32xbf16, #tpu.memory_space<vmem>>, vector<1x32x32xbf16>
    %1055 = vector.shape_cast %1054 : vector<1x32x32xbf16> to vector<32x32xbf16>
    %c2_267 = arith.constant 2 : index
    %c0_268 = arith.constant 0 : index
    %c0_269 = arith.constant 0 : index
    %1056 = vector.load %arg13[%c2_267, %c0_268, %c0_269] : memref<21x32x32xbf16, #tpu.memory_space<vmem>>, vector<1x32x32xbf16>
    %1057 = vector.shape_cast %1056 : vector<1x32x32xbf16> to vector<32x32xbf16>
    %c3_270 = arith.constant 3 : index
    %c0_271 = arith.constant 0 : index
    %c0_272 = arith.constant 0 : index
    %1058 = vector.load %arg13[%c3_270, %c0_271, %c0_272] : memref<21x32x32xbf16, #tpu.memory_space<vmem>>, vector<1x32x32xbf16>
    %1059 = vector.shape_cast %1058 : vector<1x32x32xbf16> to vector<32x32xbf16>
    %c4_273 = arith.constant 4 : index
    %c0_274 = arith.constant 0 : index
    %c0_275 = arith.constant 0 : index
    %1060 = vector.load %arg13[%c4_273, %c0_274, %c0_275] : memref<21x32x32xbf16, #tpu.memory_space<vmem>>, vector<1x32x32xbf16>
    %1061 = vector.shape_cast %1060 : vector<1x32x32xbf16> to vector<32x32xbf16>
    %c5_276 = arith.constant 5 : index
    %c0_277 = arith.constant 0 : index
    %c0_278 = arith.constant 0 : index
    %1062 = vector.load %arg13[%c5_276, %c0_277, %c0_278] : memref<21x32x32xbf16, #tpu.memory_space<vmem>>, vector<1x32x32xbf16>
    %1063 = vector.shape_cast %1062 : vector<1x32x32xbf16> to vector<32x32xbf16>
    %1064 = tpu.concatenate %1053, %1055, %1057, %1059, %1061, %1063 in 0 : vector<32x32xbf16>, vector<32x32xbf16>, vector<32x32xbf16>, vector<32x32xbf16>, vector<32x32xbf16>, vector<32x32xbf16> -> vector<192x32xbf16>
    %cst_279 = arith.constant dense<0.000000e+00> : vector<32x32xf32>
    %1065 = tpu.matmul %22, %1064, %cst_279 {dimension_numbers = #tpu.dot_dimension_numbers<[1], [0], [0], [1], [0, 0, 1, 1], [], []>} : vector<32x192xbf16>, vector<192x32xbf16>, vector<32x32xf32> -> vector<32x32xf32>
    %1066 = vector.broadcast %23 : vector<32x1xf32> to vector<32x32xf32>
    %1067 = arith.addf %1065, %1066 : vector<32x32xf32>
    %cst_280 = arith.constant 0.000000e+00 : f32
    %1068 = vector.broadcast %cst_280 : f32 to vector<32x32xf32>
    %1069 = arith.cmpf oge, %1067, %1068 : vector<32x32xf32>
    %cst_281 = arith.constant 0.00999999977 : f32
    %1070 = vector.broadcast %cst_281 : f32 to vector<32x32xf32>
    %1071 = arith.mulf %1070, %1067 : vector<32x32xf32>
    %1072 = arith.select %1069, %1067, %1071 : vector<32x32xi1>, vector<32x32xf32>
    %c1_282 = arith.constant 1 : index
    %c0_283 = arith.constant 0 : index
    %c0_284 = arith.constant 0 : index
    %1073 = vector.load %arg13[%c1_282, %c0_283, %c0_284] : memref<21x32x32xbf16, #tpu.memory_space<vmem>>, vector<1x32x32xbf16>
    %1074 = vector.shape_cast %1073 : vector<1x32x32xbf16> to vector<32x32xbf16>
    %c2_285 = arith.constant 2 : index
    %c0_286 = arith.constant 0 : index
    %c0_287 = arith.constant 0 : index
    %1075 = vector.load %arg13[%c2_285, %c0_286, %c0_287] : memref<21x32x32xbf16, #tpu.memory_space<vmem>>, vector<1x32x32xbf16>
    %1076 = vector.shape_cast %1075 : vector<1x32x32xbf16> to vector<32x32xbf16>
    %c3_288 = arith.constant 3 : index
    %c0_289 = arith.constant 0 : index
    %c0_290 = arith.constant 0 : index
    %1077 = vector.load %arg13[%c3_288, %c0_289, %c0_290] : memref<21x32x32xbf16, #tpu.memory_space<vmem>>, vector<1x32x32xbf16>
    %1078 = vector.shape_cast %1077 : vector<1x32x32xbf16> to vector<32x32xbf16>
    %c4_291 = arith.constant 4 : index
    %c0_292 = arith.constant 0 : index
    %c0_293 = arith.constant 0 : index
    %1079 = vector.load %arg13[%c4_291, %c0_292, %c0_293] : memref<21x32x32xbf16, #tpu.memory_space<vmem>>, vector<1x32x32xbf16>
    %1080 = vector.shape_cast %1079 : vector<1x32x32xbf16> to vector<32x32xbf16>
    %c5_294 = arith.constant 5 : index
    %c0_295 = arith.constant 0 : index
    %c0_296 = arith.constant 0 : index
    %1081 = vector.load %arg13[%c5_294, %c0_295, %c0_296] : memref<21x32x32xbf16, #tpu.memory_space<vmem>>, vector<1x32x32xbf16>
    %1082 = vector.shape_cast %1081 : vector<1x32x32xbf16> to vector<32x32xbf16>
    %c6_297 = arith.constant 6 : index
    %c0_298 = arith.constant 0 : index
    %c0_299 = arith.constant 0 : index
    %1083 = vector.load %arg13[%c6_297, %c0_298, %c0_299] : memref<21x32x32xbf16, #tpu.memory_space<vmem>>, vector<1x32x32xbf16>
    %1084 = vector.shape_cast %1083 : vector<1x32x32xbf16> to vector<32x32xbf16>
    %1085 = tpu.concatenate %1074, %1076, %1078, %1080, %1082, %1084 in 0 : vector<32x32xbf16>, vector<32x32xbf16>, vector<32x32xbf16>, vector<32x32xbf16>, vector<32x32xbf16>, vector<32x32xbf16> -> vector<192x32xbf16>
    %cst_300 = arith.constant dense<0.000000e+00> : vector<32x32xf32>
    %1086 = tpu.matmul %22, %1085, %cst_300 {dimension_numbers = #tpu.dot_dimension_numbers<[1], [0], [0], [1], [0, 0, 1, 1], [], []>} : vector<32x192xbf16>, vector<192x32xbf16>, vector<32x32xf32> -> vector<32x32xf32>
    %1087 = vector.broadcast %23 : vector<32x1xf32> to vector<32x32xf32>
    %1088 = arith.addf %1086, %1087 : vector<32x32xf32>
    %cst_301 = arith.constant 0.000000e+00 : f32
    %1089 = vector.broadcast %cst_301 : f32 to vector<32x32xf32>
    %1090 = arith.cmpf oge, %1088, %1089 : vector<32x32xf32>
    %cst_302 = arith.constant 0.00999999977 : f32
    %1091 = vector.broadcast %cst_302 : f32 to vector<32x32xf32>
    %1092 = arith.mulf %1091, %1088 : vector<32x32xf32>
    %1093 = arith.select %1090, %1088, %1092 : vector<32x32xi1>, vector<32x32xf32>
    %1094 = arith.maximumf %1072, %1093 : vector<32x32xf32>
    %c2_303 = arith.constant 2 : index
    %c0_304 = arith.constant 0 : index
    %c0_305 = arith.constant 0 : index
    %1095 = vector.load %arg13[%c2_303, %c0_304, %c0_305] : memref<21x32x32xbf16, #tpu.memory_space<vmem>>, vector<1x32x32xbf16>
    %1096 = vector.shape_cast %1095 : vector<1x32x32xbf16> to vector<32x32xbf16>
    %c3_306 = arith.constant 3 : index
    %c0_307 = arith.constant 0 : index
    %c0_308 = arith.constant 0 : index
    %1097 = vector.load %arg13[%c3_306, %c0_307, %c0_308] : memref<21x32x32xbf16, #tpu.memory_space<vmem>>, vector<1x32x32xbf16>
    %1098 = vector.shape_cast %1097 : vector<1x32x32xbf16> to vector<32x32xbf16>
    %c4_309 = arith.constant 4 : index
    %c0_310 = arith.constant 0 : index
    %c0_311 = arith.constant 0 : index
    %1099 = vector.load %arg13[%c4_309, %c0_310, %c0_311] : memref<21x32x32xbf16, #tpu.memory_space<vmem>>, vector<1x32x32xbf16>
    %1100 = vector.shape_cast %1099 : vector<1x32x32xbf16> to vector<32x32xbf16>
    %c5_312 = arith.constant 5 : index
    %c0_313 = arith.constant 0 : index
    %c0_314 = arith.constant 0 : index
    %1101 = vector.load %arg13[%c5_312, %c0_313, %c0_314] : memref<21x32x32xbf16, #tpu.memory_space<vmem>>, vector<1x32x32xbf16>
    %1102 = vector.shape_cast %1101 : vector<1x32x32xbf16> to vector<32x32xbf16>
    %c6_315 = arith.constant 6 : index
    %c0_316 = arith.constant 0 : index
    %c0_317 = arith.constant 0 : index
    %1103 = vector.load %arg13[%c6_315, %c0_316, %c0_317] : memref<21x32x32xbf16, #tpu.memory_space<vmem>>, vector<1x32x32xbf16>
    %1104 = vector.shape_cast %1103 : vector<1x32x32xbf16> to vector<32x32xbf16>
    %c7_318 = arith.constant 7 : index
    %c0_319 = arith.constant 0 : index
    %c0_320 = arith.constant 0 : index
    %1105 = vector.load %arg13[%c7_318, %c0_319, %c0_320] : memref<21x32x32xbf16, #tpu.memory_space<vmem>>, vector<1x32x32xbf16>
    %1106 = vector.shape_cast %1105 : vector<1x32x32xbf16> to vector<32x32xbf16>
    %1107 = tpu.concatenate %1096, %1098, %1100, %1102, %1104, %1106 in 0 : vector<32x32xbf16>, vector<32x32xbf16>, vector<32x32xbf16>, vector<32x32xbf16>, vector<32x32xbf16>, vector<32x32xbf16> -> vector<192x32xbf16>
    %cst_321 = arith.constant dense<0.000000e+00> : vector<32x32xf32>
    %1108 = tpu.matmul %22, %1107, %cst_321 {dimension_numbers = #tpu.dot_dimension_numbers<[1], [0], [0], [1], [0, 0, 1, 1], [], []>} : vector<32x192xbf16>, vector<192x32xbf16>, vector<32x32xf32> -> vector<32x32xf32>
    %1109 = vector.broadcast %23 : vector<32x1xf32> to vector<32x32xf32>
    %1110 = arith.addf %1108, %1109 : vector<32x32xf32>
    %cst_322 = arith.constant 0.000000e+00 : f32
    %1111 = vector.broadcast %cst_322 : f32 to vector<32x32xf32>
    %1112 = arith.cmpf oge, %1110, %1111 : vector<32x32xf32>
    %cst_323 = arith.constant 0.00999999977 : f32
    %1113 = vector.broadcast %cst_323 : f32 to vector<32x32xf32>
    %1114 = arith.mulf %1113, %1110 : vector<32x32xf32>
    %1115 = arith.select %1112, %1110, %1114 : vector<32x32xi1>, vector<32x32xf32>
    %1116 = arith.maximumf %1094, %1115 : vector<32x32xf32>
    %c3_324 = arith.constant 3 : index
    %c0_325 = arith.constant 0 : index
    %c0_326 = arith.constant 0 : index
    %1117 = vector.load %arg13[%c3_324, %c0_325, %c0_326] : memref<21x32x32xbf16, #tpu.memory_space<vmem>>, vector<1x32x32xbf16>
    %1118 = vector.shape_cast %1117 : vector<1x32x32xbf16> to vector<32x32xbf16>
    %c4_327 = arith.constant 4 : index
    %c0_328 = arith.constant 0 : index
    %c0_329 = arith.constant 0 : index
    %1119 = vector.load %arg13[%c4_327, %c0_328, %c0_329] : memref<21x32x32xbf16, #tpu.memory_space<vmem>>, vector<1x32x32xbf16>
    %1120 = vector.shape_cast %1119 : vector<1x32x32xbf16> to vector<32x32xbf16>
    %c5_330 = arith.constant 5 : index
    %c0_331 = arith.constant 0 : index
    %c0_332 = arith.constant 0 : index
    %1121 = vector.load %arg13[%c5_330, %c0_331, %c0_332] : memref<21x32x32xbf16, #tpu.memory_space<vmem>>, vector<1x32x32xbf16>
    %1122 = vector.shape_cast %1121 : vector<1x32x32xbf16> to vector<32x32xbf16>
    %c6_333 = arith.constant 6 : index
    %c0_334 = arith.constant 0 : index
    %c0_335 = arith.constant 0 : index
    %1123 = vector.load %arg13[%c6_333, %c0_334, %c0_335] : memref<21x32x32xbf16, #tpu.memory_space<vmem>>, vector<1x32x32xbf16>
    %1124 = vector.shape_cast %1123 : vector<1x32x32xbf16> to vector<32x32xbf16>
    %c7_336 = arith.constant 7 : index
    %c0_337 = arith.constant 0 : index
    %c0_338 = arith.constant 0 : index
    %1125 = vector.load %arg13[%c7_336, %c0_337, %c0_338] : memref<21x32x32xbf16, #tpu.memory_space<vmem>>, vector<1x32x32xbf16>
    %1126 = vector.shape_cast %1125 : vector<1x32x32xbf16> to vector<32x32xbf16>
    %c8_339 = arith.constant 8 : index
    %c0_340 = arith.constant 0 : index
    %c0_341 = arith.constant 0 : index
    %1127 = vector.load %arg13[%c8_339, %c0_340, %c0_341] : memref<21x32x32xbf16, #tpu.memory_space<vmem>>, vector<1x32x32xbf16>
    %1128 = vector.shape_cast %1127 : vector<1x32x32xbf16> to vector<32x32xbf16>
    %1129 = tpu.concatenate %1118, %1120, %1122, %1124, %1126, %1128 in 0 : vector<32x32xbf16>, vector<32x32xbf16>, vector<32x32xbf16>, vector<32x32xbf16>, vector<32x32xbf16>, vector<32x32xbf16> -> vector<192x32xbf16>
    %cst_342 = arith.constant dense<0.000000e+00> : vector<32x32xf32>
    %1130 = tpu.matmul %22, %1129, %cst_342 {dimension_numbers = #tpu.dot_dimension_numbers<[1], [0], [0], [1], [0, 0, 1, 1], [], []>} : vector<32x192xbf16>, vector<192x32xbf16>, vector<32x32xf32> -> vector<32x32xf32>
    %1131 = vector.broadcast %23 : vector<32x1xf32> to vector<32x32xf32>
    %1132 = arith.addf %1130, %1131 : vector<32x32xf32>
    %cst_343 = arith.constant 0.000000e+00 : f32
    %1133 = vector.broadcast %cst_343 : f32 to vector<32x32xf32>
    %1134 = arith.cmpf oge, %1132, %1133 : vector<32x32xf32>
    %cst_344 = arith.constant 0.00999999977 : f32
    %1135 = vector.broadcast %cst_344 : f32 to vector<32x32xf32>
    %1136 = arith.mulf %1135, %1132 : vector<32x32xf32>
    %1137 = arith.select %1134, %1132, %1136 : vector<32x32xi1>, vector<32x32xf32>
    %1138 = arith.maximumf %1116, %1137 : vector<32x32xf32>
    %1139 = arith.truncf %1138 : vector<32x32xf32> to vector<32x32xbf16>
    %cst_345 = arith.constant dense<0.000000e+00> : vector<32x16xf32>
    %1140 = tpu.matmul %1139, %26, %cst_345 {dimension_numbers = #tpu.dot_dimension_numbers<[1], [0], [0], [1], [0, 0, 1, 1], [], []>} : vector<32x32xbf16>, vector<32x16xbf16>, vector<32x16xf32> -> vector<32x16xf32>
    %cst_346 = arith.constant dense<0.000000e+00> : vector<32x16xf32>
    %1141 = tpu.matmul %1139, %27, %cst_346 {dimension_numbers = #tpu.dot_dimension_numbers<[1], [0], [0], [1], [0, 0, 1, 1], [], []>} : vector<32x32xbf16>, vector<32x16xbf16>, vector<32x16xf32> -> vector<32x16xf32>
    %1142 = arith.maximumf %1140, %1141 : vector<32x16xf32>
    %1143 = tpu.concatenate %31, %1142, %31 in 1 : vector<32x1xf32>, vector<32x16xf32>, vector<32x1xf32> -> vector<32x18xf32>
    %1144 = vector.extract_strided_slice %1143 {offsets = [0, 0], sizes = [32, 16], strides = [1, 1]} : vector<32x18xf32> to vector<32x16xf32>
    %1145 = vector.extract_strided_slice %1143 {offsets = [0, 1], sizes = [32, 16], strides = [1, 1]} : vector<32x18xf32> to vector<32x16xf32>
    %1146 = vector.extract_strided_slice %1143 {offsets = [0, 2], sizes = [32, 16], strides = [1, 1]} : vector<32x18xf32> to vector<32x16xf32>
    %1147 = tpu.concatenate %1144, %1145, %1146 in 0 : vector<32x16xf32>, vector<32x16xf32>, vector<32x16xf32> -> vector<96x16xf32>
    %1148 = arith.truncf %1147 : vector<96x16xf32> to vector<96x16xbf16>
    %c1_347 = arith.constant 1 : index
    %c0_348 = arith.constant 0 : index
    %c0_349 = arith.constant 0 : index
    %1149 = vector.load %arg14[%c1_347, %c0_348, %c0_349] : memref<6x96x16xbf16, #tpu.memory_space<vmem>>, vector<1x96x16xbf16>
    %1150 = vector.shape_cast %1149 : vector<1x96x16xbf16> to vector<96x16xbf16>
    %1151 = vector.shape_cast %1148 : vector<96x16xbf16> to vector<1x96x16xbf16>
    tpu.vector_store %arg14[%c1_347, %c0_348, %c0_349], %1151 {strides = array<i32>} : memref<6x96x16xbf16, #tpu.memory_space<vmem>>, vector<1x96x16xbf16>,
    %c4_350 = arith.constant 4 : index
    %c0_351 = arith.constant 0 : index
    %c0_352 = arith.constant 0 : index
    %1152 = vector.load %arg13[%c4_350, %c0_351, %c0_352] : memref<21x32x32xbf16, #tpu.memory_space<vmem>>, vector<1x32x32xbf16>
    %1153 = vector.shape_cast %1152 : vector<1x32x32xbf16> to vector<32x32xbf16>
    %c5_353 = arith.constant 5 : index
    %c0_354 = arith.constant 0 : index
    %c0_355 = arith.constant 0 : index
    %1154 = vector.load %arg13[%c5_353, %c0_354, %c0_355] : memref<21x32x32xbf16, #tpu.memory_space<vmem>>, vector<1x32x32xbf16>
    %1155 = vector.shape_cast %1154 : vector<1x32x32xbf16> to vector<32x32xbf16>
    %c6_356 = arith.constant 6 : index
    %c0_357 = arith.constant 0 : index
    %c0_358 = arith.constant 0 : index
    %1156 = vector.load %arg13[%c6_356, %c0_357, %c0_358] : memref<21x32x32xbf16, #tpu.memory_space<vmem>>, vector<1x32x32xbf16>
    %1157 = vector.shape_cast %1156 : vector<1x32x32xbf16> to vector<32x32xbf16>
    %c7_359 = arith.constant 7 : index
    %c0_360 = arith.constant 0 : index
    %c0_361 = arith.constant 0 : index
    %1158 = vector.load %arg13[%c7_359, %c0_360, %c0_361] : memref<21x32x32xbf16, #tpu.memory_space<vmem>>, vector<1x32x32xbf16>
    %1159 = vector.shape_cast %1158 : vector<1x32x32xbf16> to vector<32x32xbf16>
    %c8_362 = arith.constant 8 : index
    %c0_363 = arith.constant 0 : index
    %c0_364 = arith.constant 0 : index
    %1160 = vector.load %arg13[%c8_362, %c0_363, %c0_364] : memref<21x32x32xbf16, #tpu.memory_space<vmem>>, vector<1x32x32xbf16>
    %1161 = vector.shape_cast %1160 : vector<1x32x32xbf16> to vector<32x32xbf16>
    %c9_365 = arith.constant 9 : index
    %c0_366 = arith.constant 0 : index
    %c0_367 = arith.constant 0 : index
    %1162 = vector.load %arg13[%c9_365, %c0_366, %c0_367] : memref<21x32x32xbf16, #tpu.memory_space<vmem>>, vector<1x32x32xbf16>
    %1163 = vector.shape_cast %1162 : vector<1x32x32xbf16> to vector<32x32xbf16>
    %1164 = tpu.concatenate %1153, %1155, %1157, %1159, %1161, %1163 in 0 : vector<32x32xbf16>, vector<32x32xbf16>, vector<32x32xbf16>, vector<32x32xbf16>, vector<32x32xbf16>, vector<32x32xbf16> -> vector<192x32xbf16>
    %cst_368 = arith.constant dense<0.000000e+00> : vector<32x32xf32>
    %1165 = tpu.matmul %22, %1164, %cst_368 {dimension_numbers = #tpu.dot_dimension_numbers<[1], [0], [0], [1], [0, 0, 1, 1], [], []>} : vector<32x192xbf16>, vector<192x32xbf16>, vector<32x32xf32> -> vector<32x32xf32>
    %1166 = vector.broadcast %23 : vector<32x1xf32> to vector<32x32xf32>
    %1167 = arith.addf %1165, %1166 : vector<32x32xf32>
    %cst_369 = arith.constant 0.000000e+00 : f32
    %1168 = vector.broadcast %cst_369 : f32 to vector<32x32xf32>
    %1169 = arith.cmpf oge, %1167, %1168 : vector<32x32xf32>
    %cst_370 = arith.constant 0.00999999977 : f32
    %1170 = vector.broadcast %cst_370 : f32 to vector<32x32xf32>
    %1171 = arith.mulf %1170, %1167 : vector<32x32xf32>
    %1172 = arith.select %1169, %1167, %1171 : vector<32x32xi1>, vector<32x32xf32>
    %c5_371 = arith.constant 5 : index
    %c0_372 = arith.constant 0 : index
    %c0_373 = arith.constant 0 : index
    %1173 = vector.load %arg13[%c5_371, %c0_372, %c0_373] : memref<21x32x32xbf16, #tpu.memory_space<vmem>>, vector<1x32x32xbf16>
    %1174 = vector.shape_cast %1173 : vector<1x32x32xbf16> to vector<32x32xbf16>
    %c6_374 = arith.constant 6 : index
    %c0_375 = arith.constant 0 : index
    %c0_376 = arith.constant 0 : index
    %1175 = vector.load %arg13[%c6_374, %c0_375, %c0_376] : memref<21x32x32xbf16, #tpu.memory_space<vmem>>, vector<1x32x32xbf16>
    %1176 = vector.shape_cast %1175 : vector<1x32x32xbf16> to vector<32x32xbf16>
    %c7_377 = arith.constant 7 : index
    %c0_378 = arith.constant 0 : index
    %c0_379 = arith.constant 0 : index
    %1177 = vector.load %arg13[%c7_377, %c0_378, %c0_379] : memref<21x32x32xbf16, #tpu.memory_space<vmem>>, vector<1x32x32xbf16>
    %1178 = vector.shape_cast %1177 : vector<1x32x32xbf16> to vector<32x32xbf16>
    %c8_380 = arith.constant 8 : index
    %c0_381 = arith.constant 0 : index
    %c0_382 = arith.constant 0 : index
    %1179 = vector.load %arg13[%c8_380, %c0_381, %c0_382] : memref<21x32x32xbf16, #tpu.memory_space<vmem>>, vector<1x32x32xbf16>
    %1180 = vector.shape_cast %1179 : vector<1x32x32xbf16> to vector<32x32xbf16>
    %c9_383 = arith.constant 9 : index
    %c0_384 = arith.constant 0 : index
    %c0_385 = arith.constant 0 : index
    %1181 = vector.load %arg13[%c9_383, %c0_384, %c0_385] : memref<21x32x32xbf16, #tpu.memory_space<vmem>>, vector<1x32x32xbf16>
    %1182 = vector.shape_cast %1181 : vector<1x32x32xbf16> to vector<32x32xbf16>
    %c10_386 = arith.constant 10 : index
    %c0_387 = arith.constant 0 : index
    %c0_388 = arith.constant 0 : index
    %1183 = vector.load %arg13[%c10_386, %c0_387, %c0_388] : memref<21x32x32xbf16, #tpu.memory_space<vmem>>, vector<1x32x32xbf16>
    %1184 = vector.shape_cast %1183 : vector<1x32x32xbf16> to vector<32x32xbf16>
    %1185 = tpu.concatenate %1174, %1176, %1178, %1180, %1182, %1184 in 0 : vector<32x32xbf16>, vector<32x32xbf16>, vector<32x32xbf16>, vector<32x32xbf16>, vector<32x32xbf16>, vector<32x32xbf16> -> vector<192x32xbf16>
    %cst_389 = arith.constant dense<0.000000e+00> : vector<32x32xf32>
    %1186 = tpu.matmul %22, %1185, %cst_389 {dimension_numbers = #tpu.dot_dimension_numbers<[1], [0], [0], [1], [0, 0, 1, 1], [], []>} : vector<32x192xbf16>, vector<192x32xbf16>, vector<32x32xf32> -> vector<32x32xf32>
    %1187 = vector.broadcast %23 : vector<32x1xf32> to vector<32x32xf32>
    %1188 = arith.addf %1186, %1187 : vector<32x32xf32>
    %cst_390 = arith.constant 0.000000e+00 : f32
    %1189 = vector.broadcast %cst_390 : f32 to vector<32x32xf32>
    %1190 = arith.cmpf oge, %1188, %1189 : vector<32x32xf32>
    %cst_391 = arith.constant 0.00999999977 : f32
    %1191 = vector.broadcast %cst_391 : f32 to vector<32x32xf32>
    %1192 = arith.mulf %1191, %1188 : vector<32x32xf32>
    %1193 = arith.select %1190, %1188, %1192 : vector<32x32xi1>, vector<32x32xf32>
    %1194 = arith.maximumf %1172, %1193 : vector<32x32xf32>
    %c6_392 = arith.constant 6 : index
    %c0_393 = arith.constant 0 : index
    %c0_394 = arith.constant 0 : index
    %1195 = vector.load %arg13[%c6_392, %c0_393, %c0_394] : memref<21x32x32xbf16, #tpu.memory_space<vmem>>, vector<1x32x32xbf16>
    %1196 = vector.shape_cast %1195 : vector<1x32x32xbf16> to vector<32x32xbf16>
    %c7_395 = arith.constant 7 : index
    %c0_396 = arith.constant 0 : index
    %c0_397 = arith.constant 0 : index
    %1197 = vector.load %arg13[%c7_395, %c0_396, %c0_397] : memref<21x32x32xbf16, #tpu.memory_space<vmem>>, vector<1x32x32xbf16>
    %1198 = vector.shape_cast %1197 : vector<1x32x32xbf16> to vector<32x32xbf16>
    %c8_398 = arith.constant 8 : index
    %c0_399 = arith.constant 0 : index
    %c0_400 = arith.constant 0 : index
    %1199 = vector.load %arg13[%c8_398, %c0_399, %c0_400] : memref<21x32x32xbf16, #tpu.memory_space<vmem>>, vector<1x32x32xbf16>
    %1200 = vector.shape_cast %1199 : vector<1x32x32xbf16> to vector<32x32xbf16>
    %c9_401 = arith.constant 9 : index
    %c0_402 = arith.constant 0 : index
    %c0_403 = arith.constant 0 : index
    %1201 = vector.load %arg13[%c9_401, %c0_402, %c0_403] : memref<21x32x32xbf16, #tpu.memory_space<vmem>>, vector<1x32x32xbf16>
    %1202 = vector.shape_cast %1201 : vector<1x32x32xbf16> to vector<32x32xbf16>
    %c10_404 = arith.constant 10 : index
    %c0_405 = arith.constant 0 : index
    %c0_406 = arith.constant 0 : index
    %1203 = vector.load %arg13[%c10_404, %c0_405, %c0_406] : memref<21x32x32xbf16, #tpu.memory_space<vmem>>, vector<1x32x32xbf16>
    %1204 = vector.shape_cast %1203 : vector<1x32x32xbf16> to vector<32x32xbf16>
    %c11_407 = arith.constant 11 : index
    %c0_408 = arith.constant 0 : index
    %c0_409 = arith.constant 0 : index
    %1205 = vector.load %arg13[%c11_407, %c0_408, %c0_409] : memref<21x32x32xbf16, #tpu.memory_space<vmem>>, vector<1x32x32xbf16>
    %1206 = vector.shape_cast %1205 : vector<1x32x32xbf16> to vector<32x32xbf16>
    %1207 = tpu.concatenate %1196, %1198, %1200, %1202, %1204, %1206 in 0 : vector<32x32xbf16>, vector<32x32xbf16>, vector<32x32xbf16>, vector<32x32xbf16>, vector<32x32xbf16>, vector<32x32xbf16> -> vector<192x32xbf16>
    %cst_410 = arith.constant dense<0.000000e+00> : vector<32x32xf32>
    %1208 = tpu.matmul %22, %1207, %cst_410 {dimension_numbers = #tpu.dot_dimension_numbers<[1], [0], [0], [1], [0, 0, 1, 1], [], []>} : vector<32x192xbf16>, vector<192x32xbf16>, vector<32x32xf32> -> vector<32x32xf32>
    %1209 = vector.broadcast %23 : vector<32x1xf32> to vector<32x32xf32>
    %1210 = arith.addf %1208, %1209 : vector<32x32xf32>
    %cst_411 = arith.constant 0.000000e+00 : f32
    %1211 = vector.broadcast %cst_411 : f32 to vector<32x32xf32>
    %1212 = arith.cmpf oge, %1210, %1211 : vector<32x32xf32>
    %cst_412 = arith.constant 0.00999999977 : f32
    %1213 = vector.broadcast %cst_412 : f32 to vector<32x32xf32>
    %1214 = arith.mulf %1213, %1210 : vector<32x32xf32>
    %1215 = arith.select %1212, %1210, %1214 : vector<32x32xi1>, vector<32x32xf32>
    %1216 = arith.maximumf %1194, %1215 : vector<32x32xf32>
    %c7_413 = arith.constant 7 : index
    %c0_414 = arith.constant 0 : index
    %c0_415 = arith.constant 0 : index
    %1217 = vector.load %arg13[%c7_413, %c0_414, %c0_415] : memref<21x32x32xbf16, #tpu.memory_space<vmem>>, vector<1x32x32xbf16>
    %1218 = vector.shape_cast %1217 : vector<1x32x32xbf16> to vector<32x32xbf16>
    %c8_416 = arith.constant 8 : index
    %c0_417 = arith.constant 0 : index
    %c0_418 = arith.constant 0 : index
    %1219 = vector.load %arg13[%c8_416, %c0_417, %c0_418] : memref<21x32x32xbf16, #tpu.memory_space<vmem>>, vector<1x32x32xbf16>
    %1220 = vector.shape_cast %1219 : vector<1x32x32xbf16> to vector<32x32xbf16>
    %c9_419 = arith.constant 9 : index
    %c0_420 = arith.constant 0 : index
    %c0_421 = arith.constant 0 : index
    %1221 = vector.load %arg13[%c9_419, %c0_420, %c0_421] : memref<21x32x32xbf16, #tpu.memory_space<vmem>>, vector<1x32x32xbf16>
    %1222 = vector.shape_cast %1221 : vector<1x32x32xbf16> to vector<32x32xbf16>
    %c10_422 = arith.constant 10 : index
    %c0_423 = arith.constant 0 : index
    %c0_424 = arith.constant 0 : index
    %1223 = vector.load %arg13[%c10_422, %c0_423, %c0_424] : memref<21x32x32xbf16, #tpu.memory_space<vmem>>, vector<1x32x32xbf16>
    %1224 = vector.shape_cast %1223 : vector<1x32x32xbf16> to vector<32x32xbf16>
    %c11_425 = arith.constant 11 : index
    %c0_426 = arith.constant 0 : index
    %c0_427 = arith.constant 0 : index
    %1225 = vector.load %arg13[%c11_425, %c0_426, %c0_427] : memref<21x32x32xbf16, #tpu.memory_space<vmem>>, vector<1x32x32xbf16>
    %1226 = vector.shape_cast %1225 : vector<1x32x32xbf16> to vector<32x32xbf16>
    %c12_428 = arith.constant 12 : index
    %c0_429 = arith.constant 0 : index
    %c0_430 = arith.constant 0 : index
    %1227 = vector.load %arg13[%c12_428, %c0_429, %c0_430] : memref<21x32x32xbf16, #tpu.memory_space<vmem>>, vector<1x32x32xbf16>
    %1228 = vector.shape_cast %1227 : vector<1x32x32xbf16> to vector<32x32xbf16>
    %1229 = tpu.concatenate %1218, %1220, %1222, %1224, %1226, %1228 in 0 : vector<32x32xbf16>, vector<32x32xbf16>, vector<32x32xbf16>, vector<32x32xbf16>, vector<32x32xbf16>, vector<32x32xbf16> -> vector<192x32xbf16>
    %cst_431 = arith.constant dense<0.000000e+00> : vector<32x32xf32>
    %1230 = tpu.matmul %22, %1229, %cst_431 {dimension_numbers = #tpu.dot_dimension_numbers<[1], [0], [0], [1], [0, 0, 1, 1], [], []>} : vector<32x192xbf16>, vector<192x32xbf16>, vector<32x32xf32> -> vector<32x32xf32>
    %1231 = vector.broadcast %23 : vector<32x1xf32> to vector<32x32xf32>
    %1232 = arith.addf %1230, %1231 : vector<32x32xf32>
    %cst_432 = arith.constant 0.000000e+00 : f32
    %1233 = vector.broadcast %cst_432 : f32 to vector<32x32xf32>
    %1234 = arith.cmpf oge, %1232, %1233 : vector<32x32xf32>
    %cst_433 = arith.constant 0.00999999977 : f32
    %1235 = vector.broadcast %cst_433 : f32 to vector<32x32xf32>
    %1236 = arith.mulf %1235, %1232 : vector<32x32xf32>
    %1237 = arith.select %1234, %1232, %1236 : vector<32x32xi1>, vector<32x32xf32>
    %1238 = arith.maximumf %1216, %1237 : vector<32x32xf32>
    %1239 = arith.truncf %1238 : vector<32x32xf32> to vector<32x32xbf16>
    %cst_434 = arith.constant dense<0.000000e+00> : vector<32x16xf32>
    %1240 = tpu.matmul %1239, %26, %cst_434 {dimension_numbers = #tpu.dot_dimension_numbers<[1], [0], [0], [1], [0, 0, 1, 1], [], []>} : vector<32x32xbf16>, vector<32x16xbf16>, vector<32x16xf32> -> vector<32x16xf32>
    %cst_435 = arith.constant dense<0.000000e+00> : vector<32x16xf32>
    %1241 = tpu.matmul %1239, %27, %cst_435 {dimension_numbers = #tpu.dot_dimension_numbers<[1], [0], [0], [1], [0, 0, 1, 1], [], []>} : vector<32x32xbf16>, vector<32x16xbf16>, vector<32x16xf32> -> vector<32x16xf32>
    %1242 = arith.maximumf %1240, %1241 : vector<32x16xf32>
    %1243 = tpu.concatenate %31, %1242, %31 in 1 : vector<32x1xf32>, vector<32x16xf32>, vector<32x1xf32> -> vector<32x18xf32>
    %1244 = vector.extract_strided_slice %1243 {offsets = [0, 0], sizes = [32, 16], strides = [1, 1]} : vector<32x18xf32> to vector<32x16xf32>
    %1245 = vector.extract_strided_slice %1243 {offsets = [0, 1], sizes = [32, 16], strides = [1, 1]} : vector<32x18xf32> to vector<32x16xf32>
    %1246 = vector.extract_strided_slice %1243 {offsets = [0, 2], sizes = [32, 16], strides = [1, 1]} : vector<32x18xf32> to vector<32x16xf32>
    %1247 = tpu.concatenate %1244, %1245, %1246 in 0 : vector<32x16xf32>, vector<32x16xf32>, vector<32x16xf32> -> vector<96x16xf32>
    %1248 = arith.truncf %1247 : vector<96x16xf32> to vector<96x16xbf16>
    %c2_436 = arith.constant 2 : index
    %c0_437 = arith.constant 0 : index
    %c0_438 = arith.constant 0 : index
    %1249 = vector.load %arg14[%c2_436, %c0_437, %c0_438] : memref<6x96x16xbf16, #tpu.memory_space<vmem>>, vector<1x96x16xbf16>
    %1250 = vector.shape_cast %1249 : vector<1x96x16xbf16> to vector<96x16xbf16>
    %1251 = vector.shape_cast %1248 : vector<96x16xbf16> to vector<1x96x16xbf16>
    tpu.vector_store %arg14[%c2_436, %c0_437, %c0_438], %1251 {strides = array<i32>} : memref<6x96x16xbf16, #tpu.memory_space<vmem>>, vector<1x96x16xbf16>,
    %c8_439 = arith.constant 8 : index
    %c0_440 = arith.constant 0 : index
    %c0_441 = arith.constant 0 : index
    %1252 = vector.load %arg13[%c8_439, %c0_440, %c0_441] : memref<21x32x32xbf16, #tpu.memory_space<vmem>>, vector<1x32x32xbf16>
    %1253 = vector.shape_cast %1252 : vector<1x32x32xbf16> to vector<32x32xbf16>
    %c9_442 = arith.constant 9 : index
    %c0_443 = arith.constant 0 : index
    %c0_444 = arith.constant 0 : index
    %1254 = vector.load %arg13[%c9_442, %c0_443, %c0_444] : memref<21x32x32xbf16, #tpu.memory_space<vmem>>, vector<1x32x32xbf16>
    %1255 = vector.shape_cast %1254 : vector<1x32x32xbf16> to vector<32x32xbf16>
    %c10_445 = arith.constant 10 : index
    %c0_446 = arith.constant 0 : index
    %c0_447 = arith.constant 0 : index
    %1256 = vector.load %arg13[%c10_445, %c0_446, %c0_447] : memref<21x32x32xbf16, #tpu.memory_space<vmem>>, vector<1x32x32xbf16>
    %1257 = vector.shape_cast %1256 : vector<1x32x32xbf16> to vector<32x32xbf16>
    %c11_448 = arith.constant 11 : index
    %c0_449 = arith.constant 0 : index
    %c0_450 = arith.constant 0 : index
    %1258 = vector.load %arg13[%c11_448, %c0_449, %c0_450] : memref<21x32x32xbf16, #tpu.memory_space<vmem>>, vector<1x32x32xbf16>
    %1259 = vector.shape_cast %1258 : vector<1x32x32xbf16> to vector<32x32xbf16>
    %c12_451 = arith.constant 12 : index
    %c0_452 = arith.constant 0 : index
    %c0_453 = arith.constant 0 : index
    %1260 = vector.load %arg13[%c12_451, %c0_452, %c0_453] : memref<21x32x32xbf16, #tpu.memory_space<vmem>>, vector<1x32x32xbf16>
    %1261 = vector.shape_cast %1260 : vector<1x32x32xbf16> to vector<32x32xbf16>
    %c13_454 = arith.constant 13 : index
    %c0_455 = arith.constant 0 : index
    %c0_456 = arith.constant 0 : index
    %1262 = vector.load %arg13[%c13_454, %c0_455, %c0_456] : memref<21x32x32xbf16, #tpu.memory_space<vmem>>, vector<1x32x32xbf16>
    %1263 = vector.shape_cast %1262 : vector<1x32x32xbf16> to vector<32x32xbf16>
    %1264 = tpu.concatenate %1253, %1255, %1257, %1259, %1261, %1263 in 0 : vector<32x32xbf16>, vector<32x32xbf16>, vector<32x32xbf16>, vector<32x32xbf16>, vector<32x32xbf16>, vector<32x32xbf16> -> vector<192x32xbf16>
    %cst_457 = arith.constant dense<0.000000e+00> : vector<32x32xf32>
    %1265 = tpu.matmul %22, %1264, %cst_457 {dimension_numbers = #tpu.dot_dimension_numbers<[1], [0], [0], [1], [0, 0, 1, 1], [], []>} : vector<32x192xbf16>, vector<192x32xbf16>, vector<32x32xf32> -> vector<32x32xf32>
    %1266 = vector.broadcast %23 : vector<32x1xf32> to vector<32x32xf32>
    %1267 = arith.addf %1265, %1266 : vector<32x32xf32>
    %cst_458 = arith.constant 0.000000e+00 : f32
    %1268 = vector.broadcast %cst_458 : f32 to vector<32x32xf32>
    %1269 = arith.cmpf oge, %1267, %1268 : vector<32x32xf32>
    %cst_459 = arith.constant 0.00999999977 : f32
    %1270 = vector.broadcast %cst_459 : f32 to vector<32x32xf32>
    %1271 = arith.mulf %1270, %1267 : vector<32x32xf32>
    %1272 = arith.select %1269, %1267, %1271 : vector<32x32xi1>, vector<32x32xf32>
    %c9_460 = arith.constant 9 : index
    %c0_461 = arith.constant 0 : index
    %c0_462 = arith.constant 0 : index
    %1273 = vector.load %arg13[%c9_460, %c0_461, %c0_462] : memref<21x32x32xbf16, #tpu.memory_space<vmem>>, vector<1x32x32xbf16>
    %1274 = vector.shape_cast %1273 : vector<1x32x32xbf16> to vector<32x32xbf16>
    %c10_463 = arith.constant 10 : index
    %c0_464 = arith.constant 0 : index
    %c0_465 = arith.constant 0 : index
    %1275 = vector.load %arg13[%c10_463, %c0_464, %c0_465] : memref<21x32x32xbf16, #tpu.memory_space<vmem>>, vector<1x32x32xbf16>
    %1276 = vector.shape_cast %1275 : vector<1x32x32xbf16> to vector<32x32xbf16>
    %c11_466 = arith.constant 11 : index
    %c0_467 = arith.constant 0 : index
    %c0_468 = arith.constant 0 : index
    %1277 = vector.load %arg13[%c11_466, %c0_467, %c0_468] : memref<21x32x32xbf16, #tpu.memory_space<vmem>>, vector<1x32x32xbf16>
    %1278 = vector.shape_cast %1277 : vector<1x32x32xbf16> to vector<32x32xbf16>
    %c12_469 = arith.constant 12 : index
    %c0_470 = arith.constant 0 : index
    %c0_471 = arith.constant 0 : index
    %1279 = vector.load %arg13[%c12_469, %c0_470, %c0_471] : memref<21x32x32xbf16, #tpu.memory_space<vmem>>, vector<1x32x32xbf16>
    %1280 = vector.shape_cast %1279 : vector<1x32x32xbf16> to vector<32x32xbf16>
    %c13_472 = arith.constant 13 : index
    %c0_473 = arith.constant 0 : index
    %c0_474 = arith.constant 0 : index
    %1281 = vector.load %arg13[%c13_472, %c0_473, %c0_474] : memref<21x32x32xbf16, #tpu.memory_space<vmem>>, vector<1x32x32xbf16>
    %1282 = vector.shape_cast %1281 : vector<1x32x32xbf16> to vector<32x32xbf16>
    %c14_475 = arith.constant 14 : index
    %c0_476 = arith.constant 0 : index
    %c0_477 = arith.constant 0 : index
    %1283 = vector.load %arg13[%c14_475, %c0_476, %c0_477] : memref<21x32x32xbf16, #tpu.memory_space<vmem>>, vector<1x32x32xbf16>
    %1284 = vector.shape_cast %1283 : vector<1x32x32xbf16> to vector<32x32xbf16>
    %1285 = tpu.concatenate %1274, %1276, %1278, %1280, %1282, %1284 in 0 : vector<32x32xbf16>, vector<32x32xbf16>, vector<32x32xbf16>, vector<32x32xbf16>, vector<32x32xbf16>, vector<32x32xbf16> -> vector<192x32xbf16>
    %cst_478 = arith.constant dense<0.000000e+00> : vector<32x32xf32>
    %1286 = tpu.matmul %22, %1285, %cst_478 {dimension_numbers = #tpu.dot_dimension_numbers<[1], [0], [0], [1], [0, 0, 1, 1], [], []>} : vector<32x192xbf16>, vector<192x32xbf16>, vector<32x32xf32> -> vector<32x32xf32>
    %1287 = vector.broadcast %23 : vector<32x1xf32> to vector<32x32xf32>
    %1288 = arith.addf %1286, %1287 : vector<32x32xf32>
    %cst_479 = arith.constant 0.000000e+00 : f32
    %1289 = vector.broadcast %cst_479 : f32 to vector<32x32xf32>
    %1290 = arith.cmpf oge, %1288, %1289 : vector<32x32xf32>
    %cst_480 = arith.constant 0.00999999977 : f32
    %1291 = vector.broadcast %cst_480 : f32 to vector<32x32xf32>
    %1292 = arith.mulf %1291, %1288 : vector<32x32xf32>
    %1293 = arith.select %1290, %1288, %1292 : vector<32x32xi1>, vector<32x32xf32>
    %1294 = arith.maximumf %1272, %1293 : vector<32x32xf32>
    %c10_481 = arith.constant 10 : index
    %c0_482 = arith.constant 0 : index
    %c0_483 = arith.constant 0 : index
    %1295 = vector.load %arg13[%c10_481, %c0_482, %c0_483] : memref<21x32x32xbf16, #tpu.memory_space<vmem>>, vector<1x32x32xbf16>
    %1296 = vector.shape_cast %1295 : vector<1x32x32xbf16> to vector<32x32xbf16>
    %c11_484 = arith.constant 11 : index
    %c0_485 = arith.constant 0 : index
    %c0_486 = arith.constant 0 : index
    %1297 = vector.load %arg13[%c11_484, %c0_485, %c0_486] : memref<21x32x32xbf16, #tpu.memory_space<vmem>>, vector<1x32x32xbf16>
    %1298 = vector.shape_cast %1297 : vector<1x32x32xbf16> to vector<32x32xbf16>
    %c12_487 = arith.constant 12 : index
    %c0_488 = arith.constant 0 : index
    %c0_489 = arith.constant 0 : index
    %1299 = vector.load %arg13[%c12_487, %c0_488, %c0_489] : memref<21x32x32xbf16, #tpu.memory_space<vmem>>, vector<1x32x32xbf16>
    %1300 = vector.shape_cast %1299 : vector<1x32x32xbf16> to vector<32x32xbf16>
    %c13_490 = arith.constant 13 : index
    %c0_491 = arith.constant 0 : index
    %c0_492 = arith.constant 0 : index
    %1301 = vector.load %arg13[%c13_490, %c0_491, %c0_492] : memref<21x32x32xbf16, #tpu.memory_space<vmem>>, vector<1x32x32xbf16>
    %1302 = vector.shape_cast %1301 : vector<1x32x32xbf16> to vector<32x32xbf16>
    %c14_493 = arith.constant 14 : index
    %c0_494 = arith.constant 0 : index
    %c0_495 = arith.constant 0 : index
    %1303 = vector.load %arg13[%c14_493, %c0_494, %c0_495] : memref<21x32x32xbf16, #tpu.memory_space<vmem>>, vector<1x32x32xbf16>
    %1304 = vector.shape_cast %1303 : vector<1x32x32xbf16> to vector<32x32xbf16>
    %c15_496 = arith.constant 15 : index
    %c0_497 = arith.constant 0 : index
    %c0_498 = arith.constant 0 : index
    %1305 = vector.load %arg13[%c15_496, %c0_497, %c0_498] : memref<21x32x32xbf16, #tpu.memory_space<vmem>>, vector<1x32x32xbf16>
    %1306 = vector.shape_cast %1305 : vector<1x32x32xbf16> to vector<32x32xbf16>
    %1307 = tpu.concatenate %1296, %1298, %1300, %1302, %1304, %1306 in 0 : vector<32x32xbf16>, vector<32x32xbf16>, vector<32x32xbf16>, vector<32x32xbf16>, vector<32x32xbf16>, vector<32x32xbf16> -> vector<192x32xbf16>
    %cst_499 = arith.constant dense<0.000000e+00> : vector<32x32xf32>
    %1308 = tpu.matmul %22, %1307, %cst_499 {dimension_numbers = #tpu.dot_dimension_numbers<[1], [0], [0], [1], [0, 0, 1, 1], [], []>} : vector<32x192xbf16>, vector<192x32xbf16>, vector<32x32xf32> -> vector<32x32xf32>
    %1309 = vector.broadcast %23 : vector<32x1xf32> to vector<32x32xf32>
    %1310 = arith.addf %1308, %1309 : vector<32x32xf32>
    %cst_500 = arith.constant 0.000000e+00 : f32
    %1311 = vector.broadcast %cst_500 : f32 to vector<32x32xf32>
    %1312 = arith.cmpf oge, %1310, %1311 : vector<32x32xf32>
    %cst_501 = arith.constant 0.00999999977 : f32
    %1313 = vector.broadcast %cst_501 : f32 to vector<32x32xf32>
    %1314 = arith.mulf %1313, %1310 : vector<32x32xf32>
    %1315 = arith.select %1312, %1310, %1314 : vector<32x32xi1>, vector<32x32xf32>
    %1316 = arith.maximumf %1294, %1315 : vector<32x32xf32>
    %c11_502 = arith.constant 11 : index
    %c0_503 = arith.constant 0 : index
    %c0_504 = arith.constant 0 : index
    %1317 = vector.load %arg13[%c11_502, %c0_503, %c0_504] : memref<21x32x32xbf16, #tpu.memory_space<vmem>>, vector<1x32x32xbf16>
    %1318 = vector.shape_cast %1317 : vector<1x32x32xbf16> to vector<32x32xbf16>
    %c12_505 = arith.constant 12 : index
    %c0_506 = arith.constant 0 : index
    %c0_507 = arith.constant 0 : index
    %1319 = vector.load %arg13[%c12_505, %c0_506, %c0_507] : memref<21x32x32xbf16, #tpu.memory_space<vmem>>, vector<1x32x32xbf16>
    %1320 = vector.shape_cast %1319 : vector<1x32x32xbf16> to vector<32x32xbf16>
    %c13_508 = arith.constant 13 : index
    %c0_509 = arith.constant 0 : index
    %c0_510 = arith.constant 0 : index
    %1321 = vector.load %arg13[%c13_508, %c0_509, %c0_510] : memref<21x32x32xbf16, #tpu.memory_space<vmem>>, vector<1x32x32xbf16>
    %1322 = vector.shape_cast %1321 : vector<1x32x32xbf16> to vector<32x32xbf16>
    %c14_511 = arith.constant 14 : index
    %c0_512 = arith.constant 0 : index
    %c0_513 = arith.constant 0 : index
    %1323 = vector.load %arg13[%c14_511, %c0_512, %c0_513] : memref<21x32x32xbf16, #tpu.memory_space<vmem>>, vector<1x32x32xbf16>
    %1324 = vector.shape_cast %1323 : vector<1x32x32xbf16> to vector<32x32xbf16>
    %c15_514 = arith.constant 15 : index
    %c0_515 = arith.constant 0 : index
    %c0_516 = arith.constant 0 : index
    %1325 = vector.load %arg13[%c15_514, %c0_515, %c0_516] : memref<21x32x32xbf16, #tpu.memory_space<vmem>>, vector<1x32x32xbf16>
    %1326 = vector.shape_cast %1325 : vector<1x32x32xbf16> to vector<32x32xbf16>
    %c16_517 = arith.constant 16 : index
    %c0_518 = arith.constant 0 : index
    %c0_519 = arith.constant 0 : index
    %1327 = vector.load %arg13[%c16_517, %c0_518, %c0_519] : memref<21x32x32xbf16, #tpu.memory_space<vmem>>, vector<1x32x32xbf16>
    %1328 = vector.shape_cast %1327 : vector<1x32x32xbf16> to vector<32x32xbf16>
    %1329 = tpu.concatenate %1318, %1320, %1322, %1324, %1326, %1328 in 0 : vector<32x32xbf16>, vector<32x32xbf16>, vector<32x32xbf16>, vector<32x32xbf16>, vector<32x32xbf16>, vector<32x32xbf16> -> vector<192x32xbf16>
    %cst_520 = arith.constant dense<0.000000e+00> : vector<32x32xf32>
    %1330 = tpu.matmul %22, %1329, %cst_520 {dimension_numbers = #tpu.dot_dimension_numbers<[1], [0], [0], [1], [0, 0, 1, 1], [], []>} : vector<32x192xbf16>, vector<192x32xbf16>, vector<32x32xf32> -> vector<32x32xf32>
    %1331 = vector.broadcast %23 : vector<32x1xf32> to vector<32x32xf32>
    %1332 = arith.addf %1330, %1331 : vector<32x32xf32>
    %cst_521 = arith.constant 0.000000e+00 : f32
    %1333 = vector.broadcast %cst_521 : f32 to vector<32x32xf32>
    %1334 = arith.cmpf oge, %1332, %1333 : vector<32x32xf32>
    %cst_522 = arith.constant 0.00999999977 : f32
    %1335 = vector.broadcast %cst_522 : f32 to vector<32x32xf32>
    %1336 = arith.mulf %1335, %1332 : vector<32x32xf32>
    %1337 = arith.select %1334, %1332, %1336 : vector<32x32xi1>, vector<32x32xf32>
    %1338 = arith.maximumf %1316, %1337 : vector<32x32xf32>
    %1339 = arith.truncf %1338 : vector<32x32xf32> to vector<32x32xbf16>
    %cst_523 = arith.constant dense<0.000000e+00> : vector<32x16xf32>
    %1340 = tpu.matmul %1339, %26, %cst_523 {dimension_numbers = #tpu.dot_dimension_numbers<[1], [0], [0], [1], [0, 0, 1, 1], [], []>} : vector<32x32xbf16>, vector<32x16xbf16>, vector<32x16xf32> -> vector<32x16xf32>
    %cst_524 = arith.constant dense<0.000000e+00> : vector<32x16xf32>
    %1341 = tpu.matmul %1339, %27, %cst_524 {dimension_numbers = #tpu.dot_dimension_numbers<[1], [0], [0], [1], [0, 0, 1, 1], [], []>} : vector<32x32xbf16>, vector<32x16xbf16>, vector<32x16xf32> -> vector<32x16xf32>
    %1342 = arith.maximumf %1340, %1341 : vector<32x16xf32>
    %1343 = tpu.concatenate %31, %1342, %31 in 1 : vector<32x1xf32>, vector<32x16xf32>, vector<32x1xf32> -> vector<32x18xf32>
    %1344 = vector.extract_strided_slice %1343 {offsets = [0, 0], sizes = [32, 16], strides = [1, 1]} : vector<32x18xf32> to vector<32x16xf32>
    %1345 = vector.extract_strided_slice %1343 {offsets = [0, 1], sizes = [32, 16], strides = [1, 1]} : vector<32x18xf32> to vector<32x16xf32>
    %1346 = vector.extract_strided_slice %1343 {offsets = [0, 2], sizes = [32, 16], strides = [1, 1]} : vector<32x18xf32> to vector<32x16xf32>
    %1347 = tpu.concatenate %1344, %1345, %1346 in 0 : vector<32x16xf32>, vector<32x16xf32>, vector<32x16xf32> -> vector<96x16xf32>
    %1348 = arith.truncf %1347 : vector<96x16xf32> to vector<96x16xbf16>
    %c3_525 = arith.constant 3 : index
    %c0_526 = arith.constant 0 : index
    %c0_527 = arith.constant 0 : index
    %1349 = vector.load %arg14[%c3_525, %c0_526, %c0_527] : memref<6x96x16xbf16, #tpu.memory_space<vmem>>, vector<1x96x16xbf16>
    %1350 = vector.shape_cast %1349 : vector<1x96x16xbf16> to vector<96x16xbf16>
    %1351 = vector.shape_cast %1348 : vector<96x16xbf16> to vector<1x96x16xbf16>
    tpu.vector_store %arg14[%c3_525, %c0_526, %c0_527], %1351 {strides = array<i32>} : memref<6x96x16xbf16, #tpu.memory_space<vmem>>, vector<1x96x16xbf16>,
    %c12_528 = arith.constant 12 : index
    %c0_529 = arith.constant 0 : index
    %c0_530 = arith.constant 0 : index
    %1352 = vector.load %arg13[%c12_528, %c0_529, %c0_530] : memref<21x32x32xbf16, #tpu.memory_space<vmem>>, vector<1x32x32xbf16>
    %1353 = vector.shape_cast %1352 : vector<1x32x32xbf16> to vector<32x32xbf16>
    %c13_531 = arith.constant 13 : index
    %c0_532 = arith.constant 0 : index
    %c0_533 = arith.constant 0 : index
    %1354 = vector.load %arg13[%c13_531, %c0_532, %c0_533] : memref<21x32x32xbf16, #tpu.memory_space<vmem>>, vector<1x32x32xbf16>
    %1355 = vector.shape_cast %1354 : vector<1x32x32xbf16> to vector<32x32xbf16>
    %c14_534 = arith.constant 14 : index
    %c0_535 = arith.constant 0 : index
    %c0_536 = arith.constant 0 : index
    %1356 = vector.load %arg13[%c14_534, %c0_535, %c0_536] : memref<21x32x32xbf16, #tpu.memory_space<vmem>>, vector<1x32x32xbf16>
    %1357 = vector.shape_cast %1356 : vector<1x32x32xbf16> to vector<32x32xbf16>
    %c15_537 = arith.constant 15 : index
    %c0_538 = arith.constant 0 : index
    %c0_539 = arith.constant 0 : index
    %1358 = vector.load %arg13[%c15_537, %c0_538, %c0_539] : memref<21x32x32xbf16, #tpu.memory_space<vmem>>, vector<1x32x32xbf16>
    %1359 = vector.shape_cast %1358 : vector<1x32x32xbf16> to vector<32x32xbf16>
    %c16_540 = arith.constant 16 : index
    %c0_541 = arith.constant 0 : index
    %c0_542 = arith.constant 0 : index
    %1360 = vector.load %arg13[%c16_540, %c0_541, %c0_542] : memref<21x32x32xbf16, #tpu.memory_space<vmem>>, vector<1x32x32xbf16>
    %1361 = vector.shape_cast %1360 : vector<1x32x32xbf16> to vector<32x32xbf16>
    %c17_543 = arith.constant 17 : index
    %c0_544 = arith.constant 0 : index
    %c0_545 = arith.constant 0 : index
    %1362 = vector.load %arg13[%c17_543, %c0_544, %c0_545] : memref<21x32x32xbf16, #tpu.memory_space<vmem>>, vector<1x32x32xbf16>
    %1363 = vector.shape_cast %1362 : vector<1x32x32xbf16> to vector<32x32xbf16>
    %1364 = tpu.concatenate %1353, %1355, %1357, %1359, %1361, %1363 in 0 : vector<32x32xbf16>, vector<32x32xbf16>, vector<32x32xbf16>, vector<32x32xbf16>, vector<32x32xbf16>, vector<32x32xbf16> -> vector<192x32xbf16>
    %cst_546 = arith.constant dense<0.000000e+00> : vector<32x32xf32>
    %1365 = tpu.matmul %22, %1364, %cst_546 {dimension_numbers = #tpu.dot_dimension_numbers<[1], [0], [0], [1], [0, 0, 1, 1], [], []>} : vector<32x192xbf16>, vector<192x32xbf16>, vector<32x32xf32> -> vector<32x32xf32>
    %1366 = vector.broadcast %23 : vector<32x1xf32> to vector<32x32xf32>
    %1367 = arith.addf %1365, %1366 : vector<32x32xf32>
    %cst_547 = arith.constant 0.000000e+00 : f32
    %1368 = vector.broadcast %cst_547 : f32 to vector<32x32xf32>
    %1369 = arith.cmpf oge, %1367, %1368 : vector<32x32xf32>
    %cst_548 = arith.constant 0.00999999977 : f32
    %1370 = vector.broadcast %cst_548 : f32 to vector<32x32xf32>
    %1371 = arith.mulf %1370, %1367 : vector<32x32xf32>
    %1372 = arith.select %1369, %1367, %1371 : vector<32x32xi1>, vector<32x32xf32>
    %c13_549 = arith.constant 13 : index
    %c0_550 = arith.constant 0 : index
    %c0_551 = arith.constant 0 : index
    %1373 = vector.load %arg13[%c13_549, %c0_550, %c0_551] : memref<21x32x32xbf16, #tpu.memory_space<vmem>>, vector<1x32x32xbf16>
    %1374 = vector.shape_cast %1373 : vector<1x32x32xbf16> to vector<32x32xbf16>
    %c14_552 = arith.constant 14 : index
    %c0_553 = arith.constant 0 : index
    %c0_554 = arith.constant 0 : index
    %1375 = vector.load %arg13[%c14_552, %c0_553, %c0_554] : memref<21x32x32xbf16, #tpu.memory_space<vmem>>, vector<1x32x32xbf16>
    %1376 = vector.shape_cast %1375 : vector<1x32x32xbf16> to vector<32x32xbf16>
    %c15_555 = arith.constant 15 : index
    %c0_556 = arith.constant 0 : index
    %c0_557 = arith.constant 0 : index
    %1377 = vector.load %arg13[%c15_555, %c0_556, %c0_557] : memref<21x32x32xbf16, #tpu.memory_space<vmem>>, vector<1x32x32xbf16>
    %1378 = vector.shape_cast %1377 : vector<1x32x32xbf16> to vector<32x32xbf16>
    %c16_558 = arith.constant 16 : index
    %c0_559 = arith.constant 0 : index
    %c0_560 = arith.constant 0 : index
    %1379 = vector.load %arg13[%c16_558, %c0_559, %c0_560] : memref<21x32x32xbf16, #tpu.memory_space<vmem>>, vector<1x32x32xbf16>
    %1380 = vector.shape_cast %1379 : vector<1x32x32xbf16> to vector<32x32xbf16>
    %c17_561 = arith.constant 17 : index
    %c0_562 = arith.constant 0 : index
    %c0_563 = arith.constant 0 : index
    %1381 = vector.load %arg13[%c17_561, %c0_562, %c0_563] : memref<21x32x32xbf16, #tpu.memory_space<vmem>>, vector<1x32x32xbf16>
    %1382 = vector.shape_cast %1381 : vector<1x32x32xbf16> to vector<32x32xbf16>
    %c18_564 = arith.constant 18 : index
    %c0_565 = arith.constant 0 : index
    %c0_566 = arith.constant 0 : index
    %1383 = vector.load %arg13[%c18_564, %c0_565, %c0_566] : memref<21x32x32xbf16, #tpu.memory_space<vmem>>, vector<1x32x32xbf16>
    %1384 = vector.shape_cast %1383 : vector<1x32x32xbf16> to vector<32x32xbf16>
    %1385 = tpu.concatenate %1374, %1376, %1378, %1380, %1382, %1384 in 0 : vector<32x32xbf16>, vector<32x32xbf16>, vector<32x32xbf16>, vector<32x32xbf16>, vector<32x32xbf16>, vector<32x32xbf16> -> vector<192x32xbf16>
    %cst_567 = arith.constant dense<0.000000e+00> : vector<32x32xf32>
    %1386 = tpu.matmul %22, %1385, %cst_567 {dimension_numbers = #tpu.dot_dimension_numbers<[1], [0], [0], [1], [0, 0, 1, 1], [], []>} : vector<32x192xbf16>, vector<192x32xbf16>, vector<32x32xf32> -> vector<32x32xf32>
    %1387 = vector.broadcast %23 : vector<32x1xf32> to vector<32x32xf32>
    %1388 = arith.addf %1386, %1387 : vector<32x32xf32>
    %cst_568 = arith.constant 0.000000e+00 : f32
    %1389 = vector.broadcast %cst_568 : f32 to vector<32x32xf32>
    %1390 = arith.cmpf oge, %1388, %1389 : vector<32x32xf32>
    %cst_569 = arith.constant 0.00999999977 : f32
    %1391 = vector.broadcast %cst_569 : f32 to vector<32x32xf32>
    %1392 = arith.mulf %1391, %1388 : vector<32x32xf32>
    %1393 = arith.select %1390, %1388, %1392 : vector<32x32xi1>, vector<32x32xf32>
    %1394 = arith.maximumf %1372, %1393 : vector<32x32xf32>
    %c14_570 = arith.constant 14 : index
    %c0_571 = arith.constant 0 : index
    %c0_572 = arith.constant 0 : index
    %1395 = vector.load %arg13[%c14_570, %c0_571, %c0_572] : memref<21x32x32xbf16, #tpu.memory_space<vmem>>, vector<1x32x32xbf16>
    %1396 = vector.shape_cast %1395 : vector<1x32x32xbf16> to vector<32x32xbf16>
    %c15_573 = arith.constant 15 : index
    %c0_574 = arith.constant 0 : index
    %c0_575 = arith.constant 0 : index
    %1397 = vector.load %arg13[%c15_573, %c0_574, %c0_575] : memref<21x32x32xbf16, #tpu.memory_space<vmem>>, vector<1x32x32xbf16>
    %1398 = vector.shape_cast %1397 : vector<1x32x32xbf16> to vector<32x32xbf16>
    %c16_576 = arith.constant 16 : index
    %c0_577 = arith.constant 0 : index
    %c0_578 = arith.constant 0 : index
    %1399 = vector.load %arg13[%c16_576, %c0_577, %c0_578] : memref<21x32x32xbf16, #tpu.memory_space<vmem>>, vector<1x32x32xbf16>
    %1400 = vector.shape_cast %1399 : vector<1x32x32xbf16> to vector<32x32xbf16>
    %c17_579 = arith.constant 17 : index
    %c0_580 = arith.constant 0 : index
    %c0_581 = arith.constant 0 : index
    %1401 = vector.load %arg13[%c17_579, %c0_580, %c0_581] : memref<21x32x32xbf16, #tpu.memory_space<vmem>>, vector<1x32x32xbf16>
    %1402 = vector.shape_cast %1401 : vector<1x32x32xbf16> to vector<32x32xbf16>
    %c18_582 = arith.constant 18 : index
    %c0_583 = arith.constant 0 : index
    %c0_584 = arith.constant 0 : index
    %1403 = vector.load %arg13[%c18_582, %c0_583, %c0_584] : memref<21x32x32xbf16, #tpu.memory_space<vmem>>, vector<1x32x32xbf16>
    %1404 = vector.shape_cast %1403 : vector<1x32x32xbf16> to vector<32x32xbf16>
    %c19_585 = arith.constant 19 : index
    %c0_586 = arith.constant 0 : index
    %c0_587 = arith.constant 0 : index
    %1405 = vector.load %arg13[%c19_585, %c0_586, %c0_587] : memref<21x32x32xbf16, #tpu.memory_space<vmem>>, vector<1x32x32xbf16>
    %1406 = vector.shape_cast %1405 : vector<1x32x32xbf16> to vector<32x32xbf16>
    %1407 = tpu.concatenate %1396, %1398, %1400, %1402, %1404, %1406 in 0 : vector<32x32xbf16>, vector<32x32xbf16>, vector<32x32xbf16>, vector<32x32xbf16>, vector<32x32xbf16>, vector<32x32xbf16> -> vector<192x32xbf16>
    %cst_588 = arith.constant dense<0.000000e+00> : vector<32x32xf32>
    %1408 = tpu.matmul %22, %1407, %cst_588 {dimension_numbers = #tpu.dot_dimension_numbers<[1], [0], [0], [1], [0, 0, 1, 1], [], []>} : vector<32x192xbf16>, vector<192x32xbf16>, vector<32x32xf32> -> vector<32x32xf32>
    %1409 = vector.broadcast %23 : vector<32x1xf32> to vector<32x32xf32>
    %1410 = arith.addf %1408, %1409 : vector<32x32xf32>
    %cst_589 = arith.constant 0.000000e+00 : f32
    %1411 = vector.broadcast %cst_589 : f32 to vector<32x32xf32>
    %1412 = arith.cmpf oge, %1410, %1411 : vector<32x32xf32>
    %cst_590 = arith.constant 0.00999999977 : f32
    %1413 = vector.broadcast %cst_590 : f32 to vector<32x32xf32>
    %1414 = arith.mulf %1413, %1410 : vector<32x32xf32>
    %1415 = arith.select %1412, %1410, %1414 : vector<32x32xi1>, vector<32x32xf32>
    %1416 = arith.maximumf %1394, %1415 : vector<32x32xf32>
    %c15_591 = arith.constant 15 : index
    %c0_592 = arith.constant 0 : index
    %c0_593 = arith.constant 0 : index
    %1417 = vector.load %arg13[%c15_591, %c0_592, %c0_593] : memref<21x32x32xbf16, #tpu.memory_space<vmem>>, vector<1x32x32xbf16>
    %1418 = vector.shape_cast %1417 : vector<1x32x32xbf16> to vector<32x32xbf16>
    %c16_594 = arith.constant 16 : index
    %c0_595 = arith.constant 0 : index
    %c0_596 = arith.constant 0 : index
    %1419 = vector.load %arg13[%c16_594, %c0_595, %c0_596] : memref<21x32x32xbf16, #tpu.memory_space<vmem>>, vector<1x32x32xbf16>
    %1420 = vector.shape_cast %1419 : vector<1x32x32xbf16> to vector<32x32xbf16>
    %c17_597 = arith.constant 17 : index
    %c0_598 = arith.constant 0 : index
    %c0_599 = arith.constant 0 : index
    %1421 = vector.load %arg13[%c17_597, %c0_598, %c0_599] : memref<21x32x32xbf16, #tpu.memory_space<vmem>>, vector<1x32x32xbf16>
    %1422 = vector.shape_cast %1421 : vector<1x32x32xbf16> to vector<32x32xbf16>
    %c18_600 = arith.constant 18 : index
    %c0_601 = arith.constant 0 : index
    %c0_602 = arith.constant 0 : index
    %1423 = vector.load %arg13[%c18_600, %c0_601, %c0_602] : memref<21x32x32xbf16, #tpu.memory_space<vmem>>, vector<1x32x32xbf16>
    %1424 = vector.shape_cast %1423 : vector<1x32x32xbf16> to vector<32x32xbf16>
    %c19_603 = arith.constant 19 : index
    %c0_604 = arith.constant 0 : index
    %c0_605 = arith.constant 0 : index
    %1425 = vector.load %arg13[%c19_603, %c0_604, %c0_605] : memref<21x32x32xbf16, #tpu.memory_space<vmem>>, vector<1x32x32xbf16>
    %1426 = vector.shape_cast %1425 : vector<1x32x32xbf16> to vector<32x32xbf16>
    %c20_606 = arith.constant 20 : index
    %c0_607 = arith.constant 0 : index
    %c0_608 = arith.constant 0 : index
    %1427 = vector.load %arg13[%c20_606, %c0_607, %c0_608] : memref<21x32x32xbf16, #tpu.memory_space<vmem>>, vector<1x32x32xbf16>
    %1428 = vector.shape_cast %1427 : vector<1x32x32xbf16> to vector<32x32xbf16>
    %1429 = tpu.concatenate %1418, %1420, %1422, %1424, %1426, %1428 in 0 : vector<32x32xbf16>, vector<32x32xbf16>, vector<32x32xbf16>, vector<32x32xbf16>, vector<32x32xbf16>, vector<32x32xbf16> -> vector<192x32xbf16>
    %cst_609 = arith.constant dense<0.000000e+00> : vector<32x32xf32>
    %1430 = tpu.matmul %22, %1429, %cst_609 {dimension_numbers = #tpu.dot_dimension_numbers<[1], [0], [0], [1], [0, 0, 1, 1], [], []>} : vector<32x192xbf16>, vector<192x32xbf16>, vector<32x32xf32> -> vector<32x32xf32>
    %1431 = vector.broadcast %23 : vector<32x1xf32> to vector<32x32xf32>
    %1432 = arith.addf %1430, %1431 : vector<32x32xf32>
    %cst_610 = arith.constant 0.000000e+00 : f32
    %1433 = vector.broadcast %cst_610 : f32 to vector<32x32xf32>
    %1434 = arith.cmpf oge, %1432, %1433 : vector<32x32xf32>
    %cst_611 = arith.constant 0.00999999977 : f32
    %1435 = vector.broadcast %cst_611 : f32 to vector<32x32xf32>
    %1436 = arith.mulf %1435, %1432 : vector<32x32xf32>
    %1437 = arith.select %1434, %1432, %1436 : vector<32x32xi1>, vector<32x32xf32>
    %1438 = arith.maximumf %1416, %1437 : vector<32x32xf32>
    %1439 = arith.truncf %1438 : vector<32x32xf32> to vector<32x32xbf16>
    %cst_612 = arith.constant dense<0.000000e+00> : vector<32x16xf32>
    %1440 = tpu.matmul %1439, %26, %cst_612 {dimension_numbers = #tpu.dot_dimension_numbers<[1], [0], [0], [1], [0, 0, 1, 1], [], []>} : vector<32x32xbf16>, vector<32x16xbf16>, vector<32x16xf32> -> vector<32x16xf32>
    %cst_613 = arith.constant dense<0.000000e+00> : vector<32x16xf32>
    %1441 = tpu.matmul %1439, %27, %cst_613 {dimension_numbers = #tpu.dot_dimension_numbers<[1], [0], [0], [1], [0, 0, 1, 1], [], []>} : vector<32x32xbf16>, vector<32x16xbf16>, vector<32x16xf32> -> vector<32x16xf32>
    %1442 = arith.maximumf %1440, %1441 : vector<32x16xf32>
    %1443 = tpu.concatenate %31, %1442, %31 in 1 : vector<32x1xf32>, vector<32x16xf32>, vector<32x1xf32> -> vector<32x18xf32>
    %1444 = vector.extract_strided_slice %1443 {offsets = [0, 0], sizes = [32, 16], strides = [1, 1]} : vector<32x18xf32> to vector<32x16xf32>
    %1445 = vector.extract_strided_slice %1443 {offsets = [0, 1], sizes = [32, 16], strides = [1, 1]} : vector<32x18xf32> to vector<32x16xf32>
    %1446 = vector.extract_strided_slice %1443 {offsets = [0, 2], sizes = [32, 16], strides = [1, 1]} : vector<32x18xf32> to vector<32x16xf32>
    %1447 = tpu.concatenate %1444, %1445, %1446 in 0 : vector<32x16xf32>, vector<32x16xf32>, vector<32x16xf32> -> vector<96x16xf32>
    %1448 = arith.truncf %1447 : vector<96x16xf32> to vector<96x16xbf16>
    %c4_614 = arith.constant 4 : index
    %c0_615 = arith.constant 0 : index
    %c0_616 = arith.constant 0 : index
    %1449 = vector.load %arg14[%c4_614, %c0_615, %c0_616] : memref<6x96x16xbf16, #tpu.memory_space<vmem>>, vector<1x96x16xbf16>
    %1450 = vector.shape_cast %1449 : vector<1x96x16xbf16> to vector<96x16xbf16>
    %1451 = vector.shape_cast %1448 : vector<96x16xbf16> to vector<1x96x16xbf16>
    tpu.vector_store %arg14[%c4_614, %c0_615, %c0_616], %1451 {strides = array<i32>} : memref<6x96x16xbf16, #tpu.memory_space<vmem>>, vector<1x96x16xbf16>,
    %c0_617 = arith.constant 0 : index
    %c0_618 = arith.constant 0 : index
    %c0_619 = arith.constant 0 : index
    %1452 = vector.load %arg14[%c0_617, %c0_618, %c0_619] : memref<6x96x16xbf16, #tpu.memory_space<vmem>>, vector<1x96x16xbf16>
    %1453 = vector.shape_cast %1452 : vector<1x96x16xbf16> to vector<96x16xbf16>
    %c1_620 = arith.constant 1 : index
    %c0_621 = arith.constant 0 : index
    %c0_622 = arith.constant 0 : index
    %1454 = vector.load %arg14[%c1_620, %c0_621, %c0_622] : memref<6x96x16xbf16, #tpu.memory_space<vmem>>, vector<1x96x16xbf16>
    %1455 = vector.shape_cast %1454 : vector<1x96x16xbf16> to vector<96x16xbf16>
    %c2_623 = arith.constant 2 : index
    %c0_624 = arith.constant 0 : index
    %c0_625 = arith.constant 0 : index
    %1456 = vector.load %arg14[%c2_623, %c0_624, %c0_625] : memref<6x96x16xbf16, #tpu.memory_space<vmem>>, vector<1x96x16xbf16>
    %1457 = vector.shape_cast %1456 : vector<1x96x16xbf16> to vector<96x16xbf16>
    %1458 = tpu.concatenate %1453, %1455, %1457 in 0 : vector<96x16xbf16>, vector<96x16xbf16>, vector<96x16xbf16> -> vector<288x16xbf16>
    %cst_626 = arith.constant dense<0.000000e+00> : vector<64x16xf32>
    %1459 = tpu.matmul %24, %1458, %cst_626 {dimension_numbers = #tpu.dot_dimension_numbers<[1], [0], [0], [1], [0, 0, 1, 1], [], []>} : vector<64x288xbf16>, vector<288x16xbf16>, vector<64x16xf32> -> vector<64x16xf32>
    %1460 = vector.broadcast %25 : vector<64x1xf32> to vector<64x16xf32>
    %1461 = arith.addf %1459, %1460 : vector<64x16xf32>
    %cst_627 = arith.constant 0.000000e+00 : f32
    %1462 = vector.broadcast %cst_627 : f32 to vector<64x16xf32>
    %1463 = arith.cmpf oge, %1461, %1462 : vector<64x16xf32>
    %cst_628 = arith.constant 0.00999999977 : f32
    %1464 = vector.broadcast %cst_628 : f32 to vector<64x16xf32>
    %1465 = arith.mulf %1464, %1461 : vector<64x16xf32>
    %1466 = arith.select %1463, %1461, %1465 : vector<64x16xi1>, vector<64x16xf32>
    %1467 = arith.truncf %1466 : vector<64x16xf32> to vector<64x16xbf16>
    %cst_629 = arith.constant dense<0.000000e+00> : vector<64x8xf32>
    %1468 = tpu.matmul %1467, %28, %cst_629 {dimension_numbers = #tpu.dot_dimension_numbers<[1], [0], [0], [1], [0, 0, 1, 1], [], []>} : vector<64x16xbf16>, vector<16x8xbf16>, vector<64x8xf32> -> vector<64x8xf32>
    %cst_630 = arith.constant dense<0.000000e+00> : vector<64x8xf32>
    %1469 = tpu.matmul %1467, %29, %cst_630 {dimension_numbers = #tpu.dot_dimension_numbers<[1], [0], [0], [1], [0, 0, 1, 1], [], []>} : vector<64x16xbf16>, vector<16x8xbf16>, vector<64x8xf32> -> vector<64x8xf32>
    %1470 = arith.maximumf %1468, %1469 : vector<64x8xf32>
    %c1_631 = arith.constant 1 : index
    %c0_632 = arith.constant 0 : index
    %c0_633 = arith.constant 0 : index
    %1471 = vector.load %arg14[%c1_631, %c0_632, %c0_633] : memref<6x96x16xbf16, #tpu.memory_space<vmem>>, vector<1x96x16xbf16>
    %1472 = vector.shape_cast %1471 : vector<1x96x16xbf16> to vector<96x16xbf16>
    %c2_634 = arith.constant 2 : index
    %c0_635 = arith.constant 0 : index
    %c0_636 = arith.constant 0 : index
    %1473 = vector.load %arg14[%c2_634, %c0_635, %c0_636] : memref<6x96x16xbf16, #tpu.memory_space<vmem>>, vector<1x96x16xbf16>
    %1474 = vector.shape_cast %1473 : vector<1x96x16xbf16> to vector<96x16xbf16>
    %c3_637 = arith.constant 3 : index
    %c0_638 = arith.constant 0 : index
    %c0_639 = arith.constant 0 : index
    %1475 = vector.load %arg14[%c3_637, %c0_638, %c0_639] : memref<6x96x16xbf16, #tpu.memory_space<vmem>>, vector<1x96x16xbf16>
    %1476 = vector.shape_cast %1475 : vector<1x96x16xbf16> to vector<96x16xbf16>
    %1477 = tpu.concatenate %1472, %1474, %1476 in 0 : vector<96x16xbf16>, vector<96x16xbf16>, vector<96x16xbf16> -> vector<288x16xbf16>
    %cst_640 = arith.constant dense<0.000000e+00> : vector<64x16xf32>
    %1478 = tpu.matmul %24, %1477, %cst_640 {dimension_numbers = #tpu.dot_dimension_numbers<[1], [0], [0], [1], [0, 0, 1, 1], [], []>} : vector<64x288xbf16>, vector<288x16xbf16>, vector<64x16xf32> -> vector<64x16xf32>
    %1479 = vector.broadcast %25 : vector<64x1xf32> to vector<64x16xf32>
    %1480 = arith.addf %1478, %1479 : vector<64x16xf32>
    %cst_641 = arith.constant 0.000000e+00 : f32
    %1481 = vector.broadcast %cst_641 : f32 to vector<64x16xf32>
    %1482 = arith.cmpf oge, %1480, %1481 : vector<64x16xf32>
    %cst_642 = arith.constant 0.00999999977 : f32
    %1483 = vector.broadcast %cst_642 : f32 to vector<64x16xf32>
    %1484 = arith.mulf %1483, %1480 : vector<64x16xf32>
    %1485 = arith.select %1482, %1480, %1484 : vector<64x16xi1>, vector<64x16xf32>
    %1486 = arith.truncf %1485 : vector<64x16xf32> to vector<64x16xbf16>
    %cst_643 = arith.constant dense<0.000000e+00> : vector<64x8xf32>
    %1487 = tpu.matmul %1486, %28, %cst_643 {dimension_numbers = #tpu.dot_dimension_numbers<[1], [0], [0], [1], [0, 0, 1, 1], [], []>} : vector<64x16xbf16>, vector<16x8xbf16>, vector<64x8xf32> -> vector<64x8xf32>
    %cst_644 = arith.constant dense<0.000000e+00> : vector<64x8xf32>
    %1488 = tpu.matmul %1486, %29, %cst_644 {dimension_numbers = #tpu.dot_dimension_numbers<[1], [0], [0], [1], [0, 0, 1, 1], [], []>} : vector<64x16xbf16>, vector<16x8xbf16>, vector<64x8xf32> -> vector<64x8xf32>
    %1489 = arith.maximumf %1487, %1488 : vector<64x8xf32>
    %c2_645 = arith.constant 2 : index
    %c0_646 = arith.constant 0 : index
    %c0_647 = arith.constant 0 : index
    %1490 = vector.load %arg14[%c2_645, %c0_646, %c0_647] : memref<6x96x16xbf16, #tpu.memory_space<vmem>>, vector<1x96x16xbf16>
    %1491 = vector.shape_cast %1490 : vector<1x96x16xbf16> to vector<96x16xbf16>
    %c3_648 = arith.constant 3 : index
    %c0_649 = arith.constant 0 : index
    %c0_650 = arith.constant 0 : index
    %1492 = vector.load %arg14[%c3_648, %c0_649, %c0_650] : memref<6x96x16xbf16, #tpu.memory_space<vmem>>, vector<1x96x16xbf16>
    %1493 = vector.shape_cast %1492 : vector<1x96x16xbf16> to vector<96x16xbf16>
    %c4_651 = arith.constant 4 : index
    %c0_652 = arith.constant 0 : index
    %c0_653 = arith.constant 0 : index
    %1494 = vector.load %arg14[%c4_651, %c0_652, %c0_653] : memref<6x96x16xbf16, #tpu.memory_space<vmem>>, vector<1x96x16xbf16>
    %1495 = vector.shape_cast %1494 : vector<1x96x16xbf16> to vector<96x16xbf16>
    %1496 = tpu.concatenate %1491, %1493, %1495 in 0 : vector<96x16xbf16>, vector<96x16xbf16>, vector<96x16xbf16> -> vector<288x16xbf16>
    %cst_654 = arith.constant dense<0.000000e+00> : vector<64x16xf32>
    %1497 = tpu.matmul %24, %1496, %cst_654 {dimension_numbers = #tpu.dot_dimension_numbers<[1], [0], [0], [1], [0, 0, 1, 1], [], []>} : vector<64x288xbf16>, vector<288x16xbf16>, vector<64x16xf32> -> vector<64x16xf32>
    %1498 = vector.broadcast %25 : vector<64x1xf32> to vector<64x16xf32>
    %1499 = arith.addf %1497, %1498 : vector<64x16xf32>
    %cst_655 = arith.constant 0.000000e+00 : f32
    %1500 = vector.broadcast %cst_655 : f32 to vector<64x16xf32>
    %1501 = arith.cmpf oge, %1499, %1500 : vector<64x16xf32>
    %cst_656 = arith.constant 0.00999999977 : f32
    %1502 = vector.broadcast %cst_656 : f32 to vector<64x16xf32>
    %1503 = arith.mulf %1502, %1499 : vector<64x16xf32>
    %1504 = arith.select %1501, %1499, %1503 : vector<64x16xi1>, vector<64x16xf32>
    %1505 = arith.truncf %1504 : vector<64x16xf32> to vector<64x16xbf16>
    %cst_657 = arith.constant dense<0.000000e+00> : vector<64x8xf32>
    %1506 = tpu.matmul %1505, %28, %cst_657 {dimension_numbers = #tpu.dot_dimension_numbers<[1], [0], [0], [1], [0, 0, 1, 1], [], []>} : vector<64x16xbf16>, vector<16x8xbf16>, vector<64x8xf32> -> vector<64x8xf32>
    %cst_658 = arith.constant dense<0.000000e+00> : vector<64x8xf32>
    %1507 = tpu.matmul %1505, %29, %cst_658 {dimension_numbers = #tpu.dot_dimension_numbers<[1], [0], [0], [1], [0, 0, 1, 1], [], []>} : vector<64x16xbf16>, vector<16x8xbf16>, vector<64x8xf32> -> vector<64x8xf32>
    %1508 = arith.maximumf %1506, %1507 : vector<64x8xf32>
    %c3_659 = arith.constant 3 : index
    %c0_660 = arith.constant 0 : index
    %c0_661 = arith.constant 0 : index
    %1509 = vector.load %arg14[%c3_659, %c0_660, %c0_661] : memref<6x96x16xbf16, #tpu.memory_space<vmem>>, vector<1x96x16xbf16>
    %1510 = vector.shape_cast %1509 : vector<1x96x16xbf16> to vector<96x16xbf16>
    %c4_662 = arith.constant 4 : index
    %c0_663 = arith.constant 0 : index
    %c0_664 = arith.constant 0 : index
    %1511 = vector.load %arg14[%c4_662, %c0_663, %c0_664] : memref<6x96x16xbf16, #tpu.memory_space<vmem>>, vector<1x96x16xbf16>
    %1512 = vector.shape_cast %1511 : vector<1x96x16xbf16> to vector<96x16xbf16>
    %c5_665 = arith.constant 5 : index
    %c0_666 = arith.constant 0 : index
    %c0_667 = arith.constant 0 : index
    %1513 = vector.load %arg14[%c5_665, %c0_666, %c0_667] : memref<6x96x16xbf16, #tpu.memory_space<vmem>>, vector<1x96x16xbf16>
    %1514 = vector.shape_cast %1513 : vector<1x96x16xbf16> to vector<96x16xbf16>
    %1515 = tpu.concatenate %1510, %1512, %1514 in 0 : vector<96x16xbf16>, vector<96x16xbf16>, vector<96x16xbf16> -> vector<288x16xbf16>
    %cst_668 = arith.constant dense<0.000000e+00> : vector<64x16xf32>
    %1516 = tpu.matmul %24, %1515, %cst_668 {dimension_numbers = #tpu.dot_dimension_numbers<[1], [0], [0], [1], [0, 0, 1, 1], [], []>} : vector<64x288xbf16>, vector<288x16xbf16>, vector<64x16xf32> -> vector<64x16xf32>
    %1517 = vector.broadcast %25 : vector<64x1xf32> to vector<64x16xf32>
    %1518 = arith.addf %1516, %1517 : vector<64x16xf32>
    %cst_669 = arith.constant 0.000000e+00 : f32
    %1519 = vector.broadcast %cst_669 : f32 to vector<64x16xf32>
    %1520 = arith.cmpf oge, %1518, %1519 : vector<64x16xf32>
    %cst_670 = arith.constant 0.00999999977 : f32
    %1521 = vector.broadcast %cst_670 : f32 to vector<64x16xf32>
    %1522 = arith.mulf %1521, %1518 : vector<64x16xf32>
    %1523 = arith.select %1520, %1518, %1522 : vector<64x16xi1>, vector<64x16xf32>
    %1524 = arith.truncf %1523 : vector<64x16xf32> to vector<64x16xbf16>
    %cst_671 = arith.constant dense<0.000000e+00> : vector<64x8xf32>
    %1525 = tpu.matmul %1524, %28, %cst_671 {dimension_numbers = #tpu.dot_dimension_numbers<[1], [0], [0], [1], [0, 0, 1, 1], [], []>} : vector<64x16xbf16>, vector<16x8xbf16>, vector<64x8xf32> -> vector<64x8xf32>
    %cst_672 = arith.constant dense<0.000000e+00> : vector<64x8xf32>
    %1526 = tpu.matmul %1524, %29, %cst_672 {dimension_numbers = #tpu.dot_dimension_numbers<[1], [0], [0], [1], [0, 0, 1, 1], [], []>} : vector<64x16xbf16>, vector<16x8xbf16>, vector<64x8xf32> -> vector<64x8xf32>
    %1527 = arith.maximumf %1525, %1526 : vector<64x8xf32>
    %1528 = tpu.concatenate %1470, %1489, %1508, %1527 in 1 : vector<64x8xf32>, vector<64x8xf32>, vector<64x8xf32>, vector<64x8xf32> -> vector<64x32xf32>
    %c0_673 = arith.constant 0 : index
    %c0_674 = arith.constant 0 : index
    %c0_675 = arith.constant 0 : index
    %1529 = vector.load %arg12[%c0_673, %c0_674, %c0_675] : memref<1x64x32xf32, #tpu.memory_space<vmem>>, vector<1x64x32xf32>
    %1530 = vector.shape_cast %1529 : vector<1x64x32xf32> to vector<64x32xf32>
    %1531 = vector.shape_cast %1528 : vector<64x32xf32> to vector<1x64x32xf32>
    tpu.vector_store %arg12[%c0_673, %c0_674, %c0_675], %1531 {strides = array<i32>} : memref<1x64x32xf32, #tpu.memory_space<vmem>>, vector<1x64x32xf32>,
    return
  }
  func.func @transform_0(%arg0: i32) -> (i32, i32, i32) {
    %c0_i32 = arith.constant 0 : i32
    %c0_i32_0 = arith.constant 0 : i32
    %c0_i32_1 = arith.constant 0 : i32
    return %arg0, %c0_i32, %c0_i32_0 : i32, i32, i32
  }
  func.func @transform_1(%arg0: i32) -> (i32, i32) {
    %c0_i32 = arith.constant 0 : i32
    %c0_i32_0 = arith.constant 0 : i32
    %c0_i32_1 = arith.constant 0 : i32
    return %c0_i32, %c0_i32_0 : i32, i32
  }
  func.func @transform_2(%arg0: i32) -> (i32, i32) {
    %c0_i32 = arith.constant 0 : i32
    %c0_i32_0 = arith.constant 0 : i32
    %c0_i32_1 = arith.constant 0 : i32
    return %c0_i32, %c0_i32_0 : i32, i32
  }
  func.func @transform_3(%arg0: i32) -> (i32, i32) {
    %c0_i32 = arith.constant 0 : i32
    %c0_i32_0 = arith.constant 0 : i32
    %c0_i32_1 = arith.constant 0 : i32
    return %c0_i32, %c0_i32_0 : i32, i32
  }
  func.func @transform_4(%arg0: i32) -> (i32, i32) {
    %c0_i32 = arith.constant 0 : i32
    %c0_i32_0 = arith.constant 0 : i32
    %c0_i32_1 = arith.constant 0 : i32
    return %c0_i32, %c0_i32_0 : i32, i32
  }
  func.func @transform_5(%arg0: i32) -> (i32, i32) {
    %c0_i32 = arith.constant 0 : i32
    %c0_i32_0 = arith.constant 0 : i32
    %c0_i32_1 = arith.constant 0 : i32
    return %c0_i32, %c0_i32_0 : i32, i32
  }
  func.func @transform_6(%arg0: i32) -> (i32, i32) {
    %c0_i32 = arith.constant 0 : i32
    %c0_i32_0 = arith.constant 0 : i32
    %c0_i32_1 = arith.constant 0 : i32
    return %c0_i32, %c0_i32_0 : i32, i32
  }
  func.func @transform_7(%arg0: i32) -> (i32, i32) {
    %c0_i32 = arith.constant 0 : i32
    %c0_i32_0 = arith.constant 0 : i32
    %c0_i32_1 = arith.constant 0 : i32
    return %c0_i32, %c0_i32_0 : i32, i32
  }
  func.func @transform_8(%arg0: i32) -> (i32, i32) {
    %c0_i32 = arith.constant 0 : i32
    %c0_i32_0 = arith.constant 0 : i32
    %c0_i32_1 = arith.constant 0 : i32
    return %c0_i32, %c0_i32_0 : i32, i32
  }
  func.func @transform_9(%arg0: i32) -> (i32, i32) {
    %c0_i32 = arith.constant 0 : i32
    %c0_i32_0 = arith.constant 0 : i32
    %c0_i32_1 = arith.constant 0 : i32
    return %c0_i32, %c0_i32_0 : i32, i32
  }
  func.func @transform_10(%arg0: i32) -> (i32, i32) {
    %c0_i32 = arith.constant 0 : i32
    %c0_i32_0 = arith.constant 0 : i32
    %c0_i32_1 = arith.constant 0 : i32
    return %c0_i32, %c0_i32_0 : i32, i32
  }
  func.func @transform_11(%arg0: i32) -> (i32, i32, i32) {
    %c0_i32 = arith.constant 0 : i32
    %c0_i32_0 = arith.constant 0 : i32
    %c0_i32_1 = arith.constant 0 : i32
    return %arg0, %c0_i32, %c0_i32_0 : i32, i32, i32
  }
}

</mosaic_0001>

<bundles_post_ra>
// kernel: backbone_forward.1
= control target key start
LH: loop header
LB: loop body
LE: loop exit
PB: predicated region body
PF: predicated region fallthrough
CT: control target
= control target key end

     0   :  { %s5935_s17 = smov 0   ;;  %s8011_s0 = inlined_call_operand.vmem [shape: f32[2,35,35], index: 0, kind: input, shape index: {}]   ;;  %s8012_s1 = inlined_call_operand.vmem [shape: f32[8,6], index: 1, kind: input, shape index: {}]   ;;  %s8013_s2 = inlined_call_operand.vmem [shape: f32[8,1], index: 2, kind: input, shape index: {}]   ;;  %s8014_s3 = inlined_call_operand.vmem [shape: bf16[32,192], index: 3, kind: input, shape index: {}]   ;;  %s8015_s4 = inlined_call_operand.vmem [shape: f32[32,1], index: 4, kind: input, shape index: {}]   ;;  %s8016_s5 = inlined_call_operand.vmem [shape: bf16[64,288], index: 5, kind: input, shape index: {}]   ;;  %s8017_s6 = inlined_call_operand.vmem [shape: f32[64,1], index: 6, kind: input, shape index: {}]   ;;  %s8018_s7 = inlined_call_operand.vmem [shape: bf16[32,16], index: 7, kind: input, shape index: {}]   ;;  %s8019_s8 = inlined_call_operand.vmem [shape: bf16[32,16], index: 8, kind: input, shape index: {}]   ;;  %s8020_s9 = inlined_call_operand.vmem [shape: bf16[16,8], index: 9, kind: input, shape index: {}]   ;;  %s8021_s10 = inlined_call_operand.vmem [shape: bf16[16,8], index: 10, kind: input, shape index: {}]   ;;  %s8022_s11 = inlined_call_operand.vmem [shape: f32[2,64,32], index: 11, kind: output, shape index: {}]  }
   0x1 LB: > { %s5023_s18 = sadd.s32 4294967295, %s5860_s17   ;;  %p5027_p0 = scmp.ge.s32.totalorder %s5860_s17, 1  ;;  %s5860_s17 = sphi %s5935_s17, %s21_s17  }
   0x2   : > { %p337_p1 = scmp.lt.s32.totalorder %s5860_s17, 3 }
   0x4   : > { %p338_p2 = pnand %p5027_p0, %p337_p1 }
   0x6   : > { %341 = sbr.rel (%p338_p2) target bundleno = 3307 (0xceb), region = 64 }
   0xd   : > { %v414_v0 = vld [vmem:[%s8012_s1] sm:$0xff]  ;;  %v5862_v1 = vmov 1   ;;  %v5863_v2 = vmov 5   ;;  %v5864_v3 = vmov 0   ;;  %v5865_v4 = vmov 3   ;;  %p377_p3 = scmp.lt.s32.totalorder %s5023_s18, 1 }
   0xe   : > { %5673 = vset.pattern.permute.xlu0 %v5862_v1  ;;  %5675 = vset.pattern.permute.xlu1 %v5863_v2  ;;  %v5866_v5 = vmov 2   ;;  %v5867_v6 = vmov 4   ;;  %s5868_s25 = smov 127   ;;  %v415_v11 = vld [vmem:[%s8013_s2] sm:$0xff]  ;;  %s5869_s28 = smov 1   ;;  %vm388_vm4 = vcmask 261120  }
   0xf   : > { %473 = vperm.xlu0 %5673, %v414_v0   ;;  %515 = vperm.xlu1 %5675, %v414_v0   ;;  %s8047_s18 = smov (!%p377_p3, %s5023_s18), 1  ;;  %389 = vst.msk [vmem:[#allocation2] sm:$0xff] %vm388_vm4, %v5864_v3  ;;  %390 = vst.msk [vmem:[#allocation2 + $0x8] sm:$0xff] %vm388_vm4, %v5864_v3  ;;  %vm537_vm6 = vcmask 7168   ;;  %vm539_vm7 = vcmask 285696   ;;  %s5870_s29 = smov 126  }
  0x10   : > { %1637 = vmatprep.subr.bf16.mxu0 %v5864_v3  ;;  %1700 = vmatprep.subr.bf16.mxu1 %v5864_v3  ;;  %s5651_s21 = smul.u32 40, %s8047_s18  ;;  %392 = vst.msk [vmem:[#allocation2 + $0x10] sm:$0xff] %vm388_vm4, %v5864_v3  ;;  %393 = vst.msk [vmem:[#allocation2 + $0x18] sm:$0xff] %vm388_vm4, %v5864_v3  ;;  %s5871_s30 = smov 125   ;;  %vm1630_vm9 = vcmask 523264  }
  0x11   : > { %395 = vst.msk [vmem:[#allocation2 + $0x20] sm:$0xff] %vm388_vm4, %v5864_v3  ;;  %396 = vst.msk [vmem:[#allocation2 + $0x28] sm:$0xff] %vm388_vm4, %v5864_v3  ;;  %s5873_s15 = smov 16   ;;  %s5874_s20 = smov 24  }
  0x12   : > { %s5957_s24 = scalar_lea.vmem %s8011_s0, %s5651_s21  ;;  %398 = vst.msk [vmem:[#allocation2 + $0x140] sm:$0xff] %vm388_vm4, %v5864_v3  ;;  %399 = vst.msk [vmem:[#allocation2 + $0x148] sm:$0xff] %vm388_vm4, %v5864_v3  ;;  %s5202_s21 = sshll.u32 %s8047_s18, 6 }
  0x13   : > { %5674 = vset.pattern.permute.xlu0 %v5865_v4  ;;  %5676 = vset.pattern.permute.xlu1 %v5864_v3  ;;  %v5031_v7 = vld [vmem:[%s5957_s24] ss:$0 sm:$0xff]  ;;  %v5032_v10 = vld [vmem:[%s5957_s24 + $0x1] ss:$0 sm:$0xff]  ;;  %v5033_v15 = vld [vmem:[%s5957_s24 + $0x2] ss:$0 sm:$0xff]  ;;  %s7946_s23 = scalar_lea.vmem %s8022_s11, %s5202_s21 }
  0x14   : > { %494 = vperm.xlu0 %5674, %v414_v0   ;;  %463 = vperm.xlu1 %5676, %v414_v0   ;;  %v5035_v17 = vld [vmem:[%s5957_s24 + $0x3] ss:$0 sm:$0xff]  ;;  %v5981_v20 = vld [vmem:[%s5957_s24 + $0x4] ss:$0 sm:$0xff]  ;;  %v5987_v22 = vld [vmem:[%s5957_s24 + $0x5] ss:$0 sm:$0xff] }
  0x15   : > { %v5996_v25 = vld [vmem:[%s5957_s24 + $0x6] ss:$0 sm:$0xff]  ;;  %v5041_v28 = vld [vmem:[%s5957_s24 + $0x7] ss:$0 sm:$0xff]  ;;  %v6009_v30 = vld [vmem:[%s5957_s24 + $0x8] ss:$0 sm:$0xff] }
  0x16   : > { %v6015_v32 = vld [vmem:[%s5957_s24 + $0x9] ss:$0 sm:$0xff]  ;;  %v6024_v35 = vld [vmem:[%s5957_s24 + $0xa] ss:$0 sm:$0xff]  ;;  %v5047_v38 = vld [vmem:[%s5957_s24 + $0xb] ss:$0 sm:$0xff] }
  0x18   : > { %5677 = vset.pattern.permute.xlu1 %v5866_v5  ;;  %5678 = vset.pattern.permute.xlu0 %v5867_v6 }
  0x19   : > { %484 = vperm.xlu1 %5677, %v414_v0   ;;  %505 = vperm.xlu0 %5678, %v414_v0  }
  0x1d   : > { %5679 = vset.pattern.permute.xlu1 %v5864_v3  ;;  %5680 = vset.pattern.permute.xlu0 %v5864_v3 }
  0x8e   : > { %v5960_v8 = vpop.permute.xlu0 %473  ;;  %v5968_v12 = vpop.permute.xlu1 %515 }
  0x8f   : > { %v476_v9 = vmul.f32 %v5031_v7, %v5960_v8  ;;  %v518_v16 = vmul.f32 %v5033_v15, %v5968_v12  ;;  %v563_v18 = vmul.f32 %v5033_v15, %v5960_v8  ;;  %v589_v21 = vmul.f32 %v5981_v20, %v5968_v12 }
  0x90   : > { %v627_v24 = vmul.f32 %v5981_v20, %v5960_v8  ;;  %v653_v26 = vmul.f32 %v5996_v25, %v5968_v12  ;;  %v691_v27 = vmul.f32 %v5996_v25, %v5960_v8  ;;  %v717_v31 = vmul.f32 %v6009_v30, %v5968_v12 }
  0x91   : > { %478 = vrot.lane.b32.xlu1 %v476_v9, %s5868_s25  ;;  %v755_v33 = vmul.f32 %v6009_v30, %v5960_v8  ;;  %v781_v36 = vmul.f32 %v6024_v35, %v5968_v12  ;;  %v819_v37 = vmul.f32 %v6024_v35, %v5960_v8 }
  0x93   : > { %v5970_v13 = vpop.permute.xlu0 %494  ;;  %v6036_v40 = vpop.permute.xlu1 %463 }
  0x94   : > { %v497_v14 = vmul.f32 %v5032_v10, %v5970_v13  ;;  %v576_v19 = vmul.f32 %v5035_v17, %v5970_v13  ;;  %v640_v23 = vmul.f32 %v5987_v22, %v5970_v13  ;;  %v704_v29 = vmul.f32 %v5041_v28, %v5970_v13 }
  0x95   : > { %526 = vperm.xlu1 %5679, %v415_v11   ;;  %v768_v34 = vmul.f32 %v6015_v32, %v5970_v13  ;;  %v832_v39 = vmul.f32 %v5047_v38, %v5970_v13  ;;  %v470_v42 = vmul.f32 %v5031_v7, %v6036_v40  ;;  %v561_v51 = vmul.f32 %v5033_v15, %v6036_v40 }
  0x96   : > { %499 = vrot.lane.b32.xlu0 %v497_v14, %s5868_s25  ;;  %v689_v60 = vmul.f32 %v5996_v25, %v6036_v40  ;;  %v625_v14 = vmul.f32 %v5981_v20, %v6036_v40 }
  0x98   : > { %v6038_v41 = vpop.permute.xlu1 %484  ;;  %v6041_v43 = vpop.permute.xlu0 %505 }
  0x99   : > { %520 = vrot.lane.b32.xlu1 %v518_v16, %s5868_s25  ;;  %v491_v44 = vmul.f32 %v5032_v10, %v6038_v41  ;;  %v512_v48 = vmul.f32 %v5033_v15, %v6041_v43  ;;  %v574_v53 = vmul.f32 %v5035_v17, %v6038_v41  ;;  %v702_v1 = vmul.f32 %v5041_v28, %v6038_v41 }
  0x9a   : > { %565 = vrot.lane.b32.xlu0 %v563_v18, %s5868_s25  ;;  %v587_v7 = vmul.f32 %v5981_v20, %v6041_v43  ;;  %v817_v20 = vmul.f32 %v6024_v35, %v6036_v40 }
  0x9d   : > { %578 = vrot.lane.b32.xlu1 %v576_v19, %s5868_s25  ;;  %v638_v19 = vmul.f32 %v5987_v22, %v6038_v41  ;;  %v830_v22 = vmul.f32 %v5047_v38, %v6038_v41 }
  0x9e   : > { %591 = vrot.lane.b32.xlu0 %v589_v21, %s5868_s25 }
  0xa1   : > { %629 = vrot.lane.b32.xlu1 %v627_v24, %s5868_s25 }
  0xa2   : > { %642 = vrot.lane.b32.xlu0 %v640_v23, %s5868_s25  ;;  %v6061_v23 = vld [vmem:[%s5957_s24 + $0xc] ss:$0 sm:$0xff] }
  0xa3   : > { %v845_v24 = vmul.f32 %v6061_v23, %v5968_v12  ;;  %v843_v38 = vmul.f32 %v6061_v23, %v6041_v43 }
  0xa5   : > { %655 = vrot.lane.b32.xlu1 %v653_v26, %s5868_s25 }
  0xa6   : > { %693 = vrot.lane.b32.xlu0 %v691_v27, %s5868_s25 }
  0xa9   : > { %706 = vrot.lane.b32.xlu1 %v704_v29, %s5868_s25  ;;  %v651_v29 = vmul.f32 %v5996_v25, %v6041_v43 }
  0xaa   : > { %719 = vrot.lane.b32.xlu0 %v717_v31, %s5868_s25 }
  0xad   : > { %757 = vrot.lane.b32.xlu1 %v755_v33, %s5868_s25 }
  0xae   : > { %770 = vrot.lane.b32.xlu0 %v768_v34, %s5868_s25 }
  0xb1   : > { %783 = vrot.lane.b32.xlu1 %v781_v36, %s5868_s25 }
  0xb2   : > { %821 = vrot.lane.b32.xlu0 %v819_v37, %s5868_s25 }
  0xb6   : > { %834 = vrot.lane.b32.xlu0 %v832_v39, %s5868_s25 }
 0x103   : > { %v479_v45 = vpop.permute.xlu1 %478 }
 0x104   : > { %v481_v46 = vadd.f32 %v479_v45, %v470_v42  ;;  %v715_v45 = vmul.f32 %v6009_v30, %v6041_v43 }
 0x106   : > { %v492_v47 = vadd.f32 %v491_v44, %v481_v46 }
 0x108   : > { %v500_v49 = vpop.permute.xlu0 %499 }
 0x109   : > { %v502_v50 = vadd.f32 %v500_v49, %v492_v47 }
 0x10b   : > { %v513_v52 = vadd.f32 %v512_v48, %v502_v50 }
 0x10c   : > { %v566_v54 = vpop.permute.xlu0 %565 }
 0x10d   : > { %v568_v55 = vadd.f32 %v566_v54, %v561_v51  ;;  %v753_v51 = vmul.f32 %v6009_v30, %v6036_v40  ;;  %v779_v30 = vmul.f32 %v6024_v35, %v6041_v43 }
 0x10f   : > { %v575_v56 = vadd.f32 %v574_v53, %v568_v55  ;;  %v766_v53 = vmul.f32 %v6015_v32, %v6038_v41 }
 0x110   : > { %v592_v57 = vpop.permute.xlu0 %591 }
 0x114   : > { %v643_v58 = vpop.permute.xlu0 %642  ;;  %v6047_v59 = vpop.permute.xlu1 %526 }
 0x118   : > { %v694_v61 = vpop.permute.xlu0 %693  ;;  %v521_v62 = vpop.permute.xlu1 %520 }
 0x119   : > { %v696_v63 = vadd.f32 %v694_v61, %v689_v60  ;;  %v523_v0 = vadd.f32 %v521_v62, %v513_v52 }
 0x11b   : > { %v529_v2 = vadd.f32 %v6047_v59, %v523_v0  ;;  %v703_v4 = vadd.f32 %v702_v1, %v696_v63 }
 0x11c   : > { %v720_v5 = vpop.permute.xlu0 %719  ;;  %v579_v6 = vpop.permute.xlu1 %578 }
 0x11d   : > { %v581_v9 = vadd.f32 %v579_v6, %v575_v56  ;;  %vm530_vm0 = vcmp.ge.f32.partialorder %v529_v2, 0.0  ;;  %v531_v10 = vmul.f32 0.01, %v529_v2  ;;  %v1580_v6 = vld [vmem:[#allocation2] sm:$0xff] }
 0x11e   : > { %1638 = vmatpush1.bf16.msra.mxu0 %v1580_v6 }
 0x11f   : > { %v588_v11 = vadd.f32 %v587_v7, %v581_v9  ;;  %v532_v15 = vsel %vm530_vm0, %v529_v2, %v531_v10  ;;  %v1582_v7 = vld [vmem:[#allocation2 + $0x10] sm:$0xff]  ;;  %1639 = vmatprep.subr.bf16.mxu0 %v5864_v3  ;;  %v1581_v9 = vld [vmem:[#allocation2 + $0x8] sm:$0xff]  ;;  %v1583_v10 = vld [vmem:[#allocation2 + $0x18] sm:$0xff] }
 0x120   : > { %v771_v16 = vpop.permute.xlu0 %770  ;;  %v630_v17 = vpop.permute.xlu1 %629  ;;  %534 = vrot.lane.b32.xlu1 %v532_v15, %s5869_s28  ;;  %1701 = vmatpush1.bf16.msra.mxu1 %v1582_v7 }
 0x121   : > { %v594_v18 = vadd.f32 %v592_v57, %v588_v11  ;;  %v632_v21 = vadd.f32 %v630_v17, %v625_v14  ;;  %1702 = vmatprep.subr.bf16.mxu1 %v5864_v3  ;;  %v6113_v11 = vld [vmem:[#allocation2 + $0x20] sm:$0xff]  ;;  %v6119_v14 = vld [vmem:[#allocation2 + $0x28] sm:$0xff] }
 0x122   : > { %1640 = vmatpush1.bf16.msra.mxu0 %v1581_v9 }
 0x123   : > { %v639_v26 = vadd.f32 %v638_v19, %v632_v21  ;;  %v595_v27 = vadd.f32 %v594_v18, %v6047_v59  ;;  %1641 = vmatprep.subr.bf16.mxu0 %v5864_v3 }
 0x124   : > { %v822_v28 = vpop.permute.xlu0 %821  ;;  %v656_v31 = vpop.permute.xlu1 %655  ;;  %847 = vrot.lane.b32.xlu1 %v845_v24, %s5868_s25  ;;  %1703 = vmatpush1.bf16.msra.mxu1 %v1583_v10 }
 0x125   : > { %v824_v33 = vadd.f32 %v822_v28, %v817_v20  ;;  %v645_v34 = vadd.f32 %v643_v58, %v639_v26  ;;  %vm596_vm1 = vcmp.ge.f32.partialorder %v595_v27, 0.0  ;;  %v597_v36 = vmul.f32 0.01, %v595_v27  ;;  %1704 = vmatprep.subr.bf16.mxu1 %v5864_v3 }
 0x126   : > { %1642 = vmatpush1.bf16.msra.mxu0 %v1582_v7  ;;  %v6222_v7 = vld [vmem:[%s5957_s24 + $0xf] ss:$0 sm:$0xff] }
 0x127   : > { %v652_v37 = vadd.f32 %v651_v29, %v645_v34  ;;  %v831_v39 = vadd.f32 %v830_v22, %v824_v33  ;;  %v598_v42 = vsel %vm596_vm1, %v595_v27, %v597_v36  ;;  %1643 = vmatprep.subr.bf16.mxu0 %v5864_v3 }
 0x128   : > { %v835_v44 = vpop.permute.xlu0 %834  ;;  %600 = vrot.lane.b32.xlu0 %v598_v42, %s5869_s28  ;;  %v707_v46 = vpop.permute.xlu1 %706  ;;  %1705 = vmatpush1.bf16.msra.mxu1 %v6113_v11 }
 0x129   : > { %v658_v25 = vadd.f32 %v656_v31, %v652_v37  ;;  %v837_v47 = vadd.f32 %v835_v44, %v831_v39  ;;  %v709_v48 = vadd.f32 %v707_v46, %v703_v4  ;;  %1706 = vmatprep.subr.bf16.mxu1 %v5864_v3  ;;  %v6152_v37 = vld [vmem:[%s8014_s3 + $0x4] ss:$8 sps:$4 sm:$0xff]  }
 0x12a   : > { %1644 = vmatpush1.bf16.msra.mxu0 %v1583_v10  ;;  %5086 = vmatprep.mubr.msk.bf16.mxu0 %vm1630_vm9, %v6152_v37 }
 0x12b   : > { %v659_v49 = vadd.f32 %v658_v25, %v6047_v59  ;;  %v716_v50 = vadd.f32 %v715_v45, %v709_v48  ;;  %v6080_v52 = vadd.f32 %v843_v38, %v837_v47  ;;  %1645 = vmatprep.subr.bf16.mxu0 %v5864_v3  ;;  %5088 = vmatprep.mubr.msk.bf16.mxu1 %vm1630_vm9, %v6152_v37 }
 0x12c   : > { %v758_v54 = vpop.permute.xlu1 %757  ;;  %1707 = vmatpush1.bf16.msra.mxu1 %v6119_v14 }
 0x12d   : > { %v722_v55 = vadd.f32 %v720_v5, %v716_v50  ;;  %v760_v56 = vadd.f32 %v758_v54, %v753_v51  ;;  %vm660_vm2 = vcmp.ge.f32.partialorder %v659_v49, 0.0  ;;  %v661_v57 = vmul.f32 0.01, %v659_v49  ;;  %1708 = vmatprep.subr.bf16.mxu1 %v5864_v3 }
 0x12e   : > { %1646 = vmatpush1.bf16.msra.mxu0 %v6113_v11 }
 0x12f   : > { %v767_v58 = vadd.f32 %v766_v53, %v760_v56  ;;  %v662_v60 = vsel %vm660_vm2, %v659_v49, %v661_v57  ;;  %v723_v61 = vadd.f32 %v722_v55, %v6047_v59  ;;  %1647 = vmatprep.subr.bf16.mxu0 %v5864_v3 }
 0x130   : > { %664 = vrot.lane.b32.xlu1 %v662_v60, %s5869_s28  ;;  %v784_v32 = vpop.permute.xlu1 %783 }
 0x131   : > { %v773_v62 = vadd.f32 %v771_v16, %v767_v58  ;;  %vm724_vm3 = vcmp.ge.f32.partialorder %v723_v61, 0.0  ;;  %v725_v63 = vmul.f32 0.01, %v723_v61 }
 0x132   : > { %1648 = vmatpush1.bf16.msra.mxu0 %v6119_v14 }
 0x133   : > { %v780_v0 = vadd.f32 %v779_v30, %v773_v62  ;;  %v726_v1 = vsel %vm724_vm3, %v723_v61, %v725_v63  ;;  %1649 = vmatprep.subr.bf16.mxu0 %v5864_v3  ;;  %v883_v62 = vmul.f32 %v6061_v23, %v5960_v8  ;;  %v6201_v63 = vld [vmem:[%s5957_s24 + $0xd] ss:$0 sm:$0xff] }
 0x134   : > { %728 = vrot.lane.b32.xlu0 %v726_v1, %s5869_s28 }
 0x135   : > { %v786_v2 = vadd.f32 %v784_v32, %v780_v0  ;;  %v6208_v0 = vld [vmem:[%s5957_s24 + $0xe] ss:$0 sm:$0xff] }
 0x137   : > { %v787_v35 = vadd.f32 %v786_v2, %v6047_v59  ;;  %v909_v2 = vmul.f32 %v6208_v0, %v5968_v12 }
 0x139   : > { %vm788_vm5 = vcmp.ge.f32.partialorder %v787_v35, 0.0  ;;  %v789_v4 = vmul.f32 0.01, %v787_v35 }
 0x13b   : > { %v790_v5 = vsel %vm788_vm5, %v787_v35, %v789_v4 }
 0x13c   : > { %792 = vrot.lane.b32.xlu0 %v790_v5, %s5869_s28  ;;  %v896_v5 = vmul.f32 %v6201_v63, %v5970_v13 }
 0x192   : > { %v535_v15 = vpop.permute.xlu1 %534 }
 0x193   : > { %v538_v16 = vsel %vm537_vm6, 0.0, %v535_v15 }
 0x194   : > { %v540_v17 = vsel %vm539_vm7, %v538_v16, 0.0  ;;  %v947_v16 = vmul.f32 %v6208_v0, %v5960_v8 }
 0x195   : > { %545 = vrot.lane.b32.xlu0 %v540_v17, %s5870_s29  ;;  %542 = vrot.lane.b32.xlu1 %v540_v17, %s5868_s25 }
 0x196   : > { %v848_v18 = vpop.permute.xlu1 %847 }
 0x197   : > { %v850_v19 = vadd.f32 %v848_v18, %v6080_v52 }
 0x199   : > { %v851_v21 = vadd.f32 %v850_v19, %v6047_v59  ;;  %548 = vrot.lane.b32.xlu1 %v540_v17, %s5871_s30  ;;  %v6239_v19 = vld [vmem:[%s5957_s24 + $0x10] ss:$0 sm:$0xff] }
 0x19a   : > { %v601_v24 = vpop.permute.xlu0 %600 }
 0x19b   : > { %v603_v26 = vsel %vm537_vm6, 0.0, %v601_v24  ;;  %v853_v27 = vmul.f32 0.01, %v851_v21  ;;  %vm852_vm8 = vcmp.ge.f32.partialorder %v851_v21, 0.0 }
 0x19c   : > { %v604_v20 = vsel %vm539_vm7, %v603_v26, 0.0  ;;  %v973_v26 = vmul.f32 %v6239_v19, %v5968_v12 }
 0x19d   : > { %609 = vrot.lane.b32.xlu0 %v604_v20, %s5870_s29  ;;  %606 = vrot.lane.b32.xlu1 %v604_v20, %s5868_s25  ;;  %v854_v28 = vsel %vm852_vm8, %v851_v21, %v853_v27 }
 0x1a1   : > { %612 = vrot.lane.b32.xlu1 %v604_v20, %s5871_s30  ;;  %856 = vrot.lane.b32.xlu0 %v854_v28, %s5869_s28  ;;  %v6256_v28 = vld [vmem:[%s5957_s24 + $0x11] ss:$0 sm:$0xff] }
 0x1a2   : > { %v665_v29 = vpop.permute.xlu1 %664 }
 0x1a3   : > { %v667_v31 = vsel %vm537_vm6, 0.0, %v665_v29 }
 0x1a4   : > { %v668_v22 = vsel %vm539_vm7, %v667_v31, 0.0 }
 0x1a5   : > { %673 = vrot.lane.b32.xlu0 %v668_v22, %s5870_s29  ;;  %670 = vrot.lane.b32.xlu1 %v668_v22, %s5868_s25 }
 0x1a6   : > { %v729_v33 = vpop.permute.xlu0 %728 }
 0x1a7   : > { %v731_v34 = vsel %vm537_vm6, 0.0, %v729_v33  ;;  %v6269_v33 = vld [vmem:[%s8014_s3] ss:$8 sps:$4 sm:$0xff]  }
 0x1a8   : > { %v6144_v36 = vsel %vm539_vm7, %v731_v34, 0.0 }
 0x1a9   : > { %734 = vrot.lane.b32.xlu0 %v6144_v36, %s5868_s25  ;;  %676 = vrot.lane.b32.xlu1 %v668_v22, %s5871_s30 }
 0x1ad   : > { %740 = vrot.lane.b32.xlu0 %v6144_v36, %s5871_s30  ;;  %737 = vrot.lane.b32.xlu1 %v6144_v36, %s5870_s29 }
 0x1ae   : > { %v793_v39 = vpop.permute.xlu0 %792 }
 0x1af   : > { %v795_v42 = vsel %vm537_vm6, 0.0, %v793_v39 }
 0x1b0   : > { %v6164_v44 = vsel %vm539_vm7, %v795_v42, 0.0  ;;  %v6278_v42 = vld [vmem:[%s5957_s24 + $0x13] ss:$0 sm:$0xff] }
 0x1b1   : > { %801 = vrot.lane.b32.xlu0 %v6164_v44, %s5870_s29  ;;  %798 = vrot.lane.b32.xlu1 %v6164_v44, %s5868_s25 }
 0x1b5   : > { %804 = vrot.lane.b32.xlu1 %v6164_v44, %s5871_s30 }
 0x207   : > { %v543_v45 = vpop.permute.xlu1 %542  ;;  %v546_v25 = vpop.permute.xlu0 %545 }
 0x208   : > { %v551_v46 = vpack.c.bf16 %v543_v45, %v540_v17  ;;  %v960_v17 = vmul.f32 %v6222_v7, %v5970_v13 }
 0x20a   : > { %554 = vst.msk [vmem:[#allocation2 + $0x30] sm:$0xff] %vm388_vm4, %v551_v46 }
 0x20b   : > { %v549_v47 = vpop.permute.xlu1 %548 }
 0x20c   : > { %v552_v48 = vpack.c.bf16 %v549_v47, %v546_v25  ;;  %v1088_v25 = vmul.f32 %v6278_v42, %v5970_v13 }
 0x20e   : > { %555 = vst.msk [vmem:[#allocation2 + $0x38] sm:$0xff] %vm388_vm4, %v552_v48 }
 0x20f   : > { %v610_v38 = vpop.permute.xlu0 %609  ;;  %v607_v49 = vpop.permute.xlu1 %606 }
 0x210   : > { %v615_v50 = vpack.c.bf16 %v607_v49, %v604_v20  ;;  %v1011_v20 = vmul.f32 %v6239_v19, %v5960_v8 }
 0x211   : > { %v6174_v51 = vld [vmem:[#allocation2 + $0x30] sm:$0xff] }
 0x212   : > { %618 = vst.msk [vmem:[#allocation2 + $0x40] sm:$0xff] %vm388_vm4, %v615_v50  ;;  %1650 = vmatpush1.bf16.msra.mxu0 %v6174_v51  ;;  %1709 = vmatpush1.bf16.msra.mxu1 %v6174_v51 }
 0x213   : > { %v857_v52 = vpop.permute.xlu0 %856  ;;  %v613_v53 = vpop.permute.xlu1 %612  ;;  %1651 = vmatprep.subr.bf16.mxu0 %v5864_v3  ;;  %1710 = vmatprep.subr.bf16.mxu1 %v5864_v3 }
 0x214   : > { %v859_v54 = vsel %vm537_vm6, 0.0, %v857_v52  ;;  %v616_v55 = vpack.c.bf16 %v613_v53, %v610_v38  ;;  %v6317_v38 = vld [vmem:[%s8014_s3 + $0x10] ss:$8 sps:$4 sm:$0xff]   ;;  %v881_v53 = vmul.f32 %v6061_v23, %v6036_v40  ;;  %v945_v23 = vmul.f32 %v6208_v0, %v6036_v40 }
 0x215   : > { %v6183_v56 = vsel %vm539_vm7, %v859_v54, 0.0  ;;  %v6185_v57 = vld [vmem:[#allocation2 + $0x38] sm:$0xff] }
 0x216   : > { %619 = vst.msk [vmem:[#allocation2 + $0x48] sm:$0xff] %vm388_vm4, %v616_v55  ;;  %862 = vrot.lane.b32.xlu0 %v6183_v56, %s5868_s25  ;;  %865 = vrot.lane.b32.xlu1 %v6183_v56, %s5870_s29 }
 0x217   : > { %1652 = vmatpush1.bf16.msra.mxu0 %v6185_v57  ;;  %1711 = vmatpush1.bf16.msra.mxu1 %v6185_v57  ;;  %v674_v58 = vpop.permute.xlu0 %673  ;;  %v671_v60 = vpop.permute.xlu1 %670 }
 0x218   : > { %v679_v61 = vpack.c.bf16 %v671_v60, %v668_v22  ;;  %1653 = vmatprep.subr.bf16.mxu0 %v5864_v3  ;;  %1712 = vmatprep.subr.bf16.mxu1 %v5864_v3  ;;  %v6264_v22 = vld [vmem:[%s5957_s24 + $0x12] ss:$0 sm:$0xff]  ;;  %v894_v60 = vmul.f32 %v6201_v63, %v6038_v41 }
 0x219   : > { %v6198_v30 = vld [vmem:[#allocation2 + $0x40] sm:$0xff]  ;;  %v1037_v39 = vmul.f32 %v6264_v22, %v5968_v12  ;;  %v1075_v46 = vmul.f32 %v6264_v22, %v5960_v8 }
 0x21a   : > { %682 = vst.msk [vmem:[#allocation2 + $0x50] sm:$0xff] %vm388_vm4, %v679_v61  ;;  %868 = vrot.lane.b32.xlu0 %v6183_v56, %s5871_s30  ;;  %885 = vrot.lane.b32.xlu1 %v883_v62, %s5868_s25 }
 0x21b   : > { %1654 = vmatpush1.bf16.msra.mxu0 %v6198_v30  ;;  %1713 = vmatpush1.bf16.msra.mxu1 %v6198_v30  ;;  %v735_v1 = vpop.permute.xlu0 %734  ;;  %v677_v32 = vpop.permute.xlu1 %676 }
 0x21c   : > { %v743_v35 = vpack.c.bf16 %v735_v1, %v6144_v36  ;;  %v680_v4 = vpack.c.bf16 %v677_v32, %v674_v58  ;;  %1655 = vmatprep.subr.bf16.mxu0 %v5864_v3  ;;  %1714 = vmatprep.subr.bf16.mxu1 %v5864_v3  ;;  %v1024_v36 = vmul.f32 %v6256_v28, %v5970_v13 }
 0x21d   : > { %v6219_v6 = vld [vmem:[#allocation2 + $0x48] sm:$0xff] }
 0x21e   : > { %746 = vst.msk [vmem:[#allocation2 + $0x60] sm:$0xff] %vm388_vm4, %v743_v35  ;;  %683 = vst.msk [vmem:[#allocation2 + $0x58] sm:$0xff] %vm388_vm4, %v680_v4  ;;  %898 = vrot.lane.b32.xlu0 %v896_v5, %s5868_s25  ;;  %911 = vrot.lane.b32.xlu1 %v909_v2, %s5868_s25 }
 0x21f   : > { %1656 = vmatpush1.bf16.msra.mxu0 %v6219_v6  ;;  %1715 = vmatpush1.bf16.msra.mxu1 %v6219_v6  ;;  %v741_v9 = vpop.permute.xlu0 %740  ;;  %v738_v10 = vpop.permute.xlu1 %737 }
 0x220   : > { %v744_v15 = vpack.c.bf16 %v741_v9, %v738_v10  ;;  %1657 = vmatprep.subr.bf16.mxu0 %v5864_v3  ;;  %1716 = vmatprep.subr.bf16.mxu1 %v5864_v3  ;;  %v958_v10 = vmul.f32 %v6222_v7, %v6038_v41 }
 0x221   : > { %v6236_v18 = vld [vmem:[#allocation2 + $0x50] sm:$0xff] }
 0x222   : > { %747 = vst.msk [vmem:[#allocation2 + $0x68] sm:$0xff] %vm388_vm4, %v744_v15  ;;  %949 = vrot.lane.b32.xlu0 %v947_v16, %s5868_s25  ;;  %962 = vrot.lane.b32.xlu1 %v960_v17, %s5868_s25 }
 0x223   : > { %1658 = vmatpush1.bf16.msra.mxu0 %v6236_v18  ;;  %1717 = vmatpush1.bf16.msra.mxu1 %v6236_v18  ;;  %v799_v21 = vpop.permute.xlu1 %798  ;;  %v802_v29 = vpop.permute.xlu0 %801 }
 0x224   : > { %v807_v24 = vpack.c.bf16 %v799_v21, %v6164_v44  ;;  %1659 = vmatprep.subr.bf16.mxu0 %v5864_v3  ;;  %1718 = vmatprep.subr.bf16.mxu1 %v5864_v3  ;;  %v6283_v44 = vld [vmem:[%s8014_s3 + $0x14] ss:$8 sps:$4 sm:$0xff]   ;;  %v1009_v21 = vmul.f32 %v6239_v19, %v6036_v40 }
 0x225   : > { %v6253_v27 = vld [vmem:[#allocation2 + $0x58] sm:$0xff]  ;;  %v6288_v45 = vld [vmem:[#allocation2 + $0x60] sm:$0xff] }
 0x226   : > { %810 = vst.msk [vmem:[#allocation2 + $0x70] sm:$0xff] %vm388_vm4, %v807_v24  ;;  %975 = vrot.lane.b32.xlu0 %v973_v26, %s5868_s25  ;;  %1013 = vrot.lane.b32.xlu1 %v1011_v20, %s5868_s25  ;;  %v1022_v20 = vmul.f32 %v6256_v28, %v6038_v41  ;;  %v1035_v28 = vmul.f32 %v6264_v22, %v6041_v43 }
 0x227   : > { %1660 = vmatpush1.bf16.msra.mxu0 %v6253_v27  ;;  %1719 = vmatpush1.bf16.msra.mxu1 %v6253_v27  ;;  %v805_v31 = vpop.permute.xlu1 %804 }
 0x228   : > { %v808_v34 = vpack.c.bf16 %v805_v31, %v802_v29  ;;  %1720 = vmatprep.subr.bf16.mxu1 %v5864_v3  ;;  %1767 = vmatprep.subr.bf16.mxu0 %v5864_v3 }
 0x229   : > { %v6303_v47 = vld [vmem:[#allocation2 + $0x68] sm:$0xff] }
 0x22a   : > { %811 = vst.msk [vmem:[#allocation2 + $0x78] sm:$0xff] %vm388_vm4, %v808_v34  ;;  %1026 = vrot.lane.b32.xlu0 %v1024_v36, %s5868_s25  ;;  %1039 = vrot.lane.b32.xlu1 %v1037_v39, %s5868_s25 }
 0x22b   : > { %1670 = vmatmul.mubr.bf16.vlgmr.msra.gmra.mrb[0].mxu0 %v6269_v33  ;;  %1721 = vmatpush1.bf16.msra.mxu1 %v6288_v45 }
 0x22c   : > { %1768 = vmatpush1.bf16.msra.mxu0 %v6113_v11  ;;  %1722 = vmatprep.subr.bf16.mxu1 %v5864_v3  ;;  %v6307_v11 = vld [vmem:[%s5957_s24 + $0x14] ss:$0 sm:$0xff] }
 0x22d   : > { %1769 = vmatprep.subr.bf16.mxu0 %v5864_v3  ;;  %5087 = vmatprep.mubr.msk.bf16.mxu0 %vm1630_vm9, %v6283_v44  ;;  %v1101_v48 = vmul.f32 %v6307_v11, %v5968_v12 }
 0x22e   : > { %1077 = vrot.lane.b32.xlu0 %v1075_v46, %s5868_s25  ;;  %1090 = vrot.lane.b32.xlu1 %v1088_v25, %s5868_s25 }
 0x22f   : > { %1723 = vmatpush1.bf16.msra.mxu1 %v6303_v47 }
 0x230   : > { %1770 = vmatpush1.bf16.msra.mxu0 %v6119_v14  ;;  %1834 = vmatprep.subr.bf16.mxu1 %v5864_v3  ;;  %v6361_v14 = vld [vmem:[#allocation2 + $0x70] sm:$0xff] }
 0x231   : > { %1771 = vmatprep.subr.bf16.mxu0 %v5864_v3  ;;  %v6367_v49 = vld [vmem:[#allocation2 + $0x78] sm:$0xff] }
 0x232   : > { %1103 = vrot.lane.b32.xlu0 %v1101_v48, %s5868_s25  ;;  %1733 = vmatmul.mubr.bf16.vlgmr.msra.gmra.mrb[0].mxu1 %v6269_v33  ;;  %v420_v48 = vld [vmem:[%s8015_s4] sm:$0xff] }
 0x233   : > { %1835 = vmatpush1.bf16.msra.mxu1 %v6174_v51  ;;  %5089 = vmatprep.mubr.msk.bf16.mxu1 %vm1630_vm9, %v6283_v44 }
 0x234   : > { %1772 = vmatpush1.bf16.msra.mxu0 %v6174_v51  ;;  %1836 = vmatprep.subr.bf16.mxu1 %v5864_v3 }
 0x235   : > { %1773 = vmatprep.subr.bf16.mxu0 %v5864_v3  ;;  %1678 = vmatmul.mubr.bf16.gmra.mrb[4].mxu0 %v6317_v38 }
 0x236   : > { %5090 = vmatprep.mubr.msk.bf16.mxu0 %vm1630_vm9, %v6152_v37 }
 0x237   : > { %1837 = vmatpush1.bf16.msra.mxu1 %v6185_v57 }
 0x238   : > { %1774 = vmatpush1.bf16.msra.mxu0 %v6185_v57  ;;  %1838 = vmatprep.subr.bf16.mxu1 %v5864_v3 }
 0x239   : > { %1775 = vmatprep.subr.bf16.mxu0 %v5864_v3 }
 0x23a   : > { %1741 = vmatmul.mubr.bf16.gmra.mrb[4].mxu1 %v6317_v38 }
 0x23b   : > { %1839 = vmatpush1.bf16.msra.mxu1 %v6198_v30  ;;  %5092 = vmatprep.mubr.msk.bf16.mxu1 %vm1630_vm9, %v6152_v37 }
 0x23c   : > { %1776 = vmatpush1.bf16.msra.mxu0 %v6198_v30  ;;  %1840 = vmatprep.subr.bf16.mxu1 %v5864_v3 }
 0x23d   : > { %1777 = vmatprep.subr.bf16.mxu0 %v5864_v3 }
 0x23f   : > { %1841 = vmatpush1.bf16.msra.mxu1 %v6219_v6 }
 0x240   : > { %1778 = vmatpush1.bf16.msra.mxu0 %v6219_v6  ;;  %1842 = vmatprep.subr.bf16.mxu1 %v5864_v3 }
 0x241   : > { %1779 = vmatprep.subr.bf16.mxu0 %v5864_v3 }
 0x243   : > { %1843 = vmatpush1.bf16.msra.mxu1 %v6236_v18 }
 0x244   : > { %1780 = vmatpush1.bf16.msra.mxu0 %v6236_v18  ;;  %1844 = vmatprep.subr.bf16.mxu1 %v5864_v3 }
 0x245   : > { %1781 = vmatprep.subr.bf16.mxu0 %v5864_v3 }
 0x247   : > { %1845 = vmatpush1.bf16.msra.mxu1 %v6253_v27 }
 0x248   : > { %1782 = vmatpush1.bf16.msra.mxu0 %v6253_v27  ;;  %1846 = vmatprep.subr.bf16.mxu1 %v5864_v3 }
 0x249   : > { %1783 = vmatprep.subr.bf16.mxu0 %v5864_v3 }
 0x24b   : > { %1847 = vmatpush1.bf16.msra.mxu1 %v6288_v45 }
 0x24c   : > { %1784 = vmatpush1.bf16.msra.mxu0 %v6288_v45  ;;  %1848 = vmatprep.subr.bf16.mxu1 %v5864_v3 }
 0x24d   : > { %1785 = vmatprep.subr.bf16.mxu0 %v5864_v3 }
 0x24f   : > { %1849 = vmatpush1.bf16.msra.mxu1 %v6303_v47 }
 0x250   : > { %1786 = vmatpush1.bf16.msra.mxu0 %v6303_v47  ;;  %1850 = vmatprep.subr.bf16.mxu1 %v5864_v3 }
 0x251   : > { %1787 = vmatprep.subr.bf16.mxu0 %v5864_v3 }
 0x253   : > { %1851 = vmatpush1.bf16.msra.mxu1 %v6361_v14 }
 0x254   : > { %1788 = vmatpush1.bf16.msra.mxu0 %v6361_v14  ;;  %1852 = vmatprep.subr.bf16.mxu1 %v5864_v3 }
 0x255   : > { %1789 = vmatprep.subr.bf16.mxu0 %v5864_v3 }
 0x257   : > { %1853 = vmatpush1.bf16.msra.mxu1 %v6367_v49 }
 0x258   : > { %1790 = vmatpush1.bf16.msra.mxu0 %v6367_v49  ;;  %1854 = vmatprep.subr.bf16.mxu1 %v5864_v3 }
 0x25b   : > { %1800 = vmatmul.mubr.bf16.vlgmr.msra.gmra.mrb[8].mxu0 %v6269_v33 }
 0x25c   : > { %5091 = vmatprep.mubr.msk.bf16.mxu0 %vm1630_vm9, %v6283_v44 }
 0x263   : > { %1808 = vmatmul.mubr.bf16.gmra.mrb[12].mxu0 %v6317_v38 }
 0x288   : > { %v863_v50 = vpop.permute.xlu0 %862  ;;  %v866_v51 = vpop.permute.xlu1 %865 }
 0x289   : > { %v871_v52 = vpack.c.bf16 %v863_v50, %v6183_v56  ;;  %v907_v56 = vmul.f32 %v6208_v0, %v6041_v43  ;;  %v971_v0 = vmul.f32 %v6239_v19, %v6041_v43 }
 0x28b   : > { %874 = vst.msk [vmem:[#allocation2 + $0x80] sm:$0xff] %vm388_vm4, %v871_v52 }
 0x28c   : > { %v869_v54 = vpop.permute.xlu0 %868  ;;  %v886_v55 = vpop.permute.xlu1 %885 }
 0x28d   : > { %v872_v57 = vpack.c.bf16 %v869_v54, %v866_v51  ;;  %v888_v58 = vadd.f32 %v886_v55, %v881_v53  ;;  %v1073_v53 = vmul.f32 %v6264_v22, %v6036_v40  ;;  %v1086_v55 = vmul.f32 %v6278_v42, %v6038_v41 }
 0x28e   : > { %v1099_v42 = vmul.f32 %v6307_v11, %v6041_v43 }
 0x28f   : > { %875 = vst.msk [vmem:[#allocation2 + $0x88] sm:$0xff] %vm388_vm4, %v872_v57  ;;  %v895_v61 = vadd.f32 %v894_v60, %v888_v58  ;;  %v422_v60 = vld [vmem:[%s8015_s4 + $0x10] sm:$0xff] }
 0x290   : > { %v899_v62 = vpop.permute.xlu0 %898  ;;  %v912_v1 = vpop.permute.xlu1 %911 }
 0x291   : > { %v901_v32 = vadd.f32 %v899_v62, %v895_v61 }
 0x292   : > { %v6385_v2 = vld [vmem:[#allocation2 + $0x80] sm:$0xff] }
 0x293   : > { %v908_v35 = vadd.f32 %v907_v56, %v901_v32  ;;  %1855 = vmatpush1.bf16.msra.mxu1 %v6385_v2 }
 0x294   : > { %v950_v4 = vpop.permute.xlu0 %949  ;;  %v963_v5 = vpop.permute.xlu1 %962  ;;  %1856 = vmatprep.subr.bf16.mxu1 %v5864_v3 }
 0x295   : > { %v914_v63 = vadd.f32 %v912_v1, %v908_v35  ;;  %v952_v9 = vadd.f32 %v950_v4, %v945_v23  ;;  %v423_v35 = vld [vmem:[%s8015_s4 + $0x18] sm:$0xff]  ;;  %v421_v23 = vld [vmem:[%s8015_s4 + $0x8] sm:$0xff] }
 0x296   : > { %v6393_v15 = vld [vmem:[#allocation2 + $0x88] sm:$0xff] }
 0x297   : > { %v915_v16 = vadd.f32 %v914_v63, %v6047_v59  ;;  %v959_v17 = vadd.f32 %v958_v10, %v952_v9  ;;  %1857 = vmatpush1.bf16.msra.mxu1 %v6393_v15 }
 0x298   : > { %v976_v24 = vpop.permute.xlu0 %975  ;;  %v1014_v26 = vpop.permute.xlu1 %1013 }
 0x299   : > { %v965_v29 = vadd.f32 %v963_v5, %v959_v17  ;;  %v1016_v7 = vadd.f32 %v1014_v26, %v1009_v21  ;;  %vm916_vm10 = vcmp.ge.f32.partialorder %v915_v16, 0.0  ;;  %v917_v31 = vmul.f32 0.01, %v915_v16 }
 0x29a   : > { %1867 = vmatmul.mubr.bf16.vlgmr.msra.gmra.mrb[8].mxu1 %v6269_v33 }
 0x29b   : > { %v972_v34 = vadd.f32 %v971_v0, %v965_v29  ;;  %v1023_v36 = vadd.f32 %v1022_v20, %v1016_v7  ;;  %v918_v39 = vsel %vm916_vm10, %v915_v16, %v917_v31  ;;  %5093 = vmatprep.mubr.msk.bf16.mxu1 %vm1630_vm9, %v6283_v44  ;;  %v6437_v0 = vld [vmem:[%s8018_s7] sm:$0xff]   ;;  %v6451_v29 = vld [vmem:[%s8018_s7 + $0x8] sm:$0xff]  }
 0x29c   : > { %v1027_v46 = vpop.permute.xlu0 %1026  ;;  %920 = vrot.lane.b32.xlu1 %v918_v39, %s5869_s28  ;;  %v1040_v50 = vpop.permute.xlu1 %1039  ;;  %5459 = vmatprep.subr.bf16.mxu0 %v6437_v0  ;;  %v6456_v7 = vld [vmem:[%s8019_s8 + $0x8] sm:$0xff]  }
 0x29d   : > { %v978_v19 = vadd.f32 %v976_v24, %v972_v34  ;;  %v1029_v25 = vadd.f32 %v1027_v46, %v1023_v36  ;;  %v6442_v24 = vld [vmem:[%s8019_s8] sm:$0xff]   ;;  %5460 = vmatpush3.bf16.msra.mxu0 %v6437_v0 }
 0x29e   : > { %5467 = vmatprep.subr.bf16.mxu1 %v6442_v24  ;;  %5461 = vmatprep.subr.bf16.mxu0 %v6451_v29 }
 0x29f   : > { %v979_v51 = vadd.f32 %v978_v19, %v6047_v59  ;;  %v1036_v52 = vadd.f32 %v1035_v28, %v1029_v25  ;;  %5468 = vmatpush3.bf16.msra.mxu1 %v6442_v24 }
 0x2a0   : > { %v1078_v54 = vpop.permute.xlu0 %1077  ;;  %1594 = vperm.xlu1 %5679, %v420_v48   ;;  %v1091_v22 = vpop.permute.xlu1 %1090  ;;  %5469 = vmatprep.subr.bf16.mxu1 %v6456_v7 }
 0x2a1   : > { %v1042_v57 = vadd.f32 %v1040_v50, %v1036_v52  ;;  %v1080_v58 = vadd.f32 %v1078_v54, %v1073_v53  ;;  %vm980_vm11 = vcmp.ge.f32.partialorder %v979_v51, 0.0  ;;  %v981_v61 = vmul.f32 0.01, %v979_v51  ;;  %5462 = vmatpush3.bf16.msra.mxu0 %v6451_v29 }
 0x2a2   : > { %1875 = vmatmul.mubr.bf16.gmra.mrb[12].mxu1 %v6317_v38  ;;  %2111 = vmatprep.subr.bf16.mxu0 %v5864_v3 }
 0x2a3   : > { %v1043_v62 = vadd.f32 %v1042_v57, %v6047_v59  ;;  %v1087_v1 = vadd.f32 %v1086_v55, %v1080_v58  ;;  %v982_v32 = vsel %vm980_vm11, %v979_v51, %v981_v61  ;;  %5470 = vmatpush3.bf16.msra.mxu1 %v6456_v7 }
 0x2a4   : > { %1604 = vperm.xlu1 %5679, %v422_v60   ;;  %984 = vrot.lane.b32.xlu0 %v982_v32, %s5869_s28  ;;  %v1104_v63 = vpop.permute.xlu0 %1103 }
 0x2a5   : > { %v1093_v56 = vadd.f32 %v1091_v22, %v1087_v1  ;;  %v1045_v5 = vmul.f32 0.01, %v1043_v62  ;;  %vm1044_vm12 = vcmp.ge.f32.partialorder %v1043_v62, 0.0  ;;  %2174 = vmatprep.subr.bf16.mxu1 %v5864_v3 }
 0x2a7   : > { %v1100_v4 = vadd.f32 %v1099_v42, %v1093_v56  ;;  %v1046_v16 = vsel %vm1044_vm12, %v1043_v62, %v1045_v5 }
 0x2a8   : > { %1609 = vperm.xlu1 %5679, %v423_v35   ;;  %1599 = vperm.xlu0 %5680, %v421_v23  }
 0x2a9   : > { %v1106_v9 = vadd.f32 %v1104_v63, %v1100_v4 }
 0x2ab   : > { %v1107_v10 = vadd.f32 %v1106_v9, %v6047_v59 }
 0x2ac   : > { %1048 = vrot.lane.b32.xlu0 %v1046_v16, %s5869_s28 }
 0x2ad   : > { %vm1108_vm13 = vcmp.ge.f32.partialorder %v1107_v10, 0.0  ;;  %v1109_v17 = vmul.f32 0.01, %v1107_v10 }
 0x2af   : > { %v1110_v21 = vsel %vm1108_vm13, %v1107_v10, %v1109_v17 }
 0x2b0   : > { %1112 = vrot.lane.b32.xlu1 %v1110_v21, %s5869_s28 }
 0x2fe   : > { %v1671_v26 = vpop.f32.mrb[0].mxu0 }
 0x2ff   : > { %v1673_v20 = vpop.f32.mrb[1].mxu0 }
 0x300   : > { %v1674_v31 = vpop.f32.mrb[2].mxu0 }
 0x301   : > { %v1676_v34 = vpop.f32.mrb[3].mxu0 }
 0x305   : > { %v1734_v36 = vpop.f32.mrb[0].mxu1 }
 0x306   : > { %v1736_v39 = vpop.f32.mrb[1].mxu1 }
 0x307   : > { %v1737_v46 = vpop.f32.mrb[2].mxu1 }
 0x308   : > { %v1739_v19 = vpop.f32.mrb[3].mxu1  ;;  %v1679_v25 = vpop.f32.mrb[4].mxu0 }
 0x309   : > { %v1681_v28 = vpop.f32.mrb[5].mxu0 }
 0x30a   : > { %v1682_v48 = vpop.f32.mrb[6].mxu0 }
 0x30b   : > { %v1684_v50 = vpop.f32.mrb[7].mxu0 }
 0x30d   : > { %v1742_v51 = vpop.f32.mrb[4].mxu1 }
 0x30e   : > { %v921_v52 = vpop.permute.xlu1 %920  ;;  %v1744_v53 = vpop.f32.mrb[5].mxu1 }
 0x30f   : > { %v923_v54 = vsel %vm537_vm6, 0.0, %v921_v52  ;;  %v1745_v55 = vpop.f32.mrb[6].mxu1 }
 0x310   : > { %v6466_v57 = vsel %vm539_vm7, %v923_v54, 0.0  ;;  %v1747_v58 = vpop.f32.mrb[7].mxu1 }
 0x311   : > { %929 = vrot.lane.b32.xlu1 %v6466_v57, %s5870_s29  ;;  %926 = vrot.lane.b32.xlu0 %v6466_v57, %s5868_s25 }
 0x315   : > { %932 = vrot.lane.b32.xlu0 %v6466_v57, %s5871_s30 }
 0x316   : > { %v985_v60 = vpop.permute.xlu0 %984 }
 0x317   : > { %v987_v61 = vsel %vm537_vm6, 0.0, %v985_v60 }
 0x318   : > { %v6476_v62 = vsel %vm539_vm7, %v987_v61, 0.0 }
 0x319   : > { %990 = vrot.lane.b32.xlu1 %v6476_v62, %s5868_s25  ;;  %993 = vrot.lane.b32.xlu0 %v6476_v62, %s5870_s29 }
 0x31d   : > { %996 = vrot.lane.b32.xlu1 %v6476_v62, %s5871_s30 }
 0x31f   : > { %v6484_v1 = vpop.permute.xlu1 %1594 }
 0x320   : > { %v1672_v32 = vadd.f32 %v1671_v26, %v6484_v1  ;;  %v1735_v22 = vadd.f32 %v1734_v36, %v6484_v1 }
 0x322   : > { %vm1686_vm14 = vcmp.ge.f32.partialorder %v1672_v32, 0.0  ;;  %v1690_v56 = vmul.f32 0.01, %v1672_v32  ;;  %vm1749_vm15 = vcmp.ge.f32.partialorder %v1735_v22, 0.0  ;;  %v1753_v42 = vmul.f32 0.01, %v1735_v22 }
 0x323   : > { %v6488_v35 = vpop.permute.xlu1 %1604 }
 0x324   : > { %v1694_v23 = vsel %vm1686_vm14, %v1672_v32, %v1690_v56  ;;  %v1757_v4 = vsel %vm1749_vm15, %v1735_v22, %v1753_v42  ;;  %v1680_v5 = vadd.f32 %v1679_v25, %v6488_v35  ;;  %v1743_v63 = vadd.f32 %v1742_v51, %v6488_v35 }
 0x325   : > { %v1761_v9 = vmax.f32 %v1694_v23, %v1757_v4 }
 0x326   : > { %vm1688_vm0 = vcmp.ge.f32.partialorder %v1680_v5, 0.0  ;;  %v1692_v10 = vmul.f32 0.01, %v1680_v5  ;;  %vm1751_vm1 = vcmp.ge.f32.partialorder %v1743_v63, 0.0  ;;  %v1755_v16 = vmul.f32 0.01, %v1743_v63 }
 0x327   : > { %v6492_v17 = vpop.permute.xlu0 %1599  ;;  %v6494_v21 = vpop.permute.xlu1 %1609 }
 0x328   : > { %v1675_v26 = vadd.f32 %v1674_v31, %v6492_v17  ;;  %v1738_v20 = vadd.f32 %v1737_v46, %v6492_v17  ;;  %v6498_v34 = vsel %vm1688_vm0, %v1680_v5, %v1692_v10  ;;  %v1759_v36 = vsel %vm1751_vm1, %v1743_v63, %v1755_v16 }
 0x329   : > { %v1763_v39 = vmax.f32 %v6498_v34, %v1759_v36  ;;  %v1683_v19 = vadd.f32 %v1682_v48, %v6494_v21  ;;  %v1746_v25 = vadd.f32 %v1745_v55, %v6494_v21 }
 0x32a   : > { %vm1687_vm2 = vcmp.ge.f32.partialorder %v1675_v26, 0.0  ;;  %v1691_v28 = vmul.f32 0.01, %v1675_v26  ;;  %vm1750_vm3 = vcmp.ge.f32.partialorder %v1738_v20, 0.0  ;;  %v1754_v50 = vmul.f32 0.01, %v1738_v20 }
 0x32b   : > { %v1049_v51 = vpop.permute.xlu0 %1048  ;;  %v1113_v52 = vpop.permute.xlu1 %1112  ;;  %vm1689_vm5 = vcmp.ge.f32.partialorder %v1683_v19, 0.0  ;;  %v1693_v53 = vmul.f32 0.01, %v1683_v19  ;;  %vm1752_vm8 = vcmp.ge.f32.partialorder %v1746_v25, 0.0  ;;  %v1756_v31 = vmul.f32 0.01, %v1746_v25 }
 0x32c   : > { %v1051_v46 = vsel %vm537_vm6, 0.0, %v1049_v51  ;;  %v1695_v54 = vsel %vm1687_vm2, %v1675_v26, %v1691_v28  ;;  %v1758_v58 = vsel %vm1750_vm3, %v1738_v20, %v1754_v50  ;;  %v1115_v55 = vsel %vm537_vm6, 0.0, %v1113_v52 }
 0x32d   : > { %v6505_v60 = vsel %vm539_vm7, %v1051_v46, 0.0  ;;  %v1762_v48 = vmax.f32 %v1695_v54, %v1758_v58  ;;  %v1697_v61 = vsel %vm1689_vm5, %v1683_v19, %v1693_v53  ;;  %v1760_v22 = vsel %vm1752_vm8, %v1746_v25, %v1756_v31  ;;  %v6524_v19 = vld [vmem:[%s5957_s24 + $0x15] ss:$0 sm:$0xff]  ;;  %v6539_v54 = vld [vmem:[%s5957_s24 + $0x16] ss:$0 sm:$0xff] }
 0x32e   : > { %v1801_v32 = vpop.f32.mrb[8].mxu0  ;;  %1057 = vrot.lane.b32.xlu1 %v6505_v60, %s5870_s29  ;;  %1054 = vrot.lane.b32.xlu0 %v6505_v60, %s5868_s25  ;;  %v1764_v23 = vmax.f32 %v1697_v61, %v1760_v22  ;;  %v6514_v5 = vsel %vm539_vm7, %v1115_v55, 0.0  ;;  %v1152_v53 = vmul.f32 %v6524_v19, %v5970_v13  ;;  %v1203_v22 = vmul.f32 %v6539_v54, %v5960_v8 }
 0x32f   : > { %v1802_v56 = vadd.f32 %v1801_v32, %v6484_v1  ;;  %v1803_v42 = vpop.f32.mrb[9].mxu0  ;;  %v1165_v32 = vmul.f32 %v6539_v54, %v5968_v12 }
 0x330   : > { %v1804_v4 = vpop.f32.mrb[10].mxu0  ;;  %v6548_v42 = vld [vmem:[%s5957_s24 + $0x17] ss:$0 sm:$0xff] }
 0x331   : > { %vm1816_vm10 = vcmp.ge.f32.partialorder %v1802_v56, 0.0  ;;  %v1820_v63 = vmul.f32 0.01, %v1802_v56  ;;  %v1805_v10 = vadd.f32 %v1804_v4, %v6492_v17  ;;  %v1806_v16 = vpop.f32.mrb[11].mxu0 }
 0x332   : > { %1060 = vrot.lane.b32.xlu0 %v6505_v60, %s5871_s30  ;;  %1118 = vrot.lane.b32.xlu1 %v6514_v5, %s5868_s25  ;;  %v6560_v16 = vld [vmem:[%s5957_s24 + $0x19] ss:$0 sm:$0xff] }
 0x333   : > { %v1824_v26 = vsel %vm1816_vm10, %v1802_v56, %v1820_v63  ;;  %vm1817_vm11 = vcmp.ge.f32.partialorder %v1805_v10, 0.0  ;;  %v1821_v20 = vmul.f32 0.01, %v1805_v10  ;;  %v6553_v63 = vld [vmem:[%s5957_s24 + $0x18] ss:$0 sm:$0xff] }
 0x334   : > { %v6521_v34 = vmax.f32 %v1761_v9, %v1824_v26  ;;  %v1139_v9 = vmul.f32 %v6307_v11, %v5960_v8  ;;  %v1280_v26 = vmul.f32 %v6560_v16, %v5970_v13 }
 0x335   : > { %v1825_v36 = vsel %vm1817_vm11, %v1805_v10, %v1821_v20  ;;  %v1229_v10 = vmul.f32 %v6553_v63, %v5968_v12  ;;  %v6569_v20 = vld [vmem:[%s5957_s24 + $0x1a] ss:$0 sm:$0xff] }
 0x336   : > { %v6526_v25 = vmax.f32 %v1762_v48, %v1825_v36  ;;  %v1809_v28 = vpop.f32.mrb[12].mxu0  ;;  %1121 = vrot.lane.b32.xlu0 %v6514_v5, %s5870_s29  ;;  %1124 = vrot.lane.b32.xlu1 %v6514_v5, %s5871_s30  ;;  %v1293_v36 = vmul.f32 %v6569_v20, %v5968_v12 }
 0x337   : > { %v1810_v50 = vadd.f32 %v1809_v28, %v6488_v35  ;;  %v1811_v51 = vpop.f32.mrb[13].mxu0  ;;  %v1331_v28 = vmul.f32 %v6569_v20, %v5960_v8 }
 0x338   : > { %v1812_v52 = vpop.f32.mrb[14].mxu0  ;;  %v6583_v51 = vld [vmem:[%s5957_s24 + $0x1c] ss:$0 sm:$0xff] }
 0x339   : > { %vm1818_vm12 = vcmp.ge.f32.partialorder %v1810_v50, 0.0  ;;  %v1822_v31 = vmul.f32 0.01, %v1810_v50  ;;  %v1813_v46 = vadd.f32 %v1812_v52, %v6494_v21  ;;  %v1814_v58 = vpop.f32.mrb[15].mxu0 }
 0x33a   : > { %1141 = vrot.lane.b32.xlu0 %v1139_v9, %s5868_s25  ;;  %1154 = vrot.lane.b32.xlu1 %v1152_v53, %s5868_s25  ;;  %v1357_v9 = vmul.f32 %v6583_v51, %v5968_v12 }
 0x33b   : > { %v1826_v48 = vsel %vm1818_vm12, %v1810_v50, %v1822_v31  ;;  %vm1819_vm13 = vcmp.ge.f32.partialorder %v1813_v46, 0.0  ;;  %v1823_v61 = vmul.f32 0.01, %v1813_v46  ;;  %v6578_v50 = vld [vmem:[%s5957_s24 + $0x1b] ss:$0 sm:$0xff] }
 0x33c   : > { %v1830_v55 = vmax.f32 %v1763_v39, %v1826_v48  ;;  %v1216_v39 = vmul.f32 %v6548_v42, %v5970_v13  ;;  %v1344_v52 = vmul.f32 %v6578_v50, %v5970_v13 }
 0x33d   : > { %v1827_v56 = vsel %vm1819_vm13, %v1813_v46, %v1823_v61 }
 0x33e   : > { %v1831_v4 = vmax.f32 %v1764_v23, %v1827_v56  ;;  %1167 = vrot.lane.b32.xlu0 %v1165_v32, %s5868_s25  ;;  %1205 = vrot.lane.b32.xlu1 %v1203_v22, %s5868_s25  ;;  %v1267_v23 = vmul.f32 %v6553_v63, %v5960_v8 }
 0x342   : > { %1218 = vrot.lane.b32.xlu0 %v1216_v39, %s5868_s25  ;;  %1231 = vrot.lane.b32.xlu1 %v1229_v10, %s5868_s25 }
 0x346   : > { %1269 = vrot.lane.b32.xlu0 %v1267_v23, %s5868_s25  ;;  %1282 = vrot.lane.b32.xlu1 %v1280_v26, %s5868_s25 }
 0x34a   : > { %1295 = vrot.lane.b32.xlu0 %v1293_v36, %s5868_s25  ;;  %1333 = vrot.lane.b32.xlu1 %v1331_v28, %s5868_s25 }
 0x34e   : > { %1346 = vrot.lane.b32.xlu0 %v1344_v52, %s5868_s25  ;;  %1359 = vrot.lane.b32.xlu1 %v1357_v9, %s5868_s25 }
 0x36d   : > { %v1868_v53 = vpop.f32.mrb[8].mxu1 }
 0x36e   : > { %v1869_v31 = vadd.f32 %v1868_v53, %v6484_v1  ;;  %v1870_v46 = vpop.f32.mrb[9].mxu1 }
 0x36f   : > { %v1871_v58 = vpop.f32.mrb[10].mxu1 }
 0x370   : > { %vm1883_vm14 = vcmp.ge.f32.partialorder %v1869_v31, 0.0  ;;  %v1887_v48 = vmul.f32 0.01, %v1869_v31  ;;  %v1872_v61 = vadd.f32 %v1871_v58, %v6492_v17  ;;  %v1873_v32 = vpop.f32.mrb[11].mxu1 }
 0x372   : > { %v1891_v22 = vsel %vm1883_vm14, %v1869_v31, %v1887_v48  ;;  %vm1884_vm15 = vcmp.ge.f32.partialorder %v1872_v61, 0.0  ;;  %v1888_v56 = vmul.f32 0.01, %v1872_v61 }
 0x373   : > { %v1895_v39 = vmax.f32 %v6521_v34, %v1891_v22 }
 0x374   : > { %v1892_v10 = vsel %vm1884_vm15, %v1872_v61, %v1888_v56 }
 0x375   : > { %v1896_v23 = vmax.f32 %v6526_v25, %v1892_v10  ;;  %v1876_v26 = vpop.f32.mrb[12].mxu1 }
 0x376   : > { %v1877_v36 = vadd.f32 %v1876_v26, %v6488_v35  ;;  %v1878_v28 = vpop.f32.mrb[13].mxu1 }
 0x377   : > { %v1879_v52 = vpop.f32.mrb[14].mxu1  ;;  %v1899_v9 = vpack.c.bf16 %v1896_v23, %v1895_v39 }
 0x378   : > { %vm1885_vm0 = vcmp.ge.f32.partialorder %v1877_v36, 0.0  ;;  %v1889_v53 = vmul.f32 0.01, %v1877_v36  ;;  %v1880_v46 = vadd.f32 %v1879_v52, %v6494_v21  ;;  %v1881_v58 = vpop.f32.mrb[15].mxu1 }
 0x379   : > { %5463 = vmatprep.mubr.msk.bf16.mxu0 %vm388_vm4, %v1899_v9  ;;  %5471 = vmatprep.mubr.msk.bf16.mxu1 %vm388_vm4, %v1899_v9 }
 0x37a   : > { %v1893_v31 = vsel %vm1885_vm0, %v1877_v36, %v1889_v53  ;;  %vm1886_vm1 = vcmp.ge.f32.partialorder %v1880_v46, 0.0  ;;  %v1890_v34 = vmul.f32 0.01, %v1880_v46 }
 0x37b   : > { %v1897_v48 = vmax.f32 %v1830_v55, %v1893_v31 }
 0x37c   : > { %v1894_v25 = vsel %vm1886_vm1, %v1880_v46, %v1890_v34 }
 0x37d   : > { %v1898_v61 = vmax.f32 %v1831_v4, %v1894_v25  ;;  %v1150_v25 = vmul.f32 %v6524_v19, %v6038_v41 }
 0x37f   : > { %v1900_v32 = vpack.c.bf16 %v1898_v61, %v1897_v48 }
 0x381   : > { %5464 = vmatmul.mubr.msk.bf16.vlgmr.msra.gmra.mrb[16].mxu0 %vm388_vm4, %v1900_v32  ;;  %5472 = vmatmul.mubr.msk.bf16.vlgmr.msra.gmra.mrb[16].mxu1 %vm388_vm4, %v1900_v32 }
 0x382   : > { %2112 = vmatpush1.bf16.msra.mxu0 %v6198_v30  ;;  %2175 = vmatpush1.bf16.msra.mxu1 %v6236_v18 }
 0x383   : > { %v927_v22 = vpop.permute.xlu0 %926  ;;  %2113 = vmatprep.subr.bf16.mxu0 %v5864_v3  ;;  %2176 = vmatprep.subr.bf16.mxu1 %v5864_v3  ;;  %v930_v30 = vpop.permute.xlu1 %929 }
 0x384   : > { %v935_v56 = vpack.c.bf16 %v927_v22, %v6466_v57  ;;  %5102 = vmatprep.mubr.msk.bf16.mxu0 %vm1630_vm9, %v6152_v37  ;;  %5104 = vmatprep.mubr.msk.bf16.mxu1 %vm1630_vm9, %v6152_v37 }
 0x386   : > { %938 = vst.msk [vmem:[#allocation2 + $0x90] sm:$0xff] %vm388_vm4, %v935_v56  ;;  %2114 = vmatpush1.bf16.msra.mxu0 %v6219_v6  ;;  %2177 = vmatpush1.bf16.msra.mxu1 %v6253_v27 }
 0x387   : > { %v933_v55 = vpop.permute.xlu0 %932  ;;  %2115 = vmatprep.subr.bf16.mxu0 %v5864_v3  ;;  %2178 = vmatprep.subr.bf16.mxu1 %v5864_v3 }
 0x388   : > { %v936_v4 = vpack.c.bf16 %v933_v55, %v930_v30  ;;  %v1214_v30 = vmul.f32 %v6548_v42, %v6038_v41  ;;  %v1163_v55 = vmul.f32 %v6539_v54, %v6041_v43 }
 0x38a   : > { %939 = vst.msk [vmem:[#allocation2 + $0x98] sm:$0xff] %vm388_vm4, %v936_v4  ;;  %2116 = vmatpush1.bf16.msra.mxu0 %v6236_v18  ;;  %2179 = vmatpush1.bf16.msra.mxu1 %v6288_v45 }
 0x38b   : > { %v991_v37 = vpop.permute.xlu1 %990  ;;  %2117 = vmatprep.subr.bf16.mxu0 %v5864_v3  ;;  %2180 = vmatprep.subr.bf16.mxu1 %v5864_v3  ;;  %v994_v57 = vpop.permute.xlu0 %993 }
 0x38c   : > { %v999_v6 = vpack.c.bf16 %v991_v37, %v6476_v62 }
 0x38d   : > { %v6644_v23 = vld [vmem:[#allocation2 + $0x90] sm:$0xff] }
 0x38e   : > { %1002 = vst.msk [vmem:[#allocation2 + $0xa0] sm:$0xff] %vm388_vm4, %v999_v6  ;;  %2118 = vmatpush1.bf16.msra.mxu0 %v6253_v27  ;;  %2181 = vmatpush1.bf16.msra.mxu1 %v6303_v47 }
 0x38f   : > { %v997_v39 = vpop.permute.xlu1 %996  ;;  %2119 = vmatprep.subr.bf16.mxu0 %v5864_v3  ;;  %2182 = vmatprep.subr.bf16.mxu1 %v5864_v3 }
 0x390   : > { %v1000_v18 = vpack.c.bf16 %v997_v39, %v994_v57 }
 0x391   : > { %v6652_v9 = vld [vmem:[#allocation2 + $0x98] sm:$0xff] }
 0x392   : > { %1003 = vst.msk [vmem:[#allocation2 + $0xa8] sm:$0xff] %vm388_vm4, %v1000_v18  ;;  %2120 = vmatpush1.bf16.msra.mxu0 %v6288_v45  ;;  %2183 = vmatpush1.bf16.msra.mxu1 %v6361_v14 }
 0x393   : > { %2121 = vmatprep.subr.bf16.mxu0 %v5864_v3  ;;  %2184 = vmatprep.subr.bf16.mxu1 %v5864_v3 }
 0x395   : > { %v6660_v58 = vld [vmem:[#allocation2 + $0xa0] sm:$0xff] }
 0x396   : > { %2122 = vmatpush1.bf16.msra.mxu0 %v6303_v47  ;;  %2185 = vmatpush1.bf16.msra.mxu1 %v6367_v49 }
 0x397   : > { %2123 = vmatprep.subr.bf16.mxu0 %v5864_v3  ;;  %2186 = vmatprep.subr.bf16.mxu1 %v5864_v3 }
 0x399   : > { %v6671_v61 = vld [vmem:[#allocation2 + $0xa8] sm:$0xff] }
 0x39a   : > { %2124 = vmatpush1.bf16.msra.mxu0 %v6361_v14  ;;  %2187 = vmatpush1.bf16.msra.mxu1 %v6385_v2 }
 0x39b   : > { %2125 = vmatprep.subr.bf16.mxu0 %v5864_v3  ;;  %2188 = vmatprep.subr.bf16.mxu1 %v5864_v3 }
 0x39e   : > { %2126 = vmatpush1.bf16.msra.mxu0 %v6367_v49  ;;  %2189 = vmatpush1.bf16.msra.mxu1 %v6393_v15 }
 0x39f   : > { %2127 = vmatprep.subr.bf16.mxu0 %v5864_v3  ;;  %2190 = vmatprep.subr.bf16.mxu1 %v5864_v3 }
 0x3a0   : > { %v1055_v27 = vpop.permute.xlu0 %1054  ;;  %v1058_v62 = vpop.permute.xlu1 %1057 }
 0x3a1   : > { %v1063_v10 = vpack.c.bf16 %v1055_v27, %v6505_v60  ;;  %v1265_v27 = vmul.f32 %v6553_v63, %v6036_v40 }
 0x3a2   : > { %2128 = vmatpush1.bf16.msra.mxu0 %v6385_v2  ;;  %2191 = vmatpush1.bf16.msra.mxu1 %v6644_v23 }
 0x3a3   : > { %1066 = vst.msk [vmem:[#allocation2 + $0xb0] sm:$0xff] %vm388_vm4, %v1063_v10  ;;  %2129 = vmatprep.subr.bf16.mxu0 %v5864_v3  ;;  %2192 = vmatprep.subr.bf16.mxu1 %v5864_v3 }
 0x3a4   : > { %v1061_v26 = vpop.permute.xlu0 %1060  ;;  %v1119_v36 = vpop.permute.xlu1 %1118 }
 0x3a5   : > { %v1064_v28 = vpack.c.bf16 %v1061_v26, %v1058_v62  ;;  %v1127_v52 = vpack.c.bf16 %v1119_v36, %v6514_v5  ;;  %v1137_v5 = vmul.f32 %v6307_v11, %v6036_v40  ;;  %v1201_v11 = vmul.f32 %v6539_v54, %v6036_v40 }
 0x3a6   : > { %2130 = vmatpush1.bf16.msra.mxu0 %v6393_v15  ;;  %2193 = vmatpush1.bf16.msra.mxu1 %v6652_v9  ;;  %v1278_v62 = vmul.f32 %v6560_v16, %v6038_v41 }
 0x3a7   : > { %1067 = vst.msk [vmem:[#allocation2 + $0xb8] sm:$0xff] %vm388_vm4, %v1064_v28  ;;  %1130 = vst.msk [vmem:[#allocation2 + $0xc0] sm:$0xff] %vm388_vm4, %v1127_v52  ;;  %2131 = vmatprep.subr.bf16.mxu0 %v5864_v3  ;;  %2194 = vmatprep.subr.bf16.mxu1 %v5864_v3 }
 0x3a8   : > { %v1122_v60 = vpop.permute.xlu0 %1121  ;;  %v1125_v53 = vpop.permute.xlu1 %1124 }
 0x3a9   : > { %v1128_v46 = vpack.c.bf16 %v1125_v53, %v1122_v60  ;;  %v1342_v53 = vmul.f32 %v6578_v50, %v6038_v41 }
 0x3aa   : > { %2132 = vmatpush1.bf16.msra.mxu0 %v6644_v23  ;;  %2195 = vmatpush1.bf16.msra.mxu1 %v6660_v58 }
 0x3ab   : > { %1131 = vst.msk [vmem:[#allocation2 + $0xc8] sm:$0xff] %vm388_vm4, %v1128_v46  ;;  %2133 = vmatprep.subr.bf16.mxu0 %v5864_v3  ;;  %2196 = vmatprep.subr.bf16.mxu1 %v5864_v3  ;;  %v6721_v46 = vld [vmem:[%s8014_s3 + $0x4] ss:$8 sps:$4 sm:$0xff]  }
 0x3ac   : > { %v1142_v31 = vpop.permute.xlu0 %1141  ;;  %v1155_v34 = vpop.permute.xlu1 %1154 }
 0x3ad   : > { %v1144_v48 = vadd.f32 %v1142_v31, %v1137_v5 }
 0x3ae   : > { %2134 = vmatpush1.bf16.msra.mxu0 %v6652_v9  ;;  %2197 = vmatpush1.bf16.msra.mxu1 %v6671_v61 }
 0x3af   : > { %v1151_v32 = vadd.f32 %v1150_v25, %v1144_v48  ;;  %2241 = vmatprep.subr.bf16.mxu0 %v5864_v3  ;;  %2308 = vmatprep.subr.bf16.mxu1 %v5864_v3 }
 0x3b0   : > { %v1168_v22 = vpop.permute.xlu0 %1167  ;;  %v1206_v56 = vpop.permute.xlu1 %1205 }
 0x3b1   : > { %v1157_v19 = vadd.f32 %v1155_v34, %v1151_v32  ;;  %2144 = vmatmul.mubr.bf16.vlgmr.msra.gmra.mrb[20].mxu0 %v6269_v33  ;;  %2207 = vmatmul.mubr.bf16.vlgmr.msra.gmra.mrb[20].mxu1 %v6269_v33  ;;  %v1208_v4 = vadd.f32 %v1206_v56, %v1201_v11 }
 0x3b2   : > { %2242 = vmatpush1.bf16.msra.mxu0 %v6288_v45  ;;  %2309 = vmatpush1.bf16.msra.mxu1 %v6361_v14  ;;  %v1227_v45 = vmul.f32 %v6553_v63, %v6041_v43  ;;  %v1329_v63 = vmul.f32 %v6569_v20, %v6036_v40 }
 0x3b3   : > { %v1164_v37 = vadd.f32 %v1163_v55, %v1157_v19  ;;  %v1215_v6 = vadd.f32 %v1214_v30, %v1208_v4  ;;  %2243 = vmatprep.subr.bf16.mxu0 %v5864_v3  ;;  %2310 = vmatprep.subr.bf16.mxu1 %v5864_v3 }
 0x3b4   : > { %v1219_v42 = vpop.permute.xlu0 %1218  ;;  %v1232_v57 = vpop.permute.xlu1 %1231  ;;  %5103 = vmatprep.mubr.msk.bf16.mxu0 %vm1630_vm9, %v6283_v44  ;;  %5105 = vmatprep.mubr.msk.bf16.mxu1 %vm1630_vm9, %v6283_v44 }
 0x3b5   : > { %v1170_v33 = vadd.f32 %v1168_v22, %v1164_v37  ;;  %v1221_v54 = vadd.f32 %v1219_v42, %v1215_v6  ;;  %v1355_v22 = vmul.f32 %v6583_v51, %v6041_v43  ;;  %v6754_v6 = vld [vmem:[#allocation2 + $0xb0] sm:$0xff]  ;;  %v6760_v42 = vld [vmem:[#allocation2 + $0xb8] sm:$0xff] }
 0x3b6   : > { %2244 = vmatpush1.bf16.msra.mxu0 %v6303_v47  ;;  %2311 = vmatpush1.bf16.msra.mxu1 %v6367_v49 }
 0x3b7   : > { %v1171_v39 = vadd.f32 %v1170_v33, %v6047_v59  ;;  %v1228_v18 = vadd.f32 %v1227_v45, %v1221_v54  ;;  %2245 = vmatprep.subr.bf16.mxu0 %v5864_v3  ;;  %2312 = vmatprep.subr.bf16.mxu1 %v5864_v3  ;;  %v6772_v33 = vld [vmem:[#allocation2 + $0xc8] sm:$0xff]  ;;  %v6788_v45 = vld [vmem:[%s8014_s3 + $0x14] ss:$8 sps:$4 sm:$0xff]  }
 0x3b8   : > { %v1270_v44 = vpop.permute.xlu0 %1269  ;;  %v1283_v10 = vpop.permute.xlu1 %1282  ;;  %v6781_v54 = vld [vmem:[%s8014_s3] ss:$8 sps:$4 sm:$0xff]  }
 0x3b9   : > { %v1234_v26 = vadd.f32 %v1232_v57, %v1228_v18  ;;  %v1272_v36 = vadd.f32 %v1270_v44, %v1265_v27  ;;  %2152 = vmatmul.mubr.bf16.gmra.mrb[24].mxu0 %v6317_v38  ;;  %2215 = vmatmul.mubr.bf16.gmra.mrb[24].mxu1 %v6317_v38  ;;  %vm1172_vm2 = vcmp.ge.f32.partialorder %v1171_v39, 0.0  ;;  %v1173_v47 = vmul.f32 0.01, %v1171_v39  ;;  %v6766_v57 = vld [vmem:[#allocation2 + $0xc0] sm:$0xff] }
 0x3ba   : > { %2246 = vmatpush1.bf16.msra.mxu0 %v6361_v14  ;;  %2313 = vmatpush1.bf16.msra.mxu1 %v6385_v2  ;;  %v1291_v38 = vmul.f32 %v6569_v20, %v6041_v43 }
 0x3bb   : > { %v1235_v28 = vadd.f32 %v1234_v26, %v6047_v59  ;;  %v1279_v52 = vadd.f32 %v1278_v62, %v1272_v36  ;;  %2247 = vmatprep.subr.bf16.mxu0 %v5864_v3  ;;  %2314 = vmatprep.subr.bf16.mxu1 %v5864_v3  ;;  %v1174_v16 = vsel %vm1172_vm2, %v1171_v39, %v1173_v47  ;;  %v6805_v39 = vld [vmem:[%s8014_s3 + $0x10] ss:$8 sps:$4 sm:$0xff]  }
 0x3bc   : > { %v1296_v60 = vpop.permute.xlu0 %1295  ;;  %1176 = vrot.lane.b32.xlu0 %v1174_v16, %s5869_s28  ;;  %v1334_v14 = vpop.permute.xlu1 %1333  ;;  %5106 = vmatprep.mubr.msk.bf16.mxu0 %vm1630_vm9, %v6721_v46  ;;  %v6857_v16 = vld [vmem:[%s5957_s24 + $0x1e] ss:$0 sm:$0xff] }
 0x3bd   : > { %v1285_v5 = vadd.f32 %v1283_v10, %v1279_v52  ;;  %v1336_v31 = vadd.f32 %v1334_v14, %v1329_v63  ;;  %vm1236_vm3 = vcmp.ge.f32.partialorder %v1235_v28, 0.0  ;;  %v1237_v34 = vmul.f32 0.01, %v1235_v28  ;;  %5108 = vmatprep.mubr.msk.bf16.mxu1 %vm1630_vm9, %v6721_v46  ;;  %v6846_v63 = vld [vmem:[%s5957_s24 + $0x1d] ss:$0 sm:$0xff] }
 0x3be   : > { %2248 = vmatpush1.bf16.msra.mxu0 %v6367_v49  ;;  %2315 = vmatpush1.bf16.msra.mxu1 %v6393_v15  ;;  %v1408_v52 = vmul.f32 %v6846_v63, %v5970_v13  ;;  %v6866_v14 = vld [vmem:[%s5957_s24 + $0x1f] ss:$0 sm:$0xff] }
 0x3bf   : > { %v1292_v20 = vadd.f32 %v1291_v38, %v1285_v5  ;;  %v1343_v50 = vadd.f32 %v1342_v53, %v1336_v31  ;;  %2249 = vmatprep.subr.bf16.mxu0 %v5864_v3  ;;  %2316 = vmatprep.subr.bf16.mxu1 %v5864_v3  ;;  %v1238_v48 = vsel %vm1236_vm3, %v1235_v28, %v1237_v34  ;;  %v6871_v53 = vld [vmem:[%s5957_s24 + $0x20] ss:$0 sm:$0xff]  ;;  %v6878_v34 = vld [vmem:[%s5957_s24 + $0x21] ss:$0 sm:$0xff] }
 0x3c0   : > { %v1347_v25 = vpop.permute.xlu0 %1346  ;;  %1240 = vrot.lane.b32.xlu1 %v1238_v48, %s5869_s28  ;;  %v1360_v30 = vpop.permute.xlu1 %1359  ;;  %v1395_v28 = vmul.f32 %v6583_v51, %v5960_v8  ;;  %v1421_v38 = vmul.f32 %v6857_v16, %v5968_v12  ;;  %v1472_v5 = vmul.f32 %v6866_v14, %v5970_v13  ;;  %v1485_v31 = vmul.f32 %v6871_v53, %v5968_v12 }
 0x3c1   : > { %v1298_v32 = vadd.f32 %v1296_v60, %v1292_v20  ;;  %v1349_v11 = vadd.f32 %v1347_v25, %v1343_v50  ;;  %v1459_v60 = vmul.f32 %v6857_v16, %v5960_v8  ;;  %v1523_v20 = vmul.f32 %v6871_v53, %v5960_v8 }
 0x3c2   : > { %2250 = vmatpush1.bf16.msra.mxu0 %v6385_v2  ;;  %2317 = vmatpush1.bf16.msra.mxu1 %v6644_v23  ;;  %v1536_v50 = vmul.f32 %v6878_v34, %v5970_v13 }
 0x3c3   : > { %v1299_v49 = vadd.f32 %v1298_v32, %v6047_v59  ;;  %v1356_v56 = vadd.f32 %v1355_v22, %v1349_v11  ;;  %2251 = vmatprep.subr.bf16.mxu0 %v5864_v3  ;;  %2318 = vmatprep.subr.bf16.mxu1 %v5864_v3  ;;  %v6887_v32 = vld [vmem:[%s5957_s24 + $0x22] ss:$0 sm:$0xff] }
 0x3c4   : > { %v1549_v13 = vmul.f32 %v6887_v32, %v5968_v12 }
 0x3c5   : > { %v1362_v19 = vadd.f32 %v1360_v30, %v1356_v56  ;;  %vm1300_vm5 = vcmp.ge.f32.partialorder %v1299_v49, 0.0  ;;  %v1301_v55 = vmul.f32 0.01, %v1299_v49 }
 0x3c6   : > { %2252 = vmatpush1.bf16.msra.mxu0 %v6393_v15  ;;  %2319 = vmatpush1.bf16.msra.mxu1 %v6652_v9 }
 0x3c7   : > { %v1363_v4 = vadd.f32 %v1362_v19, %v6047_v59  ;;  %2253 = vmatprep.subr.bf16.mxu0 %v5864_v3  ;;  %2320 = vmatprep.subr.bf16.mxu1 %v5864_v3  ;;  %v1302_v2 = vsel %vm1300_vm5, %v1299_v49, %v1301_v55 }
 0x3c8   : > { %1304 = vrot.lane.b32.xlu0 %v1302_v2, %s5869_s28 }
 0x3c9   : > { %v1365_v37 = vmul.f32 0.01, %v1363_v4  ;;  %vm1364_vm8 = vcmp.ge.f32.partialorder %v1363_v4, 0.0 }
 0x3ca   : > { %2254 = vmatpush1.bf16.msra.mxu0 %v6644_v23  ;;  %2321 = vmatpush1.bf16.msra.mxu1 %v6660_v58 }
 0x3cb   : > { %2255 = vmatprep.subr.bf16.mxu0 %v5864_v3  ;;  %2322 = vmatprep.subr.bf16.mxu1 %v5864_v3  ;;  %v1366_v15 = vsel %vm1364_vm8, %v1363_v4, %v1365_v37 }
 0x3cc   : > { %1368 = vrot.lane.b32.xlu1 %v1366_v15, %s5869_s28 }
 0x3ce   : > { %2256 = vmatpush1.bf16.msra.mxu0 %v6652_v9  ;;  %2323 = vmatpush1.bf16.msra.mxu1 %v6671_v61 }
 0x3cf   : > { %2257 = vmatprep.subr.bf16.mxu0 %v5864_v3  ;;  %2324 = vmatprep.subr.bf16.mxu1 %v5864_v3 }
 0x3d2   : > { %2258 = vmatpush1.bf16.msra.mxu0 %v6660_v58  ;;  %2325 = vmatpush1.bf16.msra.mxu1 %v6754_v6 }
 0x3d3   : > { %2259 = vmatprep.subr.bf16.mxu0 %v5864_v3  ;;  %2326 = vmatprep.subr.bf16.mxu1 %v5864_v3 }
 0x3d6   : > { %2260 = vmatpush1.bf16.msra.mxu0 %v6671_v61  ;;  %2327 = vmatpush1.bf16.msra.mxu1 %v6760_v42 }
 0x3d7   : > { %2261 = vmatprep.subr.bf16.mxu0 %v5864_v3  ;;  %2328 = vmatprep.subr.bf16.mxu1 %v5864_v3 }
 0x3da   : > { %2262 = vmatpush1.bf16.msra.mxu0 %v6754_v6  ;;  %2329 = vmatpush1.bf16.msra.mxu1 %v6766_v57 }
 0x3db   : > { %2263 = vmatprep.subr.bf16.mxu0 %v5864_v3  ;;  %2330 = vmatprep.subr.bf16.mxu1 %v5864_v3 }
 0x3de   : > { %2264 = vmatpush1.bf16.msra.mxu0 %v6760_v42  ;;  %2331 = vmatpush1.bf16.msra.mxu1 %v6772_v33 }
 0x3df   : > { %5475 = vmatprep.subr.bf16.mxu0 %v6437_v0  ;;  %5483 = vmatprep.subr.bf16.mxu1 %v6442_v24 }
 0x3e1   : > { %2274 = vmatmul.mubr.bf16.vlgmr.msra.gmra.mrb[28].mxu0 %v6781_v54  ;;  %2341 = vmatmul.mubr.bf16.vlgmr.msra.gmra.mrb[28].mxu1 %v6781_v54 }
 0x3e2   : > { %5107 = vmatprep.mubr.msk.bf16.mxu0 %vm1630_vm9, %v6788_v45  ;;  %5109 = vmatprep.mubr.msk.bf16.mxu1 %vm1630_vm9, %v6788_v45 }
 0x3e3   : > { %5476 = vmatpush3.bf16.msra.mxu0 %v6437_v0  ;;  %5484 = vmatpush3.bf16.msra.mxu1 %v6442_v24 }
 0x3e4   : > { %5477 = vmatprep.subr.bf16.mxu0 %v6451_v29  ;;  %5485 = vmatprep.subr.bf16.mxu1 %v6456_v7 }
 0x3e7   : > { %5478 = vmatpush3.bf16.msra.mxu0 %v6451_v29  ;;  %5486 = vmatpush3.bf16.msra.mxu1 %v6456_v7 }
 0x3e8   : > { %2560 = vmatprep.subr.bf16.mxu0 %v5864_v3  ;;  %2623 = vmatprep.subr.bf16.mxu1 %v5864_v3 }
 0x3e9   : > { %2282 = vmatmul.mubr.bf16.gmra.mrb[32].mxu0 %v6805_v39  ;;  %2349 = vmatmul.mubr.bf16.gmra.mrb[32].mxu1 %v6805_v39 }
 0x42e   : > { %v1177_v0 = vpop.permute.xlu0 %1176 }
 0x42f   : > { %v1179_v24 = vsel %vm537_vm6, 0.0, %v1177_v0 }
 0x430   : > { %v6811_v29 = vsel %vm539_vm7, %v1179_v24, 0.0 }
 0x431   : > { %1182 = vrot.lane.b32.xlu0 %v6811_v29, %s5868_s25  ;;  %1185 = vrot.lane.b32.xlu1 %v6811_v29, %s5870_s29 }
 0x432   : > { %v1241_v7 = vpop.permute.xlu1 %1240 }
 0x433   : > { %v1243_v18 = vsel %vm537_vm6, 0.0, %v1241_v7 }
 0x434   : > { %v6819_v27 = vsel %vm539_vm7, %v1243_v18, 0.0 }
 0x435   : > { %1188 = vrot.lane.b32.xlu0 %v6811_v29, %s5871_s30  ;;  %1246 = vrot.lane.b32.xlu1 %v6819_v27, %s5868_s25 }
 0x439   : > { %1249 = vrot.lane.b32.xlu0 %v6819_v27, %s5870_s29  ;;  %1252 = vrot.lane.b32.xlu1 %v6819_v27, %s5871_s30 }
 0x43a   : > { %v1305_v44 = vpop.permute.xlu0 %1304 }
 0x43b   : > { %v1307_v62 = vsel %vm537_vm6, 0.0, %v1305_v44 }
 0x43c   : > { %v6831_v10 = vsel %vm539_vm7, %v1307_v62, 0.0 }
 0x43d   : > { %1310 = vrot.lane.b32.xlu0 %v6831_v10, %s5868_s25  ;;  %1313 = vrot.lane.b32.xlu1 %v6831_v10, %s5870_s29 }
 0x43e   : > { %v1369_v26 = vpop.permute.xlu1 %1368 }
 0x43f   : > { %v1371_v36 = vsel %vm537_vm6, 0.0, %v1369_v26 }
 0x440   : > { %v6839_v47 = vsel %vm539_vm7, %v1371_v36, 0.0 }
 0x441   : > { %1316 = vrot.lane.b32.xlu0 %v6831_v10, %s5871_s30  ;;  %1374 = vrot.lane.b32.xlu1 %v6839_v47, %s5868_s25 }
 0x445   : > { %1377 = vrot.lane.b32.xlu0 %v6839_v47, %s5870_s29  ;;  %1380 = vrot.lane.b32.xlu1 %v6839_v47, %s5871_s30 }
 0x449   : > { %1397 = vrot.lane.b32.xlu0 %v1395_v28, %s5868_s25  ;;  %1410 = vrot.lane.b32.xlu1 %v1408_v52, %s5868_s25 }
 0x44d   : > { %1423 = vrot.lane.b32.xlu0 %v1421_v38, %s5868_s25  ;;  %1461 = vrot.lane.b32.xlu1 %v1459_v60, %s5868_s25 }
 0x451   : > { %1474 = vrot.lane.b32.xlu0 %v1472_v5, %s5868_s25  ;;  %1487 = vrot.lane.b32.xlu1 %v1485_v31, %s5868_s25 }
 0x454   : > { %v5465_v48 = vpop.f32.mrb[16].mxu0  ;;  %v5473_v25 = vpop.f32.mrb[16].mxu1 }
 0x455   : > { %v2031_v11 = vmax.f32 %v5465_v48, %v5473_v25  ;;  %v1953_v22 = vpop.f32.mrb[17].mxu0  ;;  %v2014_v49 = vpop.f32.mrb[17].mxu1  ;;  %1525 = vrot.lane.b32.xlu0 %v1523_v20, %s5868_s25  ;;  %1538 = vrot.lane.b32.xlu1 %v1536_v50, %s5868_s25 }
 0x456   : > { %v2029_v56 = vmax.f32 %v1953_v22, %v2014_v49  ;;  %v5466_v30 = vpop.f32.mrb[18].mxu0  ;;  %v5474_v19 = vpop.f32.mrb[18].mxu1 }
 0x457   : > { %v2032_v55 = vmax.f32 %v5466_v30, %v5474_v19  ;;  %v1956_v4 = vpop.f32.mrb[19].mxu0  ;;  %v2017_v8 = vpop.f32.mrb[19].mxu1 }
 0x458   : > { %v2030_v2 = vmax.f32 %v1956_v4, %v2017_v8 }
 0x459   : > { %v6893_v37 = vpack.i.bf16 %v2032_v55, %v2031_v11  ;;  %1551 = vrot.lane.b32.xlu0 %v1549_v13, %s5868_s25 }
 0x45a   : > { %v6896_v15 = vpack.i.bf16 %v2030_v2, %v2029_v56 }
 0x484   : > { %v2145_v0 = vpop.f32.mrb[20].mxu0  ;;  %v2208_v24 = vpop.f32.mrb[20].mxu1 }
 0x485   : > { %v2146_v7 = vadd.f32 %v2145_v0, %v6484_v1  ;;  %v2209_v18 = vadd.f32 %v2208_v24, %v6484_v1  ;;  %v2147_v44 = vpop.f32.mrb[21].mxu0  ;;  %v2210_v62 = vpop.f32.mrb[21].mxu1 }
 0x486   : > { %v2148_v26 = vpop.f32.mrb[22].mxu0  ;;  %v2211_v36 = vpop.f32.mrb[22].mxu1 }
 0x487   : > { %vm2160_vm10 = vcmp.ge.f32.partialorder %v2146_v7, 0.0  ;;  %v2164_v28 = vmul.f32 0.01, %v2146_v7  ;;  %vm2223_vm11 = vcmp.ge.f32.partialorder %v2209_v18, 0.0  ;;  %v2227_v12 = vmul.f32 0.01, %v2209_v18 }
 0x488   : > { %v2149_v52 = vadd.f32 %v2148_v26, %v6492_v17  ;;  %v2212_v38 = vadd.f32 %v2211_v36, %v6492_v17  ;;  %v2150_v60 = vpop.f32.mrb[23].mxu0  ;;  %v2213_v5 = vpop.f32.mrb[23].mxu1 }
 0x489   : > { %v6902_v31 = vsel %vm2160_vm10, %v2146_v7, %v2164_v28  ;;  %v6904_v20 = vsel %vm2223_vm11, %v2209_v18, %v2227_v12 }
 0x48a   : > { %v2235_v50 = vmax.f32 %v6902_v31, %v6904_v20  ;;  %vm2161_vm12 = vcmp.ge.f32.partialorder %v2149_v52, 0.0  ;;  %v2165_v48 = vmul.f32 0.01, %v2149_v52  ;;  %vm2224_vm13 = vcmp.ge.f32.partialorder %v2212_v38, 0.0 }
 0x48b   : > { %v2228_v25 = vmul.f32 0.01, %v2212_v38  ;;  %v1406_v31 = vmul.f32 %v6846_v63, %v6038_v41  ;;  %v1457_v63 = vmul.f32 %v6857_v16, %v6036_v40 }
 0x48c   : > { %v6908_v11 = vsel %vm2161_vm12, %v2149_v52, %v2165_v48  ;;  %v2153_v22 = vpop.f32.mrb[24].mxu0  ;;  %v2216_v49 = vpop.f32.mrb[24].mxu1 }
 0x48d   : > { %v6910_v56 = vsel %vm2224_vm13, %v2212_v38, %v2228_v25  ;;  %v2154_v30 = vadd.f32 %v2153_v22, %v6488_v35  ;;  %v2217_v19 = vadd.f32 %v2216_v49, %v6488_v35  ;;  %v2155_v55 = vpop.f32.mrb[25].mxu0  ;;  %v2218_v4 = vpop.f32.mrb[25].mxu1 }
 0x48e   : > { %v2236_v8 = vmax.f32 %v6908_v11, %v6910_v56  ;;  %v2156_v13 = vpop.f32.mrb[26].mxu0  ;;  %v2219_v2 = vpop.f32.mrb[26].mxu1 }
 0x48f   : > { %vm2162_vm14 = vcmp.ge.f32.partialorder %v2154_v30, 0.0  ;;  %v2166_v0 = vmul.f32 0.01, %v2154_v30  ;;  %vm2225_vm15 = vcmp.ge.f32.partialorder %v2217_v19, 0.0  ;;  %v2229_v24 = vmul.f32 0.01, %v2217_v19 }
 0x490   : > { %v2157_v7 = vadd.f32 %v2156_v13, %v6494_v21  ;;  %v2220_v18 = vadd.f32 %v2219_v2, %v6494_v21  ;;  %v2158_v44 = vpop.f32.mrb[27].mxu0  ;;  %v2221_v62 = vpop.f32.mrb[27].mxu1 }
 0x491   : > { %v6918_v26 = vsel %vm2162_vm14, %v2154_v30, %v2166_v0  ;;  %v6920_v36 = vsel %vm2225_vm15, %v2217_v19, %v2229_v24 }
 0x492   : > { %v2237_v28 = vmax.f32 %v6918_v26, %v6920_v36  ;;  %vm2163_vm0 = vcmp.ge.f32.partialorder %v2157_v7, 0.0  ;;  %v2167_v12 = vmul.f32 0.01, %v2157_v7  ;;  %vm2226_vm1 = vcmp.ge.f32.partialorder %v2220_v18, 0.0 }
 0x493   : > { %v2230_v52 = vmul.f32 0.01, %v2220_v18 }
 0x494   : > { %v6924_v38 = vsel %vm2163_vm0, %v2157_v7, %v2167_v12 }
 0x495   : > { %v6926_v60 = vsel %vm2226_vm1, %v2220_v18, %v2230_v52  ;;  %vm400_vm1 = vcmask 130048  }
 0x496   : > { %v2238_v5 = vmax.f32 %v6924_v38, %v6926_v60  ;;  %401 = vst.msk [vmem:[#allocation3] sm:$0xff] %vm400_vm1, %v5864_v3  ;;  %402 = vst.msk [vmem:[#allocation3 + $0x8] sm:$0xff] %vm400_vm1, %v5864_v3 }
 0x497   : > { %403 = vst.msk [vmem:[#allocation3 + $0x10] sm:$0xff] %vm400_vm1, %v5864_v3  ;;  %404 = vst.msk [vmem:[#allocation3 + $0x18] sm:$0xff] %vm400_vm1, %v5864_v3 }
 0x498   : > { %405 = vst.msk [vmem:[#allocation3 + $0x20] sm:$0xff] %vm400_vm1, %v5864_v3  ;;  %406 = vst.msk [vmem:[#allocation3 + $0x28] sm:$0xff] %vm400_vm1, %v5864_v3 }
 0x499   : > { %408 = vst.msk [vmem:[#allocation3 + $0xf0] sm:$0xff] %vm400_vm1, %v5864_v3  ;;  %409 = vst.msk [vmem:[#allocation3 + $0xf8] sm:$0xff] %vm400_vm1, %v5864_v3 }
 0x49a   : > { %410 = vst.msk [vmem:[#allocation3 + $0x100] sm:$0xff] %vm400_vm1, %v5864_v3  ;;  %411 = vst.msk [vmem:[#allocation3 + $0x108] sm:$0xff] %vm400_vm1, %v5864_v3 }
 0x49b   : > { %412 = vst.msk [vmem:[#allocation3 + $0x110] sm:$0xff] %vm400_vm1, %v5864_v3  ;;  %413 = vst.msk [vmem:[#allocation3 + $0x118] sm:$0xff] %vm400_vm1, %v5864_v3 }
 0x4a3   : > { %v1183_v48 = vpop.permute.xlu0 %1182  ;;  %v1186_v25 = vpop.permute.xlu1 %1185 }
 0x4a4   : > { %v1191_v22 = vpack.c.bf16 %v1183_v48, %v6811_v29 }
 0x4a6   : > { %1194 = vst.msk [vmem:[#allocation2 + $0xd0] sm:$0xff] %vm388_vm4, %v1191_v22 }
 0x4a7   : > { %v1189_v49 = vpop.permute.xlu0 %1188  ;;  %v1247_v30 = vpop.permute.xlu1 %1246 }
 0x4a8   : > { %v1192_v19 = vpack.c.bf16 %v1189_v49, %v1186_v25  ;;  %v1255_v55 = vpack.c.bf16 %v1247_v30, %v6819_v27 }
 0x4aa   : > { %1195 = vst.msk [vmem:[#allocation2 + $0xd8] sm:$0xff] %vm388_vm4, %v1192_v19  ;;  %1258 = vst.msk [vmem:[#allocation2 + $0xe0] sm:$0xff] %vm388_vm4, %v1255_v55 }
 0x4ab   : > { %v1250_v4 = vpop.permute.xlu0 %1249  ;;  %v1253_v13 = vpop.permute.xlu1 %1252 }
 0x4ac   : > { %v1256_v2 = vpack.c.bf16 %v1253_v13, %v1250_v4 }
 0x4ae   : > { %1259 = vst.msk [vmem:[#allocation2 + $0xe8] sm:$0xff] %vm388_vm4, %v1256_v2 }
 0x4af   : > { %v1311_v0 = vpop.permute.xlu0 %1310  ;;  %v1314_v24 = vpop.permute.xlu1 %1313 }
 0x4b0   : > { %v1319_v29 = vpack.c.bf16 %v1311_v0, %v6831_v10 }
 0x4b2   : > { %1322 = vst.msk [vmem:[#allocation2 + $0xf0] sm:$0xff] %vm388_vm4, %v1319_v29 }
 0x4b3   : > { %v1317_v7 = vpop.permute.xlu0 %1316  ;;  %v1375_v18 = vpop.permute.xlu1 %1374 }
 0x4b4   : > { %v2275_v44 = vpop.f32.mrb[28].mxu0  ;;  %v2342_v62 = vpop.f32.mrb[28].mxu1  ;;  %v1320_v27 = vpack.c.bf16 %v1317_v7, %v1314_v24  ;;  %v1383_v12 = vpack.c.bf16 %v1375_v18, %v6839_v47 }
 0x4b5   : > { %v2276_v52 = vadd.f32 %v2275_v44, %v6484_v1  ;;  %v2343_v48 = vadd.f32 %v2342_v62, %v6484_v1  ;;  %v2277_v25 = vpop.f32.mrb[29].mxu0  ;;  %v2344_v22 = vpop.f32.mrb[29].mxu1  ;;  %v1393_v44 = vmul.f32 %v6583_v51, %v6036_v40 }
 0x4b6   : > { %1323 = vst.msk [vmem:[#allocation2 + $0xf8] sm:$0xff] %vm388_vm4, %v1320_v27  ;;  %1386 = vst.msk [vmem:[#allocation2 + $0x100] sm:$0xff] %vm388_vm4, %v1383_v12  ;;  %v2278_v10 = vpop.f32.mrb[30].mxu0  ;;  %v2345_v49 = vpop.f32.mrb[30].mxu1 }
 0x4b7   : > { %vm2290_vm2 = vcmp.ge.f32.partialorder %v2276_v52, 0.0  ;;  %v2294_v30 = vmul.f32 0.01, %v2276_v52  ;;  %v2361_v19 = vmul.f32 0.01, %v2343_v48  ;;  %v1378_v55 = vpop.permute.xlu0 %1377  ;;  %v1381_v4 = vpop.permute.xlu1 %1380  ;;  %vm2357_vm3 = vcmp.ge.f32.partialorder %v2343_v48, 0.0 }
 0x4b8   : > { %v2279_v47 = vadd.f32 %v2278_v10, %v6492_v17  ;;  %v2346_v13 = vadd.f32 %v2345_v49, %v6492_v17  ;;  %v2280_v2 = vpop.f32.mrb[31].mxu0  ;;  %v2347_v0 = vpop.f32.mrb[31].mxu1  ;;  %v1384_v24 = vpack.c.bf16 %v1381_v4, %v1378_v55 }
 0x4b9   : > { %v2298_v29 = vsel %vm2290_vm2, %v2276_v52, %v2294_v30  ;;  %v2365_v62 = vsel %vm2357_vm3, %v2343_v48, %v2361_v19  ;;  %v1419_v0 = vmul.f32 %v6857_v16, %v6041_v43  ;;  %v1470_v16 = vmul.f32 %v6866_v14, %v6038_v41 }
 0x4ba   : > { %v2302_v7 = vmax.f32 %v2235_v50, %v2298_v29  ;;  %vm2291_vm5 = vcmp.ge.f32.partialorder %v2279_v47, 0.0  ;;  %v2295_v18 = vmul.f32 0.01, %v2279_v47  ;;  %1387 = vst.msk [vmem:[#allocation2 + $0x108] sm:$0xff] %vm388_vm4, %v1384_v24  ;;  %vm2358_vm8 = vcmp.ge.f32.partialorder %v2346_v13, 0.0 }
 0x4bb   : > { %v2362_v27 = vmul.f32 0.01, %v2346_v13  ;;  %v1398_v12 = vpop.permute.xlu0 %1397  ;;  %v1411_v25 = vpop.permute.xlu1 %1410 }
 0x4bc   : > { %v2369_v22 = vmax.f32 %v2302_v7, %v2365_v62  ;;  %v2299_v10 = vsel %vm2291_vm5, %v2279_v47, %v2295_v18  ;;  %v2283_v49 = vpop.f32.mrb[32].mxu0  ;;  %v2350_v52 = vpop.f32.mrb[32].mxu1  ;;  %v1400_v30 = vadd.f32 %v1398_v12, %v1393_v44 }
 0x4bd   : > { %v2303_v20 = vmax.f32 %v2236_v8, %v2299_v10  ;;  %v2284_v50 = vadd.f32 %v2283_v49, %v6488_v35  ;;  %v2351_v51 = vadd.f32 %v2350_v52, %v6488_v35  ;;  %v2285_v48 = vpop.f32.mrb[33].mxu0  ;;  %v2352_v19 = vpop.f32.mrb[33].mxu1  ;;  %v2366_v55 = vsel %vm2358_vm8, %v2346_v13, %v2362_v27 }
 0x4be   : > { %v1407_v4 = vadd.f32 %v1406_v31, %v1400_v30  ;;  %v2286_v2 = vpop.f32.mrb[34].mxu0  ;;  %v2353_v47 = vpop.f32.mrb[34].mxu1 }
 0x4bf   : > { %v2370_v24 = vmax.f32 %v2303_v20, %v2366_v55  ;;  %vm2292_vm10 = vcmp.ge.f32.partialorder %v2284_v50, 0.0  ;;  %v2296_v11 = vmul.f32 0.01, %v2284_v50  ;;  %vm2359_vm11 = vcmp.ge.f32.partialorder %v2351_v51, 0.0  ;;  %v2288_v56 = vpop.f32.mrb[35].mxu0  ;;  %v2355_v8 = vpop.f32.mrb[35].mxu1 }
 0x4c0   : > { %v2363_v29 = vmul.f32 0.01, %v2351_v51  ;;  %v1413_v7 = vadd.f32 %v1411_v25, %v1407_v4  ;;  %v2287_v18 = vadd.f32 %v2286_v2, %v6494_v21  ;;  %v2354_v13 = vadd.f32 %v2353_v47, %v6494_v21  ;;  %v1424_v44 = vpop.permute.xlu0 %1423  ;;  %v1462_v62 = vpop.permute.xlu1 %1461  ;;  %v2548_v8 = vld [vmem:[#allocation2 + $0x80] sm:$0xff] }
 0x4c1   : > { %v2300_v27 = vsel %vm2292_vm10, %v2284_v50, %v2296_v11  ;;  %v1464_v12 = vadd.f32 %v1462_v62, %v1457_v63  ;;  %v2373_v10 = vpack.c.bf16 %v2370_v24, %v2369_v22  ;;  %v1521_v47 = vmul.f32 %v6871_v53, %v6036_v40 }
 0x4c2   : > { %v2304_v49 = vmax.f32 %v2237_v28, %v2300_v27  ;;  %v2367_v52 = vsel %vm2359_vm11, %v2351_v51, %v2363_v29  ;;  %vm2293_vm12 = vcmp.ge.f32.partialorder %v2287_v18, 0.0  ;;  %v2297_v30 = vmul.f32 0.01, %v2287_v18 }
 0x4c3   : > { %vm2360_vm13 = vcmp.ge.f32.partialorder %v2354_v13, 0.0  ;;  %v2364_v25 = vmul.f32 0.01, %v2354_v13  ;;  %v1420_v31 = vadd.f32 %v1419_v0, %v1413_v7  ;;  %5479 = vmatprep.mubr.msk.bf16.mxu0 %vm388_vm4, %v2373_v10  ;;  %5487 = vmatprep.mubr.msk.bf16.mxu1 %vm388_vm4, %v2373_v10  ;;  %v1471_v20 = vadd.f32 %v1470_v16, %v1464_v12  ;;  %v7042_v12 = vld [vmem:[#allocation2 + $0xe8] sm:$0xff] }
 0x4c4   : > { %v2371_v50 = vmax.f32 %v2304_v49, %v2367_v52  ;;  %v2301_v22 = vsel %vm2293_vm12, %v2287_v18, %v2297_v30  ;;  %v1475_v48 = vpop.permute.xlu0 %1474  ;;  %v1483_v28 = vmul.f32 %v6871_v53, %v6041_v43  ;;  %v1488_v19 = vpop.permute.xlu1 %1487  ;;  %v1534_v63 = vmul.f32 %v6878_v34, %v6038_v41  ;;  %v2549_v18 = vld [vmem:[#allocation2 + $0x88] sm:$0xff] }
 0x4c5   : > { %v2305_v14 = vmax.f32 %v2238_v5, %v2301_v22  ;;  %v1426_v26 = vadd.f32 %v1424_v44, %v1420_v31  ;;  %v1477_v36 = vadd.f32 %v1475_v48, %v1471_v20  ;;  %v2368_v51 = vsel %vm2360_vm13, %v2354_v13, %v2364_v25 }
 0x4c6   : > { %v1547_v53 = vmul.f32 %v6887_v32, %v6041_v43 }
 0x4c7   : > { %v2372_v55 = vmax.f32 %v2305_v14, %v2368_v51  ;;  %v1427_v4 = vadd.f32 %v1426_v26, %v6047_v59  ;;  %v1484_v2 = vadd.f32 %v1483_v28, %v1477_v36 }
 0x4c8   : > { %v1526_v0 = vpop.permute.xlu0 %1525  ;;  %v1539_v7 = vpop.permute.xlu1 %1538 }
 0x4c9   : > { %v2374_v38 = vpack.c.bf16 %v2372_v55, %v2371_v50  ;;  %v1429_v60 = vmul.f32 0.01, %v1427_v4  ;;  %v1490_v5 = vadd.f32 %v1488_v19, %v1484_v2  ;;  %v1528_v24 = vadd.f32 %v1526_v0, %v1521_v47 }
 0x4ca   : > { %vm1428_vm14 = vcmp.ge.f32.partialorder %v1427_v4, 0.0 }
 0x4cb   : > { %v1491_v11 = vadd.f32 %v1490_v5, %v6047_v59  ;;  %v1535_v56 = vadd.f32 %v1534_v63, %v1528_v24  ;;  %5480 = vmatmul.mubr.msk.bf16.vlgmr.msra.gmra.mrb[36].mxu0 %vm388_vm4, %v2374_v38  ;;  %5488 = vmatmul.mubr.msk.bf16.vlgmr.msra.gmra.mrb[36].mxu1 %vm388_vm4, %v2374_v38  ;;  %v1430_v29 = vsel %vm1428_vm14, %v1427_v4, %v1429_v60 }
 0x4cc   : > { %2561 = vmatpush1.bf16.msra.mxu0 %v2548_v8  ;;  %2624 = vmatpush1.bf16.msra.mxu1 %v6644_v23  ;;  %v1552_v44 = vpop.permute.xlu0 %1551 }
 0x4cd   : > { %v1493_v40 = vmul.f32 0.01, %v1491_v11  ;;  %v1541_v41 = vadd.f32 %v1539_v7, %v1535_v56  ;;  %1432 = vrot.lane.b32.xlu1 %v1430_v29, %s5869_s28  ;;  %2562 = vmatprep.subr.bf16.mxu0 %v5864_v3  ;;  %vm1492_vm15 = vcmp.ge.f32.partialorder %v1491_v11, 0.0 }
 0x4ce   : > { %2625 = vmatprep.subr.bf16.mxu1 %v5864_v3  ;;  %5114 = vmatprep.mubr.msk.bf16.mxu0 %vm1630_vm9, %v6721_v46 }
 0x4cf   : > { %v1548_v34 = vadd.f32 %v1547_v53, %v1541_v41  ;;  %v1494_v13 = vsel %vm1492_vm15, %v1491_v11, %v1493_v40  ;;  %5116 = vmatprep.mubr.msk.bf16.mxu1 %vm1630_vm9, %v6721_v46 }
 0x4d0   : > { %2563 = vmatpush1.bf16.msra.mxu0 %v2549_v18  ;;  %2626 = vmatpush1.bf16.msra.mxu1 %v6652_v9 }
 0x4d1   : > { %v1554_v43 = vadd.f32 %v1552_v44, %v1548_v34  ;;  %1496 = vrot.lane.b32.xlu0 %v1494_v13, %s5869_s28  ;;  %2564 = vmatprep.subr.bf16.mxu0 %v5864_v3 }
 0x4d2   : > { %2627 = vmatprep.subr.bf16.mxu1 %v5864_v3 }
 0x4d3   : > { %v1555_v32 = vadd.f32 %v1554_v43, %v6047_v59  ;;  %v7024_v59 = vld [vmem:[#allocation2 + $0xd0] sm:$0xff] }
 0x4d4   : > { %2565 = vmatpush1.bf16.msra.mxu0 %v6644_v23  ;;  %2628 = vmatpush1.bf16.msra.mxu1 %v6660_v58  ;;  %v7030_v23 = vld [vmem:[#allocation2 + $0xd8] sm:$0xff] }
 0x4d5   : > { %v1557_v62 = vmul.f32 0.01, %v1555_v32  ;;  %2566 = vmatprep.subr.bf16.mxu0 %v5864_v3  ;;  %2629 = vmatprep.subr.bf16.mxu1 %v5864_v3  ;;  %vm1556_vm0 = vcmp.ge.f32.partialorder %v1555_v32, 0.0 }
 0x4d7   : > { %v1558_v27 = vsel %vm1556_vm0, %v1555_v32, %v1557_v62 }
 0x4d8   : > { %2567 = vmatpush1.bf16.msra.mxu0 %v6652_v9  ;;  %2630 = vmatpush1.bf16.msra.mxu1 %v6671_v61  ;;  %v7036_v9 = vld [vmem:[#allocation2 + $0xe0] sm:$0xff] }
 0x4d9   : > { %1560 = vrot.lane.b32.xlu1 %v1558_v27, %s5869_s28  ;;  %2568 = vmatprep.subr.bf16.mxu0 %v5864_v3 }
 0x4da   : > { %2631 = vmatprep.subr.bf16.mxu1 %v5864_v3 }
 0x4dc   : > { %2569 = vmatpush1.bf16.msra.mxu0 %v6660_v58  ;;  %2632 = vmatpush1.bf16.msra.mxu1 %v6754_v6 }
 0x4dd   : > { %2570 = vmatprep.subr.bf16.mxu0 %v5864_v3  ;;  %2633 = vmatprep.subr.bf16.mxu1 %v5864_v3 }
 0x4e0   : > { %2571 = vmatpush1.bf16.msra.mxu0 %v6671_v61  ;;  %2634 = vmatpush1.bf16.msra.mxu1 %v6760_v42 }
 0x4e1   : > { %2572 = vmatprep.subr.bf16.mxu0 %v5864_v3  ;;  %2635 = vmatprep.subr.bf16.mxu1 %v5864_v3 }
 0x4e4   : > { %2573 = vmatpush1.bf16.msra.mxu0 %v6754_v6  ;;  %2636 = vmatpush1.bf16.msra.mxu1 %v6766_v57 }
 0x4e5   : > { %2574 = vmatprep.subr.bf16.mxu0 %v5864_v3  ;;  %2637 = vmatprep.subr.bf16.mxu1 %v5864_v3 }
 0x4e8   : > { %2575 = vmatpush1.bf16.msra.mxu0 %v6760_v42  ;;  %2638 = vmatpush1.bf16.msra.mxu1 %v6772_v33 }
 0x4e9   : > { %2576 = vmatprep.subr.bf16.mxu0 %v5864_v3  ;;  %2639 = vmatprep.subr.bf16.mxu1 %v5864_v3 }
 0x4ec   : > { %2577 = vmatpush1.bf16.msra.mxu0 %v6766_v57  ;;  %2640 = vmatpush1.bf16.msra.mxu1 %v7024_v59 }
 0x4ed   : > { %2578 = vmatprep.subr.bf16.mxu0 %v5864_v3  ;;  %2641 = vmatprep.subr.bf16.mxu1 %v5864_v3 }
 0x4f0   : > { %2579 = vmatpush1.bf16.msra.mxu0 %v6772_v33  ;;  %2642 = vmatpush1.bf16.msra.mxu1 %v7030_v23 }
 0x4f1   : > { %2580 = vmatprep.subr.bf16.mxu0 %v5864_v3  ;;  %2643 = vmatprep.subr.bf16.mxu1 %v5864_v3 }
 0x4f4   : > { %2581 = vmatpush1.bf16.msra.mxu0 %v7024_v59  ;;  %2644 = vmatpush1.bf16.msra.mxu1 %v7036_v9 }
 0x4f5   : > { %2582 = vmatprep.subr.bf16.mxu0 %v5864_v3  ;;  %2645 = vmatprep.subr.bf16.mxu1 %v5864_v3 }
 0x4f8   : > { %2583 = vmatpush1.bf16.msra.mxu0 %v7030_v23  ;;  %2646 = vmatpush1.bf16.msra.mxu1 %v7042_v12 }
 0x4f9   : > { %2690 = vmatprep.subr.bf16.mxu0 %v5864_v3  ;;  %2757 = vmatprep.subr.bf16.mxu1 %v5864_v3 }
 0x4fb   : > { %2593 = vmatmul.mubr.bf16.vlgmr.msra.gmra.mrb[40].mxu0 %v6781_v54  ;;  %2656 = vmatmul.mubr.bf16.vlgmr.msra.gmra.mrb[40].mxu1 %v6781_v54 }
 0x4fc   : > { %2691 = vmatpush1.bf16.msra.mxu0 %v6660_v58  ;;  %2758 = vmatpush1.bf16.msra.mxu1 %v6754_v6  ;;  %v7092_v58 = vld [vmem:[#allocation2 + $0xf0] sm:$0xff] }
 0x4fd   : > { %2692 = vmatprep.subr.bf16.mxu0 %v5864_v3  ;;  %2759 = vmatprep.subr.bf16.mxu1 %v5864_v3 }
 0x4fe   : > { %5115 = vmatprep.mubr.msk.bf16.mxu0 %vm1630_vm9, %v6788_v45  ;;  %5117 = vmatprep.mubr.msk.bf16.mxu1 %vm1630_vm9, %v6788_v45 }
 0x500   : > { %2693 = vmatpush1.bf16.msra.mxu0 %v6671_v61  ;;  %2760 = vmatpush1.bf16.msra.mxu1 %v6760_v42  ;;  %v7098_v61 = vld [vmem:[#allocation2 + $0xf8] sm:$0xff] }
 0x501   : > { %2694 = vmatprep.subr.bf16.mxu0 %v5864_v3  ;;  %2761 = vmatprep.subr.bf16.mxu1 %v5864_v3 }
 0x503   : > { %2601 = vmatmul.mubr.bf16.gmra.mrb[44].mxu0 %v6805_v39  ;;  %2664 = vmatmul.mubr.bf16.gmra.mrb[44].mxu1 %v6805_v39 }
 0x504   : > { %2695 = vmatpush1.bf16.msra.mxu0 %v6754_v6  ;;  %2762 = vmatpush1.bf16.msra.mxu1 %v6766_v57  ;;  %v7110_v6 = vld [vmem:[#allocation2 + $0x108] sm:$0xff] }
 0x505   : > { %2696 = vmatprep.subr.bf16.mxu0 %v5864_v3  ;;  %2763 = vmatprep.subr.bf16.mxu1 %v5864_v3 }
 0x506   : > { %5118 = vmatprep.mubr.msk.bf16.mxu0 %vm1630_vm9, %v6721_v46  ;;  %5120 = vmatprep.mubr.msk.bf16.mxu1 %vm1630_vm9, %v6721_v46  ;;  %v7104_v46 = vld [vmem:[#allocation2 + $0x100] sm:$0xff] }
 0x508   : > { %2697 = vmatpush1.bf16.msra.mxu0 %v6760_v42  ;;  %2764 = vmatpush1.bf16.msra.mxu1 %v6772_v33  ;;  %v7117_v42 = vld [vmem:[%s8018_s7] sm:$0xff]  }
 0x509   : > { %2698 = vmatprep.subr.bf16.mxu0 %v5864_v3  ;;  %2765 = vmatprep.subr.bf16.mxu1 %v5864_v3 }
 0x50c   : > { %2699 = vmatpush1.bf16.msra.mxu0 %v6766_v57  ;;  %2766 = vmatpush1.bf16.msra.mxu1 %v7024_v59  ;;  %v7123_v57 = vld [vmem:[%s8019_s8] sm:$0xff]  }
 0x50d   : > { %2700 = vmatprep.subr.bf16.mxu0 %v5864_v3  ;;  %2767 = vmatprep.subr.bf16.mxu1 %v5864_v3 }
 0x510   : > { %2701 = vmatpush1.bf16.msra.mxu0 %v6772_v33  ;;  %2768 = vmatpush1.bf16.msra.mxu1 %v7030_v23  ;;  %v7137_v33 = vld [vmem:[%s8018_s7 + $0x8] sm:$0xff]  }
 0x511   : > { %2702 = vmatprep.subr.bf16.mxu0 %v5864_v3  ;;  %2769 = vmatprep.subr.bf16.mxu1 %v5864_v3 }
 0x514   : > { %2703 = vmatpush1.bf16.msra.mxu0 %v7024_v59  ;;  %2770 = vmatpush1.bf16.msra.mxu1 %v7036_v9 }
 0x515   : > { %2704 = vmatprep.subr.bf16.mxu0 %v5864_v3  ;;  %2771 = vmatprep.subr.bf16.mxu1 %v5864_v3 }
 0x518   : > { %2705 = vmatpush1.bf16.msra.mxu0 %v7030_v23  ;;  %2772 = vmatpush1.bf16.msra.mxu1 %v7042_v12 }
 0x519   : > { %2706 = vmatprep.subr.bf16.mxu0 %v5864_v3  ;;  %2773 = vmatprep.subr.bf16.mxu1 %v5864_v3 }
 0x51c   : > { %2707 = vmatpush1.bf16.msra.mxu0 %v7036_v9  ;;  %2774 = vmatpush1.bf16.msra.mxu1 %v7092_v58 }
 0x51d   : > { %2708 = vmatprep.subr.bf16.mxu0 %v5864_v3  ;;  %2775 = vmatprep.subr.bf16.mxu1 %v5864_v3 }
 0x520   : > { %2709 = vmatpush1.bf16.msra.mxu0 %v7042_v12  ;;  %2776 = vmatpush1.bf16.msra.mxu1 %v7098_v61 }
 0x521   : > { %2710 = vmatprep.subr.bf16.mxu0 %v5864_v3  ;;  %2777 = vmatprep.subr.bf16.mxu1 %v5864_v3 }
 0x524   : > { %2711 = vmatpush1.bf16.msra.mxu0 %v7092_v58  ;;  %2778 = vmatpush1.bf16.msra.mxu1 %v7104_v46 }
 0x525   : > { %2712 = vmatprep.subr.bf16.mxu0 %v5864_v3  ;;  %2779 = vmatprep.subr.bf16.mxu1 %v5864_v3 }
 0x528   : > { %2713 = vmatpush1.bf16.msra.mxu0 %v7098_v61  ;;  %2780 = vmatpush1.bf16.msra.mxu1 %v7110_v6 }
 0x529   : > { %5491 = vmatprep.subr.bf16.mxu0 %v7117_v42  ;;  %5499 = vmatprep.subr.bf16.mxu1 %v7123_v57 }
 0x52b   : > { %2723 = vmatmul.mubr.bf16.vlgmr.msra.gmra.mrb[48].mxu0 %v6781_v54  ;;  %2790 = vmatmul.mubr.bf16.vlgmr.msra.gmra.mrb[48].mxu1 %v6781_v54  ;;  %v7143_v54 = vld [vmem:[%s8019_s8 + $0x8] sm:$0xff]  }
 0x52c   : > { %5119 = vmatprep.mubr.msk.bf16.mxu0 %vm1630_vm9, %v6788_v45  ;;  %5121 = vmatprep.mubr.msk.bf16.mxu1 %vm1630_vm9, %v6788_v45 }
 0x52d   : > { %5492 = vmatpush3.bf16.msra.mxu0 %v7117_v42  ;;  %5500 = vmatpush3.bf16.msra.mxu1 %v7123_v57 }
 0x52e   : > { %5493 = vmatprep.subr.bf16.mxu0 %v7137_v33  ;;  %5501 = vmatprep.subr.bf16.mxu1 %v7143_v54 }
 0x531   : > { %5494 = vmatpush3.bf16.msra.mxu0 %v7137_v33  ;;  %5502 = vmatpush3.bf16.msra.mxu1 %v7143_v54 }
 0x532   : > { %3009 = vmatprep.subr.bf16.mxu0 %v5864_v3  ;;  %3072 = vmatprep.subr.bf16.mxu1 %v5864_v3 }
 0x533   : > { %2731 = vmatmul.mubr.bf16.gmra.mrb[52].mxu0 %v6805_v39  ;;  %2798 = vmatmul.mubr.bf16.gmra.mrb[52].mxu1 %v6805_v39 }
 0x53f   : > { %v1433_v45 = vpop.permute.xlu1 %1432 }
 0x540   : > { %v1435_v10 = vsel %vm537_vm6, 0.0, %v1433_v45 }
 0x541   : > { %v1436_v16 = vsel %vm539_vm7, %v1435_v10, 0.0 }
 0x542   : > { %1441 = vrot.lane.b32.xlu1 %v1436_v16, %s5870_s29  ;;  %1438 = vrot.lane.b32.xlu0 %v1436_v16, %s5868_s25 }
 0x543   : > { %v1497_v49 = vpop.permute.xlu0 %1496 }
 0x544   : > { %v1499_v52 = vsel %vm537_vm6, 0.0, %v1497_v49 }
 0x545   : > { %v1500_v30 = vsel %vm539_vm7, %v1499_v52, 0.0 }
 0x546   : > { %1502 = vrot.lane.b32.xlu1 %v1500_v30, %s5868_s25  ;;  %1444 = vrot.lane.b32.xlu0 %v1436_v16, %s5871_s30 }
 0x54a   : > { %1508 = vrot.lane.b32.xlu1 %v1500_v30, %s5871_s30  ;;  %1505 = vrot.lane.b32.xlu0 %v1500_v30, %s5870_s29 }
 0x54b   : > { %v1561_v39 = vpop.permute.xlu1 %1560 }
 0x54c   : > { %v1563_v25 = vsel %vm537_vm6, 0.0, %v1561_v39 }
 0x54d   : > { %v1564_v31 = vsel %vm539_vm7, %v1563_v25, 0.0  ;;  %vm2053_vm7 = vcmask 138240  }
 0x54e   : > { %1569 = vrot.lane.b32.xlu1 %v1564_v31, %s5870_s29  ;;  %1566 = vrot.lane.b32.xlu0 %v1564_v31, %s5868_s25 }
 0x552   : > { %5682 = vrot.lane.b32.xlu1 %v6896_v15, %s5869_s28  ;;  %1572 = vrot.lane.b32.xlu0 %v1564_v31, %s5871_s30 }
 0x556   : > { %5687 = vrot.lane.b32.xlu0 %v6893_v37, %s5869_s28 }
 0x59e   : > { %v5481_v20 = vpop.f32.mrb[36].mxu0  ;;  %v5489_v50 = vpop.f32.mrb[36].mxu1 }
 0x59f   : > { %v2481_v22 = vmax.f32 %v5481_v20, %v5489_v50  ;;  %v2415_v48 = vpop.f32.mrb[37].mxu0  ;;  %v2464_v14 = vpop.f32.mrb[37].mxu1 }
 0x5a0   : > { %v2479_v26 = vmax.f32 %v2415_v48, %v2464_v14  ;;  %v5482_v36 = vpop.f32.mrb[38].mxu0  ;;  %v5490_v28 = vpop.f32.mrb[38].mxu1 }
 0x5a1   : > { %v2482_v51 = vmax.f32 %v5482_v36, %v5490_v28  ;;  %v2418_v19 = vpop.f32.mrb[39].mxu0  ;;  %v2467_v55 = vpop.f32.mrb[39].mxu1 }
 0x5a2   : > { %v2480_v4 = vmax.f32 %v2418_v19, %v2467_v55 }
 0x5a3   : > { %v5696_v2 = vpack.i.bf16 %v2482_v51, %v2481_v22 }
 0x5a4   : > { %v5691_v47 = vpack.i.bf16 %v2480_v4, %v2479_v26 }
 0x5a5   : > { %5697 = vrot.lane.b32.xlu0 %v5696_v2, %s5869_s28 }
 0x5a6   : > { %5692 = vrot.lane.b32.xlu1 %v5691_v47, %s5869_s28 }
 0x5b4   : > { %v1439_v15 = vpop.permute.xlu0 %1438  ;;  %v1442_v37 = vpop.permute.xlu1 %1441 }
 0x5b5   : > { %v1447_v0 = vpack.c.bf16 %v1439_v15, %v1436_v16 }
 0x5b7   : > { %1450 = vst.msk [vmem:[#allocation2 + $0x110] sm:$0xff] %vm388_vm4, %v1447_v0 }
 0x5b8   : > { %v1445_v63 = vpop.permute.xlu0 %1444  ;;  %v1503_v38 = vpop.permute.xlu1 %1502 }
 0x5b9   : > { %v1448_v60 = vpack.c.bf16 %v1445_v63, %v1442_v37  ;;  %v1511_v5 = vpack.c.bf16 %v1503_v38, %v1500_v30 }
 0x5bb   : > { %1451 = vst.msk [vmem:[#allocation2 + $0x118] sm:$0xff] %vm388_vm4, %v1448_v60  ;;  %1514 = vst.msk [vmem:[#allocation2 + $0x120] sm:$0xff] %vm388_vm4, %v1511_v5 }
 0x5bc   : > { %v1506_v24 = vpop.permute.xlu0 %1505  ;;  %v1509_v11 = vpop.permute.xlu1 %1508 }
 0x5bd   : > { %v1512_v56 = vpack.c.bf16 %v1509_v11, %v1506_v24 }
 0x5bf   : > { %1515 = vst.msk [vmem:[#allocation2 + $0x128] sm:$0xff] %vm388_vm4, %v1512_v56 }
 0x5c0   : > { %v1567_v8 = vpop.permute.xlu0 %1566  ;;  %v1570_v29 = vpop.permute.xlu1 %1569 }
 0x5c1   : > { %v1575_v7 = vpack.c.bf16 %v1567_v8, %v1564_v31 }
 0x5c3   : > { %1578 = vst.msk [vmem:[#allocation2 + $0x130] sm:$0xff] %vm388_vm4, %v1575_v7 }
 0x5c4   : > { %v1573_v40 = vpop.permute.xlu0 %1572  ;;  %v5683_v41 = vpop.permute.xlu1 %5682 }
 0x5c5   : > { %v1576_v53 = vpack.c.bf16 %v1573_v40, %v1570_v29  ;;  %v5685_v34 = vunpack.i.h.bf16 %v5683_v41  ;;  %v5684_v18 = vunpack.i.l.bf16 %v5683_v41 }
 0x5c7   : > { %1579 = vst.msk [vmem:[#allocation2 + $0x138] sm:$0xff] %vm388_vm4, %v1576_v53  ;;  %v2050_v13 = vsel %vm537_vm6, 0.0, %v5685_v34  ;;  %v2049_v44 = vsel %vm537_vm6, 0.0, %v5684_v18 }
 0x5c8   : > { %v2055_v43 = vsel %vm2053_vm7, %v2050_v13, 0.0  ;;  %v2054_v32 = vsel %vm2053_vm7, %v2049_v44, 0.0  ;;  %v5688_v62 = vpop.permute.xlu0 %5687 }
 0x5c9   : > { %v5701_v27 = vpack.i.bf16 %v2055_v43, %v2054_v32  ;;  %v2086_v45 = vpack.c.bf16 %v2055_v43, %v2054_v32  ;;  %v5690_v10 = vunpack.i.h.bf16 %v5688_v62  ;;  %v5689_v16 = vunpack.i.l.bf16 %v5688_v62 }
 0x5cb   : > { %2093 = vst.msk [vmem:[#allocation3 + $0x30] sm:$0xff] %vm400_vm1, %v2086_v45  ;;  %v2052_v49 = vsel %vm537_vm6, 0.0, %v5690_v10  ;;  %5702 = vrot.lane.b32.xlu1 %v5701_v27, %s5868_s25  ;;  %v2051_v30 = vsel %vm537_vm6, 0.0, %v5689_v16 }
 0x5cc   : > { %v2057_v52 = vsel %vm2053_vm7, %v2052_v49, 0.0  ;;  %v2056_v39 = vsel %vm2053_vm7, %v2051_v30, 0.0 }
 0x5cd   : > { %v5706_v25 = vpack.i.bf16 %v2057_v52, %v2056_v39  ;;  %v2087_v31 = vpack.c.bf16 %v2057_v52, %v2056_v39 }
 0x5ce   : > { %v2594_v20 = vpop.f32.mrb[40].mxu0  ;;  %v2657_v50 = vpop.f32.mrb[40].mxu1 }
 0x5cf   : > { %v2595_v22 = vadd.f32 %v2594_v20, %v6484_v1  ;;  %v2658_v48 = vadd.f32 %v2657_v50, %v6484_v1  ;;  %v2596_v14 = vpop.f32.mrb[41].mxu0  ;;  %v2659_v26 = vpop.f32.mrb[41].mxu1  ;;  %5712 = vrot.lane.b32.xlu1 %v5701_v27, %s5870_s29  ;;  %2094 = vst.msk [vmem:[#allocation3 + $0x38] sm:$0xff] %vm400_vm1, %v2087_v31  ;;  %5707 = vrot.lane.b32.xlu0 %v5706_v25, %s5868_s25 }
 0x5d0   : > { %v2597_v36 = vpop.f32.mrb[42].mxu0  ;;  %v2660_v28 = vpop.f32.mrb[42].mxu1 }
 0x5d1   : > { %vm2609_vm2 = vcmp.ge.f32.partialorder %v2595_v22, 0.0  ;;  %v2613_v51 = vmul.f32 0.01, %v2595_v22  ;;  %vm2672_vm3 = vcmp.ge.f32.partialorder %v2658_v48, 0.0  ;;  %v2676_v19 = vmul.f32 0.01, %v2658_v48 }
 0x5d2   : > { %v2598_v55 = vadd.f32 %v2597_v36, %v6492_v17  ;;  %v2661_v4 = vadd.f32 %v2660_v28, %v6492_v17  ;;  %v2599_v2 = vpop.f32.mrb[43].mxu0  ;;  %v2662_v47 = vpop.f32.mrb[43].mxu1 }
 0x5d3   : > { %v2617_v15 = vsel %vm2609_vm2, %v2595_v22, %v2613_v51  ;;  %v2680_v37 = vsel %vm2672_vm3, %v2658_v48, %v2676_v19  ;;  %5717 = vrot.lane.b32.xlu0 %v5706_v25, %s5870_s29 }
 0x5d4   : > { %v2684_v0 = vmax.f32 %v2617_v15, %v2680_v37  ;;  %vm2610_vm5 = vcmp.ge.f32.partialorder %v2598_v55, 0.0  ;;  %v2614_v63 = vmul.f32 0.01, %v2598_v55  ;;  %vm2673_vm8 = vcmp.ge.f32.partialorder %v2661_v4, 0.0 }
 0x5d5   : > { %v2677_v38 = vmul.f32 0.01, %v2661_v4 }
 0x5d6   : > { %v2618_v60 = vsel %vm2610_vm5, %v2598_v55, %v2614_v63  ;;  %v2602_v5 = vpop.f32.mrb[44].mxu0  ;;  %v2665_v24 = vpop.f32.mrb[44].mxu1 }
 0x5d7   : > { %v2681_v11 = vsel %vm2673_vm8, %v2661_v4, %v2677_v38  ;;  %v2603_v56 = vadd.f32 %v2602_v5, %v6488_v35  ;;  %v2666_v8 = vadd.f32 %v2665_v24, %v6488_v35  ;;  %v2604_v29 = vpop.f32.mrb[45].mxu0  ;;  %v2667_v7 = vpop.f32.mrb[45].mxu1 }
 0x5d8   : > { %v2685_v40 = vmax.f32 %v2618_v60, %v2681_v11  ;;  %v2605_v41 = vpop.f32.mrb[46].mxu0  ;;  %v2668_v53 = vpop.f32.mrb[46].mxu1 }
 0x5d9   : > { %vm2611_vm10 = vcmp.ge.f32.partialorder %v2603_v56, 0.0  ;;  %v2615_v34 = vmul.f32 0.01, %v2603_v56  ;;  %vm2674_vm11 = vcmp.ge.f32.partialorder %v2666_v8, 0.0  ;;  %v2678_v18 = vmul.f32 0.01, %v2666_v8 }
 0x5da   : > { %v2606_v13 = vadd.f32 %v2605_v41, %v6494_v21  ;;  %v2669_v44 = vadd.f32 %v2668_v53, %v6494_v21  ;;  %v2607_v43 = vpop.f32.mrb[47].mxu0  ;;  %v2670_v32 = vpop.f32.mrb[47].mxu1 }
 0x5db   : > { %v2619_v62 = vsel %vm2611_vm10, %v2603_v56, %v2615_v34  ;;  %v2682_v27 = vsel %vm2674_vm11, %v2666_v8, %v2678_v18 }
 0x5dc   : > { %v2686_v45 = vmax.f32 %v2619_v62, %v2682_v27  ;;  %vm2612_vm12 = vcmp.ge.f32.partialorder %v2606_v13, 0.0  ;;  %v2616_v10 = vmul.f32 0.01, %v2606_v13  ;;  %vm2675_vm13 = vcmp.ge.f32.partialorder %v2669_v44, 0.0 }
 0x5dd   : > { %v2679_v16 = vmul.f32 0.01, %v2669_v44 }
 0x5de   : > { %v2620_v49 = vsel %vm2612_vm12, %v2606_v13, %v2616_v10 }
 0x5df   : > { %v2683_v52 = vsel %vm2675_vm13, %v2669_v44, %v2679_v16 }
 0x5e0   : > { %v2687_v30 = vmax.f32 %v2620_v49, %v2683_v52 }
 0x5fe   : > { %v2724_v39 = vpop.f32.mrb[48].mxu0  ;;  %v2791_v25 = vpop.f32.mrb[48].mxu1 }
 0x5ff   : > { %v2725_v31 = vadd.f32 %v2724_v39, %v6484_v1  ;;  %v2792_v20 = vadd.f32 %v2791_v25, %v6484_v1  ;;  %v2726_v50 = vpop.f32.mrb[49].mxu0  ;;  %v2793_v22 = vpop.f32.mrb[49].mxu1 }
 0x600   : > { %v2727_v48 = vpop.f32.mrb[50].mxu0  ;;  %v2794_v14 = vpop.f32.mrb[50].mxu1 }
 0x601   : > { %vm2739_vm14 = vcmp.ge.f32.partialorder %v2725_v31, 0.0  ;;  %v2743_v26 = vmul.f32 0.01, %v2725_v31  ;;  %v2810_v36 = vmul.f32 0.01, %v2792_v20  ;;  %vm2806_vm15 = vcmp.ge.f32.partialorder %v2792_v20, 0.0 }
 0x602   : > { %v2728_v28 = vadd.f32 %v2727_v48, %v6492_v17  ;;  %v2795_v51 = vadd.f32 %v2794_v14, %v6492_v17  ;;  %v2729_v19 = vpop.f32.mrb[51].mxu0  ;;  %v2796_v55 = vpop.f32.mrb[51].mxu1 }
 0x603   : > { %v2747_v4 = vsel %vm2739_vm14, %v2725_v31, %v2743_v26  ;;  %v2814_v15 = vsel %vm2806_vm15, %v2792_v20, %v2810_v36  ;;  %v2998_v36 = vld [vmem:[#allocation2 + $0xc8] sm:$0xff] }
 0x604   : > { %v2751_v2 = vmax.f32 %v2684_v0, %v2747_v4  ;;  %vm2740_vm0 = vcmp.ge.f32.partialorder %v2728_v28, 0.0  ;;  %v2744_v47 = vmul.f32 0.01, %v2728_v28  ;;  %vm2807_vm2 = vcmp.ge.f32.partialorder %v2795_v51, 0.0 }
 0x605   : > { %v2811_v37 = vmul.f32 0.01, %v2795_v51 }
 0x606   : > { %v2818_v63 = vmax.f32 %v2751_v2, %v2814_v15  ;;  %v2748_v38 = vsel %vm2740_vm0, %v2728_v28, %v2744_v47  ;;  %v2732_v60 = vpop.f32.mrb[52].mxu0  ;;  %v2799_v5 = vpop.f32.mrb[52].mxu1 }
 0x607   : > { %v2752_v24 = vmax.f32 %v2685_v40, %v2748_v38  ;;  %v2733_v11 = vadd.f32 %v2732_v60, %v6488_v35  ;;  %v2800_v56 = vadd.f32 %v2799_v5, %v6488_v35  ;;  %v2734_v8 = vpop.f32.mrb[53].mxu0  ;;  %v2801_v29 = vpop.f32.mrb[53].mxu1  ;;  %v2815_v7 = vsel %vm2807_vm2, %v2795_v51, %v2811_v37 }
 0x608   : > { %v2735_v41 = vpop.f32.mrb[54].mxu0  ;;  %v2802_v53 = vpop.f32.mrb[54].mxu1 }
 0x609   : > { %v2819_v0 = vmax.f32 %v2752_v24, %v2815_v7  ;;  %vm2741_vm3 = vcmp.ge.f32.partialorder %v2733_v11, 0.0  ;;  %v2745_v34 = vmul.f32 0.01, %v2733_v11  ;;  %v2737_v18 = vpop.f32.mrb[55].mxu0  ;;  %v2804_v13 = vpop.f32.mrb[55].mxu1  ;;  %vm2808_vm5 = vcmp.ge.f32.partialorder %v2800_v56, 0.0 }
 0x60a   : > { %v2812_v44 = vmul.f32 0.01, %v2800_v56  ;;  %v2736_v43 = vadd.f32 %v2735_v41, %v6494_v21  ;;  %v2803_v40 = vadd.f32 %v2802_v53, %v6494_v21  ;;  %v7308_v41 = vld [vmem:[#allocation2 + $0x128] sm:$0xff] }
 0x60b   : > { %v2749_v32 = vsel %vm2741_vm3, %v2733_v11, %v2745_v34  ;;  %v2822_v62 = vpack.c.bf16 %v2819_v0, %v2818_v63  ;;  %v7302_v11 = vld [vmem:[#allocation2 + $0x120] sm:$0xff] }
 0x60c   : > { %v2753_v27 = vmax.f32 %v2686_v45, %v2749_v32  ;;  %vm2742_vm8 = vcmp.ge.f32.partialorder %v2736_v43, 0.0  ;;  %v2746_v10 = vmul.f32 0.01, %v2736_v43  ;;  %v2816_v16 = vsel %vm2808_vm5, %v2800_v56, %v2812_v44  ;;  %v2997_v45 = vld [vmem:[#allocation2 + $0xc0] sm:$0xff] }
 0x60d   : > { %vm2809_vm10 = vcmp.ge.f32.partialorder %v2803_v40, 0.0  ;;  %v2813_v49 = vmul.f32 0.01, %v2803_v40  ;;  %5495 = vmatprep.mubr.msk.bf16.mxu0 %vm388_vm4, %v2822_v62  ;;  %5503 = vmatprep.mubr.msk.bf16.mxu1 %vm388_vm4, %v2822_v62  ;;  %v7318_v32 = vld [vmem:[%s8014_s3] ss:$8 sps:$4 sm:$0xff]  }
 0x60e   : > { %v2820_v52 = vmax.f32 %v2753_v27, %v2816_v16  ;;  %v2750_v39 = vsel %vm2742_vm8, %v2736_v43, %v2746_v10  ;;  %v7331_v16 = vld [vmem:[%s8014_s3 + $0x14] ss:$8 sps:$4 sm:$0xff]  }
 0x60f   : > { %v2754_v25 = vmax.f32 %v2687_v30, %v2750_v39  ;;  %v2817_v31 = vsel %vm2809_vm10, %v2803_v40, %v2813_v49  ;;  %v7243_v30 = vld [vmem:[%s8014_s3 + $0x4] ss:$8 sps:$4 sm:$0xff]   ;;  %v5840_v49 = vld [vmem:[%s8014_s3 + $0x10] ss:$8 sps:$4 sm:$0xff]  }
 0x611   : > { %v2821_v20 = vmax.f32 %v2754_v25, %v2817_v31 }
 0x613   : > { %v2823_v50 = vpack.c.bf16 %v2821_v20, %v2820_v52 }
 0x615   : > { %5496 = vmatmul.mubr.msk.bf16.vlgmr.msra.gmra.mrb[56].mxu0 %vm388_vm4, %v2823_v50  ;;  %5504 = vmatmul.mubr.msk.bf16.vlgmr.msra.gmra.mrb[56].mxu1 %vm388_vm4, %v2823_v50 }
 0x616   : > { %3010 = vmatpush1.bf16.msra.mxu0 %v2997_v45  ;;  %3073 = vmatpush1.bf16.msra.mxu1 %v7024_v59 }
 0x617   : > { %3011 = vmatprep.subr.bf16.mxu0 %v5864_v3  ;;  %3074 = vmatprep.subr.bf16.mxu1 %v5864_v3  ;;  %v5698_v22 = vpop.permute.xlu0 %5697 }
 0x618   : > { %v5700_v48 = vunpack.i.h.bf16 %v5698_v22  ;;  %v5699_v14 = vunpack.i.l.bf16 %v5698_v22  ;;  %v5693_v26 = vpop.permute.xlu1 %5692  ;;  %5126 = vmatprep.mubr.msk.bf16.mxu0 %vm1630_vm9, %v7243_v30  ;;  %5128 = vmatprep.mubr.msk.bf16.mxu1 %vm1630_vm9, %v7243_v30 }
 0x619   : > { %v5695_v28 = vunpack.i.h.bf16 %v5693_v26  ;;  %v5694_v51 = vunpack.i.l.bf16 %v5693_v26 }
 0x61a   : > { %3012 = vmatpush1.bf16.msra.mxu0 %v2998_v36  ;;  %3075 = vmatpush1.bf16.msra.mxu1 %v7030_v23  ;;  %v2502_v19 = vsel %vm537_vm6, 0.0, %v5700_v48  ;;  %v2501_v55 = vsel %vm537_vm6, 0.0, %v5699_v14 }
 0x61b   : > { %v2506_v4 = vsel %vm2053_vm7, %v2502_v19, 0.0  ;;  %v2505_v2 = vsel %vm2053_vm7, %v2501_v55, 0.0  ;;  %v2500_v47 = vsel %vm537_vm6, 0.0, %v5695_v28  ;;  %v2499_v15 = vsel %vm537_vm6, 0.0, %v5694_v51  ;;  %3013 = vmatprep.subr.bf16.mxu0 %v5864_v3  ;;  %3076 = vmatprep.subr.bf16.mxu1 %v5864_v3 }
 0x61c   : > { %v5726_v37 = vpack.i.bf16 %v2506_v4, %v2505_v2  ;;  %v2536_v63 = vpack.c.bf16 %v2506_v4, %v2505_v2  ;;  %v2504_v38 = vsel %vm2053_vm7, %v2500_v47, 0.0  ;;  %v2503_v60 = vsel %vm2053_vm7, %v2499_v15, 0.0 }
 0x61d   : > { %v5721_v5 = vpack.i.bf16 %v2504_v38, %v2503_v60  ;;  %v2535_v24 = vpack.c.bf16 %v2504_v38, %v2503_v60 }
 0x61e   : > { %2543 = vst.msk [vmem:[#allocation3 + $0x68] sm:$0xff] %vm400_vm1, %v2536_v63  ;;  %3014 = vmatpush1.bf16.msra.mxu0 %v7024_v59  ;;  %3077 = vmatpush1.bf16.msra.mxu1 %v7036_v9  ;;  %v7290_v59 = vld [vmem:[#allocation2 + $0x110] sm:$0xff] }
 0x61f   : > { %3015 = vmatprep.subr.bf16.mxu0 %v5864_v3  ;;  %3078 = vmatprep.subr.bf16.mxu1 %v5864_v3  ;;  %2542 = vst.msk [vmem:[#allocation3 + $0x60] sm:$0xff] %vm400_vm1, %v2535_v24  ;;  %v441_v24 = vld [vmem:[%s8017_s6 + $0x8] sm:$0xff] }
 0x620   : > { %5727 = vrot.lane.b32.xlu0 %v5726_v37, %s5868_s25  ;;  %5722 = vrot.lane.b32.xlu1 %v5721_v5, %s5868_s25 }
 0x622   : > { %3016 = vmatpush1.bf16.msra.mxu0 %v7030_v23  ;;  %3079 = vmatpush1.bf16.msra.mxu1 %v7042_v12  ;;  %v7296_v23 = vld [vmem:[#allocation2 + $0x118] sm:$0xff] }
 0x623   : > { %3017 = vmatprep.subr.bf16.mxu0 %v5864_v3  ;;  %3080 = vmatprep.subr.bf16.mxu1 %v5864_v3 }
 0x624   : > { %5737 = vrot.lane.b32.xlu0 %v5726_v37, %s5870_s29  ;;  %5732 = vrot.lane.b32.xlu1 %v5721_v5, %s5870_s29 }
 0x626   : > { %3018 = vmatpush1.bf16.msra.mxu0 %v7036_v9  ;;  %3081 = vmatpush1.bf16.msra.mxu1 %v7092_v58 }
 0x627   : > { %3019 = vmatprep.subr.bf16.mxu0 %v5864_v3  ;;  %3082 = vmatprep.subr.bf16.mxu1 %v5864_v3 }
 0x62a   : > { %3020 = vmatpush1.bf16.msra.mxu0 %v7042_v12  ;;  %3083 = vmatpush1.bf16.msra.mxu1 %v7098_v61 }
 0x62b   : > { %3021 = vmatprep.subr.bf16.mxu0 %v5864_v3  ;;  %3084 = vmatprep.subr.bf16.mxu1 %v5864_v3 }
 0x62e   : > { %3022 = vmatpush1.bf16.msra.mxu0 %v7092_v58  ;;  %3085 = vmatpush1.bf16.msra.mxu1 %v7104_v46 }
 0x62f   : > { %3023 = vmatprep.subr.bf16.mxu0 %v5864_v3  ;;  %3086 = vmatprep.subr.bf16.mxu1 %v5864_v3 }
 0x632   : > { %3024 = vmatpush1.bf16.msra.mxu0 %v7098_v61  ;;  %3087 = vmatpush1.bf16.msra.mxu1 %v7110_v6 }
 0x633   : > { %3025 = vmatprep.subr.bf16.mxu0 %v5864_v3  ;;  %3088 = vmatprep.subr.bf16.mxu1 %v5864_v3 }
 0x636   : > { %3026 = vmatpush1.bf16.msra.mxu0 %v7104_v46  ;;  %3089 = vmatpush1.bf16.msra.mxu1 %v7290_v59 }
 0x637   : > { %3027 = vmatprep.subr.bf16.mxu0 %v5864_v3  ;;  %3090 = vmatprep.subr.bf16.mxu1 %v5864_v3 }
 0x63a   : > { %3028 = vmatpush1.bf16.msra.mxu0 %v7110_v6  ;;  %3091 = vmatpush1.bf16.msra.mxu1 %v7296_v23 }
 0x63b   : > { %3029 = vmatprep.subr.bf16.mxu0 %v5864_v3  ;;  %3092 = vmatprep.subr.bf16.mxu1 %v5864_v3 }
 0x63d   : > { %v5703_v56 = vpop.permute.xlu1 %5702 }
 0x63e   : > { %3030 = vmatpush1.bf16.msra.mxu0 %v7290_v59  ;;  %3093 = vmatpush1.bf16.msra.mxu1 %v7302_v11  ;;  %v5705_v8 = vunpack.i.h.bf16 %v5703_v56  ;;  %v5704_v29 = vunpack.i.l.bf16 %v5703_v56  ;;  %v445_v56 = vld [vmem:[%s8017_s6 + $0x28] sm:$0xff] }
 0x63f   : > { %3031 = vmatprep.subr.bf16.mxu0 %v5864_v3  ;;  %3094 = vmatprep.subr.bf16.mxu1 %v5864_v3 }
 0x640   : > { %v2088_v7 = vpack.c.bf16 %v5705_v8, %v5704_v29  ;;  %v444_v8 = vld [vmem:[%s8017_s6 + $0x20] sm:$0xff]  ;;  %v447_v29 = vld [vmem:[%s8017_s6 + $0x38] sm:$0xff] }
 0x641   : > { %v5713_v53 = vpop.permute.xlu1 %5712  ;;  %v5708_v0 = vpop.permute.xlu0 %5707 }
 0x642   : > { %2095 = vst.msk [vmem:[#allocation3 + $0x40] sm:$0xff] %vm400_vm1, %v2088_v7  ;;  %3032 = vmatpush1.bf16.msra.mxu0 %v7296_v23  ;;  %3095 = vmatpush1.bf16.msra.mxu1 %v7308_v41  ;;  %v5715_v34 = vunpack.i.h.bf16 %v5713_v53  ;;  %v5714_v18 = vunpack.i.l.bf16 %v5713_v53  ;;  %v5710_v13 = vunpack.i.h.bf16 %v5708_v0  ;;  %v5709_v44 = vunpack.i.l.bf16 %v5708_v0  ;;  %v446_v7 = vld [vmem:[%s8017_s6 + $0x30] sm:$0xff] }
 0x643   : > { %3139 = vmatprep.subr.bf16.mxu0 %v5864_v3  ;;  %3206 = vmatprep.subr.bf16.mxu1 %v5864_v3 }
 0x644   : > { %v2090_v43 = vpack.c.bf16 %v5715_v34, %v5714_v18  ;;  %v2089_v40 = vpack.c.bf16 %v5710_v13, %v5709_v44 }
 0x645   : > { %3042 = vmatmul.mubr.bf16.vlgmr.msra.gmra.mrb[60].mxu0 %v7318_v32  ;;  %3105 = vmatmul.mubr.bf16.vlgmr.msra.gmra.mrb[60].mxu1 %v7318_v32  ;;  %v5718_v62 = vpop.permute.xlu0 %5717 }
 0x646   : > { %2097 = vst.msk [vmem:[#allocation3 + $0x50] sm:$0xff] %vm400_vm1, %v2090_v43  ;;  %3140 = vmatpush1.bf16.msra.mxu0 %v7036_v9  ;;  %3207 = vmatpush1.bf16.msra.mxu1 %v7092_v58  ;;  %2096 = vst.msk [vmem:[#allocation3 + $0x48] sm:$0xff] %vm400_vm1, %v2089_v40  ;;  %v5720_v27 = vunpack.i.h.bf16 %v5718_v62  ;;  %v5719_v10 = vunpack.i.l.bf16 %v5718_v62 }
 0x647   : > { %3141 = vmatprep.subr.bf16.mxu0 %v5864_v3  ;;  %3208 = vmatprep.subr.bf16.mxu1 %v5864_v3 }
 0x648   : > { %5127 = vmatprep.mubr.msk.bf16.mxu0 %vm1630_vm9, %v7331_v16  ;;  %5129 = vmatprep.mubr.msk.bf16.mxu1 %vm1630_vm9, %v7331_v16  ;;  %v2091_v9 = vpack.c.bf16 %v5720_v27, %v5719_v10 }
 0x64a   : > { %3142 = vmatpush1.bf16.msra.mxu0 %v7042_v12  ;;  %3209 = vmatpush1.bf16.msra.mxu1 %v7098_v61  ;;  %2098 = vst.msk [vmem:[#allocation3 + $0x58] sm:$0xff] %vm400_vm1, %v2091_v9  ;;  %v3137_v12 = vld [vmem:[#allocation2 + $0x130] sm:$0xff] }
 0x64b   : > { %3143 = vmatprep.subr.bf16.mxu0 %v5864_v3  ;;  %3210 = vmatprep.subr.bf16.mxu1 %v5864_v3 }
 0x64d   : > { %3050 = vmatmul.mubr.bf16.gmra.mrb[64].mxu0 %v5840_v49  ;;  %3113 = vmatmul.mubr.bf16.gmra.mrb[64].mxu1 %v5840_v49 }
 0x64e   : > { %3144 = vmatpush1.bf16.msra.mxu0 %v7092_v58  ;;  %3211 = vmatpush1.bf16.msra.mxu1 %v7104_v46  ;;  %v3138_v58 = vld [vmem:[#allocation2 + $0x138] sm:$0xff] }
 0x64f   : > { %3145 = vmatprep.subr.bf16.mxu0 %v5864_v3  ;;  %3212 = vmatprep.subr.bf16.mxu1 %v5864_v3 }
 0x650   : > { %5130 = vmatprep.mubr.msk.bf16.mxu0 %vm1630_vm9, %v7243_v30  ;;  %5132 = vmatprep.mubr.msk.bf16.mxu1 %vm1630_vm9, %v7243_v30 }
 0x652   : > { %3146 = vmatpush1.bf16.msra.mxu0 %v7098_v61  ;;  %3213 = vmatpush1.bf16.msra.mxu1 %v7110_v6  ;;  %v3204_v61 = vld [vmem:[#allocation2 + $0x140] sm:$0xff] }
 0x653   : > { %3147 = vmatprep.subr.bf16.mxu0 %v5864_v3  ;;  %3214 = vmatprep.subr.bf16.mxu1 %v5864_v3 }
 0x656   : > { %3148 = vmatpush1.bf16.msra.mxu0 %v7104_v46  ;;  %3215 = vmatpush1.bf16.msra.mxu1 %v7290_v59  ;;  %v3205_v46 = vld [vmem:[#allocation2 + $0x148] sm:$0xff] }
 0x657   : > { %3149 = vmatprep.subr.bf16.mxu0 %v5864_v3  ;;  %3216 = vmatprep.subr.bf16.mxu1 %v5864_v3 }
 0x65a   : > { %3150 = vmatpush1.bf16.msra.mxu0 %v7110_v6  ;;  %3217 = vmatpush1.bf16.msra.mxu1 %v7296_v23 }
 0x65b   : > { %3151 = vmatprep.subr.bf16.mxu0 %v5864_v3  ;;  %3218 = vmatprep.subr.bf16.mxu1 %v5864_v3 }
 0x65e   : > { %3152 = vmatpush1.bf16.msra.mxu0 %v7290_v59  ;;  %3219 = vmatpush1.bf16.msra.mxu1 %v7302_v11  ;;  %v440_v59 = vld [vmem:[%s8017_s6] sm:$0xff] }
 0x65f   : > { %3153 = vmatprep.subr.bf16.mxu0 %v5864_v3  ;;  %3220 = vmatprep.subr.bf16.mxu1 %v5864_v3 }
 0x662   : > { %3154 = vmatpush1.bf16.msra.mxu0 %v7296_v23  ;;  %3221 = vmatpush1.bf16.msra.mxu1 %v7308_v41  ;;  %v443_v23 = vld [vmem:[%s8017_s6 + $0x18] sm:$0xff] }
 0x663   : > { %3155 = vmatprep.subr.bf16.mxu0 %v5864_v3  ;;  %3222 = vmatprep.subr.bf16.mxu1 %v5864_v3 }
 0x666   : > { %3156 = vmatpush1.bf16.msra.mxu0 %v7302_v11  ;;  %3223 = vmatpush1.bf16.msra.mxu1 %v3137_v12  ;;  %v442_v11 = vld [vmem:[%s8017_s6 + $0x10] sm:$0xff] }
 0x667   : > { %3157 = vmatprep.subr.bf16.mxu0 %v5864_v3  ;;  %3224 = vmatprep.subr.bf16.mxu1 %v5864_v3 }
 0x66a   : > { %3158 = vmatpush1.bf16.msra.mxu0 %v7308_v41  ;;  %3225 = vmatpush1.bf16.msra.mxu1 %v3138_v58 }
 0x66b   : > { %3159 = vmatprep.subr.bf16.mxu0 %v5864_v3  ;;  %3226 = vmatprep.subr.bf16.mxu1 %v5864_v3 }
 0x66e   : > { %3160 = vmatpush1.bf16.msra.mxu0 %v3137_v12  ;;  %3227 = vmatpush1.bf16.msra.mxu1 %v3204_v61 }
 0x66f   : > { %3161 = vmatprep.subr.bf16.mxu0 %v5864_v3  ;;  %3228 = vmatprep.subr.bf16.mxu1 %v5864_v3  ;;  %v7394_v3 = vld [vmem:[#allocation3 + $0x40] sm:$0xff] }
 0x672   : > { %3162 = vmatpush1.bf16.msra.mxu0 %v3138_v58  ;;  %3229 = vmatpush1.bf16.msra.mxu1 %v3205_v46 }
 0x673   : > { %5507 = vmatprep.subr.bf16.mxu0 %v7117_v42  ;;  %5515 = vmatprep.subr.bf16.mxu1 %v7123_v57 }
 0x675   : > { %3172 = vmatmul.mubr.bf16.vlgmr.msra.gmra.mrb[68].mxu0 %v7318_v32  ;;  %3239 = vmatmul.mubr.bf16.vlgmr.msra.gmra.mrb[68].mxu1 %v7318_v32 }
 0x676   : > { %5508 = vmatpush3.bf16.msra.mxu0 %v7117_v42  ;;  %5131 = vmatprep.mubr.msk.bf16.mxu0 %vm1630_vm9, %v7331_v16 }
 0x677   : > { %5509 = vmatprep.subr.bf16.mxu0 %v7137_v33  ;;  %5133 = vmatprep.mubr.msk.bf16.mxu1 %vm1630_vm9, %v7331_v16 }
 0x678   : > { %5516 = vmatpush3.bf16.msra.mxu1 %v7123_v57 }
 0x679   : > { %5517 = vmatprep.subr.bf16.mxu1 %v7143_v54 }
 0x67a   : > { %5510 = vmatpush3.bf16.msra.mxu0 %v7137_v33 }
 0x67b   : > { %5235 = vmatprep.subr.bf16.mxu0 %v7394_v3 }
 0x67c   : > { %5518 = vmatpush3.bf16.msra.mxu1 %v7143_v54 }
 0x67d   : > { %3180 = vmatmul.mubr.bf16.gmra.mrb[72].mxu0 %v5840_v49  ;;  %3247 = vmatmul.mubr.bf16.gmra.mrb[72].mxu1 %v5840_v49 }
 0x692   : > { %v5728_v6 = vpop.permute.xlu0 %5727  ;;  %v5723_v42 = vpop.permute.xlu1 %5722 }
 0x693   : > { %v5730_v52 = vunpack.i.h.bf16 %v5728_v6  ;;  %v5729_v39 = vunpack.i.l.bf16 %v5728_v6  ;;  %v5725_v25 = vunpack.i.h.bf16 %v5723_v42  ;;  %v5724_v31 = vunpack.i.l.bf16 %v5723_v42 }
 0x695   : > { %v2538_v20 = vpack.c.bf16 %v5730_v52, %v5729_v39  ;;  %v2537_v57 = vpack.c.bf16 %v5725_v25, %v5724_v31 }
 0x696   : > { %v5738_v50 = vpop.permute.xlu0 %5737  ;;  %v5733_v45 = vpop.permute.xlu1 %5732 }
 0x697   : > { %2545 = vst.msk [vmem:[#allocation3 + $0x78] sm:$0xff] %vm400_vm1, %v2538_v20  ;;  %2544 = vst.msk [vmem:[#allocation3 + $0x70] sm:$0xff] %vm400_vm1, %v2537_v57  ;;  %v5740_v33 = vunpack.i.h.bf16 %v5738_v50  ;;  %v5739_v22 = vunpack.i.l.bf16 %v5738_v50  ;;  %v5735_v48 = vunpack.i.h.bf16 %v5733_v45  ;;  %v5734_v54 = vunpack.i.l.bf16 %v5733_v45 }
 0x699   : > { %v2540_v14 = vpack.c.bf16 %v5740_v33, %v5739_v22  ;;  %v2539_v26 = vpack.c.bf16 %v5735_v48, %v5734_v54 }
 0x69b   : > { %2547 = vst.msk [vmem:[#allocation3 + $0x88] sm:$0xff] %vm400_vm1, %v2540_v14  ;;  %2546 = vst.msk [vmem:[#allocation3 + $0x80] sm:$0xff] %vm400_vm1, %v2539_v26 }
 0x6a2   : > { %v7402_v30 = vld [vmem:[#allocation3 + $0x80] sm:$0xff] }
 0x6a3   : > { %5523 = vmatprep.subr.bf16.mxu1 %v7402_v30 }
 0x6e8   : > { %v5497_v36 = vpop.f32.mrb[56].mxu0  ;;  %v5505_v28 = vpop.f32.mrb[56].mxu1 }
 0x6e9   : > { %v2930_v51 = vmax.f32 %v5497_v36, %v5505_v28  ;;  %v2864_v19 = vpop.f32.mrb[57].mxu0  ;;  %v2913_v55 = vpop.f32.mrb[57].mxu1 }
 0x6ea   : > { %v2928_v4 = vmax.f32 %v2864_v19, %v2913_v55  ;;  %v5498_v2 = vpop.f32.mrb[58].mxu0  ;;  %v5506_v47 = vpop.f32.mrb[58].mxu1 }
 0x6eb   : > { %v2931_v15 = vmax.f32 %v5498_v2, %v5506_v47  ;;  %v2867_v37 = vpop.f32.mrb[59].mxu0  ;;  %v2916_v63 = vpop.f32.mrb[59].mxu1 }
 0x6ec   : > { %v2929_v38 = vmax.f32 %v2867_v37, %v2916_v63 }
 0x6ed   : > { %v5746_v60 = vpack.i.bf16 %v2931_v15, %v2930_v51 }
 0x6ee   : > { %v5741_v5 = vpack.i.bf16 %v2929_v38, %v2928_v4 }
 0x6ef   : > { %5747 = vrot.lane.b32.xlu0 %v5746_v60, %s5869_s28 }
 0x6f0   : > { %5742 = vrot.lane.b32.xlu1 %v5741_v5, %s5869_s28 }
 0x6f3   : > { %3471 = vperm.xlu0 %5680, %v441_v24  }
 0x6f4   : > { %3466 = vperm.xlu1 %5679, %v440_v59  }
 0x6f7   : > { %3481 = vperm.xlu0 %5680, %v443_v23  }
 0x6f8   : > { %3476 = vperm.xlu1 %5679, %v442_v11  }
 0x6fb   : > { %3491 = vperm.xlu0 %5680, %v445_v56  }
 0x6fc   : > { %3486 = vperm.xlu1 %5679, %v444_v8  }
 0x6ff   : > { %3501 = vperm.xlu0 %5680, %v447_v29  }
 0x700   : > { %3496 = vperm.xlu1 %5679, %v446_v7  }
 0x718   : > { %v3043_v41 = vpop.f32.mrb[60].mxu0  ;;  %v3106_v53 = vpop.f32.mrb[60].mxu1 }
 0x719   : > { %v3044_v0 = vadd.f32 %v3043_v41, %v6484_v1  ;;  %v3107_v34 = vadd.f32 %v3106_v53, %v6484_v1  ;;  %v3045_v18 = vpop.f32.mrb[61].mxu0  ;;  %v3108_v13 = vpop.f32.mrb[61].mxu1 }
 0x71a   : > { %v3046_v44 = vpop.f32.mrb[62].mxu0  ;;  %v3109_v43 = vpop.f32.mrb[62].mxu1 }
 0x71b   : > { %vm3058_vm9 = vcmp.ge.f32.partialorder %v3044_v0, 0.0  ;;  %v3062_v40 = vmul.f32 0.01, %v3044_v0  ;;  %vm3121_vm11 = vcmp.ge.f32.partialorder %v3107_v34, 0.0  ;;  %v3125_v32 = vmul.f32 0.01, %v3107_v34 }
 0x71c   : > { %v3047_v62 = vadd.f32 %v3046_v44, %v6492_v17  ;;  %v3110_v27 = vadd.f32 %v3109_v43, %v6492_v17  ;;  %v3048_v10 = vpop.f32.mrb[63].mxu0  ;;  %v3111_v16 = vpop.f32.mrb[63].mxu1 }
 0x71d   : > { %v3066_v9 = vsel %vm3058_vm9, %v3044_v0, %v3062_v40  ;;  %v3129_v49 = vsel %vm3121_vm11, %v3107_v34, %v3125_v32 }
 0x71e   : > { %v3133_v12 = vmax.f32 %v3066_v9, %v3129_v49  ;;  %vm3059_vm12 = vcmp.ge.f32.partialorder %v3047_v62, 0.0  ;;  %v3063_v58 = vmul.f32 0.01, %v3047_v62  ;;  %vm3122_vm13 = vcmp.ge.f32.partialorder %v3110_v27, 0.0 }
 0x71f   : > { %v3126_v61 = vmul.f32 0.01, %v3110_v27 }
 0x720   : > { %v3067_v46 = vsel %vm3059_vm12, %v3047_v62, %v3063_v58  ;;  %v3051_v6 = vpop.f32.mrb[64].mxu0  ;;  %v3114_v42 = vpop.f32.mrb[64].mxu1 }
 0x721   : > { %v3130_v52 = vsel %vm3122_vm13, %v3110_v27, %v3126_v61  ;;  %v3052_v39 = vadd.f32 %v3051_v6, %v6488_v35  ;;  %v3115_v25 = vadd.f32 %v3114_v42, %v6488_v35  ;;  %v3053_v31 = vpop.f32.mrb[65].mxu0  ;;  %v3116_v20 = vpop.f32.mrb[65].mxu1 }
 0x722   : > { %v3134_v57 = vmax.f32 %v3067_v46, %v3130_v52  ;;  %v3054_v50 = vpop.f32.mrb[66].mxu0  ;;  %v3117_v45 = vpop.f32.mrb[66].mxu1 }
 0x723   : > { %vm3060_vm14 = vcmp.ge.f32.partialorder %v3052_v39, 0.0  ;;  %v3064_v33 = vmul.f32 0.01, %v3052_v39  ;;  %vm3123_vm15 = vcmp.ge.f32.partialorder %v3115_v25, 0.0  ;;  %v3127_v22 = vmul.f32 0.01, %v3115_v25 }
 0x724   : > { %v3055_v48 = vadd.f32 %v3054_v50, %v6494_v21  ;;  %v3118_v54 = vadd.f32 %v3117_v45, %v6494_v21  ;;  %v3056_v14 = vpop.f32.mrb[67].mxu0  ;;  %v3119_v26 = vpop.f32.mrb[67].mxu1 }
 0x725   : > { %v3068_v36 = vsel %vm3060_vm14, %v3052_v39, %v3064_v33  ;;  %v3131_v28 = vsel %vm3123_vm15, %v3115_v25, %v3127_v22  ;;  %v7457_v14 = vld [vmem:[%s8016_s5 + $0x8] ss:$12 sps:$4 sm:$0xff]   ;;  %v7462_v26 = vld [vmem:[#allocation3 + $0x48] sm:$0xff] }
 0x726   : > { %v3135_v51 = vmax.f32 %v3068_v36, %v3131_v28  ;;  %vm3061_vm0 = vcmp.ge.f32.partialorder %v3055_v48, 0.0  ;;  %v3065_v19 = vmul.f32 0.01, %v3055_v48  ;;  %vm3124_vm2 = vcmp.ge.f32.partialorder %v3118_v54, 0.0  ;;  %v7464_v36 = vld [vmem:[#allocation3 + $0x88] sm:$0xff] }
 0x727   : > { %v3128_v55 = vmul.f32 0.01, %v3118_v54 }
 0x728   : > { %v3069_v4 = vsel %vm3061_vm0, %v3055_v48, %v3065_v19 }
 0x729   : > { %v3132_v2 = vsel %vm3124_vm2, %v3118_v54, %v3128_v55  ;;  %v3446_v54 = vld [vmem:[#allocation3] sm:$0xff] }
 0x72a   : > { %v3136_v47 = vmax.f32 %v3069_v4, %v3132_v2 }
 0x748   : > { %v3173_v15 = vpop.f32.mrb[68].mxu0  ;;  %v3240_v37 = vpop.f32.mrb[68].mxu1 }
 0x749   : > { %v3174_v63 = vadd.f32 %v3173_v15, %v6484_v1  ;;  %v3241_v38 = vadd.f32 %v3240_v37, %v6484_v1  ;;  %v3175_v60 = vpop.f32.mrb[69].mxu0  ;;  %v3242_v5 = vpop.f32.mrb[69].mxu1  ;;  %v7474_v15 = vld [vmem:[%s8016_s5 + $0x20] ss:$12 sps:$4 sm:$0xff]  }
 0x74a   : > { %v3176_v24 = vpop.f32.mrb[70].mxu0  ;;  %v3243_v59 = vpop.f32.mrb[70].mxu1  ;;  %v3448_v60 = vld [vmem:[#allocation3 + $0x10] sm:$0xff] }
 0x74b   : > { %vm3188_vm3 = vcmp.ge.f32.partialorder %v3174_v63, 0.0  ;;  %v3192_v23 = vmul.f32 0.01, %v3174_v63  ;;  %v3259_v11 = vmul.f32 0.01, %v3241_v38  ;;  %vm3255_vm5 = vcmp.ge.f32.partialorder %v3241_v38, 0.0 }
 0x74c   : > { %v3177_v56 = vadd.f32 %v3176_v24, %v6492_v17  ;;  %v3244_v8 = vadd.f32 %v3243_v59, %v6492_v17  ;;  %v3178_v29 = vpop.f32.mrb[71].mxu0  ;;  %v3245_v7 = vpop.f32.mrb[71].mxu1 }
 0x74d   : > { %v3196_v41 = vsel %vm3188_vm3, %v3174_v63, %v3192_v23  ;;  %v3263_v34 = vsel %vm3255_vm5, %v3241_v38, %v3259_v11  ;;  %v7479_v38 = vld [vmem:[#allocation3 + $0x50] sm:$0xff] }
 0x74e   : > { %v3200_v53 = vmax.f32 %v3133_v12, %v3196_v41  ;;  %vm3189_vm8 = vcmp.ge.f32.partialorder %v3177_v56, 0.0  ;;  %v3193_v0 = vmul.f32 0.01, %v3177_v56  ;;  %vm3256_vm10 = vcmp.ge.f32.partialorder %v3244_v8, 0.0  ;;  %v7489_v11 = vld [vmem:[%s8016_s5 + $0x38] ss:$12 sps:$4 sm:$0xff]  }
 0x74f   : > { %v3260_v1 = vmul.f32 0.01, %v3244_v8 }
 0x750   : > { %v3267_v18 = vmax.f32 %v3200_v53, %v3263_v34  ;;  %v3197_v13 = vsel %vm3189_vm8, %v3177_v56, %v3193_v0  ;;  %v3181_v44 = vpop.f32.mrb[72].mxu0  ;;  %v3248_v43 = vpop.f32.mrb[72].mxu1  ;;  %v3457_v0 = vld [vmem:[#allocation3 + $0x58] sm:$0xff] }
 0x751   : > { %v3201_v40 = vmax.f32 %v3134_v57, %v3197_v13  ;;  %v3182_v32 = vadd.f32 %v3181_v44, %v6488_v35  ;;  %v3249_v62 = vadd.f32 %v3248_v43, %v6488_v35  ;;  %v3183_v27 = vpop.f32.mrb[73].mxu0  ;;  %v3250_v17 = vpop.f32.mrb[73].mxu1  ;;  %v3264_v10 = vsel %vm3256_vm10, %v3244_v8, %v3260_v1  ;;  %v3449_v34 = vld [vmem:[#allocation3 + $0x18] sm:$0xff]  ;;  %v7504_v1 = vld [vmem:[%s8016_s5 + $0x50] ss:$12 sps:$4 sm:$0xff]  }
 0x752   : > { %v3184_v16 = vpop.f32.mrb[74].mxu0  ;;  %v3251_v9 = vpop.f32.mrb[74].mxu1  ;;  %v3450_v13 = vld [vmem:[#allocation3 + $0x20] sm:$0xff]  ;;  %v7513_v44 = vld [vmem:[#allocation3 + $0x68] sm:$0xff]  ;;  %v3453_v27 = vld [vmem:[#allocation3 + $0x38] sm:$0xff] }
 0x753   : > { %v3268_v49 = vmax.f32 %v3201_v40, %v3264_v10  ;;  %vm3190_vm9 = vcmp.ge.f32.partialorder %v3182_v32, 0.0  ;;  %v3194_v12 = vmul.f32 0.01, %v3182_v32  ;;  %v3186_v58 = vpop.f32.mrb[75].mxu0  ;;  %v3253_v61 = vpop.f32.mrb[75].mxu1  ;;  %vm3257_vm11 = vcmp.ge.f32.partialorder %v3249_v62, 0.0 }
 0x754   : > { %v3261_v46 = vmul.f32 0.01, %v3249_v62  ;;  %v3185_v6 = vadd.f32 %v3184_v16, %v6494_v21  ;;  %v3252_v42 = vadd.f32 %v3251_v9, %v6494_v21  ;;  %v7452_v21 = vld [vmem:[%s8016_s5 + $0x4] ss:$12 sps:$4 sm:$0xff]   ;;  %v3451_v43 = vld [vmem:[#allocation3 + $0x28] sm:$0xff] }
 0x755   : > { %v3198_v52 = vsel %vm3190_vm9, %v3182_v32, %v3194_v12  ;;  %v3271_v39 = vpack.c.bf16 %v3268_v49, %v3267_v18  ;;  %v7506_v18 = vld [vmem:[#allocation3 + $0x60] sm:$0xff]  ;;  %v7516_v40 = vld [vmem:[#allocation3 + $0x70] sm:$0xff]  ;;  %v7530_v10 = vld [vmem:[%s8016_s5 + $0x1c] ss:$12 sps:$4 sm:$0xff]  }
 0x756   : > { %v3202_v25 = vmax.f32 %v3135_v51, %v3198_v52  ;;  %vm3191_vm12 = vcmp.ge.f32.partialorder %v3185_v6, 0.0  ;;  %v3195_v35 = vmul.f32 0.01, %v3185_v6  ;;  %v3265_v31 = vsel %vm3257_vm11, %v3249_v62, %v3261_v46  ;;  %v3447_v51 = vld [vmem:[#allocation3 + $0x8] sm:$0xff]  ;;  %v3452_v32 = vld [vmem:[#allocation3 + $0x30] sm:$0xff]  ;;  %v7519_v62 = vld [vmem:[#allocation3 + $0x78] sm:$0xff] }
 0x757   : > { %vm3258_vm13 = vcmp.ge.f32.partialorder %v3252_v42, 0.0  ;;  %v3262_v20 = vmul.f32 0.01, %v3252_v42  ;;  %5511 = vmatprep.mubr.msk.bf16.mxu0 %vm388_vm4, %v3271_v39  ;;  %5519 = vmatprep.mubr.msk.bf16.mxu1 %vm388_vm4, %v3271_v39  ;;  %v7525_v17 = vld [vmem:[%s8016_s5] ss:$12 sps:$4 sm:$0xff]  }
 0x758   : > { %v3269_v57 = vmax.f32 %v3202_v25, %v3265_v31  ;;  %v3199_v50 = vsel %vm3191_vm12, %v3185_v6, %v3195_v35  ;;  %v7539_v16 = vld [vmem:[%s8016_s5 + $0x18] ss:$12 sps:$4 sm:$0xff]   ;;  %v7544_v9 = vld [vmem:[%s8016_s5 + $0x34] ss:$12 sps:$4 sm:$0xff]   ;;  %v7554_v49 = vld [vmem:[%s8016_s5 + $0x30] ss:$12 sps:$4 sm:$0xff]  }
 0x759   : > { %v3203_v45 = vmax.f32 %v3136_v47, %v3199_v50  ;;  %v3266_v33 = vsel %vm3258_vm13, %v3252_v42, %v3262_v20  ;;  %v7562_v58 = vld [vmem:[%s8016_s5 + $0x4c] ss:$12 sps:$4 sm:$0xff]   ;;  %v7574_v61 = vld [vmem:[%s8016_s5 + $0x48] ss:$12 sps:$4 sm:$0xff]  }
 0x75b   : > { %v3270_v22 = vmax.f32 %v3203_v45, %v3266_v33 }
 0x75d   : > { %v3272_v48 = vpack.c.bf16 %v3270_v22, %v3269_v57 }
 0x75f   : > { %5512 = vmatmul.mubr.msk.bf16.vlgmr.msra.gmra.mrb[76].mxu0 %vm388_vm4, %v3272_v48  ;;  %5520 = vmatmul.mubr.msk.bf16.vlgmr.msra.gmra.mrb[76].mxu1 %vm388_vm4, %v3272_v48 }
 0x760   : > { %5236 = vmatpush3.bf16.msra.mxu0 %v3446_v54  ;;  %5524 = vmatpush3.bf16.msra.mxu1 %v7402_v30 }
 0x761   : > { %5237 = vmatprep.subr.bf16.mxu0 %v7462_v26  ;;  %5525 = vmatprep.subr.bf16.mxu1 %v7464_v36  ;;  %v5748_v28 = vpop.permute.xlu0 %5747 }
 0x762   : > { %v5750_v19 = vunpack.i.h.bf16 %v5748_v28  ;;  %v5749_v55 = vunpack.i.l.bf16 %v5748_v28  ;;  %v5743_v4 = vpop.permute.xlu1 %5742  ;;  %3608 = vmatprep.mubr.bf16.mxu0 %v7452_v21  ;;  %5527 = vmatprep.mubr.msk.bf16.mxu1 %vm388_vm4, %v7457_v14 }
 0x763   : > { %v5745_v2 = vunpack.i.h.bf16 %v5743_v4  ;;  %v5744_v47 = vunpack.i.l.bf16 %v5743_v4 }
 0x764   : > { %v2951_v37 = vsel %vm537_vm6, 0.0, %v5750_v19  ;;  %v2950_v63 = vsel %vm537_vm6, 0.0, %v5749_v55  ;;  %5238 = vmatpush3.bf16.msra.mxu0 %v3447_v51  ;;  %5526 = vmatpush3.bf16.msra.mxu1 %v7464_v36 }
 0x765   : > { %v2955_v5 = vsel %vm2053_vm7, %v2951_v37, 0.0  ;;  %v2954_v24 = vsel %vm2053_vm7, %v2950_v63, 0.0  ;;  %v2949_v59 = vsel %vm537_vm6, 0.0, %v5745_v2  ;;  %v2948_v23 = vsel %vm537_vm6, 0.0, %v5744_v47  ;;  %5239 = vmatprep.subr.bf16.mxu0 %v7479_v38  ;;  %v7601_v37 = vld [vmem:[%s8020_s9] sm:$0xff]  }
 0x766   : > { %v5756_v56 = vpack.i.bf16 %v2955_v5, %v2954_v24  ;;  %v2985_v8 = vpack.c.bf16 %v2955_v5, %v2954_v24  ;;  %v2953_v29 = vsel %vm2053_vm7, %v2949_v59, 0.0  ;;  %v2952_v7 = vsel %vm2053_vm7, %v2948_v23, 0.0  ;;  %5535 = vmatprep.subr.bf16.mxu1 %v7601_v37 }
 0x767   : > { %5528 = vmatmul.mubr.msk.bf16.vlgmr.msra.gmra.mrb[80].mxu1 %vm388_vm4, %v7474_v15  ;;  %v5751_v41 = vpack.i.bf16 %v2953_v29, %v2952_v7  ;;  %v2984_v53 = vpack.c.bf16 %v2953_v29, %v2952_v7 }
 0x768   : > { %2992 = vst.msk [vmem:[#allocation3 + $0x98] sm:$0xff] %vm400_vm1, %v2985_v8  ;;  %5240 = vmatpush3.bf16.msra.mxu0 %v3448_v60  ;;  %5757 = vrot.lane.b32.xlu0 %v5756_v56, %s5868_s25  ;;  %v7615_v60 = vld [vmem:[%s8021_s10] sm:$0xff]  }
 0x769   : > { %5241 = vmatprep.subr.bf16.mxu0 %v3457_v0  ;;  %5531 = vmatprep.mubr.msk.bf16.mxu1 %vm388_vm4, %v7489_v11  ;;  %2991 = vst.msk [vmem:[#allocation3 + $0x90] sm:$0xff] %vm400_vm1, %v2984_v53 }
 0x76a   : > { %5752 = vrot.lane.b32.xlu1 %v5751_v41, %s5868_s25  ;;  %5536 = vmatpush3.bf16.msra.mxu1 %v7601_v37 }
 0x76b   : > { %5545 = vmatprep.subr.bf16.mxu1 %v7615_v60 }
 0x76c   : > { %5242 = vmatpush3.bf16.msra.mxu0 %v3449_v34  ;;  %5767 = vrot.lane.b32.xlu0 %v5756_v56, %s5870_s29 }
 0x76d   : > { %5243 = vmatprep.subr.bf16.mxu0 %v7506_v18 }
 0x76e   : > { %5762 = vrot.lane.b32.xlu1 %v5751_v41, %s5870_s29 }
 0x76f   : > { %5532 = vmatmul.mubr.msk.bf16.gmra.mrb[84].mxu1 %vm388_vm4, %v7504_v1 }
 0x770   : > { %5244 = vmatpush3.bf16.msra.mxu0 %v3450_v13  ;;  %v7557_v12 = vld [vmem:[#allocation3 + $0x90] sm:$0xff] }
 0x771   : > { %5245 = vmatprep.subr.bf16.mxu0 %v7513_v44 }
 0x772   : > { %v7578_v46 = vpop.permute.xlu0 %3471 }
 0x773   : > { %v7580_v6 = vpop.permute.xlu1 %3466 }
 0x774   : > { %5246 = vmatpush3.bf16.msra.mxu0 %v3451_v43 }
 0x775   : > { %5247 = vmatprep.subr.bf16.mxu0 %v7516_v40 }
 0x776   : > { %v7582_v42 = vpop.permute.xlu0 %3481 }
 0x777   : > { %v7584_v52 = vpop.permute.xlu1 %3476 }
 0x778   : > { %5248 = vmatpush3.bf16.msra.mxu0 %v3452_v32 }
 0x779   : > { %5249 = vmatprep.subr.bf16.mxu0 %v7519_v62 }
 0x77a   : > { %v7586_v39 = vpop.permute.xlu0 %3491 }
 0x77b   : > { %v7588_v25 = vpop.permute.xlu1 %3486 }
 0x77c   : > { %5250 = vmatpush3.bf16.msra.mxu0 %v3453_v27 }
 0x77d   : > { %5291 = vmatprep.subr.bf16.mxu0 %v7516_v40 }
 0x77e   : > { %v7590_v35 = vpop.permute.xlu0 %3501 }
 0x77f   : > { %3609 = vmatmul.mubr.bf16.vlgmr.msra.gmra.mrb[80].mxu0 %v7525_v17  ;;  %v7592_v31 = vpop.permute.xlu1 %3496 }
 0x780   : > { %5292 = vmatpush3.bf16.msra.mxu0 %v3452_v32  ;;  %3616 = vmatprep.mubr.bf16.mxu0 %v7530_v10 }
 0x781   : > { %5293 = vmatprep.subr.bf16.mxu0 %v7519_v62 }
 0x784   : > { %5294 = vmatpush3.bf16.msra.mxu0 %v3453_v27 }
 0x785   : > { %5295 = vmatprep.subr.bf16.mxu0 %v7402_v30 }
 0x787   : > { %3617 = vmatmul.mubr.bf16.gmra.mrb[84].mxu0 %v7539_v16 }
 0x788   : > { %5296 = vmatpush3.bf16.msra.mxu0 %v7394_v3  ;;  %3624 = vmatprep.mubr.bf16.mxu0 %v7544_v9  ;;  %v7567_v3 = vld [vmem:[#allocation3 + $0x98] sm:$0xff] }
 0x789   : > { %5297 = vmatprep.subr.bf16.mxu0 %v7464_v36 }
 0x78c   : > { %5298 = vmatpush3.bf16.msra.mxu0 %v7462_v26 }
 0x78d   : > { %5299 = vmatprep.subr.bf16.mxu0 %v7557_v12 }
 0x78f   : > { %3625 = vmatmul.mubr.bf16.gmra.mrb[88].mxu0 %v7554_v49 }
 0x790   : > { %5300 = vmatpush3.bf16.msra.mxu0 %v7479_v38  ;;  %3632 = vmatprep.mubr.bf16.mxu0 %v7562_v58 }
 0x791   : > { %5301 = vmatprep.subr.bf16.mxu0 %v7567_v3 }
 0x794   : > { %5302 = vmatpush3.bf16.msra.mxu0 %v3457_v0 }
 0x797   : > { %3633 = vmatmul.mubr.bf16.gmra.mrb[92].mxu0 %v7574_v61 }
 0x798   : > { %3934 = vmatprep.mubr.bf16.mxu0 %v7452_v21 }
 0x7da   : > { %v5758_v20 = vpop.permute.xlu0 %5757 }
 0x7db   : > { %v5760_v57 = vunpack.i.h.bf16 %v5758_v20  ;;  %v5759_v50 = vunpack.i.l.bf16 %v5758_v20 }
 0x7dc   : > { %v5753_v45 = vpop.permute.xlu1 %5752 }
 0x7dd   : > { %v2987_v33 = vpack.c.bf16 %v5760_v57, %v5759_v50  ;;  %v5755_v22 = vunpack.i.h.bf16 %v5753_v45  ;;  %v5754_v48 = vunpack.i.l.bf16 %v5753_v45 }
 0x7de   : > { %v5768_v54 = vpop.permute.xlu0 %5767 }
 0x7df   : > { %2994 = vst.msk [vmem:[#allocation3 + $0xa8] sm:$0xff] %vm400_vm1, %v2987_v33  ;;  %v2986_v26 = vpack.c.bf16 %v5755_v22, %v5754_v48  ;;  %v5770_v28 = vunpack.i.h.bf16 %v5768_v54  ;;  %v5769_v51 = vunpack.i.l.bf16 %v5768_v54 }
 0x7e0   : > { %v5763_v19 = vpop.permute.xlu1 %5762 }
 0x7e1   : > { %2993 = vst.msk [vmem:[#allocation3 + $0xa0] sm:$0xff] %vm400_vm1, %v2986_v26  ;;  %v2989_v55 = vpack.c.bf16 %v5770_v28, %v5769_v51  ;;  %v5765_v4 = vunpack.i.h.bf16 %v5763_v19  ;;  %v5764_v2 = vunpack.i.l.bf16 %v5763_v19 }
 0x7e3   : > { %2996 = vst.msk [vmem:[#allocation3 + $0xb8] sm:$0xff] %vm400_vm1, %v2989_v55  ;;  %v2988_v47 = vpack.c.bf16 %v5765_v4, %v5764_v2 }
 0x7e5   : > { %2995 = vst.msk [vmem:[#allocation3 + $0xb0] sm:$0xff] %vm400_vm1, %v2988_v47 }
 0x7e6   : > { %v7608_v38 = vld [vmem:[#allocation3 + $0xa8] sm:$0xff] }
 0x7e8   : > { %v7603_v63 = vld [vmem:[#allocation3 + $0xa0] sm:$0xff] }
 0x7e9   : > { %5303 = vmatprep.subr.bf16.mxu0 %v7603_v63 }
 0x7ea   : > { %5304 = vmatpush3.bf16.msra.mxu0 %v7506_v18  ;;  %v7630_v24 = vld [vmem:[#allocation3 + $0xb8] sm:$0xff] }
 0x7eb   : > { %5305 = vmatprep.subr.bf16.mxu0 %v7608_v38 }
 0x7ec   : > { %v7625_v5 = vld [vmem:[#allocation3 + $0xb0] sm:$0xff] }
 0x7ee   : > { %5306 = vmatpush3.bf16.msra.mxu0 %v7513_v44 }
 0x7ef   : > { %5347 = vmatprep.subr.bf16.mxu0 %v7603_v63 }
 0x7f1   : > { %3935 = vmatmul.mubr.bf16.vlgmr.msra.gmra.mrb[96].mxu0 %v7525_v17 }
 0x7f2   : > { %5348 = vmatpush3.bf16.msra.mxu0 %v7506_v18  ;;  %3942 = vmatprep.mubr.bf16.mxu0 %v7530_v10 }
 0x7f3   : > { %5349 = vmatprep.subr.bf16.mxu0 %v7608_v38 }
 0x7f6   : > { %5350 = vmatpush3.bf16.msra.mxu0 %v7513_v44 }
 0x7f7   : > { %5351 = vmatprep.subr.bf16.mxu0 %v7625_v5 }
 0x7f9   : > { %3943 = vmatmul.mubr.bf16.gmra.mrb[100].mxu0 %v7539_v16 }
 0x7fa   : > { %5352 = vmatpush3.bf16.msra.mxu0 %v7516_v40  ;;  %3950 = vmatprep.mubr.bf16.mxu0 %v7544_v9 }
 0x7fb   : > { %5353 = vmatprep.subr.bf16.mxu0 %v7630_v24 }
 0x7fe   : > { %5354 = vmatpush3.bf16.msra.mxu0 %v7519_v62 }
 0x801   : > { %3951 = vmatmul.mubr.bf16.gmra.mrb[104].mxu0 %v7554_v49 }
 0x802   : > { %3958 = vmatprep.mubr.bf16.mxu0 %v7562_v58 }
 0x809   : > { %3959 = vmatmul.mubr.bf16.gmra.mrb[108].mxu0 %v7574_v61 }
 0x80a   : > { %4248 = vmatprep.mubr.bf16.mxu0 %v7452_v21 }
 0x832   : > { %v5513_v59 = vpop.f32.mrb[76].mxu0  ;;  %v5521_v23 = vpop.f32.mrb[76].mxu1 }
 0x833   : > { %v3379_v56 = vmax.f32 %v5513_v59, %v5521_v23  ;;  %v3313_v8 = vpop.f32.mrb[77].mxu0  ;;  %v3362_v29 = vpop.f32.mrb[77].mxu1 }
 0x834   : > { %v3377_v7 = vmax.f32 %v3313_v8, %v3362_v29  ;;  %v5514_v41 = vpop.f32.mrb[78].mxu0  ;;  %v5522_v53 = vpop.f32.mrb[78].mxu1 }
 0x835   : > { %v3380_v0 = vmax.f32 %v5514_v41, %v5522_v53  ;;  %v3316_v34 = vpop.f32.mrb[79].mxu0  ;;  %v3365_v18 = vpop.f32.mrb[79].mxu1 }
 0x836   : > { %v3378_v13 = vmax.f32 %v3316_v34, %v3365_v18 }
 0x837   : > { %v5776_v44 = vpack.i.bf16 %v3380_v0, %v3379_v56 }
 0x838   : > { %v5771_v43 = vpack.i.bf16 %v3378_v13, %v3377_v7 }
 0x839   : > { %5777 = vrot.lane.b32.xlu0 %v5776_v44, %s5869_s28 }
 0x83a   : > { %5772 = vrot.lane.b32.xlu1 %v5771_v43, %s5869_s28  ;;  %v5529_v40 = vpop.f32.mrb[80].mxu1 }
 0x83b   : > { %v3675_v21 = vpop.f32.mrb[81].mxu1 }
 0x83c   : > { %v5530_v32 = vpop.f32.mrb[82].mxu1 }
 0x83d   : > { %v3678_v62 = vpop.f32.mrb[83].mxu1 }
 0x842   : > { %v7641_v27 = vpop.f32.mrb[84].mxu1 }
 0x843   : > { %v3691_v20 = vpop.f32.mrb[85].mxu1 }
 0x844   : > { %v7643_v57 = vpop.f32.mrb[86].mxu1 }
 0x845   : > { %v3694_v50 = vpop.f32.mrb[87].mxu1 }
 0x852   : > { %v5251_v45 = vpop.f32.mrb[80].mxu0 }
 0x853   : > { %v5252_v33 = vpop.f32.mrb[81].mxu0 }
 0x854   : > { %v5253_v22 = vadd.f32 %v5252_v33, %v5251_v45  ;;  %v5254_v48 = vpop.f32.mrb[82].mxu0 }
 0x855   : > { %v5255_v54 = vpop.f32.mrb[83].mxu0 }
 0x856   : > { %v5256_v26 = vadd.f32 %v5255_v54, %v5254_v48  ;;  %v3611_v28 = vadd.f32 %v5253_v22, %v7580_v6 }
 0x858   : > { %v3676_v51 = vadd.f32 %v3675_v21, %v3611_v28  ;;  %v3614_v19 = vadd.f32 %v5256_v26, %v7578_v46 }
 0x85a   : > { %v3714_v55 = vmul.f32 0.01, %v3676_v51  ;;  %v3679_v4 = vadd.f32 %v3678_v62, %v3614_v19  ;;  %v5257_v2 = vpop.f32.mrb[84].mxu0  ;;  %vm3706_vm14 = vcmp.ge.f32.partialorder %v3676_v51, 0.0 }
 0x85b   : > { %v5258_v47 = vpop.f32.mrb[85].mxu0 }
 0x85c   : > { %vm3707_vm15 = vcmp.ge.f32.partialorder %v3679_v4, 0.0  ;;  %v3715_v59 = vmul.f32 0.01, %v3679_v4  ;;  %v5259_v23 = vadd.f32 %v5258_v47, %v5257_v2  ;;  %v5260_v56 = vpop.f32.mrb[86].mxu0  ;;  %v3722_v29 = vsel %vm3706_vm14, %v3676_v51, %v3714_v55 }
 0x85d   : > { %v5261_v8 = vpop.f32.mrb[87].mxu0 }
 0x85e   : > { %v3723_v7 = vsel %vm3707_vm15, %v3679_v4, %v3715_v59  ;;  %v3619_v41 = vadd.f32 %v5259_v23, %v7584_v52  ;;  %v5262_v53 = vadd.f32 %v5261_v8, %v5260_v56 }
 0x85f   : > { %v3730_v0 = vpack.c.bf16 %v3723_v7, %v3722_v29 }
 0x860   : > { %v3684_v34 = vadd.f32 %v5529_v40, %v3619_v41  ;;  %v3622_v18 = vadd.f32 %v5262_v53, %v7582_v42 }
 0x861   : > { %5537 = vmatprep.mubr.msk.bf16.mxu1 %vm400_vm1, %v3730_v0 }
 0x862   : > { %v3716_v13 = vmul.f32 0.01, %v3684_v34  ;;  %v3687_v44 = vadd.f32 %v5530_v32, %v3622_v18  ;;  %v5263_v43 = vpop.f32.mrb[88].mxu0  ;;  %vm3708_vm0 = vcmp.ge.f32.partialorder %v3684_v34, 0.0 }
 0x863   : > { %v5264_v21 = vpop.f32.mrb[89].mxu0 }
 0x864   : > { %vm3709_vm2 = vcmp.ge.f32.partialorder %v3687_v44, 0.0  ;;  %v3717_v62 = vmul.f32 0.01, %v3687_v44  ;;  %v5265_v45 = vadd.f32 %v5264_v21, %v5263_v43  ;;  %v5266_v33 = vpop.f32.mrb[90].mxu0  ;;  %v3724_v48 = vsel %vm3708_vm0, %v3684_v34, %v3716_v13 }
 0x865   : > { %v5267_v22 = vpop.f32.mrb[91].mxu0 }
 0x866   : > { %v3725_v54 = vsel %vm3709_vm2, %v3687_v44, %v3717_v62  ;;  %v5268_v26 = vadd.f32 %v5267_v22, %v5266_v33  ;;  %v3627_v28 = vadd.f32 %v5265_v45, %v7588_v25 }
 0x867   : > { %v3731_v40 = vpack.c.bf16 %v3725_v54, %v3724_v48 }
 0x868   : > { %v3692_v51 = vadd.f32 %v3691_v20, %v3627_v28  ;;  %v3630_v19 = vadd.f32 %v5268_v26, %v7586_v39 }
 0x869   : > { %5538 = vmatmul.mubr.msk.bf16.vlgmr.msra.gmra.mrb[88].mxu1 %vm400_vm1, %v3731_v40 }
 0x86a   : > { %v3718_v32 = vmul.f32 0.01, %v3692_v51  ;;  %v3695_v55 = vadd.f32 %v3694_v50, %v3630_v19  ;;  %5546 = vmatpush3.bf16.msra.mxu1 %v7615_v60  ;;  %v5269_v4 = vpop.f32.mrb[92].mxu0  ;;  %vm3710_vm3 = vcmp.ge.f32.partialorder %v3692_v51, 0.0 }
 0x86b   : > { %5555 = vmatprep.subr.bf16.mxu1 %v7625_v5  ;;  %v5270_v2 = vpop.f32.mrb[93].mxu0 }
 0x86c   : > { %vm3711_vm5 = vcmp.ge.f32.partialorder %v3695_v55, 0.0  ;;  %v3719_v47 = vmul.f32 0.01, %v3695_v55  ;;  %v5271_v59 = vadd.f32 %v5270_v2, %v5269_v4  ;;  %v5272_v23 = vpop.f32.mrb[94].mxu0  ;;  %v3726_v8 = vsel %vm3710_vm3, %v3692_v51, %v3718_v32 }
 0x86d   : > { %v5273_v56 = vpop.f32.mrb[95].mxu0 }
 0x86e   : > { %v3727_v20 = vsel %vm3711_vm5, %v3695_v55, %v3719_v47  ;;  %v3635_v29 = vadd.f32 %v5271_v59, %v7592_v31  ;;  %v5274_v7 = vadd.f32 %v5273_v56, %v5272_v23 }
 0x86f   : > { %v3732_v41 = vpack.c.bf16 %v3727_v20, %v3726_v8 }
 0x870   : > { %v3700_v50 = vadd.f32 %v7641_v27, %v3635_v29  ;;  %v3638_v53 = vadd.f32 %v5274_v7, %v7590_v35 }
 0x871   : > { %5541 = vmatprep.mubr.msk.bf16.mxu1 %vm400_vm1, %v3732_v41 }
 0x872   : > { %v3720_v34 = vmul.f32 0.01, %v3700_v50  ;;  %v3703_v18 = vadd.f32 %v7643_v57, %v3638_v53  ;;  %vm3712_vm8 = vcmp.ge.f32.partialorder %v3700_v50, 0.0 }
 0x874   : > { %vm3713_vm10 = vcmp.ge.f32.partialorder %v3703_v18, 0.0  ;;  %v3721_v13 = vmul.f32 0.01, %v3703_v18  ;;  %v3728_v44 = vsel %vm3712_vm8, %v3700_v50, %v3720_v34 }
 0x876   : > { %v3729_v43 = vsel %vm3713_vm10, %v3703_v18, %v3721_v13 }
 0x877   : > { %v3733_v21 = vpack.c.bf16 %v3729_v43, %v3728_v44 }
 0x879   : > { %5542 = vmatmul.mubr.msk.bf16.gmra.mrb[92].mxu1 %vm400_vm1, %v3733_v21 }
 0x87a   : > { %5547 = vmatprep.mubr.msk.bf16.mxu1 %vm400_vm1, %v3730_v0 }
 0x881   : > { %5548 = vmatmul.mubr.msk.bf16.vlgmr.msra.gmra.mrb[96].mxu1 %vm400_vm1, %v3731_v40 }
 0x882   : > { %5556 = vmatpush3.bf16.msra.mxu1 %v7625_v5  ;;  %5551 = vmatprep.mubr.msk.bf16.mxu1 %vm400_vm1, %v3732_v41 }
 0x883   : > { %5557 = vmatprep.subr.bf16.mxu1 %v7630_v24 }
 0x886   : > { %5558 = vmatpush3.bf16.msra.mxu1 %v7630_v24 }
 0x887   : > { %5567 = vmatprep.subr.bf16.mxu1 %v7601_v37 }
 0x889   : > { %5552 = vmatmul.mubr.msk.bf16.gmra.mrb[100].mxu1 %vm400_vm1, %v3733_v21 }
 0x88a   : > { %5559 = vmatprep.mubr.msk.bf16.mxu1 %vm388_vm4, %v7457_v14 }
 0x891   : > { %5560 = vmatmul.mubr.msk.bf16.vlgmr.msra.gmra.mrb[104].mxu1 %vm388_vm4, %v7474_v15 }
 0x892   : > { %5563 = vmatprep.mubr.msk.bf16.mxu1 %vm388_vm4, %v7489_v11  ;;  %5568 = vmatpush3.bf16.msra.mxu1 %v7601_v37 }
 0x893   : > { %5577 = vmatprep.subr.bf16.mxu1 %v7615_v60 }
 0x899   : > { %5564 = vmatmul.mubr.msk.bf16.gmra.mrb[108].mxu1 %vm388_vm4, %v7504_v1 }
 0x8ab   : > { %v5778_v27 = vpop.permute.xlu0 %5777 }
 0x8ac   : > { %v5780_v57 = vunpack.i.h.bf16 %v5778_v27  ;;  %v5779_v0 = vunpack.i.l.bf16 %v5778_v27  ;;  %v5773_v62 = vpop.permute.xlu1 %5772 }
 0x8ad   : > { %v5775_v45 = vunpack.i.h.bf16 %v5773_v62  ;;  %v5774_v33 = vunpack.i.l.bf16 %v5773_v62 }
 0x8ae   : > { %v3400_v22 = vsel %vm537_vm6, 0.0, %v5780_v57  ;;  %v3399_v48 = vsel %vm537_vm6, 0.0, %v5779_v0 }
 0x8af   : > { %v3404_v54 = vsel %vm2053_vm7, %v3400_v22, 0.0  ;;  %v3403_v26 = vsel %vm2053_vm7, %v3399_v48, 0.0  ;;  %v3398_v28 = vsel %vm537_vm6, 0.0, %v5775_v45  ;;  %v3397_v40 = vsel %vm537_vm6, 0.0, %v5774_v33 }
 0x8b0   : > { %v5786_v51 = vpack.i.bf16 %v3404_v54, %v3403_v26  ;;  %v3434_v19 = vpack.c.bf16 %v3404_v54, %v3403_v26  ;;  %v3402_v32 = vsel %vm2053_vm7, %v3398_v28, 0.0  ;;  %v3401_v55 = vsel %vm2053_vm7, %v3397_v40, 0.0 }
 0x8b1   : > { %v5781_v4 = vpack.i.bf16 %v3402_v32, %v3401_v55  ;;  %v3433_v2 = vpack.c.bf16 %v3402_v32, %v3401_v55 }
 0x8b2   : > { %3441 = vst.msk [vmem:[#allocation3 + $0xc8] sm:$0xff] %vm400_vm1, %v3434_v19  ;;  %5787 = vrot.lane.b32.xlu0 %v5786_v51, %s5868_s25 }
 0x8b3   : > { %3440 = vst.msk [vmem:[#allocation3 + $0xc0] sm:$0xff] %vm400_vm1, %v3433_v2  ;;  %5782 = vrot.lane.b32.xlu1 %v5781_v4, %s5868_s25  ;;  %s5872_s25 = smov 8  }
 0x8b6   : > { %5797 = vrot.lane.b32.xlu0 %v5786_v51, %s5870_s29 }
 0x8b7   : > { %5792 = vrot.lane.b32.xlu1 %v5781_v4, %s5870_s29 }
 0x8b9   : > { %v7697_v59 = vld [vmem:[#allocation3 + $0xc8] sm:$0xff] }
 0x8ba   : > { %v7693_v47 = vld [vmem:[#allocation3 + $0xc0] sm:$0xff] }
 0x8bb   : > { %5355 = vmatprep.subr.bf16.mxu0 %v7693_v47 }
 0x8bc   : > { %5356 = vmatpush3.bf16.msra.mxu0 %v7402_v30 }
 0x8bd   : > { %5357 = vmatprep.subr.bf16.mxu0 %v7697_v59 }
 0x8c0   : > { %5358 = vmatpush3.bf16.msra.mxu0 %v7464_v36 }
 0x8c4   : > { %v5307_v23 = vpop.f32.mrb[96].mxu0 }
 0x8c5   : > { %v5308_v56 = vpop.f32.mrb[97].mxu0 }
 0x8c6   : > { %v7701_v8 = vadd.f32 %v5308_v56, %v5307_v23  ;;  %v5310_v20 = vpop.f32.mrb[98].mxu0 }
 0x8c7   : > { %v5311_v29 = vpop.f32.mrb[99].mxu0 }
 0x8c8   : > { %v7703_v7 = vadd.f32 %v5311_v29, %v5310_v20 }
 0x8cc   : > { %v5313_v41 = vpop.f32.mrb[100].mxu0 }
 0x8cd   : > { %v5314_v50 = vpop.f32.mrb[101].mxu0 }
 0x8ce   : > { %v7705_v53 = vadd.f32 %v5314_v50, %v5313_v41  ;;  %v5316_v34 = vpop.f32.mrb[102].mxu0 }
 0x8cf   : > { %v5317_v30 = vpop.f32.mrb[103].mxu0 }
 0x8d0   : > { %v7707_v18 = vadd.f32 %v5317_v30, %v5316_v34 }
 0x8d4   : > { %v5319_v13 = vpop.f32.mrb[104].mxu0 }
 0x8d5   : > { %v5320_v44 = vpop.f32.mrb[105].mxu0 }
 0x8d6   : > { %v7709_v43 = vadd.f32 %v5320_v44, %v5319_v13  ;;  %v5322_v36 = vpop.f32.mrb[106].mxu0 }
 0x8d7   : > { %v5323_v21 = vpop.f32.mrb[107].mxu0 }
 0x8d8   : > { %v7711_v27 = vadd.f32 %v5323_v21, %v5322_v36 }
 0x8dc   : > { %v5325_v57 = vpop.f32.mrb[108].mxu0 }
 0x8dd   : > { %v5326_v0 = vpop.f32.mrb[109].mxu0 }
 0x8de   : > { %v7713_v62 = vadd.f32 %v5326_v0, %v5325_v57  ;;  %v5328_v45 = vpop.f32.mrb[110].mxu0 }
 0x8df   : > { %v5329_v33 = vpop.f32.mrb[111].mxu0 }
 0x8e0   : > { %v7715_v22 = vadd.f32 %v5329_v33, %v5328_v45 }
 0x924   : > { %v5788_v48 = vpop.permute.xlu0 %5787 }
 0x925   : > { %v5790_v54 = vunpack.i.h.bf16 %v5788_v48  ;;  %v5789_v26 = vunpack.i.l.bf16 %v5788_v48  ;;  %v5783_v28 = vpop.permute.xlu1 %5782 }
 0x926   : > { %v5785_v51 = vunpack.i.h.bf16 %v5783_v28  ;;  %v5784_v19 = vunpack.i.l.bf16 %v5783_v28 }
 0x927   : > { %v3436_v40 = vpack.c.bf16 %v5790_v54, %v5789_v26 }
 0x928   : > { %v5798_v32 = vpop.permute.xlu0 %5797  ;;  %v3435_v55 = vpack.c.bf16 %v5785_v51, %v5784_v19  ;;  %v3940_v51 = vadd.f32 %v7703_v7, %v7578_v46 }
 0x929   : > { %3443 = vst.msk [vmem:[#allocation3 + $0xd8] sm:$0xff] %vm400_vm1, %v3436_v40  ;;  %v5800_v4 = vunpack.i.h.bf16 %v5798_v32  ;;  %v5799_v2 = vunpack.i.l.bf16 %v5798_v32  ;;  %v5793_v23 = vpop.permute.xlu1 %5792 }
 0x92a   : > { %3442 = vst.msk [vmem:[#allocation3 + $0xd0] sm:$0xff] %vm400_vm1, %v3435_v55  ;;  %v5795_v20 = vunpack.i.h.bf16 %v5793_v23  ;;  %v5794_v29 = vunpack.i.l.bf16 %v5793_v23  ;;  %v3945_v55 = vadd.f32 %v7705_v53, %v7584_v52 }
 0x92b   : > { %v3438_v56 = vpack.c.bf16 %v5800_v4, %v5799_v2  ;;  %v3937_v2 = vadd.f32 %v7701_v8, %v7580_v6 }
 0x92c   : > { %v3437_v41 = vpack.c.bf16 %v5795_v20, %v5794_v29  ;;  %v3948_v20 = vadd.f32 %v7707_v18, %v7582_v42  ;;  %v3961_v18 = vadd.f32 %v7713_v62, %v7592_v31 }
 0x92d   : > { %3445 = vst.msk [vmem:[#allocation3 + $0xe8] sm:$0xff] %vm400_vm1, %v3438_v56 }
 0x92e   : > { %3444 = vst.msk [vmem:[#allocation3 + $0xe0] sm:$0xff] %vm400_vm1, %v3437_v41 }
 0x930   : > { %v7725_v34 = vld [vmem:[#allocation3 + $0xd8] sm:$0xff] }
 0x931   : > { %v7721_v50 = vld [vmem:[#allocation3 + $0xd0] sm:$0xff] }
 0x932   : > { %5359 = vmatprep.subr.bf16.mxu0 %v7721_v50 }
 0x933   : > { %5360 = vmatpush3.bf16.msra.mxu0 %v7557_v12 }
 0x934   : > { %5361 = vmatprep.subr.bf16.mxu0 %v7725_v34 }
 0x937   : > { %5362 = vmatpush3.bf16.msra.mxu0 %v7567_v3 }
 0x938   : > { %5609 = vmatprep.subr.bf16.mxu0 %v7615_v60 }
 0x93a   : > { %4249 = vmatmul.mubr.bf16.vlgmr.msra.gmra.mrb[112].mxu0 %v7525_v17 }
 0x93b   : > { %4256 = vmatprep.mubr.bf16.mxu0 %v7530_v10  ;;  %5610 = vmatpush3.bf16.msra.mxu0 %v7615_v60 }
 0x93c   : > { %v7731_v30 = vpop.f32.mrb[88].mxu1 }
 0x93d   : > { %v7735_v13 = vpop.f32.mrb[89].mxu1 }
 0x93e   : > { %v7737_v44 = vpop.f32.mrb[90].mxu1 }
 0x93f   : > { %v7739_v36 = vpop.f32.mrb[91].mxu1 }
 0x942   : > { %4257 = vmatmul.mubr.bf16.gmra.mrb[116].mxu0 %v7539_v16 }
 0x943   : > { %4264 = vmatprep.mubr.bf16.mxu0 %v7544_v9 }
 0x94a   : > { %4265 = vmatmul.mubr.bf16.gmra.mrb[120].mxu0 %v7554_v49 }
 0x94b   : > { %4272 = vmatprep.mubr.bf16.mxu0 %v7562_v58 }
 0x94c   : > { %v7744_v21 = vpop.f32.mrb[92].mxu1 }
 0x94d   : > { %8028 = vst [vmem:[#allocation4_spill] sm:$0xff] %v7744_v21  ;;  %v7747_v17 = vpop.f32.mrb[93].mxu1 }
 0x94e   : > { %v7749_v10 = vpop.f32.mrb[94].mxu1 }
 0x94f   : > { %8029 = vst [vmem:[#allocation5_spill] sm:$0xff] %v7749_v10  ;;  %v7751_v57 = vpop.f32.mrb[95].mxu1 }
 0x952   : > { %4273 = vmatmul.mubr.bf16.gmra.mrb[124].mxu0 %v7574_v61 }
 0x954   : > { %v7754_v0 = vpop.f32.mrb[96].mxu1 }
 0x955   : > { %v7758_v9 = vpop.f32.mrb[97].mxu1 }
 0x956   : > { %v7762_v45 = vpop.f32.mrb[98].mxu1 }
 0x957   : > { %v7766_v33 = vpop.f32.mrb[99].mxu1 }
 0x95c   : > { %v7770_v48 = vpop.f32.mrb[100].mxu1 }
 0x95d   : > { %8030 = vst [vmem:[#allocation6_spill] sm:$0xff] %v7770_v48  ;;  %v7774_v26 = vpop.f32.mrb[101].mxu1 }
 0x95e   : > { %v7778_v40 = vpop.f32.mrb[102].mxu1 }
 0x95f   : > { %8031 = vst [vmem:[#allocation7_spill] sm:$0xff] %v7778_v40  ;;  %v7782_v19 = vpop.f32.mrb[103].mxu1 }
 0x960   : > { %8032 = vst [vmem:[#allocation8_spill] sm:$0xff] %v7782_v19 }
 0x964   : > { %v5561_v4 = vpop.f32.mrb[104].mxu1 }
 0x965   : > { %v4010_v23 = vadd.f32 %v5561_v4, %v3945_v55  ;;  %v4001_v56 = vpop.f32.mrb[105].mxu1 }
 0x966   : > { %v4002_v29 = vadd.f32 %v4001_v56, %v3937_v2  ;;  %v5562_v41 = vpop.f32.mrb[106].mxu1 }
 0x967   : > { %v4042_v54 = vmul.f32 0.01, %v4010_v23  ;;  %v4013_v28 = vadd.f32 %v5562_v41, %v3948_v20  ;;  %v4004_v32 = vpop.f32.mrb[107].mxu1  ;;  %vm4034_vm6 = vcmp.ge.f32.partialorder %v4010_v23, 0.0  ;;  %v3953_v20 = vadd.f32 %v7709_v43, %v7588_v25 }
 0x968   : > { %v4040_v61 = vmul.f32 0.01, %v4002_v29  ;;  %v4005_v53 = vadd.f32 %v4004_v32, %v3940_v51  ;;  %vm4032_vm7 = vcmp.ge.f32.partialorder %v4002_v29, 0.0  ;;  %v3964_v32 = vadd.f32 %v7715_v22, %v7590_v35  ;;  %v7805_v22 = vld [vmem:[#allocation3 + $0xe0] sm:$0xff] }
 0x969   : > { %vm4035_vm9 = vcmp.ge.f32.partialorder %v4013_v28, 0.0  ;;  %v4043_v49 = vmul.f32 0.01, %v4013_v28  ;;  %v4050_v55 = vsel %vm4034_vm6, %v4010_v23, %v4042_v54 }
 0x96a   : > { %vm4033_vm11 = vcmp.ge.f32.partialorder %v4005_v53, 0.0  ;;  %v4041_v8 = vmul.f32 0.01, %v4005_v53  ;;  %v4048_v2 = vsel %vm4032_vm7, %v4002_v29, %v4040_v61 }
 0x96b   : > { %v4051_v4 = vsel %vm4035_vm9, %v4013_v28, %v4043_v49  ;;  %v3956_v49 = vadd.f32 %v7711_v27, %v7586_v39 }
 0x96c   : > { %v4057_v56 = vpack.c.bf16 %v4051_v4, %v4050_v55  ;;  %v4049_v58 = vsel %vm4033_vm11, %v4005_v53, %v4041_v8  ;;  %v5565_v7 = vpop.f32.mrb[108].mxu1  ;;  %v7814_v4 = vld [vmem:[#allocation3 + $0xe8] sm:$0xff] }
 0x96d   : > { %v4056_v41 = vpack.c.bf16 %v4049_v58, %v4048_v2  ;;  %v4026_v16 = vadd.f32 %v5565_v7, %v3961_v18  ;;  %v4017_v51 = vpop.f32.mrb[109].mxu1 }
 0x96e   : > { %v4018_v40 = vadd.f32 %v4017_v51, %v3953_v20  ;;  %v5566_v10 = vpop.f32.mrb[110].mxu1 }
 0x96f   : > { %v4046_v54 = vmul.f32 0.01, %v4026_v16  ;;  %v4029_v62 = vadd.f32 %v5566_v10, %v3964_v32  ;;  %v4020_v61 = vpop.f32.mrb[111].mxu1  ;;  %5569 = vmatprep.mubr.msk.bf16.mxu1 %vm400_vm1, %v4056_v41  ;;  %vm4038_vm12 = vcmp.ge.f32.partialorder %v4026_v16, 0.0 }
 0x970   : > { %v4044_v28 = vmul.f32 0.01, %v4018_v40  ;;  %v4021_v23 = vadd.f32 %v4020_v61, %v3956_v49  ;;  %5570 = vmatmul.mubr.msk.bf16.vlgmr.msra.gmra.mrb[112].mxu1 %vm400_vm1, %v4057_v56  ;;  %vm4036_vm13 = vcmp.ge.f32.partialorder %v4018_v40, 0.0 }
 0x971   : > { %vm4039_vm14 = vcmp.ge.f32.partialorder %v4029_v62, 0.0  ;;  %v4047_v43 = vmul.f32 0.01, %v4029_v62  ;;  %5578 = vmatpush3.bf16.msra.mxu1 %v7615_v60  ;;  %v4054_v27 = vsel %vm4038_vm12, %v4026_v16, %v4046_v54  ;;  %v7830_v16 = vld [vmem:[#allocation3 + $0x110] sm:$0xff] }
 0x972   : > { %vm4037_vm15 = vcmp.ge.f32.partialorder %v4021_v23, 0.0  ;;  %v4045_v58 = vmul.f32 0.01, %v4021_v23  ;;  %5587 = vmatprep.subr.bf16.mxu1 %v7805_v22  ;;  %v4052_v29 = vsel %vm4036_vm13, %v4018_v40, %v4044_v28  ;;  %5619 = vmatprep.subr.bf16.mxu0 %v7830_v16 }
 0x973   : > { %v4055_v10 = vsel %vm4039_vm14, %v4029_v62, %v4047_v43 }
 0x974   : > { %v4059_v53 = vpack.c.bf16 %v4055_v10, %v4054_v27  ;;  %v4053_v8 = vsel %vm4037_vm15, %v4021_v23, %v4045_v58 }
 0x975   : > { %v4058_v55 = vpack.c.bf16 %v4053_v8, %v4052_v29 }
 0x977   : > { %5573 = vmatprep.mubr.msk.bf16.mxu1 %vm400_vm1, %v4058_v55 }
 0x978   : > { %5574 = vmatmul.mubr.msk.bf16.gmra.mrb[116].mxu1 %vm400_vm1, %v4059_v53 }
 0x979   : > { %5579 = vmatprep.mubr.msk.bf16.mxu1 %vm400_vm1, %v4056_v41 }
 0x980   : > { %5580 = vmatmul.mubr.msk.bf16.vlgmr.msra.gmra.mrb[120].mxu1 %vm400_vm1, %v4057_v56 }
 0x981   : > { %5588 = vmatpush3.bf16.msra.mxu1 %v7805_v22  ;;  %5583 = vmatprep.mubr.msk.bf16.mxu1 %vm400_vm1, %v4058_v55 }
 0x982   : > { %5589 = vmatprep.subr.bf16.mxu1 %v7814_v4 }
 0x985   : > { %5590 = vmatpush3.bf16.msra.mxu1 %v7814_v4 }
 0x986   : > { %5599 = vmatprep.subr.bf16.mxu1 %v7601_v37 }
 0x988   : > { %5584 = vmatmul.mubr.msk.bf16.gmra.mrb[124].mxu1 %vm400_vm1, %v4059_v53 }
 0x989   : > { %5591 = vmatprep.mubr.msk.bf16.mxu1 %vm388_vm4, %v7457_v14 }
 0x990   : > { %5592 = vmatmul.mubr.msk.bf16.vlgmr.msra.gmra.mrb[128].mxu1 %vm388_vm4, %v7474_v15 }
 0x991   : > { %5600 = vmatpush3.bf16.msra.mxu1 %v7601_v37  ;;  %5595 = vmatprep.mubr.msk.bf16.mxu1 %vm388_vm4, %v7489_v11 }
 0x992   : > { %5403 = vmatprep.subr.bf16.mxu1 %v7721_v50 }
 0x998   : > { %5596 = vmatmul.mubr.msk.bf16.gmra.mrb[132].mxu1 %vm388_vm4, %v7504_v1 }
 0xa0d   : > { %v5363_v40 = vpop.f32.mrb[112].mxu0 }
 0xa0e   : > { %v5364_v18 = vpop.f32.mrb[113].mxu0 }
 0xa0f   : > { %v5365_v14 = vadd.f32 %v5364_v18, %v5363_v40  ;;  %v5366_v2 = vpop.f32.mrb[114].mxu0 }
 0xa10   : > { %v5367_v56 = vpop.f32.mrb[115].mxu0 }
 0xa11   : > { %v5368_v15 = vadd.f32 %v5367_v56, %v5366_v2 }
 0xa15   : > { %v5369_v7 = vpop.f32.mrb[116].mxu0 }
 0xa16   : > { %v5370_v20 = vpop.f32.mrb[117].mxu0 }
 0xa17   : > { %v5371_v41 = vadd.f32 %v5370_v20, %v5369_v7  ;;  %v5372_v51 = vpop.f32.mrb[118].mxu0 }
 0xa18   : > { %v5373_v11 = vpop.f32.mrb[119].mxu0 }
 0xa19   : > { %v5374_v32 = vadd.f32 %v5373_v11, %v5372_v51 }
 0xa1d   : > { %v5375_v50 = vpop.f32.mrb[120].mxu0 }
 0xa1e   : > { %v5376_v49 = vpop.f32.mrb[121].mxu0 }
 0xa1f   : > { %v7833_v54 = vadd.f32 %v5376_v49, %v5375_v50  ;;  %v5378_v1 = vpop.f32.mrb[122].mxu0 }
 0xa20   : > { %v5379_v62 = vpop.f32.mrb[123].mxu0 }
 0xa21   : > { %v7835_v61 = vadd.f32 %v5379_v62, %v5378_v1 }
 0xa25   : > { %v5381_v28 = vpop.f32.mrb[124].mxu0 }
 0xa26   : > { %v5382_v23 = vpop.f32.mrb[125].mxu0 }
 0xa27   : > { %v5383_v43 = vadd.f32 %v5382_v23, %v5381_v28  ;;  %v5384_v58 = vpop.f32.mrb[126].mxu0 }
 0xa28   : > { %v5385_v27 = vpop.f32.mrb[127].mxu0 }
 0xa29   : > { %v7837_v10 = vadd.f32 %v5385_v27, %v5384_v58 }
 0xa43   : > { %v5571_v29 = vpop.f32.mrb[112].mxu1 }
 0xa44   : > { %v4106_v53 = vpop.f32.mrb[113].mxu1 }
 0xa45   : > { %v5572_v8 = vpop.f32.mrb[114].mxu1 }
 0xa46   : > { %v4109_v55 = vpop.f32.mrb[115].mxu1 }
 0xa4b   : > { %v5575_v40 = vpop.f32.mrb[116].mxu1 }
 0xa4c   : > { %v4122_v18 = vpop.f32.mrb[117].mxu1 }
 0xa4d   : > { %v5576_v2 = vpop.f32.mrb[118].mxu1 }
 0xa4e   : > { %v4125_v56 = vpop.f32.mrb[119].mxu1 }
 0xa53   : > { %v5581_v7 = vpop.f32.mrb[120].mxu1 }
 0xa54   : > { %v4204_v20 = vmax.f32 %v5571_v29, %v5581_v7  ;;  %v4171_v51 = vpop.f32.mrb[121].mxu1  ;;  %v4251_v7 = vadd.f32 %v5365_v14, %v7580_v6 }
 0xa55   : > { %v4202_v11 = vmax.f32 %v4106_v53, %v4171_v51  ;;  %v5582_v50 = vpop.f32.mrb[122].mxu1  ;;  %v4259_v53 = vadd.f32 %v5371_v41, %v7584_v52 }
 0xa56   : > { %v4205_v49 = vmax.f32 %v5572_v8, %v5582_v50  ;;  %4850 = vrot.lane.b32.xlu1 %v4204_v20, %s5872_s25  ;;  %v4174_v1 = vpop.f32.mrb[123].mxu1 }
 0xa57   : > { %v4203_v62 = vmax.f32 %v4109_v55, %v4174_v1  ;;  %v4275_v1 = vadd.f32 %v5383_v43, %v7592_v31 }
 0xa58   : > { %4852 = vrot.lane.b32.xlu0 %v4205_v49, %s5872_s25 }
 0xa5a   : > { %4846 = vrot.lane.b32.xlu1 %v4202_v11, %s5872_s25 }
 0xa5b   : > { %v5585_v28 = vpop.f32.mrb[124].mxu1 }
 0xa5c   : > { %v4208_v23 = vmax.f32 %v5575_v40, %v5585_v28  ;;  %4848 = vrot.lane.b32.xlu0 %v4203_v62, %s5872_s25  ;;  %v4187_v58 = vpop.f32.mrb[125].mxu1  ;;  %v4262_v40 = vadd.f32 %v5374_v32, %v7582_v42 }
 0xa5d   : > { %v4206_v27 = vmax.f32 %v4122_v18, %v4187_v58  ;;  %v5586_v48 = vpop.f32.mrb[126].mxu1  ;;  %v4254_v18 = vadd.f32 %v5368_v15, %v7578_v46  ;;  %v4267_v15 = vadd.f32 %v7833_v54, %v7588_v25 }
 0xa5e   : > { %v4209_v21 = vmax.f32 %v5576_v2, %v5586_v48  ;;  %4858 = vrot.lane.b32.xlu1 %v4208_v23, %s5872_s25  ;;  %v4190_v19 = vpop.f32.mrb[127].mxu1 }
 0xa5f   : > { %v4207_v29 = vmax.f32 %v4125_v56, %v4190_v19 }
 0xa60   : > { %4860 = vrot.lane.b32.xlu0 %v4209_v21, %s5872_s25 }
 0xa62   : > { %4854 = vrot.lane.b32.xlu1 %v4206_v27, %s5872_s25 }
 0xa63   : > { %v5593_v8 = vpop.f32.mrb[128].mxu1 }
 0xa64   : > { %v4324_v55 = vadd.f32 %v5593_v8, %v4259_v53  ;;  %v4315_v20 = vpop.f32.mrb[129].mxu1  ;;  %4856 = vrot.lane.b32.xlu0 %v4207_v29, %s5872_s25  ;;  %v4278_v53 = vadd.f32 %v7837_v10, %v7590_v35 }
 0xa65   : > { %v4316_v51 = vadd.f32 %v4315_v20, %v4251_v7  ;;  %v5594_v11 = vpop.f32.mrb[130].mxu1 }
 0xa66   : > { %v4356_v48 = vmul.f32 0.01, %v4324_v55  ;;  %v4327_v2 = vadd.f32 %v5594_v11, %v4262_v40  ;;  %v4318_v50 = vpop.f32.mrb[131].mxu1  ;;  %vm4348_vm0 = vcmp.ge.f32.partialorder %v4324_v55, 0.0 }
 0xa67   : > { %v4354_v21 = vmul.f32 0.01, %v4316_v51  ;;  %v4319_v19 = vadd.f32 %v4318_v50, %v4254_v18  ;;  %vm4346_vm2 = vcmp.ge.f32.partialorder %v4316_v51, 0.0 }
 0xa68   : > { %vm4349_vm3 = vcmp.ge.f32.partialorder %v4327_v2, 0.0  ;;  %v4357_v41 = vmul.f32 0.01, %v4327_v2  ;;  %v4364_v56 = vsel %vm4348_vm0, %v4324_v55, %v4356_v48  ;;  %v4270_v55 = vadd.f32 %v7835_v61, %v7586_v39 }
 0xa69   : > { %vm4347_vm5 = vcmp.ge.f32.partialorder %v4319_v19, 0.0  ;;  %v4355_v14 = vmul.f32 0.01, %v4319_v19  ;;  %v4362_v32 = vsel %vm4346_vm2, %v4316_v51, %v4354_v21  ;;  %v4529_v51 = vld [vmem:[#allocation3 + $0x118] sm:$0xff] }
 0xa6a   : > { %v4365_v49 = vsel %vm4349_vm3, %v4327_v2, %v4357_v41  ;;  %v5851_v41 = vld [vmem:[%s8016_s5 + $0x4c] ss:$12 sps:$4 sm:$0xff]   ;;  %vm4934_vm3 = vcmask 64512  }
 0xa6b   : > { %v4371_v62 = vpack.c.bf16 %v4365_v49, %v4364_v56  ;;  %v4363_v28 = vsel %vm4347_vm5, %v4319_v19, %v4355_v14  ;;  %v5597_v23 = vpop.f32.mrb[132].mxu1  ;;  %v5852_v14 = vld [vmem:[%s8016_s5 + $0x48] ss:$12 sps:$4 sm:$0xff]   ;;  %vm4951_vm5 = vcmask 195584  }
 0xa6c   : > { %v4370_v58 = vpack.c.bf16 %v4363_v28, %v4362_v32  ;;  %v4340_v27 = vadd.f32 %v5597_v23, %v4275_v1  ;;  %v4331_v29 = vpop.f32.mrb[133].mxu1 }
 0xa6d   : > { %v4332_v8 = vadd.f32 %v4331_v29, %v4267_v15  ;;  %v5598_v7 = vpop.f32.mrb[134].mxu1 }
 0xa6e   : > { %v4360_v20 = vmul.f32 0.01, %v4340_v27  ;;  %v4343_v43 = vadd.f32 %v5598_v7, %v4278_v53  ;;  %v4334_v40 = vpop.f32.mrb[135].mxu1  ;;  %5601 = vmatprep.mubr.msk.bf16.mxu1 %vm400_vm1, %v4370_v58  ;;  %5611 = vmatprep.mubr.msk.bf16.mxu0 %vm400_vm1, %v4370_v58  ;;  %vm4352_vm8 = vcmp.ge.f32.partialorder %v4340_v27, 0.0 }
 0xa6f   : > { %v4358_v54 = vmul.f32 0.01, %v4332_v8  ;;  %v4335_v11 = vadd.f32 %v4334_v40, %v4270_v55  ;;  %5602 = vmatmul.mubr.msk.bf16.vlgmr.msra.gmra.mrb[136].mxu1 %vm400_vm1, %v4371_v62  ;;  %5612 = vmatmul.mubr.msk.bf16.vlgmr.msra.gmra.mrb[128].mxu0 %vm400_vm1, %v4371_v62  ;;  %vm4350_vm10 = vcmp.ge.f32.partialorder %v4332_v8, 0.0 }
 0xa70   : > { %vm4353_vm6 = vcmp.ge.f32.partialorder %v4343_v43, 0.0  ;;  %v4361_v10 = vmul.f32 0.01, %v4343_v43  ;;  %5404 = vmatpush3.bf16.msra.mxu1 %v7557_v12  ;;  %5620 = vmatpush3.bf16.msra.mxu0 %v7830_v16  ;;  %v4368_v18 = vsel %vm4352_vm8, %v4340_v27, %v4360_v20  ;;  %v5841_v12 = vld [vmem:[%s8016_s5 + $0x4] ss:$12 sps:$4 sm:$0xff]   ;;  %v4527_v16 = vld [vmem:[#allocation3 + $0x108] sm:$0xff] }
 0xa71   : > { %vm4351_vm7 = vcmp.ge.f32.partialorder %v4335_v11, 0.0  ;;  %v4359_v61 = vmul.f32 0.01, %v4335_v11  ;;  %5405 = vmatprep.subr.bf16.mxu1 %v7725_v34  ;;  %5621 = vmatprep.subr.bf16.mxu0 %v4529_v51  ;;  %v4366_v2 = vsel %vm4350_vm10, %v4332_v8, %v4358_v54  ;;  %v4524_v34 = vld [vmem:[#allocation3 + $0xf0] sm:$0xff] }
 0xa72   : > { %v4369_v48 = vsel %vm4353_vm6, %v4343_v43, %v4361_v10 }
 0xa73   : > { %v4373_v50 = vpack.c.bf16 %v4369_v48, %v4368_v18  ;;  %v4367_v21 = vsel %vm4351_vm7, %v4335_v11, %v4359_v61 }
 0xa74   : > { %v4372_v19 = vpack.c.bf16 %v4367_v21, %v4366_v2  ;;  %5406 = vmatpush3.bf16.msra.mxu1 %v7567_v3  ;;  %5622 = vmatpush3.bf16.msra.mxu0 %v4529_v51  ;;  %v5842_v3 = vld [vmem:[%s8016_s5 + $0x8] ss:$12 sps:$4 sm:$0xff]  }
 0xa75   : > { %5407 = vmatprep.subr.bf16.mxu1 %v7805_v22  ;;  %5631 = vmatprep.subr.bf16.mxu0 %v7601_v37  ;;  %v4525_v22 = vld [vmem:[#allocation3 + $0xf8] sm:$0xff] }
 0xa76   : > { %5605 = vmatprep.mubr.msk.bf16.mxu1 %vm400_vm1, %v4372_v19  ;;  %5615 = vmatprep.mubr.msk.bf16.mxu0 %vm400_vm1, %v4372_v19 }
 0xa77   : > { %5606 = vmatmul.mubr.msk.bf16.gmra.mrb[140].mxu1 %vm400_vm1, %v4373_v50  ;;  %5616 = vmatmul.mubr.msk.bf16.gmra.mrb[132].mxu0 %vm400_vm1, %v4373_v50 }
 0xa78   : > { %5408 = vmatpush3.bf16.msra.mxu1 %v7603_v63  ;;  %4562 = vmatprep.mubr.bf16.mxu1 %v5841_v12  ;;  %v5843_v63 = vld [vmem:[%s8016_s5 + $0x20] ss:$12 sps:$4 sm:$0xff]  }
 0xa79   : > { %5409 = vmatprep.subr.bf16.mxu1 %v7814_v4  ;;  %5623 = vmatprep.mubr.msk.bf16.mxu0 %vm388_vm4, %v5842_v3  ;;  %v5844_v4 = vld [vmem:[%s8016_s5 + $0x38] ss:$12 sps:$4 sm:$0xff]  }
 0xa7c   : > { %5410 = vmatpush3.bf16.msra.mxu1 %v7608_v38  ;;  %v4526_v38 = vld [vmem:[#allocation3 + $0x100] sm:$0xff] }
 0xa7d   : > { %5411 = vmatprep.subr.bf16.mxu1 %v4524_v34 }
 0xa7f   : > { %5624 = vmatmul.mubr.msk.bf16.vlgmr.msra.gmra.mrb[136].mxu0 %vm388_vm4, %v5843_v63 }
 0xa80   : > { %5412 = vmatpush3.bf16.msra.mxu1 %v7625_v5  ;;  %5627 = vmatprep.mubr.msk.bf16.mxu0 %vm388_vm4, %v5844_v4  ;;  %v5845_v5 = vld [vmem:[%s8016_s5 + $0x50] ss:$12 sps:$4 sm:$0xff]  }
 0xa81   : > { %5413 = vmatprep.subr.bf16.mxu1 %v4525_v22  ;;  %5632 = vmatpush3.bf16.msra.mxu0 %v7601_v37  ;;  %v5846_v37 = vld [vmem:[%s8016_s5] ss:$12 sps:$4 sm:$0xff]  }
 0xa82   : > { %5641 = vmatprep.subr.bf16.mxu0 %v7615_v60  ;;  %v5847_v60 = vld [vmem:[%s8016_s5 + $0x1c] ss:$12 sps:$4 sm:$0xff]  }
 0xa84   : > { %5414 = vmatpush3.bf16.msra.mxu1 %v7630_v24  ;;  %v5848_v24 = vld [vmem:[%s8016_s5 + $0x18] ss:$12 sps:$4 sm:$0xff]  }
 0xa85   : > { %5415 = vmatprep.subr.bf16.mxu1 %v4526_v38 }
 0xa87   : > { %5628 = vmatmul.mubr.msk.bf16.gmra.mrb[140].mxu0 %vm388_vm4, %v5845_v5 }
 0xa88   : > { %5416 = vmatpush3.bf16.msra.mxu1 %v7693_v47  ;;  %v5849_v47 = vld [vmem:[%s8016_s5 + $0x34] ss:$12 sps:$4 sm:$0xff]  }
 0xa89   : > { %5417 = vmatprep.subr.bf16.mxu1 %v4527_v16 }
 0xa8c   : > { %5418 = vmatpush3.bf16.msra.mxu1 %v7697_v59  ;;  %v5850_v59 = vld [vmem:[%s8016_s5 + $0x30] ss:$12 sps:$4 sm:$0xff]  }
 0xa8f   : > { %4563 = vmatmul.mubr.bf16.vlgmr.msra.gmra.mrb[144].mxu1 %v5846_v37 }
 0xa90   : > { %4570 = vmatprep.mubr.bf16.mxu1 %v5847_v60 }
 0xa97   : > { %4571 = vmatmul.mubr.bf16.gmra.mrb[148].mxu1 %v5848_v24 }
 0xa98   : > { %4578 = vmatprep.mubr.bf16.mxu1 %v5849_v47 }
 0xa9f   : > { %4579 = vmatmul.mubr.bf16.gmra.mrb[152].mxu1 %v5850_v59 }
 0xaa0   : > { %4586 = vmatprep.mubr.bf16.mxu1 %v5851_v41 }
 0xaa7   : > { %4587 = vmatmul.mubr.bf16.gmra.mrb[156].mxu1 %v5852_v14 }
 0xb42   : > { %v5603_v56 = vpop.f32.mrb[136].mxu1  ;;  %v5613_v49 = vpop.f32.mrb[128].mxu0 }
 0xb43   : > { %v4518_v1 = vmax.f32 %v5603_v56, %v5613_v49  ;;  %v4420_v32 = vpop.f32.mrb[137].mxu1  ;;  %v4485_v62 = vpop.f32.mrb[129].mxu0 }
 0xb44   : > { %v4516_v28 = vmax.f32 %v4420_v32, %v4485_v62  ;;  %v5604_v23 = vpop.f32.mrb[138].mxu1  ;;  %v5614_v15 = vpop.f32.mrb[130].mxu0 }
 0xb45   : > { %v4519_v58 = vmax.f32 %v5604_v23, %v5614_v15  ;;  %v4488_v27 = vpop.f32.mrb[131].mxu0  ;;  %4882 = vrot.lane.b32.xlu1 %v4518_v1, %s5873_s15  ;;  %v4423_v29 = vpop.f32.mrb[139].mxu1 }
 0xb46   : > { %v4517_v53 = vmax.f32 %v4423_v29, %v4488_v27 }
 0xb47   : > { %4884 = vrot.lane.b32.xlu0 %v4519_v58, %s5873_s15 }
 0xb49   : > { %4878 = vrot.lane.b32.xlu1 %v4516_v28, %s5873_s15 }
 0xb4a   : > { %v5607_v8 = vpop.f32.mrb[140].mxu1  ;;  %v5617_v7 = vpop.f32.mrb[132].mxu0 }
 0xb4b   : > { %v4522_v55 = vmax.f32 %v5607_v8, %v5617_v7  ;;  %v4436_v20 = vpop.f32.mrb[141].mxu1  ;;  %v4501_v43 = vpop.f32.mrb[133].mxu0  ;;  %4880 = vrot.lane.b32.xlu0 %v4517_v53, %s5873_s15 }
 0xb4c   : > { %v4520_v40 = vmax.f32 %v4436_v20, %v4501_v43  ;;  %v5608_v51 = vpop.f32.mrb[142].mxu1  ;;  %v5618_v54 = vpop.f32.mrb[134].mxu0 }
 0xb4d   : > { %v4523_v11 = vmax.f32 %v5608_v51, %v5618_v54  ;;  %v4504_v10 = vpop.f32.mrb[135].mxu0  ;;  %4890 = vrot.lane.b32.xlu1 %v4522_v55, %s5873_s15  ;;  %v4439_v61 = vpop.f32.mrb[143].mxu1 }
 0xb4e   : > { %v4521_v18 = vmax.f32 %v4439_v61, %v4504_v10 }
 0xb4f   : > { %4892 = vrot.lane.b32.xlu0 %v4523_v11, %s5873_s15 }
 0xb51   : > { %4886 = vrot.lane.b32.xlu1 %v4520_v40, %s5873_s15 }
 0xb52   : > { %v5625_v48 = vpop.f32.mrb[136].mxu0 }
 0xb53   : > { %4888 = vrot.lane.b32.xlu0 %v4521_v18, %s5873_s15  ;;  %v4629_v2 = vpop.f32.mrb[137].mxu0 }
 0xb54   : > { %v5626_v50 = vpop.f32.mrb[138].mxu0 }
 0xb55   : > { %v4632_v21 = vpop.f32.mrb[139].mxu0 }
 0xb5a   : > { %v7913_v19 = vpop.f32.mrb[140].mxu0 }
 0xb5b   : > { %v4645_v12 = vpop.f32.mrb[141].mxu0 }
 0xb5c   : > { %v7915_v3 = vpop.f32.mrb[142].mxu0 }
 0xb5d   : > { %v4648_v34 = vpop.f32.mrb[143].mxu0 }
 0xb62   : > { %v5419_v22 = vpop.f32.mrb[144].mxu1 }
 0xb63   : > { %v5420_v63 = vpop.f32.mrb[145].mxu1 }
 0xb64   : > { %v5421_v4 = vadd.f32 %v5420_v63, %v5419_v22  ;;  %v5422_v38 = vpop.f32.mrb[146].mxu1 }
 0xb65   : > { %v5423_v16 = vpop.f32.mrb[147].mxu1 }
 0xb66   : > { %v5424_v5 = vadd.f32 %v5423_v16, %v5422_v38  ;;  %v4565_v37 = vadd.f32 %v5421_v4, %v7580_v6 }
 0xb68   : > { %v4630_v60 = vadd.f32 %v4629_v2, %v4565_v37  ;;  %v4568_v24 = vadd.f32 %v5424_v5, %v7578_v46  ;;  %v5853_v2 = vld [vmem:[%s8021_s10] sm:$0xff]  }
 0xb6a   : > { %v4668_v47 = vmul.f32 0.01, %v4630_v60  ;;  %v4633_v59 = vadd.f32 %v4632_v21, %v4568_v24  ;;  %v5425_v41 = vpop.f32.mrb[148].mxu1  ;;  %vm4660_vm9 = vcmp.ge.f32.partialorder %v4630_v60, 0.0 }
 0xb6b   : > { %v5426_v14 = vpop.f32.mrb[149].mxu1 }
 0xb6c   : > { %vm4661_vm11 = vcmp.ge.f32.partialorder %v4633_v59, 0.0  ;;  %v4669_v56 = vmul.f32 0.01, %v4633_v59  ;;  %v5427_v49 = vadd.f32 %v5426_v14, %v5425_v41  ;;  %v5428_v1 = vpop.f32.mrb[150].mxu1  ;;  %v4676_v62 = vsel %vm4660_vm9, %v4630_v60, %v4668_v47 }
 0xb6d   : > { %v5429_v32 = vpop.f32.mrb[151].mxu1 }
 0xb6e   : > { %v4677_v28 = vsel %vm4661_vm11, %v4633_v59, %v4669_v56  ;;  %v4573_v23 = vadd.f32 %v5427_v49, %v7584_v52  ;;  %v5430_v15 = vadd.f32 %v5429_v32, %v5428_v1 }
 0xb6f   : > { %v4684_v58 = vpack.c.bf16 %v4677_v28, %v4676_v62 }
 0xb70   : > { %v4638_v6 = vadd.f32 %v5625_v48, %v4573_v23  ;;  %v4576_v27 = vadd.f32 %v5430_v15, %v7582_v42 }
 0xb71   : > { %5633 = vmatprep.mubr.msk.bf16.mxu0 %vm400_vm1, %v4684_v58 }
 0xb72   : > { %v4670_v46 = vmul.f32 0.01, %v4638_v6  ;;  %v4641_v29 = vadd.f32 %v5626_v50, %v4576_v27  ;;  %v5431_v53 = vpop.f32.mrb[152].mxu1  ;;  %vm4662_vm12 = vcmp.ge.f32.partialorder %v4638_v6, 0.0 }
 0xb73   : > { %v5432_v8 = vpop.f32.mrb[153].mxu1 }
 0xb74   : > { %vm4663_vm13 = vcmp.ge.f32.partialorder %v4641_v29, 0.0  ;;  %v4671_v7 = vmul.f32 0.01, %v4641_v29  ;;  %v5433_v55 = vadd.f32 %v5432_v8, %v5431_v53  ;;  %v5434_v20 = vpop.f32.mrb[154].mxu1  ;;  %v4678_v40 = vsel %vm4662_vm12, %v4638_v6, %v4670_v46 }
 0xb75   : > { %v5435_v43 = vpop.f32.mrb[155].mxu1 }
 0xb76   : > { %v4679_v51 = vsel %vm4663_vm13, %v4641_v29, %v4671_v7  ;;  %v5436_v52 = vadd.f32 %v5435_v43, %v5434_v20  ;;  %v4581_v54 = vadd.f32 %v5433_v55, %v7588_v25 }
 0xb77   : > { %v4685_v11 = vpack.c.bf16 %v4679_v51, %v4678_v40  ;;  %v4851_v40 = vpop.permute.xlu1 %4850  ;;  %v4853_v51 = vpop.permute.xlu0 %4852 }
 0xb78   : > { %v4646_v10 = vadd.f32 %v4645_v12, %v4581_v54  ;;  %v4584_v42 = vadd.f32 %v5436_v52, %v7586_v39 }
 0xb79   : > { %5634 = vmatmul.mubr.msk.bf16.vlgmr.msra.gmra.mrb[144].mxu0 %vm400_vm1, %v4685_v11 }
 0xb7a   : > { %v4672_v61 = vmul.f32 0.01, %v4646_v10  ;;  %v4649_v18 = vadd.f32 %v4648_v34, %v4584_v42  ;;  %v5437_v48 = vpop.f32.mrb[156].mxu1  ;;  %5642 = vmatpush3.bf16.msra.mxu0 %v5853_v2  ;;  %vm4664_vm14 = vcmp.ge.f32.partialorder %v4646_v10, 0.0 }
 0xb7b   : > { %v5438_v50 = vpop.f32.mrb[157].mxu1  ;;  %v4847_v52 = vpop.permute.xlu1 %4846 }
 0xb7c   : > { %vm4665_vm15 = vcmp.ge.f32.partialorder %v4649_v18, 0.0  ;;  %v4673_v21 = vmul.f32 0.01, %v4649_v18  ;;  %v5439_v22 = vadd.f32 %v5438_v50, %v5437_v48  ;;  %v5440_v25 = vpop.f32.mrb[158].mxu1  ;;  %v4680_v12 = vsel %vm4664_vm14, %v4646_v10, %v4672_v61  ;;  %v4849_v54 = vpop.permute.xlu0 %4848 }
 0xb7d   : > { %v5441_v63 = vpop.f32.mrb[159].mxu1 }
 0xb7e   : > { %v4681_v4 = vsel %vm4665_vm15, %v4649_v18, %v4673_v21  ;;  %v4589_v39 = vadd.f32 %v5439_v22, %v7592_v31  ;;  %v5442_v38 = vadd.f32 %v5441_v63, %v5440_v25 }
 0xb7f   : > { %v4686_v16 = vpack.c.bf16 %v4681_v4, %v4680_v12  ;;  %v8033_v12 = vmax.f32 %v7731_v30, %v7754_v0 }
 0xb80   : > { %v4654_v34 = vadd.f32 %v7913_v19, %v4589_v39  ;;  %v4592_v5 = vadd.f32 %v5442_v38, %v7590_v35  ;;  %v4861_v10 = vpop.permute.xlu0 %4860 }
 0xb81   : > { %5637 = vmatprep.mubr.msk.bf16.mxu0 %vm400_vm1, %v4686_v16  ;;  %v4937_v4 = vsel %vm4934_vm3, %v8033_v12, %v4851_v40 }
 0xb82   : > { %v4674_v37 = vmul.f32 0.01, %v4654_v34  ;;  %v4657_v60 = vadd.f32 %v7915_v3, %v4592_v5  ;;  %vm4666_vm0 = vcmp.ge.f32.partialorder %v4654_v34, 0.0 }
 0xb84   : > { %vm4667_vm2 = vcmp.ge.f32.partialorder %v4657_v60, 0.0  ;;  %v4675_v24 = vmul.f32 0.01, %v4657_v60  ;;  %v4682_v47 = vsel %vm4666_vm0, %v4654_v34, %v4674_v37  ;;  %v4857_v61 = vpop.permute.xlu0 %4856  ;;  %v8035_v37 = vmax.f32 %v7735_v13, %v7758_v9 }
 0xb86   : > { %v4683_v59 = vsel %vm4667_vm2, %v4657_v60, %v4675_v24  ;;  %v4935_v60 = vsel %vm4934_vm3, %v8035_v37, %v4847_v52 }
 0xb87   : > { %v4687_v41 = vpack.c.bf16 %v4683_v59, %v4682_v47 }
 0xb89   : > { %5638 = vmatmul.mubr.msk.bf16.gmra.mrb[148].mxu0 %vm400_vm1, %v4687_v41 }
 0xb8a   : > { %5643 = vmatprep.mubr.msk.bf16.mxu0 %vm400_vm1, %v4684_v58 }
 0xb91   : > { %5644 = vmatmul.mubr.msk.bf16.vlgmr.msra.gmra.mrb[152].mxu0 %vm400_vm1, %v4685_v11  ;;  %v4859_v11 = vpop.permute.xlu1 %4858 }
 0xb92   : > { %5647 = vmatprep.mubr.msk.bf16.mxu0 %vm400_vm1, %v4686_v16  ;;  %v8034_v16 = vmax.f32 %v7737_v44, %v7762_v45  ;;  %v8036_v45 = vmax.f32 %v7739_v36, %v7766_v33 }
 0xb94   : > { %v4938_v34 = vsel %vm4934_vm3, %v8034_v16, %v4853_v51  ;;  %v4936_v59 = vsel %vm4934_vm3, %v8036_v45, %v4849_v54 }
 0xb95   : > { %v4855_v42 = vpop.permute.xlu1 %4854 }
 0xb99   : > { %5648 = vmatmul.mubr.msk.bf16.gmra.mrb[156].mxu0 %vm400_vm1, %v4687_v41 }
 0xbb7   : > { %v4883_v18 = vpop.permute.xlu1 %4882 }
 0xbb8   : > { %v4945_v39 = vsel %vm400_vm1, %v4937_v4, %v4883_v18 }
 0xbb9   : > { %v4885_v48 = vpop.permute.xlu0 %4884 }
 0xbba   : > { %v4946_v0 = vsel %vm400_vm1, %v4938_v34, %v4885_v48 }
 0xbbb   : > { %v4879_v2 = vpop.permute.xlu1 %4878 }
 0xbbc   : > { %v4943_v47 = vsel %vm400_vm1, %v4935_v60, %v4879_v2 }
 0xbbd   : > { %v4881_v50 = vpop.permute.xlu0 %4880 }
 0xbbf   : > { %v4891_v21 = vpop.permute.xlu1 %4890 }
 0xbc1   : > { %v4893_v22 = vpop.permute.xlu0 %4892 }
 0xbc3   : > { %v4887_v25 = vpop.permute.xlu1 %4886 }
 0xbc5   : > { %v4889_v63 = vpop.permute.xlu0 %4888 }
 0xc4c   : > { %v5635_v35 = vpop.f32.mrb[144].mxu0 }
 0xc4d   : > { %v4734_v31 = vpop.f32.mrb[145].mxu0 }
 0xc4e   : > { %v5636_v19 = vpop.f32.mrb[146].mxu0 }
 0xc4f   : > { %v4737_v3 = vpop.f32.mrb[147].mxu0 }
 0xc5c   : > { %v5639_v14 = vpop.f32.mrb[148].mxu0 }
 0xc5d   : > { %v4750_v56 = vpop.f32.mrb[149].mxu0 }
 0xc5e   : > { %v5640_v49 = vpop.f32.mrb[150].mxu0 }
 0xc5f   : > { %v4753_v1 = vpop.f32.mrb[151].mxu0 }
 0xc64   : > { %v5645_v32 = vpop.f32.mrb[152].mxu0 }
 0xc65   : > { %v4832_v62 = vmax.f32 %v5635_v35, %v5645_v32  ;;  %v4799_v28 = vpop.f32.mrb[153].mxu0  ;;  %v4944_v35 = vsel %vm400_vm1, %v4936_v59, %v4881_v50  ;;  %v8041_v32 = vld [vmem:[#allocation6_spill] sm:$0xff] }
 0xc66   : > { %v4830_v23 = vmax.f32 %v4734_v31, %v4799_v28  ;;  %v5646_v15 = vpop.f32.mrb[154].mxu0  ;;  %v8037_v31 = vmax.f32 %v7747_v17, %v7774_v26  ;;  %v8040_v26 = vld [vmem:[#allocation4_spill] sm:$0xff] }
 0xc67   : > { %v4833_v58 = vmax.f32 %v5636_v19, %v5646_v15  ;;  %4914 = vrot.lane.b32.xlu1 %v4832_v62, %s5874_s20  ;;  %v4802_v6 = vpop.f32.mrb[155].mxu0  ;;  %v8042_v62 = vmax.f32 %v8040_v26, %v8041_v32 }
 0xc68   : > { %v4831_v27 = vmax.f32 %v4737_v3, %v4802_v6  ;;  %v4939_v19 = vsel %vm4934_vm3, %v8037_v31, %v4855_v42  ;;  %v8038_v3 = vld [vmem:[#allocation8_spill] sm:$0xff]  ;;  %v8044_v6 = vld [vmem:[#allocation7_spill] sm:$0xff] }
 0xc69   : > { %4916 = vrot.lane.b32.xlu0 %v4833_v58, %s5874_s20  ;;  %v4947_v36 = vsel %vm400_vm1, %v4939_v19, %v4887_v25  ;;  %v4941_v28 = vsel %vm4934_vm3, %v8042_v62, %v4859_v11  ;;  %v8043_v58 = vld [vmem:[#allocation5_spill] sm:$0xff] }
 0xc6a   : > { %v4949_v15 = vsel %vm400_vm1, %v4941_v28, %v4891_v21 }
 0xc6b   : > { %4910 = vrot.lane.b32.xlu1 %v4830_v23, %s5874_s20 }
 0xc6c   : > { %v5649_v46 = vpop.f32.mrb[156].mxu0 }
 0xc6d   : > { %v4836_v29 = vmax.f32 %v5639_v14, %v5649_v46  ;;  %v4815_v53 = vpop.f32.mrb[157].mxu0  ;;  %4912 = vrot.lane.b32.xlu0 %v4831_v27, %s5874_s20  ;;  %v8039_v14 = vmax.f32 %v7751_v57, %v8038_v3  ;;  %v8045_v27 = vmax.f32 %v8043_v58, %v8044_v6 }
 0xc6e   : > { %v4834_v8 = vmax.f32 %v4750_v56, %v4815_v53  ;;  %v5650_v7 = vpop.f32.mrb[158].mxu0 }
 0xc6f   : > { %v4837_v55 = vmax.f32 %v5640_v49, %v5650_v7  ;;  %v4818_v20 = vpop.f32.mrb[159].mxu0  ;;  %v4940_v56 = vsel %vm4934_vm3, %v8039_v14, %v4857_v61  ;;  %v4942_v46 = vsel %vm4934_vm3, %v8045_v27, %v4861_v10 }
 0xc70   : > { %v4835_v43 = vmax.f32 %v4753_v1, %v4818_v20  ;;  %4918 = vrot.lane.b32.xlu1 %v4834_v8, %s5874_s20  ;;  %v4948_v1 = vsel %vm400_vm1, %v4940_v56, %v4889_v63  ;;  %v4950_v53 = vsel %vm400_vm1, %v4942_v46, %v4893_v22 }
 0xc72   : > { %4920 = vrot.lane.b32.xlu0 %v4835_v43, %s5874_s20 }
 0xc74   : > { %4922 = vrot.lane.b32.xlu1 %v4836_v29, %s5874_s20 }
 0xc76   : > { %4924 = vrot.lane.b32.xlu0 %v4837_v55, %s5874_s20 }
 0xcd9   : > { %v4915_v38 = vpop.permute.xlu1 %4914 }
 0xcda   : > { %v4954_v30 = vsel %vm4951_vm5, %v4945_v39, %v4915_v38 }
 0xcdb   : > { %4962 = vst.msk [vmem:[%s7946_s23 + $0x10] sm:$0xff] %vm388_vm4, %v4954_v30  ;;  %v4917_v5 = vpop.permute.xlu0 %4916 }
 0xcdc   : > { %v4955_v24 = vsel %vm4951_vm5, %v4946_v0, %v4917_v5 }
 0xcdd   : > { %4963 = vst.msk [vmem:[%s7946_s23 + $0x18] sm:$0xff] %vm388_vm4, %v4955_v24  ;;  %v4911_v44 = vpop.permute.xlu1 %4910 }
 0xcde   : > { %v4952_v41 = vsel %vm4951_vm5, %v4943_v47, %v4911_v44 }
 0xcdf   : > { %4960 = vst.msk [vmem:[%s7946_s23] sm:$0xff] %vm388_vm4, %v4952_v41  ;;  %v4913_v13 = vpop.permute.xlu0 %4912 }
 0xce0   : > { %v4953_v9 = vsel %vm4951_vm5, %v4944_v35, %v4913_v13 }
 0xce1   : > { %4961 = vst.msk [vmem:[%s7946_s23 + $0x8] sm:$0xff] %vm388_vm4, %v4953_v9 }
 0xce2   : > { %v4919_v33 = vpop.permute.xlu1 %4918 }
 0xce3   : > { %v4956_v49 = vsel %vm4951_vm5, %v4947_v36, %v4919_v33 }
 0xce4   : > { %4964 = vst.msk [vmem:[%s7946_s23 + $0x20] sm:$0xff] %vm388_vm4, %v4956_v49  ;;  %v4921_v17 = vpop.permute.xlu0 %4920 }
 0xce5   : > { %v4957_v23 = vsel %vm4951_vm5, %v4948_v1, %v4921_v17 }
 0xce6   : > { %4965 = vst.msk [vmem:[%s7946_s23 + $0x28] sm:$0xff] %vm388_vm4, %v4957_v23  ;;  %v4923_v57 = vpop.permute.xlu1 %4922 }
 0xce7   : > { %v4958_v29 = vsel %vm4951_vm5, %v4949_v15, %v4923_v57 }
 0xce8   : > { %4966 = vst.msk [vmem:[%s7946_s23 + $0x30] sm:$0xff] %vm388_vm4, %v4958_v29  ;;  %v4925_v8 = vpop.permute.xlu0 %4924 }
 0xce9   : > { %v4959_v7 = vsel %vm4951_vm5, %v4950_v53, %v4925_v8 }
 0xcea   : > { %4967 = vst.msk [vmem:[%s7946_s23 + $0x38] sm:$0xff] %vm388_vm4, %v4959_v7 }
 0xceb PF: > { %s21_s17 = sadd.s32 1, %s5860_s17  }
 0xcec   : > { %p18_p4 = scmp.ge.s32.totalorder %s21_s17, 4  }
 0xcee   :  { %20 = sbr.rel (!%p18_p4) target bundleno = 1 (0x1), region = 119 }

</bundles_post_ra>
